<compile_context>
chip_gen: v5e
topology: v5e:2x2
jax: 0.10.0
libtpu: 0.0.40
codegen_flags: <defaults>
</compile_context>

<pallas_src>
import functools

import jax
import jax.numpy as jnp
from jax.experimental import pallas as pl
from jax.experimental.pallas import tpu as pltpu

_VMEM_LIMIT = 32 * 1024 * 1024


def _round_up(a, m):
    return ((a + m - 1) // m) * m


def _pick_tm(m, cap):
    """Divisor-aware M tile so boundary blocks are not mostly masked."""
    if m <= cap:
        return m                          # single full-extent block
    nblk = -(-m // cap)                   # number of blocks at this cap
    return _round_up(-(-m // nblk), 8)    # near-equal blocks, sublane-aligned


def _conv_m_cap(k, target_bytes=2 << 20, lo=512, hi=4096):
    """Cap M rows so the (tm, k) bf16 x-block stays around target_bytes."""
    return max(lo, min(hi, target_bytes // (2 * k)))


# ---------------------------------------------------------------------------
# Pallas kernel 1: fused  out = relu(x @ w + b)   (the three convs, im2col'd)
# ---------------------------------------------------------------------------
def _matmul_bias_relu_kernel(x_ref, w_ref, b_ref, o_ref):
    acc = jnp.dot(x_ref[...], w_ref[...], preferred_element_type=jnp.float32)
    o_ref[...] = jnp.maximum(acc + b_ref[...], 0.0).astype(o_ref.dtype)


def matmul_bias_relu(x, w, b):
    """x:(M,K) bf16, w:(K,Np) bf16, b:(1,Np) f32 -> (M,Np) bf16."""
    m, k = x.shape
    k2, n = w.shape
    assert k == k2 and n % 128 == 0
    tm = _pick_tm(m, _conv_m_cap(k))
    grid_m = pl.cdiv(m, tm)
    return pl.pallas_call(
        _matmul_bias_relu_kernel,
        out_shape=jax.ShapeDtypeStruct((m, n), jnp.bfloat16),
        grid_spec=pltpu.PrefetchScalarGridSpec(
            num_scalar_prefetch=0,
            grid=(grid_m,),
            in_specs=[
                pl.BlockSpec((tm, k), lambda i: (i, 0)),   # K = full extent
                pl.BlockSpec((k, n), lambda i: (0, 0)),    # resident weight
                pl.BlockSpec((1, n), lambda i: (0, 0)),    # resident bias
            ],
            out_specs=pl.BlockSpec((tm, n), lambda i: (i, 0)),
        ),
        compiler_params=pltpu.CompilerParams(
            dimension_semantics=("parallel",),
            vmem_limit_bytes=_VMEM_LIMIT),
    )(x, w, b)


# ---------------------------------------------------------------------------
# Pallas kernel 2: fused head  out = relu(x @ w1 + b1) @ w2 + b2
#   Single grid axis over M; fc1/fc2 weights fully VMEM-resident (constant
#   index_map), so no K tiling, no accumulator scratch, no weight re-stream.
# ---------------------------------------------------------------------------
def _head_kernel(x_ref, w1_ref, b1_ref, w2_ref, b2_ref, o_ref):
    hidden = jnp.dot(x_ref[...], w1_ref[...],
                     preferred_element_type=jnp.float32)
    hidden = jnp.maximum(hidden + b1_ref[...], 0.0)         # f32 epilogue
    out = jnp.dot(hidden.astype(jnp.bfloat16), w2_ref[...],
                  preferred_element_type=jnp.float32)
    o_ref[...] = (out + b2_ref[...]).astype(o_ref.dtype)


def fused_mlp_head(x, w1, b1, w2, b2):
    """x:(M,Kp) bf16, w1:(Kp,H) bf16, w2:(H,Np) bf16 -> (M,Np) f32."""
    m, kp = x.shape
    kp2, hid = w1.shape
    hid2, n = w2.shape
    assert kp == kp2 and hid == hid2 and n % 128 == 0 and kp % 128 == 0
    tm = _pick_tm(m, 512)
    grid_m = pl.cdiv(m, tm)
    return pl.pallas_call(
        _head_kernel,
        out_shape=jax.ShapeDtypeStruct((m, n), jnp.float32),
        grid_spec=pltpu.PrefetchScalarGridSpec(
            num_scalar_prefetch=0,
            grid=(grid_m,),
            in_specs=[
                pl.BlockSpec((tm, kp), lambda i: (i, 0)),   # full-K x block
                pl.BlockSpec((kp, hid), lambda i: (0, 0)),  # resident fc1 w
                pl.BlockSpec((1, hid), lambda i: (0, 0)),
                pl.BlockSpec((hid, n), lambda i: (0, 0)),   # resident fc2 w
                pl.BlockSpec((1, n), lambda i: (0, 0)),
            ],
            out_specs=pl.BlockSpec((tm, n), lambda i: (i, 0)),
        ),
        compiler_params=pltpu.CompilerParams(
            dimension_semantics=("parallel",),
            vmem_limit_bytes=_VMEM_LIMIT),
    )(x, w1, b1, w2, b2)


# ---------------------------------------------------------------------------
# im2col glue (NHWC, pure slicing/reshape — no per-layer transpose)
# ---------------------------------------------------------------------------
def _im2col_nhwc(x, kh, kw, stride):
    """x: (N, H, W, C) -> patches (N*Ho*Wo, kh*kw*C) in (kh, kw, c) order."""
    n, hgt, wid, c = x.shape
    ho = (hgt - kh) // stride + 1
    wo = (wid - kw) // stride + 1
    taps = []
    for i in range(kh):
        for j in range(kw):
            taps.append(
                x[:, i:i + stride * ho:stride, j:j + stride * wo:stride, :])
    p = jnp.stack(taps, axis=3)                 # (n, ho, wo, kh*kw, c)
    p = p.reshape(n * ho * wo, kh * kw * c)
    return p, ho, wo


def conv2d_relu(x, w_mat, b_row, kh, kw, stride, cout):
    """PyTorch-semantics Conv2d (valid) + ReLU on NHWC bf16 activations."""
    n = x.shape[0]
    patches, ho, wo = _im2col_nhwc(x, kh, kw, stride)     # (n*ho*wo, kh*kw*c)
    out = matmul_bias_relu(patches, w_mat, b_row)         # (n*ho*wo, 128) bf16
    # Slice back to real channels; XLA fuses this into the next layer's
    # patch-building copy (the Pallas store itself stays 128-lane dense).
    return out[:, :cout].reshape(n, ho, wo, cout)         # NHWC


# ---------------------------------------------------------------------------
# Parameter init (PyTorch-style layouts) + one-time packing for inference
# ---------------------------------------------------------------------------
def init_dqn_params(key, input_dim, output_dim):
    ks = jax.random.split(key, 10)

    def lin_init(kw_, kb_, fan_in, shape_w, shape_b):
        scale = 1.0 / jnp.sqrt(jnp.float32(fan_in))
        w = jax.random.uniform(kw_, shape_w, jnp.float32, -scale, scale)
        b = jax.random.uniform(kb_, shape_b, jnp.float32, -scale, scale)
        return w, b

    p = {}
    p["c1_w"], p["c1_b"] = lin_init(ks[0], ks[1], input_dim * 8 * 8,
                                    (32, input_dim, 8, 8), (32,))
    p["c2_w"], p["c2_b"] = lin_init(ks[2], ks[3], 32 * 4 * 4,
                                    (64, 32, 4, 4), (64,))
    p["c3_w"], p["c3_b"] = lin_init(ks[4], ks[5], 64 * 3 * 3,
                                    (64, 64, 3, 3), (64,))
    p["fc1_w"], p["fc1_b"] = lin_init(ks[6], ks[7], 3136, (3136, 512), (512,))
    p["fc2_w"], p["fc2_b"] = lin_init(ks[8], ks[9], 512,
                                      (512, output_dim), (output_dim,))
    return p


def prepare_dqn_params(p):
    """Pack params once into bf16 matmul layout (lane-padded, NHWC-ordered)."""
    def pack_conv(w, b):
        cout, cin, kh, kw = w.shape
        k = kh * kw * cin
        npad = _round_up(cout, 128)
        # (cout, cin, kh, kw) -> rows in (kh, kw, cin) order to match NHWC im2col
        wm = w.transpose(2, 3, 1, 0).reshape(k, cout).astype(jnp.bfloat16)
        wm = jnp.zeros((k, npad), jnp.bfloat16).at[:, :cout].set(wm)
        bm = jnp.zeros((1, npad), jnp.float32).at[0, :cout].set(
            b.astype(jnp.float32))
        return wm, bm

    q = {}
    q["c1_w"], q["c1_b"] = pack_conv(p["c1_w"], p["c1_b"])
    q["c2_w"], q["c2_b"] = pack_conv(p["c2_w"], p["c2_b"])
    q["c3_w"], q["c3_b"] = pack_conv(p["c3_w"], p["c3_b"])

    # fc1: rows are (c, h, w)-ordered (PyTorch Flatten of NCHW); permute to the
    # (h, w, c) order our NHWC pipeline produces, then pad K to a 128 multiple
    # so the head can use one lane-aligned resident K block.
    k1, hid = p["fc1_w"].shape                      # (3136, 512)
    c3 = p["c3_w"].shape[0]                         # 64
    hw = int(round((k1 // c3) ** 0.5))              # 7
    w1 = p["fc1_w"].reshape(c3, hw, hw, hid).transpose(1, 2, 0, 3)
    w1 = w1.reshape(k1, hid).astype(jnp.bfloat16)
    kp = _round_up(k1, 128)                         # 3200
    q["fc1_w"] = jnp.zeros((kp, hid), jnp.bfloat16).at[:k1, :].set(w1)
    q["fc1_b"] = p["fc1_b"].reshape(1, hid).astype(jnp.float32)

    # fc2: pad output dim to a lane-dense 128.
    k2, nout = p["fc2_w"].shape
    np2 = _round_up(nout, 128)
    q["fc2_w"] = jnp.zeros((k2, np2), jnp.bfloat16).at[:, :nout].set(
        p["fc2_w"].astype(jnp.bfloat16))
    q["fc2_b"] = jnp.zeros((1, np2), jnp.float32).at[0, :nout].set(
        p["fc2_b"].astype(jnp.float32))
    return q


# ---------------------------------------------------------------------------
# DQN forward
# ---------------------------------------------------------------------------
def dqn_forward(params, x, output_dim):
    """x: (N, C, 84, 84) float32 (NCHW) -> (N, output_dim) float32."""
    n = x.shape[0]
    h = x.transpose(0, 2, 3, 1).astype(jnp.bfloat16)                 # NHWC bf16
    h = conv2d_relu(h, params["c1_w"], params["c1_b"], 8, 8, 4, 32)  # (N,20,20,32)
    h = conv2d_relu(h, params["c2_w"], params["c2_b"], 4, 4, 2, 64)  # (N, 9, 9,64)
    h = conv2d_relu(h, params["c3_w"], params["c3_b"], 3, 3, 1, 64)  # (N, 7, 7,64)
    h = h.reshape(n, -1)                                             # (N, 3136)
    kp = params["fc1_w"].shape[0]
    if kp != h.shape[1]:
        h = jnp.pad(h, ((0, 0), (0, kp - h.shape[1])))               # (N, 3200)
    out = fused_mlp_head(h, params["fc1_w"], params["fc1_b"],
                         params["fc2_w"], params["fc2_b"])           # (N, 128)
    return out[:, :output_dim]


if __name__ == "__main__":
    # input_dim=1 (grayscale), output_dim=7 (SIMPLE_MOVEMENT).
    # Spatial size must be 84x84 to satisfy the fixed Linear(3136, 512).
    key = jax.random.PRNGKey(0)
    k_params, k_x = jax.random.split(key)

    input_dim, output_dim = 1, 7
    raw_params = init_dqn_params(k_params, input_dim, output_dim)
    fwd_params = prepare_dqn_params(raw_params)

    x = jax.random.normal(k_x, (2, input_dim, 84, 84), jnp.float32)

    fwd = jax.jit(functools.partial(dqn_forward, output_dim=output_dim))
    y = fwd(fwd_params, x)
    jax.block_until_ready(y)

    assert y.shape == (2, output_dim) and y.dtype == jnp.float32
    assert bool(jnp.all(jnp.isfinite(y)))
    print("KERNEL_OK")
</pallas_src>

<mosaic_0001>
module attributes {stable_mosaic.version = 11 : i64} {
  func.func @_matmul_bias_relu_kernel(%arg0: i32, %arg1: memref<800x64xbf16, #tpu.memory_space<vmem>>, %arg2: memref<64x128xbf16, #tpu.memory_space<vmem>>, %arg3: memref<1x128xf32, #tpu.memory_space<vmem>>, %arg4: memref<800x128xbf16, #tpu.memory_space<vmem>>) attributes {dimension_semantics = [#tpu.dimension_semantics<parallel>], iteration_bounds = array<i64: 1>, scalar_prefetch = 0 : i64, scratch_operands = 0 : i64, tpu.core_type = #tpu.core_type<tc>, window_params = [{transform_indices = @transform_0, window_bounds = array<i64: 800, 64>}, {pipeline_mode = #tpu.pipeline_mode<synchronous>, transform_indices = @transform_1, window_bounds = array<i64: 64, 128>}, {pipeline_mode = #tpu.pipeline_mode<synchronous>, transform_indices = @transform_2, window_bounds = array<i64: 1, 128>}, {transform_indices = @transform_3, window_bounds = array<i64: 800, 128>}]} {
    %c0 = arith.constant 0 : index
    %c0_0 = arith.constant 0 : index
    %0 = vector.load %arg1[%c0, %c0_0] : memref<800x64xbf16, #tpu.memory_space<vmem>>, vector<800x64xbf16>
    %c0_1 = arith.constant 0 : index
    %c0_2 = arith.constant 0 : index
    %1 = vector.load %arg2[%c0_1, %c0_2] : memref<64x128xbf16, #tpu.memory_space<vmem>>, vector<64x128xbf16>
    %cst = arith.constant dense<0.000000e+00> : vector<800x128xf32>
    %2 = tpu.matmul %0, %1, %cst {dimension_numbers = #tpu.dot_dimension_numbers<[1], [0], [0], [1], [0, 0, 1, 1], [], []>} : vector<800x64xbf16>, vector<64x128xbf16>, vector<800x128xf32> -> vector<800x128xf32>
    %c0_3 = arith.constant 0 : index
    %c0_4 = arith.constant 0 : index
    %3 = vector.load %arg3[%c0_3, %c0_4] : memref<1x128xf32, #tpu.memory_space<vmem>>, vector<1x128xf32>
    %4 = vector.broadcast %3 : vector<1x128xf32> to vector<800x128xf32>
    %5 = arith.addf %2, %4 : vector<800x128xf32>
    %cst_5 = arith.constant 0.000000e+00 : f32
    %6 = vector.broadcast %cst_5 : f32 to vector<800x128xf32>
    %7 = arith.maximumf %5, %6 : vector<800x128xf32>
    %8 = arith.truncf %7 : vector<800x128xf32> to vector<800x128xbf16>
    %c0_6 = arith.constant 0 : index
    %c0_7 = arith.constant 0 : index
    %9 = vector.load %arg4[%c0_6, %c0_7] : memref<800x128xbf16, #tpu.memory_space<vmem>>, vector<800x128xbf16>
    tpu.vector_store %arg4[%c0_6, %c0_7], %8 {strides = array<i32>} : memref<800x128xbf16, #tpu.memory_space<vmem>>, vector<800x128xbf16>,
    return
  }
  func.func @transform_0(%arg0: i32) -> (i32, i32) {
    %c0_i32 = arith.constant 0 : i32
    %c0_i32_0 = arith.constant 0 : i32
    return %arg0, %c0_i32 : i32, i32
  }
  func.func @transform_1(%arg0: i32) -> (i32, i32) {
    %c0_i32 = arith.constant 0 : i32
    %c0_i32_0 = arith.constant 0 : i32
    %c0_i32_1 = arith.constant 0 : i32
    return %c0_i32, %c0_i32_0 : i32, i32
  }
  func.func @transform_2(%arg0: i32) -> (i32, i32) {
    %c0_i32 = arith.constant 0 : i32
    %c0_i32_0 = arith.constant 0 : i32
    %c0_i32_1 = arith.constant 0 : i32
    return %c0_i32, %c0_i32_0 : i32, i32
  }
  func.func @transform_3(%arg0: i32) -> (i32, i32) {
    %c0_i32 = arith.constant 0 : i32
    %c0_i32_0 = arith.constant 0 : i32
    return %arg0, %c0_i32 : i32, i32
  }
}

module attributes {stable_mosaic.version = 11 : i64} {
  func.func @_matmul_bias_relu_kernel(%arg0: i32, %arg1: memref<162x512xbf16, #tpu.memory_space<vmem>>, %arg2: memref<512x128xbf16, #tpu.memory_space<vmem>>, %arg3: memref<1x128xf32, #tpu.memory_space<vmem>>, %arg4: memref<162x128xbf16, #tpu.memory_space<vmem>>) attributes {dimension_semantics = [#tpu.dimension_semantics<parallel>], iteration_bounds = array<i64: 1>, scalar_prefetch = 0 : i64, scratch_operands = 0 : i64, tpu.core_type = #tpu.core_type<tc>, window_params = [{transform_indices = @transform_0, window_bounds = array<i64: 162, 512>}, {pipeline_mode = #tpu.pipeline_mode<synchronous>, transform_indices = @transform_1, window_bounds = array<i64: 512, 128>}, {pipeline_mode = #tpu.pipeline_mode<synchronous>, transform_indices = @transform_2, window_bounds = array<i64: 1, 128>}, {transform_indices = @transform_3, window_bounds = array<i64: 162, 128>}]} {
    %c0 = arith.constant 0 : index
    %c0_0 = arith.constant 0 : index
    %0 = vector.load %arg1[%c0, %c0_0] : memref<162x512xbf16, #tpu.memory_space<vmem>>, vector<162x512xbf16>
    %c0_1 = arith.constant 0 : index
    %c0_2 = arith.constant 0 : index
    %1 = vector.load %arg2[%c0_1, %c0_2] : memref<512x128xbf16, #tpu.memory_space<vmem>>, vector<512x128xbf16>
    %cst = arith.constant dense<0.000000e+00> : vector<162x128xf32>
    %2 = tpu.matmul %0, %1, %cst {dimension_numbers = #tpu.dot_dimension_numbers<[1], [0], [0], [1], [0, 0, 1, 1], [], []>} : vector<162x512xbf16>, vector<512x128xbf16>, vector<162x128xf32> -> vector<162x128xf32>
    %c0_3 = arith.constant 0 : index
    %c0_4 = arith.constant 0 : index
    %3 = vector.load %arg3[%c0_3, %c0_4] : memref<1x128xf32, #tpu.memory_space<vmem>>, vector<1x128xf32>
    %4 = vector.broadcast %3 : vector<1x128xf32> to vector<162x128xf32>
    %5 = arith.addf %2, %4 : vector<162x128xf32>
    %cst_5 = arith.constant 0.000000e+00 : f32
    %6 = vector.broadcast %cst_5 : f32 to vector<162x128xf32>
    %7 = arith.maximumf %5, %6 : vector<162x128xf32>
    %8 = arith.truncf %7 : vector<162x128xf32> to vector<162x128xbf16>
    %c0_6 = arith.constant 0 : index
    %c0_7 = arith.constant 0 : index
    %9 = vector.load %arg4[%c0_6, %c0_7] : memref<162x128xbf16, #tpu.memory_space<vmem>>, vector<162x128xbf16>
    tpu.vector_store %arg4[%c0_6, %c0_7], %8 {strides = array<i32>} : memref<162x128xbf16, #tpu.memory_space<vmem>>, vector<162x128xbf16>,
    return
  }
  func.func @transform_0(%arg0: i32) -> (i32, i32) {
    %c0_i32 = arith.constant 0 : i32
    %c0_i32_0 = arith.constant 0 : i32
    return %arg0, %c0_i32 : i32, i32
  }
  func.func @transform_1(%arg0: i32) -> (i32, i32) {
    %c0_i32 = arith.constant 0 : i32
    %c0_i32_0 = arith.constant 0 : i32
    %c0_i32_1 = arith.constant 0 : i32
    return %c0_i32, %c0_i32_0 : i32, i32
  }
  func.func @transform_2(%arg0: i32) -> (i32, i32) {
    %c0_i32 = arith.constant 0 : i32
    %c0_i32_0 = arith.constant 0 : i32
    %c0_i32_1 = arith.constant 0 : i32
    return %c0_i32, %c0_i32_0 : i32, i32
  }
  func.func @transform_3(%arg0: i32) -> (i32, i32) {
    %c0_i32 = arith.constant 0 : i32
    %c0_i32_0 = arith.constant 0 : i32
    return %arg0, %c0_i32 : i32, i32
  }
}

module attributes {stable_mosaic.version = 11 : i64} {
  func.func @_matmul_bias_relu_kernel(%arg0: i32, %arg1: memref<98x576xbf16, #tpu.memory_space<vmem>>, %arg2: memref<576x128xbf16, #tpu.memory_space<vmem>>, %arg3: memref<1x128xf32, #tpu.memory_space<vmem>>, %arg4: memref<98x128xbf16, #tpu.memory_space<vmem>>) attributes {dimension_semantics = [#tpu.dimension_semantics<parallel>], iteration_bounds = array<i64: 1>, scalar_prefetch = 0 : i64, scratch_operands = 0 : i64, tpu.core_type = #tpu.core_type<tc>, window_params = [{transform_indices = @transform_0, window_bounds = array<i64: 98, 576>}, {pipeline_mode = #tpu.pipeline_mode<synchronous>, transform_indices = @transform_1, window_bounds = array<i64: 576, 128>}, {pipeline_mode = #tpu.pipeline_mode<synchronous>, transform_indices = @transform_2, window_bounds = array<i64: 1, 128>}, {transform_indices = @transform_3, window_bounds = array<i64: 98, 128>}]} {
    %c0 = arith.constant 0 : index
    %c0_0 = arith.constant 0 : index
    %0 = vector.load %arg1[%c0, %c0_0] : memref<98x576xbf16, #tpu.memory_space<vmem>>, vector<98x576xbf16>
    %c0_1 = arith.constant 0 : index
    %c0_2 = arith.constant 0 : index
    %1 = vector.load %arg2[%c0_1, %c0_2] : memref<576x128xbf16, #tpu.memory_space<vmem>>, vector<576x128xbf16>
    %cst = arith.constant dense<0.000000e+00> : vector<98x128xf32>
    %2 = tpu.matmul %0, %1, %cst {dimension_numbers = #tpu.dot_dimension_numbers<[1], [0], [0], [1], [0, 0, 1, 1], [], []>} : vector<98x576xbf16>, vector<576x128xbf16>, vector<98x128xf32> -> vector<98x128xf32>
    %c0_3 = arith.constant 0 : index
    %c0_4 = arith.constant 0 : index
    %3 = vector.load %arg3[%c0_3, %c0_4] : memref<1x128xf32, #tpu.memory_space<vmem>>, vector<1x128xf32>
    %4 = vector.broadcast %3 : vector<1x128xf32> to vector<98x128xf32>
    %5 = arith.addf %2, %4 : vector<98x128xf32>
    %cst_5 = arith.constant 0.000000e+00 : f32
    %6 = vector.broadcast %cst_5 : f32 to vector<98x128xf32>
    %7 = arith.maximumf %5, %6 : vector<98x128xf32>
    %8 = arith.truncf %7 : vector<98x128xf32> to vector<98x128xbf16>
    %c0_6 = arith.constant 0 : index
    %c0_7 = arith.constant 0 : index
    %9 = vector.load %arg4[%c0_6, %c0_7] : memref<98x128xbf16, #tpu.memory_space<vmem>>, vector<98x128xbf16>
    tpu.vector_store %arg4[%c0_6, %c0_7], %8 {strides = array<i32>} : memref<98x128xbf16, #tpu.memory_space<vmem>>, vector<98x128xbf16>,
    return
  }
  func.func @transform_0(%arg0: i32) -> (i32, i32) {
    %c0_i32 = arith.constant 0 : i32
    %c0_i32_0 = arith.constant 0 : i32
    return %arg0, %c0_i32 : i32, i32
  }
  func.func @transform_1(%arg0: i32) -> (i32, i32) {
    %c0_i32 = arith.constant 0 : i32
    %c0_i32_0 = arith.constant 0 : i32
    %c0_i32_1 = arith.constant 0 : i32
    return %c0_i32, %c0_i32_0 : i32, i32
  }
  func.func @transform_2(%arg0: i32) -> (i32, i32) {
    %c0_i32 = arith.constant 0 : i32
    %c0_i32_0 = arith.constant 0 : i32
    %c0_i32_1 = arith.constant 0 : i32
    return %c0_i32, %c0_i32_0 : i32, i32
  }
  func.func @transform_3(%arg0: i32) -> (i32, i32) {
    %c0_i32 = arith.constant 0 : i32
    %c0_i32_0 = arith.constant 0 : i32
    return %arg0, %c0_i32 : i32, i32
  }
}

module attributes {stable_mosaic.version = 11 : i64} {
  func.func @_head_kernel(%arg0: i32, %arg1: memref<2x3200xbf16, #tpu.memory_space<vmem>>, %arg2: memref<3200x512xbf16, #tpu.memory_space<vmem>>, %arg3: memref<1x512xf32, #tpu.memory_space<vmem>>, %arg4: memref<512x128xbf16, #tpu.memory_space<vmem>>, %arg5: memref<1x128xf32, #tpu.memory_space<vmem>>, %arg6: memref<2x128xf32, #tpu.memory_space<vmem>>) attributes {dimension_semantics = [#tpu.dimension_semantics<parallel>], iteration_bounds = array<i64: 1>, scalar_prefetch = 0 : i64, scratch_operands = 0 : i64, tpu.core_type = #tpu.core_type<tc>, window_params = [{transform_indices = @transform_0, window_bounds = array<i64: 2, 3200>}, {pipeline_mode = #tpu.pipeline_mode<synchronous>, transform_indices = @transform_1, window_bounds = array<i64: 3200, 512>}, {pipeline_mode = #tpu.pipeline_mode<synchronous>, transform_indices = @transform_2, window_bounds = array<i64: 1, 512>}, {pipeline_mode = #tpu.pipeline_mode<synchronous>, transform_indices = @transform_3, window_bounds = array<i64: 512, 128>}, {pipeline_mode = #tpu.pipeline_mode<synchronous>, transform_indices = @transform_4, window_bounds = array<i64: 1, 128>}, {transform_indices = @transform_5, window_bounds = array<i64: 2, 128>}]} {
    %c0 = arith.constant 0 : index
    %c0_0 = arith.constant 0 : index
    %0 = vector.load %arg1[%c0, %c0_0] : memref<2x3200xbf16, #tpu.memory_space<vmem>>, vector<2x3200xbf16>
    %c0_1 = arith.constant 0 : index
    %c0_2 = arith.constant 0 : index
    %1 = vector.load %arg2[%c0_1, %c0_2] : memref<3200x512xbf16, #tpu.memory_space<vmem>>, vector<3200x512xbf16>
    %cst = arith.constant dense<0.000000e+00> : vector<2x512xf32>
    %2 = tpu.matmul %0, %1, %cst {dimension_numbers = #tpu.dot_dimension_numbers<[1], [0], [0], [1], [0, 0, 1, 1], [], []>} : vector<2x3200xbf16>, vector<3200x512xbf16>, vector<2x512xf32> -> vector<2x512xf32>
    %c0_3 = arith.constant 0 : index
    %c0_4 = arith.constant 0 : index
    %3 = vector.load %arg3[%c0_3, %c0_4] : memref<1x512xf32, #tpu.memory_space<vmem>>, vector<1x512xf32>
    %4 = vector.broadcast %3 : vector<1x512xf32> to vector<2x512xf32>
    %5 = arith.addf %2, %4 : vector<2x512xf32>
    %cst_5 = arith.constant 0.000000e+00 : f32
    %6 = vector.broadcast %cst_5 : f32 to vector<2x512xf32>
    %7 = arith.maximumf %5, %6 : vector<2x512xf32>
    %8 = arith.truncf %7 : vector<2x512xf32> to vector<2x512xbf16>
    %c0_6 = arith.constant 0 : index
    %c0_7 = arith.constant 0 : index
    %9 = vector.load %arg4[%c0_6, %c0_7] : memref<512x128xbf16, #tpu.memory_space<vmem>>, vector<512x128xbf16>
    %cst_8 = arith.constant dense<0.000000e+00> : vector<2x128xf32>
    %10 = tpu.matmul %8, %9, %cst_8 {dimension_numbers = #tpu.dot_dimension_numbers<[1], [0], [0], [1], [0, 0, 1, 1], [], []>} : vector<2x512xbf16>, vector<512x128xbf16>, vector<2x128xf32> -> vector<2x128xf32>
    %c0_9 = arith.constant 0 : index
    %c0_10 = arith.constant 0 : index
    %11 = vector.load %arg5[%c0_9, %c0_10] : memref<1x128xf32, #tpu.memory_space<vmem>>, vector<1x128xf32>
    %12 = vector.broadcast %11 : vector<1x128xf32> to vector<2x128xf32>
    %13 = arith.addf %10, %12 : vector<2x128xf32>
    %c0_11 = arith.constant 0 : index
    %c0_12 = arith.constant 0 : index
    %14 = vector.load %arg6[%c0_11, %c0_12] : memref<2x128xf32, #tpu.memory_space<vmem>>, vector<2x128xf32>
    tpu.vector_store %arg6[%c0_11, %c0_12], %13 {strides = array<i32>} : memref<2x128xf32, #tpu.memory_space<vmem>>, vector<2x128xf32>,
    return
  }
  func.func @transform_0(%arg0: i32) -> (i32, i32) {
    %c0_i32 = arith.constant 0 : i32
    %c0_i32_0 = arith.constant 0 : i32
    return %arg0, %c0_i32 : i32, i32
  }
  func.func @transform_1(%arg0: i32) -> (i32, i32) {
    %c0_i32 = arith.constant 0 : i32
    %c0_i32_0 = arith.constant 0 : i32
    %c0_i32_1 = arith.constant 0 : i32
    return %c0_i32, %c0_i32_0 : i32, i32
  }
  func.func @transform_2(%arg0: i32) -> (i32, i32) {
    %c0_i32 = arith.constant 0 : i32
    %c0_i32_0 = arith.constant 0 : i32
    %c0_i32_1 = arith.constant 0 : i32
    return %c0_i32, %c0_i32_0 : i32, i32
  }
  func.func @transform_3(%arg0: i32) -> (i32, i32) {
    %c0_i32 = arith.constant 0 : i32
    %c0_i32_0 = arith.constant 0 : i32
    %c0_i32_1 = arith.constant 0 : i32
    return %c0_i32, %c0_i32_0 : i32, i32
  }
  func.func @transform_4(%arg0: i32) -> (i32, i32) {
    %c0_i32 = arith.constant 0 : i32
    %c0_i32_0 = arith.constant 0 : i32
    %c0_i32_1 = arith.constant 0 : i32
    return %c0_i32, %c0_i32_0 : i32, i32
  }
  func.func @transform_5(%arg0: i32) -> (i32, i32) {
    %c0_i32 = arith.constant 0 : i32
    %c0_i32_0 = arith.constant 0 : i32
    return %arg0, %c0_i32 : i32, i32
  }
}

</mosaic_0001>

<bundles_post_ra>
// kernel: dqn_forward.4
= control target key start
LH: loop header
LB: loop body
LE: loop exit
PB: predicated region body
PF: predicated region fallthrough
CT: control target
= control target key end

     0   :  { %vm401_vm0 = vcmask 523264   ;;  %s2234_s1 = inlined_call_operand.vmem [shape: bf16[64,128], index: 1, kind: input, shape index: {}]   ;;  %s2235_s2 = inlined_call_operand.vmem [shape: f32[1,128], index: 2, kind: input, shape index: {}]   ;;  %s2236_s0 = inlined_call_operand.vmem [shape: bf16[800,64], index: 0, kind: input, shape index: {}]   ;;  %s2237_s3 = inlined_call_operand.vmem [shape: bf16[800,128], index: 3, kind: output, shape index: {}]  }
   0x1   :  { %v1434_v0 = vld [vmem:[%s2234_s1 + $0x18] sm:$0xff]  ;;  %v1433_v1 = vld [vmem:[%s2234_s1 + $0x10] sm:$0xff]  ;;  %v1432_v2 = vld [vmem:[%s2234_s1 + $0x8] sm:$0xff] }
   0x2   :  { %1734 = vmatpush.bf16.msra.mxu1 %v1434_v0  ;;  %1735 = vmatpush.bf16.msra.mxu2 %v1434_v0  ;;  %v1431_v3 = vld [vmem:[%s2234_s1] sm:$0xff]  ;;  %v1406_v5 = vld [vmem:[%s2236_s0 + $0xc8] sm:$0xff]  ;;  %v1419_v6 = vld [vmem:[%s2236_s0 + $0x130] sm:$0xff] }
   0x3   :  { %1736 = vmatpush.bf16.msra.mxu3 %v1434_v0  ;;  %556 = vmatpush.bf16.msra.mxu0 %v1434_v0  ;;  %v1393_v4 = vld [vmem:[%s2236_s0 + $0x60] sm:$0xff]  ;;  %v1394_v8 = vld [vmem:[%s2236_s0 + $0x68] sm:$0xff]  ;;  %v1407_v9 = vld [vmem:[%s2236_s0 + $0xd0] sm:$0xff] }
   0x4   :  { %v1381_v7 = vld [vmem:[%s2236_s0] sm:$0xff]  ;;  %v1420_v10 = vld [vmem:[%s2236_s0 + $0x138] sm:$0xff]  ;;  %v1382_v11 = vld [vmem:[%s2236_s0 + $0x8] sm:$0xff] }
   0x5   :  { %v1395_v12 = vld [vmem:[%s2236_s0 + $0x70] sm:$0xff]  ;;  %v1408_v13 = vld [vmem:[%s2236_s0 + $0xd8] sm:$0xff]  ;;  %v1421_v14 = vld [vmem:[%s2236_s0 + $0x140] sm:$0xff] }
   0x6   :  { %1737 = vmatpush.bf16.msra.mxu1 %v1433_v1  ;;  %1738 = vmatpush.bf16.msra.mxu2 %v1433_v1  ;;  %v1383_v15 = vld [vmem:[%s2236_s0 + $0x10] sm:$0xff]  ;;  %v1396_v16 = vld [vmem:[%s2236_s0 + $0x78] sm:$0xff]  ;;  %v1409_v17 = vld [vmem:[%s2236_s0 + $0xe0] sm:$0xff] }
   0x7   :  { %1739 = vmatpush.bf16.msra.mxu3 %v1433_v1  ;;  %557 = vmatpush.bf16.msra.mxu0 %v1433_v1  ;;  %v1422_v18 = vld [vmem:[%s2236_s0 + $0x148] sm:$0xff]  ;;  %v1384_v19 = vld [vmem:[%s2236_s0 + $0x18] sm:$0xff]  ;;  %v1397_v20 = vld [vmem:[%s2236_s0 + $0x80] sm:$0xff] }
   0x8   :  { %v1410_v21 = vld [vmem:[%s2236_s0 + $0xe8] sm:$0xff]  ;;  %v1423_v22 = vld [vmem:[%s2236_s0 + $0x150] sm:$0xff]  ;;  %v1385_v23 = vld [vmem:[%s2236_s0 + $0x20] sm:$0xff] }
   0x9   :  { %v1398_v24 = vld [vmem:[%s2236_s0 + $0x88] sm:$0xff]  ;;  %v1411_v25 = vld [vmem:[%s2236_s0 + $0xf0] sm:$0xff]  ;;  %v1424_v26 = vld [vmem:[%s2236_s0 + $0x158] sm:$0xff] }
   0xa   :  { %1740 = vmatpush.bf16.msra.mxu1 %v1432_v2  ;;  %1741 = vmatpush.bf16.msra.mxu2 %v1432_v2  ;;  %v1386_v27 = vld [vmem:[%s2236_s0 + $0x28] sm:$0xff]  ;;  %v1399_v28 = vld [vmem:[%s2236_s0 + $0x90] sm:$0xff]  ;;  %v1412_v29 = vld [vmem:[%s2236_s0 + $0xf8] sm:$0xff] }
   0xb   :  { %1742 = vmatpush.bf16.msra.mxu3 %v1432_v2  ;;  %558 = vmatpush.bf16.msra.mxu0 %v1432_v2  ;;  %v1425_v30 = vld [vmem:[%s2236_s0 + $0x160] sm:$0xff]  ;;  %v1387_v31 = vld [vmem:[%s2236_s0 + $0x30] sm:$0xff]  ;;  %v1400_v32 = vld [vmem:[%s2236_s0 + $0x98] sm:$0xff] }
   0xc   :  { %v1413_v33 = vld [vmem:[%s2236_s0 + $0x100] sm:$0xff]  ;;  %v1426_v34 = vld [vmem:[%s2236_s0 + $0x168] sm:$0xff]  ;;  %v1388_v35 = vld [vmem:[%s2236_s0 + $0x38] sm:$0xff] }
   0xd   :  { %v1401_v36 = vld [vmem:[%s2236_s0 + $0xa0] sm:$0xff]  ;;  %v1414_v37 = vld [vmem:[%s2236_s0 + $0x108] sm:$0xff]  ;;  %v1427_v39 = vld [vmem:[%s2236_s0 + $0x170] sm:$0xff] }
   0xe   :  { %1743 = vmatpush.bf16.msra.mxu1 %v1431_v3  ;;  %1744 = vmatpush.bf16.msra.mxu2 %v1431_v3  ;;  %v1389_v40 = vld [vmem:[%s2236_s0 + $0x40] sm:$0xff]  ;;  %v1402_v61 = vld [vmem:[%s2236_s0 + $0xa8] sm:$0xff]  ;;  %v1415_v62 = vld [vmem:[%s2236_s0 + $0x110] sm:$0xff] }
   0xf   :  { %1745 = vmatpush.bf16.msra.mxu3 %v1431_v3  ;;  %559 = vmatpush.bf16.msra.mxu0 %v1431_v3  ;;  %v1922_v42 = vld [vmem:[%s2235_s2] ss:$0 sm:$0xff]  ;;  %v1428_v3 = vld [vmem:[%s2236_s0 + $0x178] sm:$0xff] }
  0x11   :  { %1343 = vmatmul.msk.bf16.vlgmr.msra.gmra.mxu1 %vm401_vm0, %v1393_v4  ;;  %1356 = vmatmul.msk.bf16.vlgmr.msra.gmra.mxu2 %vm401_vm0, %v1406_v5  ;;  %v1390_v4 = vld [vmem:[%s2236_s0 + $0x48] sm:$0xff] }
  0x12   :  { %1369 = vmatmul.msk.bf16.vlgmr.msra.gmra.mxu3 %vm401_vm0, %v1419_v6  ;;  %1331 = vmatmul.msk.bf16.vlgmr.msra.gmra.mxu0 %vm401_vm0, %v1381_v7 }
  0x21   :  { %1344 = vmatmul.msk.bf16.gmra.mxu1 %vm401_vm0, %v1394_v8  ;;  %1357 = vmatmul.msk.bf16.gmra.mxu2 %vm401_vm0, %v1407_v9 }
  0x22   :  { %1370 = vmatmul.msk.bf16.gmra.mxu3 %vm401_vm0, %v1420_v10  ;;  %1332 = vmatmul.msk.bf16.gmra.mxu0 %vm401_vm0, %v1382_v11 }
  0x31   :  { %1345 = vmatmul.msk.bf16.gmra.mxu1 %vm401_vm0, %v1395_v12  ;;  %1358 = vmatmul.msk.bf16.gmra.mxu2 %vm401_vm0, %v1408_v13 }
  0x32   :  { %1371 = vmatmul.msk.bf16.gmra.mxu3 %vm401_vm0, %v1421_v14  ;;  %1333 = vmatmul.msk.bf16.gmra.mxu0 %vm401_vm0, %v1383_v15 }
  0x41   :  { %1346 = vmatmul.msk.bf16.gmra.mxu1 %vm401_vm0, %v1396_v16  ;;  %1359 = vmatmul.msk.bf16.gmra.mxu2 %vm401_vm0, %v1409_v17 }
  0x42   :  { %1372 = vmatmul.msk.bf16.gmra.mxu3 %vm401_vm0, %v1422_v18  ;;  %1334 = vmatmul.msk.bf16.gmra.mxu0 %vm401_vm0, %v1384_v19 }
  0x51   :  { %1347 = vmatmul.msk.bf16.gmra.mxu1 %vm401_vm0, %v1397_v20  ;;  %1360 = vmatmul.msk.bf16.gmra.mxu2 %vm401_vm0, %v1410_v21 }
  0x52   :  { %1373 = vmatmul.msk.bf16.gmra.mxu3 %vm401_vm0, %v1423_v22  ;;  %1335 = vmatmul.msk.bf16.gmra.mxu0 %vm401_vm0, %v1385_v23 }
  0x61   :  { %1348 = vmatmul.msk.bf16.gmra.mxu1 %vm401_vm0, %v1398_v24  ;;  %1361 = vmatmul.msk.bf16.gmra.mxu2 %vm401_vm0, %v1411_v25 }
  0x62   :  { %1374 = vmatmul.msk.bf16.gmra.mxu3 %vm401_vm0, %v1424_v26  ;;  %1336 = vmatmul.msk.bf16.gmra.mxu0 %vm401_vm0, %v1386_v27 }
  0x71   :  { %1349 = vmatmul.msk.bf16.gmra.mxu1 %vm401_vm0, %v1399_v28  ;;  %1362 = vmatmul.msk.bf16.gmra.mxu2 %vm401_vm0, %v1412_v29  ;;  %v1403_v29 = vld [vmem:[%s2236_s0 + $0xb0] sm:$0xff] }
  0x72   :  { %1375 = vmatmul.msk.bf16.gmra.mxu3 %vm401_vm0, %v1425_v30  ;;  %1337 = vmatmul.msk.bf16.gmra.mxu0 %vm401_vm0, %v1387_v31  ;;  %v1416_v30 = vld [vmem:[%s2236_s0 + $0x118] sm:$0xff] }
  0x81   :  { %1350 = vmatmul.msk.bf16.gmra.mxu1 %vm401_vm0, %v1400_v32  ;;  %1363 = vmatmul.msk.bf16.gmra.mxu2 %vm401_vm0, %v1413_v33 }
  0x82   :  { %1376 = vmatmul.msk.bf16.gmra.mxu3 %vm401_vm0, %v1426_v34  ;;  %1338 = vmatmul.msk.bf16.gmra.mxu0 %vm401_vm0, %v1388_v35  ;;  %v1429_v35 = vld [vmem:[%s2236_s0 + $0x180] sm:$0xff] }
  0x8e   :  { %v621_v38 = vpop.f32.mrf.mxu1 }
  0x8f   :  { %v561_v41 = vpop.f32.mrf.mxu0  ;;  %v622_v45 = vadd.f32 %v1922_v42, %v621_v38 }
  0x90   :  { %v562_v44 = vadd.f32 %v1922_v42, %v561_v41 }
  0x91   :  { %1351 = vmatmul.msk.bf16.gmra.mxu1 %vm401_vm0, %v1401_v36  ;;  %1364 = vmatmul.msk.bf16.gmra.mxu2 %vm401_vm0, %v1414_v37  ;;  %v835_v52 = vmax.f32 %v622_v45, 0.0  ;;  %v1391_v36 = vld [vmem:[%s2236_s0 + $0x50] sm:$0xff] }
  0x92   :  { %1377 = vmatmul.msk.bf16.gmra.mxu3 %vm401_vm0, %v1427_v39  ;;  %1339 = vmatmul.msk.bf16.gmra.mxu0 %vm401_vm0, %v1389_v40  ;;  %v811_v50 = vmax.f32 %v562_v44, 0.0 }
  0x94   :  { %v686_v43 = vpop.f32.mrf.mxu2 }
  0x95   :  { %v751_v46 = vpop.f32.mrf.mxu3  ;;  %v687_v56 = vadd.f32 %v1922_v42, %v686_v43 }
  0x96   :  { %v623_v47 = vpop.f32.mrf.mxu1  ;;  %v752_v54 = vadd.f32 %v1922_v42, %v751_v46 }
  0x97   :  { %v624_v48 = vadd.f32 %v1922_v42, %v623_v47  ;;  %v563_v49 = vpop.f32.mrf.mxu0  ;;  %v861_v5 = vmax.f32 %v687_v56, 0.0 }
  0x98   :  { %v564_v51 = vadd.f32 %v1922_v42, %v563_v49  ;;  %v887_v0 = vmax.f32 %v752_v54, 0.0 }
  0x99   :  { %v836_v53 = vmax.f32 %v624_v48, 0.0 }
  0x9a   :  { %v812_v55 = vmax.f32 %v564_v51, 0.0 }
  0x9b   :  { %v1498_v57 = vpack.c.bf16 %v836_v53, %v835_v52 }
  0x9c   :  { %v688_v58 = vpop.f32.mrf.mxu2  ;;  %v1438_v59 = vpack.c.bf16 %v812_v55, %v811_v50 }
  0x9d   :  { %1696 = vst [vmem:[%s2237_s3 + $0x60] sm:$0xff] %v1498_v57   ;;  %v689_v60 = vadd.f32 %v1922_v42, %v688_v58  ;;  %v753_v63 = vpop.f32.mrf.mxu3 }
  0x9e   :  { %v626_v1 = vpop.f32.mrf.mxu1  ;;  %1439 = vst [vmem:[%s2237_s3] sm:$0xff] %v1438_v59   ;;  %v754_v2 = vadd.f32 %v1922_v42, %v753_v63  ;;  %v1417_v63 = vld [vmem:[%s2236_s0 + $0x120] sm:$0xff] }
  0x9f   :  { %v862_v6 = vmax.f32 %v689_v60, 0.0  ;;  %v566_v7 = vpop.f32.mrf.mxu0  ;;  %v627_v13 = vadd.f32 %v1922_v42, %v626_v1 }
  0xa0   :  { %v888_v8 = vmax.f32 %v754_v2, 0.0  ;;  %v567_v12 = vadd.f32 %v1922_v42, %v566_v7 }
  0xa1   :  { %v1563_v9 = vpack.c.bf16 %v862_v6, %v861_v5  ;;  %1352 = vmatmul.msk.bf16.gmra.mxu1 %vm401_vm0, %v1402_v61  ;;  %1365 = vmatmul.msk.bf16.gmra.mxu2 %vm401_vm0, %v1415_v62  ;;  %v837_v20 = vmax.f32 %v627_v13, 0.0  ;;  %v1404_v62 = vld [vmem:[%s2236_s0 + $0xb8] sm:$0xff] }
  0xa2   :  { %v1628_v10 = vpack.c.bf16 %v888_v8, %v887_v0  ;;  %1378 = vmatmul.msk.bf16.gmra.mxu3 %vm401_vm0, %v1428_v3  ;;  %1340 = vmatmul.msk.bf16.gmra.mxu0 %vm401_vm0, %v1390_v4  ;;  %v813_v18 = vmax.f32 %v567_v12, 0.0  ;;  %v1430_v4 = vld [vmem:[%s2236_s0 + $0x188] sm:$0xff]  ;;  %v1392_v5 = vld [vmem:[%s2236_s0 + $0x58] sm:$0xff] }
  0xa3   :  { %1709 = vst [vmem:[%s2237_s3 + $0xc8] sm:$0xff] %v1563_v9  }
  0xa4   :  { %v691_v11 = vpop.f32.mrf.mxu2  ;;  %1722 = vst [vmem:[%s2237_s3 + $0x130] sm:$0xff] %v1628_v10  }
  0xa5   :  { %v756_v14 = vpop.f32.mrf.mxu3  ;;  %v692_v24 = vadd.f32 %v1922_v42, %v691_v11 }
  0xa6   :  { %v628_v15 = vpop.f32.mrf.mxu1  ;;  %v757_v22 = vadd.f32 %v1922_v42, %v756_v14 }
  0xa7   :  { %v629_v16 = vadd.f32 %v1922_v42, %v628_v15  ;;  %v568_v17 = vpop.f32.mrf.mxu0  ;;  %v863_v37 = vmax.f32 %v692_v24, 0.0 }
  0xa8   :  { %v569_v19 = vadd.f32 %v1922_v42, %v568_v17  ;;  %v889_v32 = vmax.f32 %v757_v22, 0.0 }
  0xa9   :  { %v838_v21 = vmax.f32 %v629_v16, 0.0 }
  0xaa   :  { %v814_v23 = vmax.f32 %v569_v19, 0.0 }
  0xab   :  { %v1503_v25 = vpack.c.bf16 %v838_v21, %v837_v20 }
  0xac   :  { %v693_v26 = vpop.f32.mrf.mxu2  ;;  %v1443_v27 = vpack.c.bf16 %v814_v23, %v813_v18 }
  0xad   :  { %1697 = vst [vmem:[%s2237_s3 + $0x68] sm:$0xff] %v1503_v25   ;;  %v694_v28 = vadd.f32 %v1922_v42, %v693_v26  ;;  %v758_v31 = vpop.f32.mrf.mxu3 }
  0xae   :  { %v631_v33 = vpop.f32.mrf.mxu1  ;;  %1685 = vst [vmem:[%s2237_s3 + $0x8] sm:$0xff] %v1443_v27   ;;  %v759_v34 = vadd.f32 %v1922_v42, %v758_v31  ;;  %v1418_v31 = vld [vmem:[%s2236_s0 + $0x128] sm:$0xff] }
  0xaf   :  { %v864_v38 = vmax.f32 %v694_v28, 0.0  ;;  %v571_v39 = vpop.f32.mrf.mxu0  ;;  %v632_v46 = vadd.f32 %v1922_v42, %v631_v33 }
  0xb0   :  { %v890_v40 = vmax.f32 %v759_v34, 0.0  ;;  %v572_v45 = vadd.f32 %v1922_v42, %v571_v39 }
  0xb1   :  { %v1568_v41 = vpack.c.bf16 %v864_v38, %v863_v37  ;;  %1353 = vmatmul.msk.bf16.gmra.mxu1 %vm401_vm0, %v1403_v29  ;;  %1366 = vmatmul.msk.bf16.gmra.mxu2 %vm401_vm0, %v1416_v30  ;;  %v839_v53 = vmax.f32 %v632_v46, 0.0  ;;  %v1405_v30 = vld [vmem:[%s2236_s0 + $0xc0] sm:$0xff] }
  0xb2   :  { %v1633_v43 = vpack.c.bf16 %v890_v40, %v889_v32  ;;  %1379 = vmatmul.msk.bf16.gmra.mxu3 %vm401_vm0, %v1429_v35  ;;  %1341 = vmatmul.msk.bf16.gmra.mxu0 %vm401_vm0, %v1391_v36  ;;  %v815_v51 = vmax.f32 %v572_v45, 0.0 }
  0xb3   :  { %1710 = vst [vmem:[%s2237_s3 + $0xd0] sm:$0xff] %v1568_v41  }
  0xb4   :  { %v696_v44 = vpop.f32.mrf.mxu2  ;;  %1723 = vst [vmem:[%s2237_s3 + $0x138] sm:$0xff] %v1633_v43  }
  0xb5   :  { %v761_v47 = vpop.f32.mrf.mxu3  ;;  %v697_v57 = vadd.f32 %v1922_v42, %v696_v44 }
  0xb6   :  { %v633_v48 = vpop.f32.mrf.mxu1  ;;  %v762_v55 = vadd.f32 %v1922_v42, %v761_v47 }
  0xb7   :  { %v634_v49 = vadd.f32 %v1922_v42, %v633_v48  ;;  %v573_v50 = vpop.f32.mrf.mxu0  ;;  %v865_v6 = vmax.f32 %v697_v57, 0.0 }
  0xb8   :  { %v574_v52 = vadd.f32 %v1922_v42, %v573_v50  ;;  %v891_v1 = vmax.f32 %v762_v55, 0.0 }
  0xb9   :  { %v840_v54 = vmax.f32 %v634_v49, 0.0 }
  0xba   :  { %v816_v56 = vmax.f32 %v574_v52, 0.0 }
  0xbb   :  { %v1508_v58 = vpack.c.bf16 %v840_v54, %v839_v53 }
  0xbc   :  { %v698_v59 = vpop.f32.mrf.mxu2  ;;  %v1448_v60 = vpack.c.bf16 %v816_v56, %v815_v51 }
  0xbd   :  { %1698 = vst [vmem:[%s2237_s3 + $0x70] sm:$0xff] %v1508_v58   ;;  %v699_v61 = vadd.f32 %v1922_v42, %v698_v59  ;;  %v763_v0 = vpop.f32.mrf.mxu3 }
  0xbe   :  { %v636_v2 = vpop.f32.mrf.mxu1  ;;  %1686 = vst [vmem:[%s2237_s3 + $0x10] sm:$0xff] %v1448_v60   ;;  %v764_v3 = vadd.f32 %v1922_v42, %v763_v0 }
  0xbf   :  { %v866_v7 = vmax.f32 %v699_v61, 0.0  ;;  %v576_v8 = vpop.f32.mrf.mxu0  ;;  %v637_v14 = vadd.f32 %v1922_v42, %v636_v2 }
  0xc0   :  { %v892_v9 = vmax.f32 %v764_v3, 0.0  ;;  %v577_v13 = vadd.f32 %v1922_v42, %v576_v8 }
  0xc1   :  { %v1573_v10 = vpack.c.bf16 %v866_v7, %v865_v6  ;;  %1354 = vmatmul.msk.bf16.gmra.mxu1 %vm401_vm0, %v1404_v62  ;;  %1367 = vmatmul.msk.bf16.gmra.mxu2 %vm401_vm0, %v1417_v63  ;;  %v841_v21 = vmax.f32 %v637_v14, 0.0 }
  0xc2   :  { %v1638_v11 = vpack.c.bf16 %v892_v9, %v891_v1  ;;  %1380 = vmatmul.msk.bf16.gmra.mxu3 %vm401_vm0, %v1430_v4  ;;  %1342 = vmatmul.msk.bf16.gmra.mxu0 %vm401_vm0, %v1392_v5  ;;  %v817_v19 = vmax.f32 %v577_v13, 0.0 }
  0xc3   :  { %1711 = vst [vmem:[%s2237_s3 + $0xd8] sm:$0xff] %v1573_v10  }
  0xc4   :  { %v701_v12 = vpop.f32.mrf.mxu2  ;;  %1724 = vst [vmem:[%s2237_s3 + $0x140] sm:$0xff] %v1638_v11  }
  0xc5   :  { %v766_v15 = vpop.f32.mrf.mxu3  ;;  %v702_v25 = vadd.f32 %v1922_v42, %v701_v12 }
  0xc6   :  { %v638_v16 = vpop.f32.mrf.mxu1  ;;  %v767_v23 = vadd.f32 %v1922_v42, %v766_v15 }
  0xc7   :  { %v639_v17 = vadd.f32 %v1922_v42, %v638_v16  ;;  %v578_v18 = vpop.f32.mrf.mxu0  ;;  %v867_v36 = vmax.f32 %v702_v25, 0.0 }
  0xc8   :  { %v579_v20 = vadd.f32 %v1922_v42, %v578_v18  ;;  %v893_v33 = vmax.f32 %v767_v23, 0.0 }
  0xc9   :  { %v842_v22 = vmax.f32 %v639_v17, 0.0 }
  0xca   :  { %v818_v24 = vmax.f32 %v579_v20, 0.0 }
  0xcb   :  { %v1513_v26 = vpack.c.bf16 %v842_v22, %v841_v21 }
  0xcc   :  { %v703_v27 = vpop.f32.mrf.mxu2  ;;  %v1453_v28 = vpack.c.bf16 %v818_v24, %v817_v19 }
  0xcd   :  { %1699 = vst [vmem:[%s2237_s3 + $0x78] sm:$0xff] %v1513_v26   ;;  %v704_v29 = vadd.f32 %v1922_v42, %v703_v27  ;;  %v768_v32 = vpop.f32.mrf.mxu3 }
  0xce   :  { %v641_v34 = vpop.f32.mrf.mxu1  ;;  %1687 = vst [vmem:[%s2237_s3 + $0x18] sm:$0xff] %v1453_v28   ;;  %v769_v35 = vadd.f32 %v1922_v42, %v768_v32 }
  0xcf   :  { %v868_v37 = vmax.f32 %v704_v29, 0.0  ;;  %v581_v38 = vpop.f32.mrf.mxu0  ;;  %v642_v45 = vadd.f32 %v1922_v42, %v641_v34 }
  0xd0   :  { %v894_v39 = vmax.f32 %v769_v35, 0.0  ;;  %v582_v44 = vadd.f32 %v1922_v42, %v581_v38 }
  0xd1   :  { %v1578_v40 = vpack.c.bf16 %v868_v37, %v867_v36  ;;  %1355 = vmatmul.msk.bf16.gmra.mxu1 %vm401_vm0, %v1405_v30  ;;  %1368 = vmatmul.msk.bf16.gmra.mxu2 %vm401_vm0, %v1418_v31  ;;  %v843_v52 = vmax.f32 %v642_v45, 0.0 }
  0xd2   :  { %v1643_v41 = vpack.c.bf16 %v894_v39, %v893_v33  ;;  %v819_v50 = vmax.f32 %v582_v44, 0.0 }
  0xd3   :  { %1712 = vst [vmem:[%s2237_s3 + $0xe0] sm:$0xff] %v1578_v40  }
  0xd4   :  { %v706_v43 = vpop.f32.mrf.mxu2  ;;  %1725 = vst [vmem:[%s2237_s3 + $0x148] sm:$0xff] %v1643_v41  }
  0xd5   :  { %v771_v46 = vpop.f32.mrf.mxu3  ;;  %v707_v56 = vadd.f32 %v1922_v42, %v706_v43 }
  0xd6   :  { %v643_v47 = vpop.f32.mrf.mxu1  ;;  %v772_v54 = vadd.f32 %v1922_v42, %v771_v46 }
  0xd7   :  { %v644_v48 = vadd.f32 %v1922_v42, %v643_v47  ;;  %v583_v49 = vpop.f32.mrf.mxu0  ;;  %v869_v1 = vmax.f32 %v707_v56, 0.0 }
  0xd8   :  { %v584_v51 = vadd.f32 %v1922_v42, %v583_v49  ;;  %v895_v62 = vmax.f32 %v772_v54, 0.0 }
  0xd9   :  { %v844_v53 = vmax.f32 %v644_v48, 0.0 }
  0xda   :  { %v820_v55 = vmax.f32 %v584_v51, 0.0 }
  0xdb   :  { %v1518_v57 = vpack.c.bf16 %v844_v53, %v843_v52 }
  0xdc   :  { %v708_v58 = vpop.f32.mrf.mxu2  ;;  %v1458_v59 = vpack.c.bf16 %v820_v55, %v819_v50 }
  0xdd   :  { %1700 = vst [vmem:[%s2237_s3 + $0x80] sm:$0xff] %v1518_v57   ;;  %v709_v60 = vadd.f32 %v1922_v42, %v708_v58  ;;  %v773_v61 = vpop.f32.mrf.mxu3 }
  0xde   :  { %v646_v63 = vpop.f32.mrf.mxu1  ;;  %1688 = vst [vmem:[%s2237_s3 + $0x20] sm:$0xff] %v1458_v59   ;;  %v774_v0 = vadd.f32 %v1922_v42, %v773_v61 }
  0xdf   :  { %v870_v2 = vmax.f32 %v709_v60, 0.0  ;;  %v586_v3 = vpop.f32.mrf.mxu0  ;;  %v647_v9 = vadd.f32 %v1922_v42, %v646_v63 }
  0xe0   :  { %v896_v4 = vmax.f32 %v774_v0, 0.0  ;;  %v587_v8 = vadd.f32 %v1922_v42, %v586_v3 }
  0xe1   :  { %v1583_v5 = vpack.c.bf16 %v870_v2, %v869_v1  ;;  %v845_v16 = vmax.f32 %v647_v9, 0.0 }
  0xe2   :  { %v1648_v6 = vpack.c.bf16 %v896_v4, %v895_v62  ;;  %v821_v14 = vmax.f32 %v587_v8, 0.0 }
  0xe3   :  { %1713 = vst [vmem:[%s2237_s3 + $0xe8] sm:$0xff] %v1583_v5  }
  0xe4   :  { %v711_v7 = vpop.f32.mrf.mxu2  ;;  %1726 = vst [vmem:[%s2237_s3 + $0x150] sm:$0xff] %v1648_v6  }
  0xe5   :  { %v776_v10 = vpop.f32.mrf.mxu3  ;;  %v712_v20 = vadd.f32 %v1922_v42, %v711_v7 }
  0xe6   :  { %v648_v11 = vpop.f32.mrf.mxu1  ;;  %v777_v18 = vadd.f32 %v1922_v42, %v776_v10 }
  0xe7   :  { %v649_v12 = vadd.f32 %v1922_v42, %v648_v11  ;;  %v588_v13 = vpop.f32.mrf.mxu0  ;;  %v871_v29 = vmax.f32 %v712_v20, 0.0 }
  0xe8   :  { %v589_v15 = vadd.f32 %v1922_v42, %v588_v13  ;;  %v897_v26 = vmax.f32 %v777_v18, 0.0 }
  0xe9   :  { %v846_v17 = vmax.f32 %v649_v12, 0.0 }
  0xea   :  { %v822_v19 = vmax.f32 %v589_v15, 0.0 }
  0xeb   :  { %v1523_v21 = vpack.c.bf16 %v846_v17, %v845_v16 }
  0xec   :  { %v713_v22 = vpop.f32.mrf.mxu2  ;;  %v1463_v23 = vpack.c.bf16 %v822_v19, %v821_v14 }
  0xed   :  { %1701 = vst [vmem:[%s2237_s3 + $0x88] sm:$0xff] %v1523_v21   ;;  %v714_v24 = vadd.f32 %v1922_v42, %v713_v22  ;;  %v778_v25 = vpop.f32.mrf.mxu3 }
  0xee   :  { %v651_v27 = vpop.f32.mrf.mxu1  ;;  %1689 = vst [vmem:[%s2237_s3 + $0x28] sm:$0xff] %v1463_v23   ;;  %v779_v28 = vadd.f32 %v1922_v42, %v778_v25 }
  0xef   :  { %v872_v30 = vmax.f32 %v714_v24, 0.0  ;;  %v591_v31 = vpop.f32.mrf.mxu0  ;;  %v652_v37 = vadd.f32 %v1922_v42, %v651_v27 }
  0xf0   :  { %v898_v32 = vmax.f32 %v779_v28, 0.0  ;;  %v592_v36 = vadd.f32 %v1922_v42, %v591_v31 }
  0xf1   :  { %v1588_v33 = vpack.c.bf16 %v872_v30, %v871_v29  ;;  %v847_v45 = vmax.f32 %v652_v37, 0.0 }
  0xf2   :  { %v1653_v34 = vpack.c.bf16 %v898_v32, %v897_v26  ;;  %v823_v43 = vmax.f32 %v592_v36, 0.0 }
  0xf3   :  { %1714 = vst [vmem:[%s2237_s3 + $0xf0] sm:$0xff] %v1588_v33  }
  0xf4   :  { %v716_v35 = vpop.f32.mrf.mxu2  ;;  %1727 = vst [vmem:[%s2237_s3 + $0x158] sm:$0xff] %v1653_v34  }
  0xf5   :  { %v781_v38 = vpop.f32.mrf.mxu3  ;;  %v717_v49 = vadd.f32 %v1922_v42, %v716_v35 }
  0xf6   :  { %v653_v39 = vpop.f32.mrf.mxu1  ;;  %v782_v47 = vadd.f32 %v1922_v42, %v781_v38 }
  0xf7   :  { %v654_v40 = vadd.f32 %v1922_v42, %v653_v39  ;;  %v593_v41 = vpop.f32.mrf.mxu0  ;;  %v873_v58 = vmax.f32 %v717_v49, 0.0 }
  0xf8   :  { %v594_v44 = vadd.f32 %v1922_v42, %v593_v41  ;;  %v899_v55 = vmax.f32 %v782_v47, 0.0 }
  0xf9   :  { %v848_v46 = vmax.f32 %v654_v40, 0.0 }
  0xfa   :  { %v824_v48 = vmax.f32 %v594_v44, 0.0 }
  0xfb   :  { %v1528_v50 = vpack.c.bf16 %v848_v46, %v847_v45 }
  0xfc   :  { %v718_v51 = vpop.f32.mrf.mxu2  ;;  %v1468_v52 = vpack.c.bf16 %v824_v48, %v823_v43 }
  0xfd   :  { %1702 = vst [vmem:[%s2237_s3 + $0x90] sm:$0xff] %v1528_v50   ;;  %v719_v53 = vadd.f32 %v1922_v42, %v718_v51  ;;  %v783_v54 = vpop.f32.mrf.mxu3 }
  0xfe   :  { %v656_v56 = vpop.f32.mrf.mxu1  ;;  %1690 = vst [vmem:[%s2237_s3 + $0x30] sm:$0xff] %v1468_v52   ;;  %v784_v57 = vadd.f32 %v1922_v42, %v783_v54 }
  0xff   :  { %v874_v59 = vmax.f32 %v719_v53, 0.0  ;;  %v596_v60 = vpop.f32.mrf.mxu0  ;;  %v657_v2 = vadd.f32 %v1922_v42, %v656_v56 }
 0x100   :  { %v900_v61 = vmax.f32 %v784_v57, 0.0  ;;  %v597_v1 = vadd.f32 %v1922_v42, %v596_v60 }
 0x101   :  { %v1593_v62 = vpack.c.bf16 %v874_v59, %v873_v58  ;;  %v849_v9 = vmax.f32 %v657_v2, 0.0 }
 0x102   :  { %v1658_v63 = vpack.c.bf16 %v900_v61, %v899_v55  ;;  %v825_v7 = vmax.f32 %v597_v1, 0.0 }
 0x103   :  { %1715 = vst [vmem:[%s2237_s3 + $0xf8] sm:$0xff] %v1593_v62  }
 0x104   :  { %v721_v0 = vpop.f32.mrf.mxu2  ;;  %1728 = vst [vmem:[%s2237_s3 + $0x160] sm:$0xff] %v1658_v63  }
 0x105   :  { %v786_v3 = vpop.f32.mrf.mxu3  ;;  %v722_v13 = vadd.f32 %v1922_v42, %v721_v0 }
 0x106   :  { %v658_v4 = vpop.f32.mrf.mxu1  ;;  %v787_v11 = vadd.f32 %v1922_v42, %v786_v3 }
 0x107   :  { %v659_v5 = vadd.f32 %v1922_v42, %v658_v4  ;;  %v598_v6 = vpop.f32.mrf.mxu0  ;;  %v875_v22 = vmax.f32 %v722_v13, 0.0 }
 0x108   :  { %v599_v8 = vadd.f32 %v1922_v42, %v598_v6  ;;  %v901_v19 = vmax.f32 %v787_v11, 0.0 }
 0x109   :  { %v850_v10 = vmax.f32 %v659_v5, 0.0 }
 0x10a   :  { %v826_v12 = vmax.f32 %v599_v8, 0.0 }
 0x10b   :  { %v1533_v14 = vpack.c.bf16 %v850_v10, %v849_v9 }
 0x10c   :  { %v723_v15 = vpop.f32.mrf.mxu2  ;;  %v1473_v16 = vpack.c.bf16 %v826_v12, %v825_v7 }
 0x10d   :  { %1703 = vst [vmem:[%s2237_s3 + $0x98] sm:$0xff] %v1533_v14   ;;  %v724_v17 = vadd.f32 %v1922_v42, %v723_v15  ;;  %v788_v18 = vpop.f32.mrf.mxu3 }
 0x10e   :  { %v661_v20 = vpop.f32.mrf.mxu1  ;;  %1691 = vst [vmem:[%s2237_s3 + $0x38] sm:$0xff] %v1473_v16   ;;  %v789_v21 = vadd.f32 %v1922_v42, %v788_v18 }
 0x10f   :  { %v876_v23 = vmax.f32 %v724_v17, 0.0  ;;  %v601_v24 = vpop.f32.mrf.mxu0  ;;  %v662_v30 = vadd.f32 %v1922_v42, %v661_v20 }
 0x110   :  { %v902_v25 = vmax.f32 %v789_v21, 0.0  ;;  %v602_v29 = vadd.f32 %v1922_v42, %v601_v24 }
 0x111   :  { %v1598_v26 = vpack.c.bf16 %v876_v23, %v875_v22  ;;  %v851_v37 = vmax.f32 %v662_v30, 0.0 }
 0x112   :  { %v1663_v27 = vpack.c.bf16 %v902_v25, %v901_v19  ;;  %v827_v35 = vmax.f32 %v602_v29, 0.0 }
 0x113   :  { %1716 = vst [vmem:[%s2237_s3 + $0x100] sm:$0xff] %v1598_v26  }
 0x114   :  { %v726_v28 = vpop.f32.mrf.mxu2  ;;  %1729 = vst [vmem:[%s2237_s3 + $0x168] sm:$0xff] %v1663_v27  }
 0x115   :  { %v791_v31 = vpop.f32.mrf.mxu3  ;;  %v727_v41 = vadd.f32 %v1922_v42, %v726_v28 }
 0x116   :  { %v663_v32 = vpop.f32.mrf.mxu1  ;;  %v792_v39 = vadd.f32 %v1922_v42, %v791_v31 }
 0x117   :  { %v664_v33 = vadd.f32 %v1922_v42, %v663_v32  ;;  %v603_v34 = vpop.f32.mrf.mxu0  ;;  %v877_v51 = vmax.f32 %v727_v41, 0.0 }
 0x118   :  { %v604_v36 = vadd.f32 %v1922_v42, %v603_v34  ;;  %v903_v48 = vmax.f32 %v792_v39, 0.0 }
 0x119   :  { %v852_v38 = vmax.f32 %v664_v33, 0.0 }
 0x11a   :  { %v828_v40 = vmax.f32 %v604_v36, 0.0 }
 0x11b   :  { %v1538_v43 = vpack.c.bf16 %v852_v38, %v851_v37 }
 0x11c   :  { %v728_v44 = vpop.f32.mrf.mxu2  ;;  %v1478_v45 = vpack.c.bf16 %v828_v40, %v827_v35 }
 0x11d   :  { %1704 = vst [vmem:[%s2237_s3 + $0xa0] sm:$0xff] %v1538_v43   ;;  %v729_v46 = vadd.f32 %v1922_v42, %v728_v44  ;;  %v793_v47 = vpop.f32.mrf.mxu3 }
 0x11e   :  { %v666_v49 = vpop.f32.mrf.mxu1  ;;  %1692 = vst [vmem:[%s2237_s3 + $0x40] sm:$0xff] %v1478_v45   ;;  %v794_v50 = vadd.f32 %v1922_v42, %v793_v47 }
 0x11f   :  { %v878_v52 = vmax.f32 %v729_v46, 0.0  ;;  %v606_v53 = vpop.f32.mrf.mxu0  ;;  %v667_v59 = vadd.f32 %v1922_v42, %v666_v49 }
 0x120   :  { %v904_v54 = vmax.f32 %v794_v50, 0.0  ;;  %v607_v58 = vadd.f32 %v1922_v42, %v606_v53 }
 0x121   :  { %v1603_v55 = vpack.c.bf16 %v878_v52, %v877_v51  ;;  %v853_v2 = vmax.f32 %v667_v59, 0.0 }
 0x122   :  { %v1668_v56 = vpack.c.bf16 %v904_v54, %v903_v48  ;;  %v829_v0 = vmax.f32 %v607_v58, 0.0 }
 0x123   :  { %1717 = vst [vmem:[%s2237_s3 + $0x108] sm:$0xff] %v1603_v55  }
 0x124   :  { %v731_v57 = vpop.f32.mrf.mxu2  ;;  %1730 = vst [vmem:[%s2237_s3 + $0x170] sm:$0xff] %v1668_v56  }
 0x125   :  { %v796_v60 = vpop.f32.mrf.mxu3  ;;  %v732_v6 = vadd.f32 %v1922_v42, %v731_v57 }
 0x126   :  { %v668_v61 = vpop.f32.mrf.mxu1  ;;  %v797_v4 = vadd.f32 %v1922_v42, %v796_v60 }
 0x127   :  { %v669_v62 = vadd.f32 %v1922_v42, %v668_v61  ;;  %v608_v63 = vpop.f32.mrf.mxu0  ;;  %v879_v15 = vmax.f32 %v732_v6, 0.0 }
 0x128   :  { %v609_v1 = vadd.f32 %v1922_v42, %v608_v63  ;;  %v905_v12 = vmax.f32 %v797_v4, 0.0 }
 0x129   :  { %v854_v3 = vmax.f32 %v669_v62, 0.0 }
 0x12a   :  { %v830_v5 = vmax.f32 %v609_v1, 0.0 }
 0x12b   :  { %v1543_v7 = vpack.c.bf16 %v854_v3, %v853_v2 }
 0x12c   :  { %v733_v8 = vpop.f32.mrf.mxu2  ;;  %v1483_v9 = vpack.c.bf16 %v830_v5, %v829_v0 }
 0x12d   :  { %1705 = vst [vmem:[%s2237_s3 + $0xa8] sm:$0xff] %v1543_v7   ;;  %v734_v10 = vadd.f32 %v1922_v42, %v733_v8  ;;  %v798_v11 = vpop.f32.mrf.mxu3 }
 0x12e   :  { %v671_v13 = vpop.f32.mrf.mxu1  ;;  %1693 = vst [vmem:[%s2237_s3 + $0x48] sm:$0xff] %v1483_v9   ;;  %v799_v14 = vadd.f32 %v1922_v42, %v798_v11 }
 0x12f   :  { %v880_v16 = vmax.f32 %v734_v10, 0.0  ;;  %v611_v17 = vpop.f32.mrf.mxu0  ;;  %v672_v23 = vadd.f32 %v1922_v42, %v671_v13 }
 0x130   :  { %v906_v18 = vmax.f32 %v799_v14, 0.0  ;;  %v612_v22 = vadd.f32 %v1922_v42, %v611_v17 }
 0x131   :  { %v1608_v19 = vpack.c.bf16 %v880_v16, %v879_v15  ;;  %v855_v30 = vmax.f32 %v672_v23, 0.0 }
 0x132   :  { %v1673_v20 = vpack.c.bf16 %v906_v18, %v905_v12  ;;  %v831_v28 = vmax.f32 %v612_v22, 0.0 }
 0x133   :  { %1718 = vst [vmem:[%s2237_s3 + $0x110] sm:$0xff] %v1608_v19  }
 0x134   :  { %v736_v21 = vpop.f32.mrf.mxu2  ;;  %1731 = vst [vmem:[%s2237_s3 + $0x178] sm:$0xff] %v1673_v20  }
 0x135   :  { %v801_v24 = vpop.f32.mrf.mxu3  ;;  %v737_v34 = vadd.f32 %v1922_v42, %v736_v21 }
 0x136   :  { %v673_v25 = vpop.f32.mrf.mxu1  ;;  %v802_v32 = vadd.f32 %v1922_v42, %v801_v24 }
 0x137   :  { %v674_v26 = vadd.f32 %v1922_v42, %v673_v25  ;;  %v613_v27 = vpop.f32.mrf.mxu0  ;;  %v881_v44 = vmax.f32 %v737_v34, 0.0 }
 0x138   :  { %v614_v29 = vadd.f32 %v1922_v42, %v613_v27  ;;  %v907_v40 = vmax.f32 %v802_v32, 0.0 }
 0x139   :  { %v856_v31 = vmax.f32 %v674_v26, 0.0 }
 0x13a   :  { %v832_v33 = vmax.f32 %v614_v29, 0.0 }
 0x13b   :  { %v1548_v35 = vpack.c.bf16 %v856_v31, %v855_v30 }
 0x13c   :  { %v738_v36 = vpop.f32.mrf.mxu2  ;;  %v1488_v37 = vpack.c.bf16 %v832_v33, %v831_v28 }
 0x13d   :  { %1706 = vst [vmem:[%s2237_s3 + $0xb0] sm:$0xff] %v1548_v35   ;;  %v739_v38 = vadd.f32 %v1922_v42, %v738_v36  ;;  %v803_v39 = vpop.f32.mrf.mxu3 }
 0x13e   :  { %v676_v41 = vpop.f32.mrf.mxu1  ;;  %1694 = vst [vmem:[%s2237_s3 + $0x50] sm:$0xff] %v1488_v37   ;;  %v804_v43 = vadd.f32 %v1922_v42, %v803_v39 }
 0x13f   :  { %v882_v45 = vmax.f32 %v739_v38, 0.0  ;;  %v616_v46 = vpop.f32.mrf.mxu0  ;;  %v677_v52 = vadd.f32 %v1922_v42, %v676_v41 }
 0x140   :  { %v908_v47 = vmax.f32 %v804_v43, 0.0  ;;  %v617_v51 = vadd.f32 %v1922_v42, %v616_v46 }
 0x141   :  { %v1613_v48 = vpack.c.bf16 %v882_v45, %v881_v44  ;;  %v857_v59 = vmax.f32 %v677_v52, 0.0 }
 0x142   :  { %v1678_v49 = vpack.c.bf16 %v908_v47, %v907_v40  ;;  %v833_v57 = vmax.f32 %v617_v51, 0.0 }
 0x143   :  { %1719 = vst [vmem:[%s2237_s3 + $0x118] sm:$0xff] %v1613_v48  }
 0x144   :  { %v741_v50 = vpop.f32.mrf.mxu2  ;;  %1732 = vst [vmem:[%s2237_s3 + $0x180] sm:$0xff] %v1678_v49  }
 0x145   :  { %v806_v53 = vpop.f32.mrf.mxu3  ;;  %v742_v63 = vadd.f32 %v1922_v42, %v741_v50 }
 0x146   :  { %v678_v54 = vpop.f32.mrf.mxu1  ;;  %v807_v61 = vadd.f32 %v1922_v42, %v806_v53 }
 0x147   :  { %v679_v55 = vadd.f32 %v1922_v42, %v678_v54  ;;  %v618_v56 = vpop.f32.mrf.mxu0  ;;  %v883_v8 = vmax.f32 %v742_v63, 0.0 }
 0x148   :  { %v619_v58 = vadd.f32 %v1922_v42, %v618_v56  ;;  %v909_v5 = vmax.f32 %v807_v61, 0.0 }
 0x149   :  { %v858_v60 = vmax.f32 %v679_v55, 0.0 }
 0x14a   :  { %v834_v62 = vmax.f32 %v619_v58, 0.0 }
 0x14b   :  { %v1553_v0 = vpack.c.bf16 %v858_v60, %v857_v59 }
 0x14c   :  { %v743_v1 = vpop.f32.mrf.mxu2  ;;  %v1493_v2 = vpack.c.bf16 %v834_v62, %v833_v57 }
 0x14d   :  { %1707 = vst [vmem:[%s2237_s3 + $0xb8] sm:$0xff] %v1553_v0   ;;  %v744_v3 = vadd.f32 %v1922_v42, %v743_v1  ;;  %v808_v4 = vpop.f32.mrf.mxu3 }
 0x14e   :  { %v681_v6 = vpop.f32.mrf.mxu1  ;;  %1695 = vst [vmem:[%s2237_s3 + $0x58] sm:$0xff] %v1493_v2   ;;  %v809_v7 = vadd.f32 %v1922_v42, %v808_v4 }
 0x14f   :  { %v884_v9 = vmax.f32 %v744_v3, 0.0  ;;  %v682_v14 = vadd.f32 %v1922_v42, %v681_v6 }
 0x150   :  { %v910_v10 = vmax.f32 %v809_v7, 0.0 }
 0x151   :  { %v1618_v11 = vpack.c.bf16 %v884_v9, %v883_v8  ;;  %v859_v17 = vmax.f32 %v682_v14, 0.0 }
 0x152   :  { %v1683_v12 = vpack.c.bf16 %v910_v10, %v909_v5 }
 0x153   :  { %1720 = vst [vmem:[%s2237_s3 + $0x120] sm:$0xff] %v1618_v11  }
 0x154   :  { %v746_v13 = vpop.f32.mrf.mxu2  ;;  %1733 = vst [vmem:[%s2237_s3 + $0x188] sm:$0xff] %v1683_v12  }
 0x155   :  { %v747_v19 = vadd.f32 %v1922_v42, %v746_v13 }
 0x156   :  { %v683_v15 = vpop.f32.mrf.mxu1 }
 0x157   :  { %v684_v16 = vadd.f32 %v1922_v42, %v683_v15  ;;  %v885_v23 = vmax.f32 %v747_v19, 0.0 }
 0x159   :  { %v860_v18 = vmax.f32 %v684_v16, 0.0 }
 0x15b   :  { %v1558_v20 = vpack.c.bf16 %v860_v18, %v859_v17 }
 0x15c   :  { %v748_v21 = vpop.f32.mrf.mxu2 }
 0x15d   :  { %1708 = vst [vmem:[%s2237_s3 + $0xc0] sm:$0xff] %v1558_v20   ;;  %v749_v22 = vadd.f32 %v1922_v42, %v748_v21 }
 0x15f   :  { %v886_v24 = vmax.f32 %v749_v22, 0.0 }
 0x161   :  { %v1623_v25 = vpack.c.bf16 %v886_v24, %v885_v23 }
 0x163   :  { %1721 = vst [vmem:[%s2237_s3 + $0x128] sm:$0xff] %v1623_v25  }

// kernel: dqn_forward.5
= control target key start
LH: loop header
LB: loop body
LE: loop exit
PB: predicated region body
PF: predicated region fallthrough
CT: control target
= control target key end

     0   :  { %s1690_s1 = inlined_call_operand.vmem [shape: bf16[512,128], index: 1, kind: input, shape index: {}]   ;;  %s1691_s2 = inlined_call_operand.vmem [shape: f32[1,128], index: 2, kind: input, shape index: {}]   ;;  %s1692_s0 = inlined_call_operand.vmem [shape: bf16[162,512], index: 0, kind: input, shape index: {}]   ;;  %s1693_s3 = inlined_call_operand.vmem [shape: bf16[162,128], index: 3, kind: output, shape index: {}]  }
   0x1   :  { %v1184_v0 = vld [vmem:[%s1690_s1 + $0x38] sm:$0xff]  ;;  %v1183_v4 = vld [vmem:[%s1690_s1 + $0x30] sm:$0xff]  ;;  %v1182_v8 = vld [vmem:[%s1690_s1 + $0x28] sm:$0xff] }
   0x2   :  { %v1192_v1 = vld [vmem:[%s1690_s1 + $0x78] sm:$0xff]  ;;  %530 = vmatpush.bf16.msra.mxu0 %v1184_v0  ;;  %v1191_v5 = vld [vmem:[%s1690_s1 + $0x70] sm:$0xff]  ;;  %v1190_v9 = vld [vmem:[%s1690_s1 + $0x68] sm:$0xff] }
   0x3   :  { %v1200_v2 = vld [vmem:[%s1690_s1 + $0xb8] sm:$0xff]  ;;  %593 = vmatpush.bf16.msra.mxu1 %v1192_v1  ;;  %v1199_v6 = vld [vmem:[%s1690_s1 + $0xb0] sm:$0xff]  ;;  %v1198_v10 = vld [vmem:[%s1690_s1 + $0xa8] sm:$0xff] }
   0x4   :  { %v1208_v3 = vld [vmem:[%s1690_s1 + $0xf8] sm:$0xff]  ;;  %656 = vmatpush.bf16.msra.mxu2 %v1200_v2  ;;  %v1207_v7 = vld [vmem:[%s1690_s1 + $0xf0] sm:$0xff]  ;;  %v1206_v11 = vld [vmem:[%s1690_s1 + $0xe8] sm:$0xff] }
   0x5   :  { %719 = vmatpush.bf16.msra.mxu3 %v1208_v3  ;;  %v1181_v12 = vld [vmem:[%s1690_s1 + $0x20] sm:$0xff]  ;;  %v1180_v16 = vld [vmem:[%s1690_s1 + $0x18] sm:$0xff]  ;;  %v1179_v20 = vld [vmem:[%s1690_s1 + $0x10] sm:$0xff] }
   0x6   :  { %531 = vmatpush.bf16.msra.mxu0 %v1183_v4  ;;  %v1189_v13 = vld [vmem:[%s1690_s1 + $0x60] sm:$0xff]  ;;  %v1188_v17 = vld [vmem:[%s1690_s1 + $0x58] sm:$0xff]  ;;  %v1187_v21 = vld [vmem:[%s1690_s1 + $0x50] sm:$0xff] }
   0x7   :  { %594 = vmatpush.bf16.msra.mxu1 %v1191_v5  ;;  %v1197_v14 = vld [vmem:[%s1690_s1 + $0xa0] sm:$0xff]  ;;  %v1196_v18 = vld [vmem:[%s1690_s1 + $0x98] sm:$0xff]  ;;  %v1195_v22 = vld [vmem:[%s1690_s1 + $0x90] sm:$0xff] }
   0x8   :  { %657 = vmatpush.bf16.msra.mxu2 %v1199_v6  ;;  %v1205_v15 = vld [vmem:[%s1690_s1 + $0xe0] sm:$0xff]  ;;  %v1204_v19 = vld [vmem:[%s1690_s1 + $0xd8] sm:$0xff]  ;;  %v1203_v23 = vld [vmem:[%s1690_s1 + $0xd0] sm:$0xff] }
   0x9   :  { %720 = vmatpush.bf16.msra.mxu3 %v1207_v7  ;;  %v1178_v24 = vld [vmem:[%s1690_s1 + $0x8] sm:$0xff]  ;;  %v1177_v28 = vld [vmem:[%s1690_s1] sm:$0xff]  ;;  %v1139_v33 = vld [vmem:[%s1692_s0 + $0xc] sm:$0xf0] }
   0xa   :  { %532 = vmatpush.bf16.msra.mxu0 %v1182_v8  ;;  %v1186_v25 = vld [vmem:[%s1690_s1 + $0x48] sm:$0xff]  ;;  %v1185_v29 = vld [vmem:[%s1690_s1 + $0x40] sm:$0xff]  ;;  %v853_v35 = vld [vmem:[%s1692_s0 + $0x10] sm:$0xf0] }
   0xb   :  { %595 = vmatpush.bf16.msra.mxu1 %v1190_v9  ;;  %v1194_v26 = vld [vmem:[%s1690_s1 + $0x88] sm:$0xff]  ;;  %v1193_v30 = vld [vmem:[%s1690_s1 + $0x80] sm:$0xff]  ;;  %v1140_v37 = vld [vmem:[%s1692_s0 + $0x14] sm:$0xf0] }
   0xc   :  { %658 = vmatpush.bf16.msra.mxu2 %v1198_v10  ;;  %v1202_v27 = vld [vmem:[%s1690_s1 + $0xc8] sm:$0xff]  ;;  %v1201_v31 = vld [vmem:[%s1690_s1 + $0xc0] sm:$0xff]  ;;  %v861_v39 = vld [vmem:[%s1692_s0 + $0x18] sm:$0xf0] }
   0xd   :  { %721 = vmatpush.bf16.msra.mxu3 %v1206_v11  ;;  %v851_v32 = vld [vmem:[%s1692_s0] sm:$0xf]  ;;  %v1137_v34 = vld [vmem:[%s1692_s0 + $0x4] sm:$0xf]  ;;  %v859_v36 = vld [vmem:[%s1692_s0 + $0x8] sm:$0xf] }
   0xe   :  { %533 = vmatpush.bf16.msra.mxu0 %v1181_v12  ;;  %v1138_v38 = vld [vmem:[%s1692_s0 + $0xc] sm:$0xf]  ;;  %v852_v40 = vor.u32 %v1139_v33, %v851_v32  ;;  %v856_v41 = vor.u32 %v1137_v34, %v853_v35  ;;  %v860_v42 = vor.u32 %v1140_v37, %v859_v36  ;;  %v867_v44 = vld [vmem:[%s1692_s0 + $0x20] sm:$0xf]  ;;  %v1143_v45 = vld [vmem:[%s1692_s0 + $0x2c] sm:$0xf0] }
   0xf   :  { %596 = vmatpush.bf16.msra.mxu1 %v1189_v13  ;;  %v864_v43 = vor.u32 %v1138_v38, %v861_v39  ;;  %v1141_v46 = vld [vmem:[%s1692_s0 + $0x24] sm:$0xf]  ;;  %v869_v47 = vld [vmem:[%s1692_s0 + $0x30] sm:$0xf0]  ;;  %v875_v48 = vld [vmem:[%s1692_s0 + $0x28] sm:$0xf]  ;;  %v868_v52 = vor.u32 %v1143_v45, %v867_v44 }
  0x10   :  { %659 = vmatpush.bf16.msra.mxu2 %v1197_v14  ;;  %v1144_v49 = vld [vmem:[%s1692_s0 + $0x34] sm:$0xf0]  ;;  %v1142_v50 = vld [vmem:[%s1692_s0 + $0x2c] sm:$0xf]  ;;  %v877_v51 = vld [vmem:[%s1692_s0 + $0x38] sm:$0xf0]  ;;  %v872_v53 = vor.u32 %v1141_v46, %v869_v47 }
  0x11   :  { %722 = vmatpush.bf16.msra.mxu3 %v1205_v15  ;;  %v876_v54 = vor.u32 %v1144_v49, %v875_v48  ;;  %v880_v55 = vor.u32 %v1142_v50, %v877_v51  ;;  %v883_v56 = vld [vmem:[%s1692_s0 + $0x40] sm:$0xf]  ;;  %v1147_v57 = vld [vmem:[%s1692_s0 + $0x4c] sm:$0xf0]  ;;  %v1145_v58 = vld [vmem:[%s1692_s0 + $0x44] sm:$0xf] }
  0x12   :  { %534 = vmatpush.bf16.msra.mxu0 %v1180_v16  ;;  %v885_v59 = vld [vmem:[%s1692_s0 + $0x50] sm:$0xf0]  ;;  %v891_v60 = vld [vmem:[%s1692_s0 + $0x48] sm:$0xf]  ;;  %v1148_v61 = vld [vmem:[%s1692_s0 + $0x54] sm:$0xf0]  ;;  %v884_v0 = vor.u32 %v1147_v57, %v883_v56 }
  0x13   :  { %597 = vmatpush.bf16.msra.mxu1 %v1188_v17  ;;  %v1146_v62 = vld [vmem:[%s1692_s0 + $0x4c] sm:$0xf]  ;;  %v893_v63 = vld [vmem:[%s1692_s0 + $0x58] sm:$0xf0]  ;;  %v888_v1 = vor.u32 %v1145_v58, %v885_v59  ;;  %v892_v2 = vor.u32 %v1148_v61, %v891_v60  ;;  %v899_v4 = vld [vmem:[%s1692_s0 + $0x60] sm:$0xf] }
  0x14   :  { %660 = vmatpush.bf16.msra.mxu2 %v1196_v18  ;;  %v896_v3 = vor.u32 %v1146_v62, %v893_v63  ;;  %v1151_v5 = vld [vmem:[%s1692_s0 + $0x6c] sm:$0xf0]  ;;  %v1149_v6 = vld [vmem:[%s1692_s0 + $0x64] sm:$0xf]  ;;  %v901_v7 = vld [vmem:[%s1692_s0 + $0x70] sm:$0xf0] }
  0x15   :  { %723 = vmatpush.bf16.msra.mxu3 %v1204_v19  ;;  %v907_v8 = vld [vmem:[%s1692_s0 + $0x68] sm:$0xf]  ;;  %v1152_v9 = vld [vmem:[%s1692_s0 + $0x74] sm:$0xf0]  ;;  %v1150_v10 = vld [vmem:[%s1692_s0 + $0x6c] sm:$0xf]  ;;  %v900_v12 = vor.u32 %v1151_v5, %v899_v4  ;;  %v904_v13 = vor.u32 %v1149_v6, %v901_v7 }
  0x16   :  { %535 = vmatpush.bf16.msra.mxu0 %v1179_v20  ;;  %v909_v11 = vld [vmem:[%s1692_s0 + $0x78] sm:$0xf0]  ;;  %v908_v14 = vor.u32 %v1152_v9, %v907_v8  ;;  %v915_v16 = vld [vmem:[%s1692_s0 + $0x80] sm:$0xf]  ;;  %v1155_v17 = vld [vmem:[%s1692_s0 + $0x8c] sm:$0xf0] }
  0x17   :  { %598 = vmatpush.bf16.msra.mxu1 %v1187_v21  ;;  %v912_v15 = vor.u32 %v1150_v10, %v909_v11  ;;  %v1153_v18 = vld [vmem:[%s1692_s0 + $0x84] sm:$0xf]  ;;  %v917_v19 = vld [vmem:[%s1692_s0 + $0x90] sm:$0xf0]  ;;  %v923_v20 = vld [vmem:[%s1692_s0 + $0x88] sm:$0xf] }
  0x18   :  { %661 = vmatpush.bf16.msra.mxu2 %v1195_v22  ;;  %v1156_v21 = vld [vmem:[%s1692_s0 + $0x94] sm:$0xf0]  ;;  %v1154_v22 = vld [vmem:[%s1692_s0 + $0x8c] sm:$0xf]  ;;  %v939_v32 = vld [vmem:[%s1692_s0 + $0xa8] sm:$0xf] }
  0x19   :  { %724 = vmatpush.bf16.msra.mxu3 %v1203_v23  ;;  %v925_v23 = vld [vmem:[%s1692_s0 + $0x98] sm:$0xf0]  ;;  %v1160_v33 = vld [vmem:[%s1692_s0 + $0xb4] sm:$0xf0]  ;;  %v1158_v34 = vld [vmem:[%s1692_s0 + $0xac] sm:$0xf] }
  0x1a   :  { %536 = vmatpush.bf16.msra.mxu0 %v1178_v24  ;;  %v916_v24 = vor.u32 %v1155_v17, %v915_v16  ;;  %v941_v35 = vld [vmem:[%s1692_s0 + $0xb8] sm:$0xf0]  ;;  %v940_v38 = vor.u32 %v1160_v33, %v939_v32  ;;  %v955_v44 = vld [vmem:[%s1692_s0 + $0xc8] sm:$0xf]  ;;  %v1164_v45 = vld [vmem:[%s1692_s0 + $0xd4] sm:$0xf0] }
  0x1b   :  { %599 = vmatpush.bf16.msra.mxu1 %v1186_v25  ;;  %v920_v25 = vor.u32 %v1153_v18, %v917_v19  ;;  %v944_v39 = vor.u32 %v1158_v34, %v941_v35  ;;  %v1162_v46 = vld [vmem:[%s1692_s0 + $0xcc] sm:$0xf]  ;;  %v957_v47 = vld [vmem:[%s1692_s0 + $0xd8] sm:$0xf0]  ;;  %v956_v50 = vor.u32 %v1164_v45, %v955_v44  ;;  %v971_v56 = vld [vmem:[%s1692_s0 + $0xe8] sm:$0xf] }
  0x1c   :  { %662 = vmatpush.bf16.msra.mxu2 %v1194_v26  ;;  %v924_v26 = vor.u32 %v1156_v21, %v923_v20  ;;  %v960_v51 = vor.u32 %v1162_v46, %v957_v47  ;;  %v1168_v57 = vld [vmem:[%s1692_s0 + $0xf4] sm:$0xf0]  ;;  %v1166_v58 = vld [vmem:[%s1692_s0 + $0xec] sm:$0xf]  ;;  %v973_v59 = vld [vmem:[%s1692_s0 + $0xf8] sm:$0xf0] }
  0x1d   :  { %725 = vmatpush.bf16.msra.mxu3 %v1202_v27  ;;  %v928_v27 = vor.u32 %v1154_v22, %v925_v23  ;;  %v972_v62 = vor.u32 %v1168_v57, %v971_v56  ;;  %v976_v63 = vor.u32 %v1166_v58, %v973_v59  ;;  %v987_v4 = vld [vmem:[%s1692_s0 + $0x108] sm:$0xf]  ;;  %v1172_v5 = vld [vmem:[%s1692_s0 + $0x114] sm:$0xf0]  ;;  %v1170_v6 = vld [vmem:[%s1692_s0 + $0x10c] sm:$0xf] }
  0x1e   :  { %537 = vmatpush.bf16.msra.mxu0 %v1177_v28  ;;  %v931_v28 = vld [vmem:[%s1692_s0 + $0xa0] sm:$0xf]  ;;  %v989_v7 = vld [vmem:[%s1692_s0 + $0x118] sm:$0xf0]  ;;  %v1175_v23 = vld [vmem:[%s1692_s0 + $0x12c] sm:$0xf0] }
  0x1f   :  { %600 = vmatpush.bf16.msra.mxu1 %v1185_v29  ;;  %v1159_v29 = vld [vmem:[%s1692_s0 + $0xac] sm:$0xf0]  ;;  %v1604_v10 = vld [vmem:[%s1691_s2] ss:$0 sm:$0xff] }
  0x20   :  { %663 = vmatpush.bf16.msra.mxu2 %v1193_v30  ;;  %v1157_v30 = vld [vmem:[%s1692_s0 + $0xa4] sm:$0xf]  ;;  %v932_v36 = vor.u32 %v1159_v29, %v931_v28  ;;  %v995_v22 = vld [vmem:[%s1692_s0 + $0x120] sm:$0xf]  ;;  %v1176_v28 = vld [vmem:[%s1692_s0 + $0x134] sm:$0xf0] }
  0x21   :  { %726 = vmatpush.bf16.msra.mxu3 %v1201_v31  ;;  %538 = vmatmul.bf16.vlgmr.msra.gmra.mxu0 %v852_v40  ;;  %v933_v31 = vld [vmem:[%s1692_s0 + $0xb0] sm:$0xf0]  ;;  %v947_v40 = vld [vmem:[%s1692_s0 + $0xc0] sm:$0xf]  ;;  %v1174_v29 = vld [vmem:[%s1692_s0 + $0x12c] sm:$0xf]  ;;  %v996_v34 = vor.u32 %v1175_v23, %v995_v22 }
  0x22   :  { %601 = vmatmul.bf16.vlgmr.msra.gmra.mxu1 %v856_v41  ;;  %v936_v37 = vor.u32 %v1157_v30, %v933_v31  ;;  %v1163_v41 = vld [vmem:[%s1692_s0 + $0xcc] sm:$0xf0]  ;;  %v1005_v30 = vld [vmem:[%s1692_s0 + $0x138] sm:$0xf0] }
  0x23   :  { %664 = vmatmul.bf16.vlgmr.msra.gmra.mxu2 %v860_v42  ;;  %v1161_v42 = vld [vmem:[%s1692_s0 + $0xc4] sm:$0xf]  ;;  %v948_v48 = vor.u32 %v1163_v41, %v947_v40  ;;  %v1008_v41 = vor.u32 %v1174_v29, %v1005_v30 }
  0x24   :  { %727 = vmatmul.bf16.vlgmr.msra.gmra.mxu3 %v864_v43  ;;  %v949_v43 = vld [vmem:[%s1692_s0 + $0xd0] sm:$0xf0] }
  0x25   :  { %v952_v49 = vor.u32 %v1161_v42, %v949_v43 }
  0x31   :  { %543 = vmatmul.bf16.gmra.mxu0 %v868_v52  ;;  %v963_v52 = vld [vmem:[%s1692_s0 + $0xe0] sm:$0xf] }
  0x32   :  { %606 = vmatmul.bf16.gmra.mxu1 %v872_v53  ;;  %v1167_v53 = vld [vmem:[%s1692_s0 + $0xec] sm:$0xf0] }
  0x33   :  { %669 = vmatmul.bf16.gmra.mxu2 %v876_v54  ;;  %v1165_v54 = vld [vmem:[%s1692_s0 + $0xe4] sm:$0xf]  ;;  %v964_v60 = vor.u32 %v1167_v53, %v963_v52  ;;  %v55_v53 = vld [vmem:[%s1692_s0 + $0x148] sm:$0x11] }
  0x34   :  { %732 = vmatmul.bf16.gmra.mxu3 %v880_v55  ;;  %v965_v55 = vld [vmem:[%s1692_s0 + $0xf0] sm:$0xf0]  ;;  %v54_v52 = vld [vmem:[%s1692_s0 + $0x140] sm:$0x11]  ;;  %v248_v58 = vunpack.c.l.b16 %v55_v53  ;;  %v249_v59 = vunpack.c.h.b16 %v55_v53 }
  0x35   :  { %v968_v61 = vor.u32 %v1165_v54, %v965_v55  ;;  %v246_v55 = vunpack.c.l.b16 %v54_v52  ;;  %v247_v56 = vunpack.c.h.b16 %v54_v52 }
  0x41   :  { %548 = vmatmul.bf16.gmra.mxu0 %v884_v0  ;;  %v979_v0 = vld [vmem:[%s1692_s0 + $0x100] sm:$0xf] }
  0x42   :  { %611 = vmatmul.bf16.gmra.mxu1 %v888_v1  ;;  %v1171_v1 = vld [vmem:[%s1692_s0 + $0x10c] sm:$0xf0] }
  0x43   :  { %674 = vmatmul.bf16.gmra.mxu2 %v892_v2  ;;  %v1169_v2 = vld [vmem:[%s1692_s0 + $0x104] sm:$0xf]  ;;  %v980_v8 = vor.u32 %v1171_v1, %v979_v0  ;;  %v291_v0 = vpack.c.b16 %v247_v56, %v247_v56 }
  0x44   :  { %737 = vmatmul.bf16.gmra.mxu3 %v896_v3  ;;  %v981_v3 = vld [vmem:[%s1692_s0 + $0x110] sm:$0xf0] }
  0x45   :  { %v984_v9 = vor.u32 %v1169_v2, %v981_v3 }
  0x51   :  { %553 = vmatmul.bf16.gmra.mxu0 %v900_v12 }
  0x52   :  { %616 = vmatmul.bf16.gmra.mxu1 %v904_v13  ;;  %v988_v13 = vor.u32 %v1172_v5, %v987_v4  ;;  %v292_v5 = vpack.c.b16 %v248_v58, %v248_v58 }
  0x53   :  { %679 = vmatmul.bf16.gmra.mxu2 %v908_v14  ;;  %v992_v14 = vor.u32 %v1170_v6, %v989_v7  ;;  %v293_v6 = vpack.c.b16 %v249_v59, %v249_v59 }
  0x54   :  { %742 = vmatmul.bf16.gmra.mxu3 %v912_v15 }
  0x61   :  { %558 = vmatmul.bf16.gmra.mxu0 %v916_v24 }
  0x62   :  { %621 = vmatmul.bf16.gmra.mxu1 %v920_v25  ;;  %v1173_v25 = vld [vmem:[%s1692_s0 + $0x124] sm:$0xf] }
  0x63   :  { %684 = vmatmul.bf16.gmra.mxu2 %v924_v26  ;;  %v997_v26 = vld [vmem:[%s1692_s0 + $0x130] sm:$0xf0] }
  0x64   :  { %747 = vmatmul.bf16.gmra.mxu3 %v928_v27  ;;  %v1003_v27 = vld [vmem:[%s1692_s0 + $0x128] sm:$0xf]  ;;  %v1000_v35 = vor.u32 %v1173_v25, %v997_v26 }
  0x65   :  { %v1004_v40 = vor.u32 %v1176_v28, %v1003_v27 }
  0x71   :  { %563 = vmatmul.bf16.gmra.mxu0 %v932_v36 }
  0x72   :  { %626 = vmatmul.bf16.gmra.mxu1 %v936_v37 }
  0x73   :  { %689 = vmatmul.bf16.gmra.mxu2 %v940_v38 }
  0x74   :  { %752 = vmatmul.bf16.gmra.mxu3 %v944_v39 }
  0x81   :  { %568 = vmatmul.bf16.gmra.mxu0 %v948_v48 }
  0x82   :  { %631 = vmatmul.bf16.gmra.mxu1 %v952_v49 }
  0x83   :  { %694 = vmatmul.bf16.gmra.mxu2 %v956_v50 }
  0x84   :  { %757 = vmatmul.bf16.gmra.mxu3 %v960_v51 }
  0x91   :  { %573 = vmatmul.bf16.gmra.mxu0 %v964_v60 }
  0x92   :  { %636 = vmatmul.bf16.gmra.mxu1 %v968_v61 }
  0x93   :  { %699 = vmatmul.bf16.gmra.mxu2 %v972_v62 }
  0x94   :  { %762 = vmatmul.bf16.gmra.mxu3 %v976_v63  ;;  %v290_v63 = vpack.c.b16 %v246_v55, %v246_v55 }
  0x9e   :  { %v539_v11 = vpop.f32.mrf.mxu0 }
  0x9f   :  { %v602_v12 = vpop.f32.mrf.mxu1  ;;  %v540_v15 = vadd.f32 %v1604_v10, %v539_v11 }
  0xa1   :  { %578 = vmatmul.bf16.gmra.mxu0 %v980_v8  ;;  %v603_v18 = vadd.f32 %v602_v12, %v540_v15 }
  0xa2   :  { %641 = vmatmul.bf16.gmra.mxu1 %v984_v9 }
  0xa3   :  { %704 = vmatmul.bf16.gmra.mxu2 %v988_v13 }
  0xa4   :  { %767 = vmatmul.bf16.gmra.mxu3 %v992_v14 }
  0xa6   :  { %v665_v16 = vpop.f32.mrf.mxu2  ;;  %v541_v19 = vpop.f32.mrf.mxu0 }
  0xa7   :  { %v728_v17 = vpop.f32.mrf.mxu3  ;;  %v604_v20 = vpop.f32.mrf.mxu1  ;;  %v542_v21 = vadd.f32 %v1604_v10, %v541_v19  ;;  %v666_v24 = vadd.f32 %v665_v16, %v603_v18 }
  0xa9   :  { %v605_v31 = vadd.f32 %v604_v20, %v542_v21  ;;  %v729_v36 = vadd.f32 %v728_v17, %v666_v24 }
  0xab   :  { %v782_v43 = vmax.f32 %v729_v36, 0.0 }
  0xae   :  { %v667_v32 = vpop.f32.mrf.mxu2  ;;  %v544_v38 = vpop.f32.mrf.mxu0 }
  0xaf   :  { %v730_v33 = vpop.f32.mrf.mxu3  ;;  %v668_v37 = vadd.f32 %v667_v32, %v605_v31  ;;  %v607_v39 = vpop.f32.mrf.mxu1  ;;  %v545_v45 = vadd.f32 %v1604_v10, %v544_v38 }
  0xb1   :  { %v731_v42 = vadd.f32 %v730_v33, %v668_v37  ;;  %583 = vmatmul.bf16.gmra.mxu0 %v996_v34  ;;  %v608_v49 = vadd.f32 %v607_v39, %v545_v45 }
  0xb2   :  { %646 = vmatmul.bf16.gmra.mxu1 %v1000_v35 }
  0xb3   :  { %v783_v44 = vmax.f32 %v731_v42, 0.0  ;;  %709 = vmatmul.bf16.gmra.mxu2 %v1004_v40 }
  0xb4   :  { %772 = vmatmul.bf16.gmra.mxu3 %v1008_v41 }
  0xb5   :  { %v1212_v46 = vpack.c.bf16 %v783_v44, %v782_v43 }
  0xb6   :  { %v670_v47 = vpop.f32.mrf.mxu2  ;;  %v546_v50 = vpop.f32.mrf.mxu0 }
  0xb7   :  { %v733_v48 = vpop.f32.mrf.mxu3  ;;  %1213 = vst [vmem:[%s1693_s3] sm:$0xff] %v1212_v46   ;;  %v609_v51 = vpop.f32.mrf.mxu1  ;;  %v547_v54 = vadd.f32 %v1604_v10, %v546_v50  ;;  %v671_v57 = vadd.f32 %v670_v47, %v608_v49 }
  0xb9   :  { %v610_v60 = vadd.f32 %v609_v51, %v547_v54  ;;  %v734_v1 = vadd.f32 %v733_v48, %v671_v57 }
  0xbb   :  { %v784_v8 = vmax.f32 %v734_v1, 0.0 }
  0xbe   :  { %v672_v61 = vpop.f32.mrf.mxu2  ;;  %v549_v3 = vpop.f32.mrf.mxu0 }
  0xbf   :  { %v735_v62 = vpop.f32.mrf.mxu3  ;;  %v673_v2 = vadd.f32 %v672_v61, %v610_v60  ;;  %v612_v4 = vpop.f32.mrf.mxu1  ;;  %v550_v11 = vadd.f32 %v1604_v10, %v549_v3 }
  0xc1   :  { %v736_v7 = vadd.f32 %v735_v62, %v673_v2  ;;  %588 = vmatmul.bf16.gmra.mxu0 %v290_v63  ;;  %v613_v15 = vadd.f32 %v612_v4, %v550_v11 }
  0xc2   :  { %651 = vmatmul.bf16.gmra.mxu1 %v291_v0 }
  0xc3   :  { %v785_v9 = vmax.f32 %v736_v7, 0.0  ;;  %714 = vmatmul.bf16.gmra.mxu2 %v292_v5 }
  0xc4   :  { %777 = vmatmul.bf16.gmra.mxu3 %v293_v6 }
  0xc5   :  { %v1217_v12 = vpack.c.bf16 %v785_v9, %v784_v8 }
  0xc6   :  { %v675_v13 = vpop.f32.mrf.mxu2  ;;  %v551_v16 = vpop.f32.mrf.mxu0 }
  0xc7   :  { %v738_v14 = vpop.f32.mrf.mxu3  ;;  %1259 = vst [vmem:[%s1693_s3 + $0x8] sm:$0xff] %v1217_v12   ;;  %v614_v17 = vpop.f32.mrf.mxu1  ;;  %v552_v18 = vadd.f32 %v1604_v10, %v551_v16  ;;  %v676_v19 = vadd.f32 %v675_v13, %v613_v15 }
  0xc9   :  { %v615_v20 = vadd.f32 %v614_v17, %v552_v18  ;;  %v739_v23 = vadd.f32 %v738_v14, %v676_v19 }
  0xcb   :  { %v786_v28 = vmax.f32 %v739_v23, 0.0 }
  0xce   :  { %v677_v21 = vpop.f32.mrf.mxu2  ;;  %v554_v25 = vpop.f32.mrf.mxu0 }
  0xcf   :  { %v740_v22 = vpop.f32.mrf.mxu3  ;;  %v678_v24 = vadd.f32 %v677_v21, %v615_v20  ;;  %v617_v26 = vpop.f32.mrf.mxu1  ;;  %v555_v30 = vadd.f32 %v1604_v10, %v554_v25 }
  0xd1   :  { %v741_v27 = vadd.f32 %v740_v22, %v678_v24  ;;  %v618_v34 = vadd.f32 %v617_v26, %v555_v30 }
  0xd3   :  { %v787_v29 = vmax.f32 %v741_v27, 0.0 }
  0xd5   :  { %v1222_v31 = vpack.c.bf16 %v787_v29, %v786_v28 }
  0xd6   :  { %v680_v32 = vpop.f32.mrf.mxu2  ;;  %v556_v35 = vpop.f32.mrf.mxu0 }
  0xd7   :  { %v743_v33 = vpop.f32.mrf.mxu3  ;;  %1260 = vst [vmem:[%s1693_s3 + $0x10] sm:$0xff] %v1222_v31   ;;  %v619_v36 = vpop.f32.mrf.mxu1  ;;  %v557_v37 = vadd.f32 %v1604_v10, %v556_v35  ;;  %v681_v38 = vadd.f32 %v680_v32, %v618_v34 }
  0xd9   :  { %v620_v39 = vadd.f32 %v619_v36, %v557_v37  ;;  %v744_v42 = vadd.f32 %v743_v33, %v681_v38 }
  0xdb   :  { %v788_v47 = vmax.f32 %v744_v42, 0.0 }
  0xde   :  { %v682_v40 = vpop.f32.mrf.mxu2  ;;  %v559_v44 = vpop.f32.mrf.mxu0 }
  0xdf   :  { %v745_v41 = vpop.f32.mrf.mxu3  ;;  %v683_v43 = vadd.f32 %v682_v40, %v620_v39  ;;  %v622_v45 = vpop.f32.mrf.mxu1  ;;  %v560_v49 = vadd.f32 %v1604_v10, %v559_v44 }
  0xe1   :  { %v746_v46 = vadd.f32 %v745_v41, %v683_v43  ;;  %v623_v53 = vadd.f32 %v622_v45, %v560_v49 }
  0xe3   :  { %v789_v48 = vmax.f32 %v746_v46, 0.0 }
  0xe5   :  { %v1227_v50 = vpack.c.bf16 %v789_v48, %v788_v47 }
  0xe6   :  { %v685_v51 = vpop.f32.mrf.mxu2  ;;  %v561_v54 = vpop.f32.mrf.mxu0 }
  0xe7   :  { %v748_v52 = vpop.f32.mrf.mxu3  ;;  %1261 = vst [vmem:[%s1693_s3 + $0x18] sm:$0xff] %v1227_v50   ;;  %v624_v55 = vpop.f32.mrf.mxu1  ;;  %v562_v56 = vadd.f32 %v1604_v10, %v561_v54  ;;  %v686_v57 = vadd.f32 %v685_v51, %v623_v53 }
  0xe9   :  { %v625_v58 = vadd.f32 %v624_v55, %v562_v56  ;;  %v749_v61 = vadd.f32 %v748_v52, %v686_v57 }
  0xeb   :  { %v790_v2 = vmax.f32 %v749_v61, 0.0 }
  0xee   :  { %v687_v59 = vpop.f32.mrf.mxu2  ;;  %v564_v63 = vpop.f32.mrf.mxu0 }
  0xef   :  { %v750_v60 = vpop.f32.mrf.mxu3  ;;  %v688_v62 = vadd.f32 %v687_v59, %v625_v58  ;;  %v627_v0 = vpop.f32.mrf.mxu1  ;;  %v565_v4 = vadd.f32 %v1604_v10, %v564_v63 }
  0xf1   :  { %v751_v1 = vadd.f32 %v750_v60, %v688_v62  ;;  %v628_v8 = vadd.f32 %v627_v0, %v565_v4 }
  0xf3   :  { %v791_v3 = vmax.f32 %v751_v1, 0.0 }
  0xf5   :  { %v1232_v5 = vpack.c.bf16 %v791_v3, %v790_v2 }
  0xf6   :  { %v690_v6 = vpop.f32.mrf.mxu2  ;;  %v566_v9 = vpop.f32.mrf.mxu0 }
  0xf7   :  { %v753_v7 = vpop.f32.mrf.mxu3  ;;  %1262 = vst [vmem:[%s1693_s3 + $0x20] sm:$0xff] %v1232_v5   ;;  %v629_v11 = vpop.f32.mrf.mxu1  ;;  %v567_v12 = vadd.f32 %v1604_v10, %v566_v9  ;;  %v691_v13 = vadd.f32 %v690_v6, %v628_v8 }
  0xf9   :  { %v630_v14 = vadd.f32 %v629_v11, %v567_v12  ;;  %v754_v17 = vadd.f32 %v753_v7, %v691_v13 }
  0xfb   :  { %v792_v22 = vmax.f32 %v754_v17, 0.0 }
  0xfe   :  { %v692_v15 = vpop.f32.mrf.mxu2  ;;  %v569_v19 = vpop.f32.mrf.mxu0 }
  0xff   :  { %v755_v16 = vpop.f32.mrf.mxu3  ;;  %v693_v18 = vadd.f32 %v692_v15, %v630_v14  ;;  %v632_v20 = vpop.f32.mrf.mxu1  ;;  %v570_v24 = vadd.f32 %v1604_v10, %v569_v19 }
 0x101   :  { %v756_v21 = vadd.f32 %v755_v16, %v693_v18  ;;  %v633_v28 = vadd.f32 %v632_v20, %v570_v24 }
 0x103   :  { %v793_v23 = vmax.f32 %v756_v21, 0.0 }
 0x105   :  { %v1237_v25 = vpack.c.bf16 %v793_v23, %v792_v22 }
 0x106   :  { %v695_v26 = vpop.f32.mrf.mxu2  ;;  %v571_v29 = vpop.f32.mrf.mxu0 }
 0x107   :  { %v758_v27 = vpop.f32.mrf.mxu3  ;;  %1263 = vst [vmem:[%s1693_s3 + $0x28] sm:$0xff] %v1237_v25   ;;  %v634_v30 = vpop.f32.mrf.mxu1  ;;  %v572_v31 = vadd.f32 %v1604_v10, %v571_v29  ;;  %v696_v32 = vadd.f32 %v695_v26, %v633_v28 }
 0x109   :  { %v635_v33 = vadd.f32 %v634_v30, %v572_v31  ;;  %v759_v36 = vadd.f32 %v758_v27, %v696_v32 }
 0x10b   :  { %v794_v41 = vmax.f32 %v759_v36, 0.0 }
 0x10e   :  { %v697_v34 = vpop.f32.mrf.mxu2  ;;  %v574_v38 = vpop.f32.mrf.mxu0 }
 0x10f   :  { %v760_v35 = vpop.f32.mrf.mxu3  ;;  %v698_v37 = vadd.f32 %v697_v34, %v635_v33  ;;  %v637_v39 = vpop.f32.mrf.mxu1  ;;  %v575_v43 = vadd.f32 %v1604_v10, %v574_v38 }
 0x111   :  { %v761_v40 = vadd.f32 %v760_v35, %v698_v37  ;;  %v638_v47 = vadd.f32 %v637_v39, %v575_v43 }
 0x113   :  { %v795_v42 = vmax.f32 %v761_v40, 0.0 }
 0x115   :  { %v1242_v44 = vpack.c.bf16 %v795_v42, %v794_v41 }
 0x116   :  { %v700_v45 = vpop.f32.mrf.mxu2  ;;  %v576_v48 = vpop.f32.mrf.mxu0 }
 0x117   :  { %v763_v46 = vpop.f32.mrf.mxu3  ;;  %1264 = vst [vmem:[%s1693_s3 + $0x30] sm:$0xff] %v1242_v44   ;;  %v639_v49 = vpop.f32.mrf.mxu1  ;;  %v577_v50 = vadd.f32 %v1604_v10, %v576_v48  ;;  %v701_v51 = vadd.f32 %v700_v45, %v638_v47 }
 0x119   :  { %v640_v52 = vadd.f32 %v639_v49, %v577_v50  ;;  %v764_v55 = vadd.f32 %v763_v46, %v701_v51 }
 0x11b   :  { %v796_v60 = vmax.f32 %v764_v55, 0.0 }
 0x11e   :  { %v702_v53 = vpop.f32.mrf.mxu2  ;;  %v579_v57 = vpop.f32.mrf.mxu0 }
 0x11f   :  { %v765_v54 = vpop.f32.mrf.mxu3  ;;  %v703_v56 = vadd.f32 %v702_v53, %v640_v52  ;;  %v642_v58 = vpop.f32.mrf.mxu1  ;;  %v580_v62 = vadd.f32 %v1604_v10, %v579_v57 }
 0x121   :  { %v766_v59 = vadd.f32 %v765_v54, %v703_v56  ;;  %v643_v2 = vadd.f32 %v642_v58, %v580_v62 }
 0x123   :  { %v797_v61 = vmax.f32 %v766_v59, 0.0 }
 0x125   :  { %v1247_v63 = vpack.c.bf16 %v797_v61, %v796_v60 }
 0x126   :  { %v705_v0 = vpop.f32.mrf.mxu2  ;;  %v581_v3 = vpop.f32.mrf.mxu0 }
 0x127   :  { %v768_v1 = vpop.f32.mrf.mxu3  ;;  %1265 = vst [vmem:[%s1693_s3 + $0x38] sm:$0xff] %v1247_v63   ;;  %v644_v4 = vpop.f32.mrf.mxu1  ;;  %v582_v5 = vadd.f32 %v1604_v10, %v581_v3  ;;  %v706_v6 = vadd.f32 %v705_v0, %v643_v2 }
 0x129   :  { %v645_v7 = vadd.f32 %v644_v4, %v582_v5  ;;  %v769_v11 = vadd.f32 %v768_v1, %v706_v6 }
 0x12b   :  { %v798_v16 = vmax.f32 %v769_v11, 0.0 }
 0x12e   :  { %v707_v8 = vpop.f32.mrf.mxu2  ;;  %v584_v13 = vpop.f32.mrf.mxu0 }
 0x12f   :  { %v770_v9 = vpop.f32.mrf.mxu3  ;;  %v708_v12 = vadd.f32 %v707_v8, %v645_v7  ;;  %v647_v14 = vpop.f32.mrf.mxu1  ;;  %v585_v18 = vadd.f32 %v1604_v10, %v584_v13 }
 0x131   :  { %v771_v15 = vadd.f32 %v770_v9, %v708_v12  ;;  %v648_v22 = vadd.f32 %v647_v14, %v585_v18 }
 0x133   :  { %v799_v17 = vmax.f32 %v771_v15, 0.0 }
 0x135   :  { %v1252_v19 = vpack.c.bf16 %v799_v17, %v798_v16 }
 0x136   :  { %v710_v20 = vpop.f32.mrf.mxu2  ;;  %v586_v23 = vpop.f32.mrf.mxu0 }
 0x137   :  { %v773_v21 = vpop.f32.mrf.mxu3  ;;  %1266 = vst [vmem:[%s1693_s3 + $0x40] sm:$0xff] %v1252_v19   ;;  %v649_v24 = vpop.f32.mrf.mxu1  ;;  %v587_v25 = vadd.f32 %v1604_v10, %v586_v23  ;;  %v711_v26 = vadd.f32 %v710_v20, %v648_v22 }
 0x139   :  { %v650_v27 = vadd.f32 %v649_v24, %v587_v25  ;;  %v774_v30 = vadd.f32 %v773_v21, %v711_v26 }
 0x13b   :  { %v800_v36 = vmax.f32 %v774_v30, 0.0 }
 0x13e   :  { %v712_v28 = vpop.f32.mrf.mxu2  ;;  %v589_v32 = vpop.f32.mrf.mxu0 }
 0x13f   :  { %v775_v29 = vpop.f32.mrf.mxu3  ;;  %v713_v31 = vadd.f32 %v712_v28, %v650_v27  ;;  %v652_v33 = vpop.f32.mrf.mxu1  ;;  %v590_v34 = vadd.f32 %v1604_v10, %v589_v32 }
 0x141   :  { %v776_v35 = vadd.f32 %v775_v29, %v713_v31  ;;  %v653_v38 = vadd.f32 %v652_v33, %v590_v34 }
 0x143   :  { %v801_v37 = vmax.f32 %v776_v35, 0.0 }
 0x145   :  { %v1257_v39 = vpack.c.bf16 %v801_v37, %v800_v36 }
 0x146   :  { %v715_v40 = vpop.f32.mrf.mxu2  ;;  %v591_v43 = vpop.f32.mrf.mxu0 }
 0x147   :  { %v778_v41 = vpop.f32.mrf.mxu3  ;;  %1267 = vst [vmem:[%s1693_s3 + $0x48] sm:$0xff] %v1257_v39   ;;  %v716_v42 = vadd.f32 %v715_v40, %v653_v38  ;;  %v654_v44 = vpop.f32.mrf.mxu1 }
 0x149   :  { %v779_v45 = vadd.f32 %v778_v41, %v716_v42 }
 0x14b   :  { %v802_v46 = vmax.f32 %v779_v45, 0.0 }
 0x14d   :  { %v823_v47 = vpack.c.bf16 %v802_v46, %v802_v46 }
 0x14e   :  { %v717_v48 = vpop.f32.mrf.mxu2 }
 0x14f   :  { %v780_v49 = vpop.f32.mrf.mxu3  ;;  %844 = vst [vmem:[%s1693_s3 + $0x50] sm:$0x1] %v823_v47 }

// kernel: dqn_forward.6
= control target key start
LH: loop header
LB: loop body
LE: loop exit
PB: predicated region body
PF: predicated region fallthrough
CT: control target
= control target key end

     0   :  { %vm513_vm0 = vcmask 523264   ;;  %s1584_s1 = inlined_call_operand.vmem [shape: bf16[576,128], index: 1, kind: input, shape index: {}]   ;;  %s1585_s2 = inlined_call_operand.vmem [shape: f32[1,128], index: 2, kind: input, shape index: {}]   ;;  %s1586_s0 = inlined_call_operand.vmem [shape: bf16[98,576], index: 0, kind: input, shape index: {}]   ;;  %s1587_s3 = inlined_call_operand.vmem [shape: bf16[98,128], index: 3, kind: output, shape index: {}]  }
   0x1   :  { %v1101_v0 = vld [vmem:[%s1584_s1 + $0x38] sm:$0xff]  ;;  %v1100_v1 = vld [vmem:[%s1584_s1 + $0x30] sm:$0xff]  ;;  %v1099_v2 = vld [vmem:[%s1584_s1 + $0x28] sm:$0xff] }
   0x2   :  { %1165 = vmatpush.bf16.msra.mxu1 %v1101_v0  ;;  %1166 = vmatpush.bf16.msra.mxu2 %v1101_v0  ;;  %v1098_v3 = vld [vmem:[%s1584_s1 + $0x20] sm:$0xff]  ;;  %v1097_v4 = vld [vmem:[%s1584_s1 + $0x18] sm:$0xff]  ;;  %v1096_v5 = vld [vmem:[%s1584_s1 + $0x10] sm:$0xff] }
   0x3   :  { %1167 = vmatpush.bf16.msra.mxu3 %v1101_v0  ;;  %535 = vmatpush.bf16.msra.mxu0 %v1101_v0  ;;  %v1095_v6 = vld [vmem:[%s1584_s1 + $0x8] sm:$0xff]  ;;  %v1234_v7 = vld [vmem:[%s1586_s0 + $0xf0] sm:$0x11]  ;;  %v1094_v8 = vld [vmem:[%s1584_s1] sm:$0xff] }
   0x4   :  { %v835_v9 = vld [vmem:[%s1586_s0 + $0x50] sm:$0xf]  ;;  %v1076_v10 = vld [vmem:[%s1586_s0 + $0x60] sm:$0xf0]  ;;  %v875_v11 = vld [vmem:[%s1586_s0 + $0xa0] sm:$0xf]  ;;  %v229_v15 = vunpack.c.l.b16 %v1234_v7 }
   0x5   :  { %v1086_v12 = vld [vmem:[%s1586_s0 + $0xb0] sm:$0xf0]  ;;  %v795_v13 = vld [vmem:[%s1586_s0] sm:$0xf]  ;;  %v1125_v16 = vld [vmem:[%s1584_s1 + $0xf8] sm:$0xff]  ;;  %v836_v18 = vor.u32 %v1076_v10, %v835_v9 }
   0x6   :  { %1168 = vmatpush.bf16.msra.mxu1 %v1100_v1  ;;  %1169 = vmatpush.bf16.msra.mxu2 %v1100_v1  ;;  %v1066_v14 = vld [vmem:[%s1586_s0 + $0x10] sm:$0xf0]  ;;  %v1117_v17 = vld [vmem:[%s1584_s1 + $0xb8] sm:$0xff]  ;;  %v876_v19 = vor.u32 %v1086_v12, %v875_v11  ;;  %v264_v23 = vpack.c.b16 %v229_v15, %v229_v15  ;;  %v1123_v28 = vld [vmem:[%s1584_s1 + $0xe8] sm:$0xff] }
   0x7   :  { %1170 = vmatpush.bf16.msra.mxu3 %v1100_v1  ;;  %536 = vmatpush.bf16.msra.mxu0 %v1100_v1  ;;  %v796_v20 = vor.u32 %v1066_v14, %v795_v13  ;;  %v1109_v21 = vld [vmem:[%s1584_s1 + $0x78] sm:$0xff]  ;;  %v1124_v24 = vld [vmem:[%s1584_s1 + $0xf0] sm:$0xff]  ;;  %v1115_v29 = vld [vmem:[%s1584_s1 + $0xa8] sm:$0xff] }
   0x8   :  { %v1129_v22 = vld [vmem:[%s1584_s1 + $0x118] sm:$0xff]  ;;  %v1116_v25 = vld [vmem:[%s1584_s1 + $0xb0] sm:$0xff]  ;;  %v1107_v30 = vld [vmem:[%s1584_s1 + $0x68] sm:$0xff] }
   0x9   :  { %v1108_v26 = vld [vmem:[%s1584_s1 + $0x70] sm:$0xff]  ;;  %v1127_v31 = vld [vmem:[%s1584_s1 + $0x108] sm:$0xff]  ;;  %v1122_v32 = vld [vmem:[%s1584_s1 + $0xe0] sm:$0xff] }
   0xa   :  { %1171 = vmatpush.bf16.msra.mxu1 %v1099_v2  ;;  %1172 = vmatpush.bf16.msra.mxu2 %v1099_v2  ;;  %v1128_v27 = vld [vmem:[%s1584_s1 + $0x110] sm:$0xff]  ;;  %v1114_v33 = vld [vmem:[%s1584_s1 + $0xa0] sm:$0xff]  ;;  %v855_v35 = vld [vmem:[%s1586_s0 + $0x78] sm:$0xf] }
   0xb   :  { %1173 = vmatpush.bf16.msra.mxu3 %v1099_v2  ;;  %537 = vmatpush.bf16.msra.mxu0 %v1099_v2  ;;  %v1106_v34 = vld [vmem:[%s1584_s1 + $0x60] sm:$0xff]  ;;  %v1081_v36 = vld [vmem:[%s1586_s0 + $0x88] sm:$0xf0]  ;;  %v895_v37 = vld [vmem:[%s1586_s0 + $0xc8] sm:$0xf] }
   0xc   :  { %v1091_v38 = vld [vmem:[%s1586_s0 + $0xd8] sm:$0xf0]  ;;  %v815_v39 = vld [vmem:[%s1586_s0 + $0x28] sm:$0xf]  ;;  %v1126_v41 = vld [vmem:[%s1584_s1 + $0x100] sm:$0xff]  ;;  %v856_v44 = vor.u32 %v1081_v36, %v855_v35 }
   0xd   :  { %v1071_v40 = vld [vmem:[%s1586_s0 + $0x38] sm:$0xf0]  ;;  %v896_v45 = vor.u32 %v1091_v38, %v895_v37  ;;  %v1120_v48 = vld [vmem:[%s1584_s1 + $0xd0] sm:$0xff]  ;;  %v1119_v51 = vld [vmem:[%s1584_s1 + $0xc8] sm:$0xff] }
   0xe   :  { %1174 = vmatpush.bf16.msra.mxu1 %v1098_v3  ;;  %1175 = vmatpush.bf16.msra.mxu2 %v1098_v3  ;;  %v1121_v42 = vld [vmem:[%s1584_s1 + $0xd8] sm:$0xff]  ;;  %v816_v46 = vor.u32 %v1071_v40, %v815_v39  ;;  %v1112_v49 = vld [vmem:[%s1584_s1 + $0x90] sm:$0xff]  ;;  %v1111_v52 = vld [vmem:[%s1584_s1 + $0x88] sm:$0xff] }
   0xf   :  { %1176 = vmatpush.bf16.msra.mxu3 %v1098_v3  ;;  %538 = vmatpush.bf16.msra.mxu0 %v1098_v3  ;;  %v1113_v43 = vld [vmem:[%s1584_s1 + $0x98] sm:$0xff]  ;;  %v1104_v50 = vld [vmem:[%s1584_s1 + $0x50] sm:$0xff]  ;;  %v1103_v53 = vld [vmem:[%s1584_s1 + $0x48] sm:$0xff] }
  0x10   :  { %v1105_v47 = vld [vmem:[%s1584_s1 + $0x58] sm:$0xff]  ;;  %v1118_v54 = vld [vmem:[%s1584_s1 + $0xc0] sm:$0xff]  ;;  %v1065_v56 = vld [vmem:[%s1586_s0 + $0xc] sm:$0xf] }
  0x11   :  { %v1110_v55 = vld [vmem:[%s1584_s1 + $0x80] sm:$0xff]  ;;  %v797_v60 = vld [vmem:[%s1586_s0 + $0x14] sm:$0xf0]  ;;  %v803_v61 = vld [vmem:[%s1586_s0 + $0x8] sm:$0xf] }
  0x12   :  { %1177 = vmatpush.bf16.msra.mxu1 %v1097_v4  ;;  %1178 = vmatpush.bf16.msra.mxu2 %v1097_v4  ;;  %v805_v57 = vld [vmem:[%s1586_s0 + $0x1c] sm:$0xf0]  ;;  %v1064_v59 = vld [vmem:[%s1586_s0 + $0x4] sm:$0xf]  ;;  %v1067_v62 = vld [vmem:[%s1586_s0 + $0x18] sm:$0xf0] }
  0x13   :  { %1179 = vmatpush.bf16.msra.mxu3 %v1097_v4  ;;  %539 = vmatpush.bf16.msra.mxu0 %v1097_v4  ;;  %v1102_v58 = vld [vmem:[%s1584_s1 + $0x40] sm:$0xff]  ;;  %v808_v63 = vor.u32 %v1065_v56, %v805_v57  ;;  %v811_v0 = vld [vmem:[%s1586_s0 + $0x10] sm:$0xf]  ;;  %v800_v2 = vor.u32 %v1064_v59, %v797_v60  ;;  %v804_v3 = vor.u32 %v1067_v62, %v803_v61  ;;  %v831_v13 = vld [vmem:[%s1586_s0 + $0x38] sm:$0xf] }
  0x14   :  { %v1068_v1 = vld [vmem:[%s1586_s0 + $0x20] sm:$0xf0]  ;;  %v817_v9 = vld [vmem:[%s1586_s0 + $0x3c] sm:$0xf0]  ;;  %v823_v10 = vld [vmem:[%s1586_s0 + $0x30] sm:$0xf] }
  0x15   :  { %v812_v4 = vor.u32 %v1068_v1, %v811_v0  ;;  %v1072_v11 = vld [vmem:[%s1586_s0 + $0x40] sm:$0xf0]  ;;  %v1073_v14 = vld [vmem:[%s1586_s0 + $0x48] sm:$0xf0]  ;;  %v1082_v35 = vld [vmem:[%s1586_s0 + $0x90] sm:$0xf0] }
  0x16   :  { %1180 = vmatpush.bf16.msra.mxu1 %v1096_v5  ;;  %1181 = vmatpush.bf16.msra.mxu2 %v1096_v5  ;;  %v871_v37 = vld [vmem:[%s1586_s0 + $0x88] sm:$0xf]  ;;  %v1083_v38 = vld [vmem:[%s1586_s0 + $0x98] sm:$0xf0]  ;;  %v1089_v56 = vld [vmem:[%s1586_s0 + $0xcc] sm:$0xf] }
  0x17   :  { %1182 = vmatpush.bf16.msra.mxu3 %v1096_v5  ;;  %540 = vmatpush.bf16.msra.mxu0 %v1096_v5  ;;  %v1070_v5 = vld [vmem:[%s1586_s0 + $0x34] sm:$0xf]  ;;  %v897_v57 = vld [vmem:[%s1586_s0 + $0xdc] sm:$0xf0]  ;;  %v1092_v59 = vld [vmem:[%s1586_s0 + $0xe0] sm:$0xf0] }
  0x18   :  { %v911_v61 = vld [vmem:[%s1586_s0 + $0xd8] sm:$0xf]  ;;  %v1093_v62 = vld [vmem:[%s1586_s0 + $0xe8] sm:$0xf0] }
  0x19   :  { %v912_v1 = vor.u32 %v1093_v62, %v911_v61 }
  0x1a   :  { %1183 = vmatpush.bf16.msra.mxu1 %v1095_v6  ;;  %1184 = vmatpush.bf16.msra.mxu2 %v1095_v6 }
  0x1b   :  { %1185 = vmatpush.bf16.msra.mxu3 %v1095_v6  ;;  %541 = vmatpush.bf16.msra.mxu0 %v1095_v6  ;;  %v825_v6 = vld [vmem:[%s1586_s0 + $0x44] sm:$0xf0] }
  0x1c   :  { %v828_v12 = vor.u32 %v1070_v5, %v825_v6  ;;  %v230_v5 = vunpack.c.h.b16 %v1234_v7 }
  0x1e   :  { %1186 = vmatpush.bf16.msra.mxu1 %v1094_v8  ;;  %1187 = vmatpush.bf16.msra.mxu2 %v1094_v8 }
  0x1f   :  { %1188 = vmatpush.bf16.msra.mxu3 %v1094_v8  ;;  %542 = vmatpush.bf16.msra.mxu0 %v1094_v8  ;;  %v1069_v8 = vld [vmem:[%s1586_s0 + $0x2c] sm:$0xf] }
  0x20   :  { %v820_v15 = vor.u32 %v1069_v8, %v817_v9 }
  0x21   :  { %553 = vmatmul.bf16.vlgmr.msra.gmra.mxu1 %v836_v18  ;;  %563 = vmatmul.bf16.vlgmr.msra.gmra.mxu2 %v876_v19  ;;  %v1075_v18 = vld [vmem:[%s1586_s0 + $0x5c] sm:$0xf]  ;;  %v845_v19 = vld [vmem:[%s1586_s0 + $0x6c] sm:$0xf0] }
  0x22   :  { %621 = vmatpush.bf16.msrb.mxu2 %v1117_v17  ;;  %543 = vmatmul.bf16.vlgmr.msra.gmra.mxu0 %v796_v20  ;;  %v832_v17 = vor.u32 %v1073_v14, %v831_v13  ;;  %v1074_v20 = vld [vmem:[%s1586_s0 + $0x54] sm:$0xf] }
  0x23   :  { %664 = vmatpush.bf16.msrb.mxu3 %v1125_v16  ;;  %578 = vmatpush.bf16.msrb.mxu1 %v1109_v21  ;;  %v824_v16 = vor.u32 %v1072_v11, %v823_v10  ;;  %v837_v21 = vld [vmem:[%s1586_s0 + $0x64] sm:$0xf0]  ;;  %v265_v10 = vpack.c.b16 %v230_v5, %v230_v5 }
  0x24   :  { %711 = vmatpush.bf16.msrb.mxu0 %v1129_v22  ;;  %573 = vmatmul.bf16.vlgmr.msra.gmra.mxu3 %v264_v23  ;;  %v843_v22 = vld [vmem:[%s1586_s0 + $0x58] sm:$0xf]  ;;  %v1077_v23 = vld [vmem:[%s1586_s0 + $0x68] sm:$0xf0] }
  0x26   :  { %622 = vmatpush.bf16.msrb.mxu2 %v1116_v25  ;;  %v851_v25 = vld [vmem:[%s1586_s0 + $0x60] sm:$0xf] }
  0x27   :  { %665 = vmatpush.bf16.msrb.mxu3 %v1124_v24  ;;  %579 = vmatpush.bf16.msrb.mxu1 %v1108_v26  ;;  %v848_v24 = vor.u32 %v1075_v18, %v845_v19  ;;  %v1078_v26 = vld [vmem:[%s1586_s0 + $0x70] sm:$0xf0] }
  0x28   :  { %712 = vmatpush.bf16.msrb.mxu0 %v1128_v27  ;;  %v840_v27 = vor.u32 %v1074_v20, %v837_v21 }
  0x2a   :  { %623 = vmatpush.bf16.msrb.mxu2 %v1115_v29  ;;  %v852_v29 = vor.u32 %v1078_v26, %v851_v25 }
  0x2b   :  { %666 = vmatpush.bf16.msrb.mxu3 %v1123_v28  ;;  %580 = vmatpush.bf16.msrb.mxu1 %v1107_v30  ;;  %v844_v28 = vor.u32 %v1077_v23, %v843_v22  ;;  %v1080_v30 = vld [vmem:[%s1586_s0 + $0x84] sm:$0xf] }
  0x2c   :  { %713 = vmatpush.bf16.msrb.mxu0 %v1127_v31  ;;  %v865_v31 = vld [vmem:[%s1586_s0 + $0x94] sm:$0xf0] }
  0x2d   :  { %v868_v36 = vor.u32 %v1080_v30, %v865_v31 }
  0x2e   :  { %624 = vmatpush.bf16.msrb.mxu2 %v1114_v33  ;;  %v857_v33 = vld [vmem:[%s1586_s0 + $0x8c] sm:$0xf0] }
  0x2f   :  { %667 = vmatpush.bf16.msrb.mxu3 %v1122_v32  ;;  %581 = vmatpush.bf16.msrb.mxu1 %v1106_v34  ;;  %v1079_v32 = vld [vmem:[%s1586_s0 + $0x7c] sm:$0xf]  ;;  %v863_v34 = vld [vmem:[%s1586_s0 + $0x80] sm:$0xf] }
  0x30   :  { %714 = vmatpush.bf16.msrb.mxu0 %v1126_v41  ;;  %v860_v39 = vor.u32 %v1079_v32, %v857_v33  ;;  %v864_v40 = vor.u32 %v1082_v35, %v863_v34  ;;  %v872_v41 = vor.u32 %v1083_v38, %v871_v37 }
  0x31   :  { %558 = vmatmul.bf16.gmra.mxu1 %v856_v44  ;;  %568 = vmatmul.bf16.gmra.mxu2 %v896_v45  ;;  %v1084_v44 = vld [vmem:[%s1586_s0 + $0xa4] sm:$0xf]  ;;  %v877_v45 = vld [vmem:[%s1586_s0 + $0xb4] sm:$0xf0] }
  0x32   :  { %625 = vmatpush.bf16.msrb.mxu2 %v1113_v43  ;;  %548 = vmatmul.bf16.gmra.mxu0 %v816_v46  ;;  %v885_v43 = vld [vmem:[%s1586_s0 + $0xbc] sm:$0xf0]  ;;  %v883_v46 = vld [vmem:[%s1586_s0 + $0xa8] sm:$0xf] }
  0x33   :  { %668 = vmatpush.bf16.msrb.mxu3 %v1121_v42  ;;  %582 = vmatpush.bf16.msrb.mxu1 %v1105_v47  ;;  %v1085_v42 = vld [vmem:[%s1586_s0 + $0xac] sm:$0xf]  ;;  %v1087_v47 = vld [vmem:[%s1586_s0 + $0xb8] sm:$0xf0] }
  0x36   :  { %626 = vmatpush.bf16.msrb.mxu2 %v1112_v49  ;;  %v891_v49 = vld [vmem:[%s1586_s0 + $0xb0] sm:$0xf] }
  0x37   :  { %669 = vmatpush.bf16.msrb.mxu3 %v1120_v48  ;;  %583 = vmatpush.bf16.msrb.mxu1 %v1104_v50  ;;  %v888_v48 = vor.u32 %v1085_v42, %v885_v43  ;;  %v1088_v50 = vld [vmem:[%s1586_s0 + $0xc0] sm:$0xf0] }
  0x3a   :  { %627 = vmatpush.bf16.msrb.mxu2 %v1111_v52  ;;  %v884_v52 = vor.u32 %v1087_v47, %v883_v46 }
  0x3b   :  { %670 = vmatpush.bf16.msrb.mxu3 %v1119_v51  ;;  %584 = vmatpush.bf16.msrb.mxu1 %v1103_v53  ;;  %v880_v51 = vor.u32 %v1084_v44, %v877_v45  ;;  %v892_v53 = vor.u32 %v1088_v50, %v891_v49 }
  0x3e   :  { %628 = vmatpush.bf16.msrb.mxu2 %v1110_v55  ;;  %v905_v55 = vld [vmem:[%s1586_s0 + $0xe4] sm:$0xf0] }
  0x3f   :  { %671 = vmatpush.bf16.msrb.mxu3 %v1118_v54  ;;  %585 = vmatpush.bf16.msrb.mxu1 %v1102_v58  ;;  %v1090_v54 = vld [vmem:[%s1586_s0 + $0xd4] sm:$0xf]  ;;  %v903_v58 = vld [vmem:[%s1586_s0 + $0xd0] sm:$0xf] }
  0x40   :  { %v908_v60 = vor.u32 %v1090_v54, %v905_v55  ;;  %v904_v0 = vor.u32 %v1092_v59, %v903_v58 }
  0x41   :  { %629 = vmatmul.bf16.vlgmr.msrb.gmra.mxu2 %v804_v3 }
  0x42   :  { %672 = vmatmul.bf16.vlgmr.msrb.gmra.mxu3 %v808_v63  ;;  %586 = vmatmul.bf16.vlgmr.msrb.gmra.mxu1 %v800_v2  ;;  %v900_v63 = vor.u32 %v1089_v56, %v897_v57  ;;  %v52_v2 = vld [vmem:[%s1586_s0 + $0xf8] sm:$0x11] }
  0x43   :  { %1057 = vmatmul.msk.bf16.vlgmr.msrb.gmra.mxu0 %vm513_vm0, %v812_v4  ;;  %v232_v3 = vunpack.c.h.b16 %v52_v2  ;;  %v53_v4 = vld [vmem:[%s1586_s0 + $0x100] sm:$0x1]  ;;  %v231_v6 = vunpack.c.l.b16 %v52_v2 }
  0x44   :  { %v233_v8 = vunpack.c.l.b16 %v53_v4 }
  0x45   :  { %v267_v9 = vpack.c.b16 %v232_v3, %v232_v3  ;;  %v266_v11 = vpack.c.b16 %v231_v6, %v231_v6 }
  0x46   :  { %v268_v13 = vpack.c.b16 %v233_v8, %v233_v8 }
  0x51   :  { %634 = vmatmul.bf16.gmra.mxu2 %v824_v16 }
  0x52   :  { %677 = vmatmul.bf16.gmra.mxu3 %v828_v12  ;;  %591 = vmatmul.bf16.gmra.mxu1 %v820_v15  ;;  %v1523_v15 = vld [vmem:[%s1585_s2] ss:$0 sm:$0xff] }
  0x53   :  { %1058 = vmatmul.msk.bf16.gmra.mxu0 %vm513_vm0, %v832_v17 }
  0x61   :  { %639 = vmatmul.bf16.gmra.mxu2 %v844_v28 }
  0x62   :  { %682 = vmatmul.bf16.gmra.mxu3 %v848_v24  ;;  %596 = vmatmul.bf16.gmra.mxu1 %v840_v27 }
  0x63   :  { %1059 = vmatmul.msk.bf16.gmra.mxu0 %vm513_vm0, %v852_v29 }
  0x71   :  { %644 = vmatmul.bf16.gmra.mxu2 %v864_v40 }
  0x72   :  { %687 = vmatmul.bf16.gmra.mxu3 %v868_v36  ;;  %601 = vmatmul.bf16.gmra.mxu1 %v860_v39 }
  0x73   :  { %1060 = vmatmul.msk.bf16.gmra.mxu0 %vm513_vm0, %v872_v41 }
  0x81   :  { %649 = vmatmul.bf16.gmra.mxu2 %v884_v52 }
  0x82   :  { %692 = vmatmul.bf16.gmra.mxu3 %v888_v48  ;;  %606 = vmatmul.bf16.gmra.mxu1 %v880_v51 }
  0x83   :  { %1061 = vmatmul.msk.bf16.gmra.mxu0 %vm513_vm0, %v892_v53 }
  0x91   :  { %654 = vmatmul.bf16.gmra.mxu2 %v904_v0 }
  0x92   :  { %697 = vmatmul.bf16.gmra.mxu3 %v908_v60  ;;  %611 = vmatmul.bf16.gmra.mxu1 %v900_v63 }
  0x93   :  { %1062 = vmatmul.msk.bf16.gmra.mxu0 %vm513_vm0, %v912_v1 }
  0x9e   :  { %v1517_v12 = vpop.f32.mrf.mxu1 }
  0x9f   :  { %v544_v14 = vpop.f32.mrf.mxu0 }
  0xa0   :  { %v545_v35 = vadd.f32 %v1523_v15, %v544_v14 }
  0xa1   :  { %659 = vmatmul.bf16.gmra.mxu2 %v266_v11  ;;  %v555_v11 = vadd.f32 %v1523_v15, %v1517_v12 }
  0xa2   :  { %702 = vmatmul.bf16.gmra.mxu3 %v267_v9  ;;  %616 = vmatmul.bf16.gmra.mxu1 %v265_v10 }
  0xa3   :  { %1063 = vmatmul.msk.bf16.gmra.mxu0 %vm513_vm0, %v268_v13 }
  0xa4   :  { %v564_v7 = vpop.f32.mrf.mxu2 }
  0xa5   :  { %v1526_v16 = vadd.f32 %v1523_v15, %v564_v7 }
  0xa6   :  { %v1528_v17 = vpop.f32.mrf.mxu1 }
  0xa7   :  { %v574_v18 = vpop.f32.mrf.mxu3  ;;  %v546_v19 = vpop.f32.mrf.mxu0 }
  0xa8   :  { %v1531_v20 = vadd.f32 %v1523_v15, %v574_v18  ;;  %v547_v41 = vadd.f32 %v1523_v15, %v546_v19 }
  0xac   :  { %v566_v21 = vpop.f32.mrf.mxu2 }
  0xad   :  { %v1534_v22 = vadd.f32 %v1523_v15, %v566_v21 }
  0xae   :  { %v1536_v23 = vpop.f32.mrf.mxu1 }
  0xaf   :  { %v576_v24 = vpop.f32.mrf.mxu3  ;;  %v549_v25 = vpop.f32.mrf.mxu0 }
  0xb0   :  { %v550_v53 = vadd.f32 %v1523_v15, %v549_v25 }
  0xb4   :  { %v569_v26 = vpop.f32.mrf.mxu2 }
  0xb5   :  { %v1539_v27 = vadd.f32 %v1523_v15, %v569_v26  ;;  %v557_v26 = vadd.f32 %v1523_v15, %v1528_v17 }
  0xb6   :  { %v1541_v28 = vpop.f32.mrf.mxu1 }
  0xb7   :  { %v551_v29 = vpop.f32.mrf.mxu0 }
  0xb8   :  { %v552_v62 = vadd.f32 %v1523_v15, %v551_v29 }
  0xbc   :  { %v571_v30 = vpop.f32.mrf.mxu2 }
  0xbd   :  { %v1544_v31 = vadd.f32 %v1523_v15, %v571_v30 }
  0xbf   :  { %v587_v32 = vpop.f32.mrf.mxu1 }
  0xc0   :  { %v716_v33 = vpop.f32.mrf.mxu0  ;;  %v588_v37 = vadd.f32 %v587_v32, %v545_v35 }
  0xc4   :  { %v630_v36 = vpop.f32.mrf.mxu2 }
  0xc5   :  { %v673_v34 = vpop.f32.mrf.mxu3  ;;  %v631_v39 = vadd.f32 %v630_v36, %v588_v37 }
  0xc7   :  { %v589_v38 = vpop.f32.mrf.mxu1  ;;  %v674_v43 = vadd.f32 %v673_v34, %v631_v39 }
  0xc8   :  { %v718_v40 = vpop.f32.mrf.mxu0  ;;  %v590_v44 = vadd.f32 %v589_v38, %v547_v41 }
  0xc9   :  { %v717_v48 = vadd.f32 %v716_v33, %v674_v43 }
  0xcb   :  { %v750_v54 = vmax.f32 %v717_v48, 0.0  ;;  %v562_v48 = vadd.f32 %v1523_v15, %v1541_v28 }
  0xcc   :  { %v632_v45 = vpop.f32.mrf.mxu2 }
  0xcd   :  { %v675_v42 = vpop.f32.mrf.mxu3  ;;  %v633_v46 = vadd.f32 %v632_v45, %v590_v44 }
  0xcf   :  { %v592_v47 = vpop.f32.mrf.mxu1  ;;  %v676_v49 = vadd.f32 %v675_v42, %v633_v46 }
  0xd0   :  { %v721_v50 = vpop.f32.mrf.mxu0  ;;  %v593_v58 = vadd.f32 %v592_v47, %v550_v53 }
  0xd1   :  { %v719_v51 = vadd.f32 %v718_v40, %v676_v49  ;;  %v560_v40 = vadd.f32 %v1523_v15, %v1536_v23 }
  0xd3   :  { %v751_v55 = vmax.f32 %v719_v51, 0.0 }
  0xd4   :  { %v635_v56 = vpop.f32.mrf.mxu2 }
  0xd5   :  { %v678_v52 = vpop.f32.mrf.mxu3  ;;  %v1133_v57 = vpack.c.bf16 %v751_v55, %v750_v54  ;;  %v636_v60 = vadd.f32 %v635_v56, %v593_v58 }
  0xd7   :  { %v594_v59 = vpop.f32.mrf.mxu1  ;;  %1134 = vst [vmem:[%s1587_s3] sm:$0xff] %v1133_v57   ;;  %v679_v0 = vadd.f32 %v678_v52, %v636_v60 }
  0xd8   :  { %v723_v61 = vpop.f32.mrf.mxu0  ;;  %v595_v1 = vadd.f32 %v594_v59, %v552_v62 }
  0xd9   :  { %v722_v5 = vadd.f32 %v721_v50, %v679_v0 }
  0xdb   :  { %v752_v13 = vmax.f32 %v722_v5, 0.0 }
  0xdc   :  { %v637_v2 = vpop.f32.mrf.mxu2 }
  0xdd   :  { %v680_v63 = vpop.f32.mrf.mxu3  ;;  %v638_v3 = vadd.f32 %v637_v2, %v595_v1 }
  0xdf   :  { %v597_v4 = vpop.f32.mrf.mxu1  ;;  %v681_v6 = vadd.f32 %v680_v63, %v638_v3 }
  0xe0   :  { %v726_v8 = vpop.f32.mrf.mxu0  ;;  %v598_v19 = vadd.f32 %v597_v4, %v555_v11 }
  0xe1   :  { %v724_v9 = vadd.f32 %v723_v61, %v681_v6 }
  0xe3   :  { %v753_v14 = vmax.f32 %v724_v9, 0.0 }
  0xe4   :  { %v640_v7 = vpop.f32.mrf.mxu2 }
  0xe5   :  { %v683_v10 = vpop.f32.mrf.mxu3  ;;  %v1138_v18 = vpack.c.bf16 %v753_v14, %v752_v13  ;;  %v641_v24 = vadd.f32 %v640_v7, %v598_v19 }
  0xe7   :  { %v599_v21 = vpop.f32.mrf.mxu1  ;;  %1160 = vst [vmem:[%s1587_s3 + $0x8] sm:$0xff] %v1138_v18   ;;  %v684_v30 = vadd.f32 %v683_v10, %v641_v24 }
  0xe8   :  { %v728_v25 = vpop.f32.mrf.mxu0  ;;  %v600_v32 = vadd.f32 %v599_v21, %v557_v26 }
  0xe9   :  { %v727_v35 = vadd.f32 %v726_v8, %v684_v30 }
  0xeb   :  { %v754_v41 = vmax.f32 %v727_v35, 0.0 }
  0xec   :  { %v642_v33 = vpop.f32.mrf.mxu2 }
  0xed   :  { %v685_v29 = vpop.f32.mrf.mxu3  ;;  %v643_v12 = vadd.f32 %v642_v33, %v600_v32 }
  0xef   :  { %v602_v34 = vpop.f32.mrf.mxu1  ;;  %v686_v36 = vadd.f32 %v685_v29, %v643_v12 }
  0xf0   :  { %v731_v37 = vpop.f32.mrf.mxu0  ;;  %v603_v45 = vadd.f32 %v602_v34, %v560_v40 }
  0xf1   :  { %v729_v38 = vadd.f32 %v728_v25, %v686_v36 }
  0xf3   :  { %v755_v42 = vmax.f32 %v729_v38, 0.0 }
  0xf4   :  { %v645_v43 = vpop.f32.mrf.mxu2 }
  0xf5   :  { %v688_v39 = vpop.f32.mrf.mxu3  ;;  %v1143_v44 = vpack.c.bf16 %v755_v42, %v754_v41  ;;  %v646_v46 = vadd.f32 %v645_v43, %v603_v45 }
  0xf7   :  { %v604_v17 = vpop.f32.mrf.mxu1  ;;  %1161 = vst [vmem:[%s1587_s3 + $0x10] sm:$0xff] %v1143_v44   ;;  %v689_v50 = vadd.f32 %v688_v39, %v646_v46 }
  0xf8   :  { %v733_v47 = vpop.f32.mrf.mxu0  ;;  %v605_v51 = vadd.f32 %v604_v17, %v562_v48 }
  0xf9   :  { %v732_v54 = vadd.f32 %v731_v37, %v689_v50 }
  0xfb   :  { %v756_v59 = vmax.f32 %v732_v54, 0.0 }
  0xfc   :  { %v647_v52 = vpop.f32.mrf.mxu2 }
  0xfd   :  { %v690_v49 = vpop.f32.mrf.mxu3  ;;  %v648_v23 = vadd.f32 %v647_v52, %v605_v51 }
  0xff   :  { %v607_v53 = vpop.f32.mrf.mxu1  ;;  %v691_v55 = vadd.f32 %v690_v49, %v648_v23 }
 0x100   :  { %v736_v56 = vpop.f32.mrf.mxu0  ;;  %v608_v63 = vadd.f32 %v607_v53, %v1526_v16 }
 0x101   :  { %v734_v57 = vadd.f32 %v733_v47, %v691_v55 }
 0x103   :  { %v757_v60 = vmax.f32 %v734_v57, 0.0 }
 0x104   :  { %v650_v61 = vpop.f32.mrf.mxu2 }
 0x105   :  { %v693_v58 = vpop.f32.mrf.mxu3  ;;  %v1148_v62 = vpack.c.bf16 %v757_v60, %v756_v59  ;;  %v651_v15 = vadd.f32 %v650_v61, %v608_v63 }
 0x107   :  { %v609_v0 = vpop.f32.mrf.mxu1  ;;  %1162 = vst [vmem:[%s1587_s3 + $0x18] sm:$0xff] %v1148_v62   ;;  %v694_v2 = vadd.f32 %v693_v58, %v651_v15 }
 0x108   :  { %v738_v28 = vpop.f32.mrf.mxu0  ;;  %v610_v3 = vadd.f32 %v609_v0, %v1534_v22 }
 0x109   :  { %v737_v8 = vadd.f32 %v736_v56, %v694_v2 }
 0x10b   :  { %v758_v16 = vmax.f32 %v737_v8, 0.0 }
 0x10c   :  { %v652_v4 = vpop.f32.mrf.mxu2 }
 0x10d   :  { %v695_v1 = vpop.f32.mrf.mxu3  ;;  %v653_v5 = vadd.f32 %v652_v4, %v610_v3 }
 0x10f   :  { %v612_v6 = vpop.f32.mrf.mxu1  ;;  %v696_v9 = vadd.f32 %v695_v1, %v653_v5 }
 0x110   :  { %v741_v10 = vpop.f32.mrf.mxu0  ;;  %v613_v19 = vadd.f32 %v612_v6, %v1539_v27 }
 0x111   :  { %v739_v11 = vadd.f32 %v738_v28, %v696_v9 }
 0x113   :  { %v759_v14 = vmax.f32 %v739_v11, 0.0 }
 0x114   :  { %v655_v7 = vpop.f32.mrf.mxu2 }
 0x115   :  { %v698_v13 = vpop.f32.mrf.mxu3  ;;  %v1153_v18 = vpack.c.bf16 %v759_v14, %v758_v16  ;;  %v656_v22 = vadd.f32 %v655_v7, %v613_v19 }
 0x117   :  { %v614_v21 = vpop.f32.mrf.mxu1  ;;  %1163 = vst [vmem:[%s1587_s3 + $0x20] sm:$0xff] %v1153_v18   ;;  %v699_v26 = vadd.f32 %v698_v13, %v656_v22 }
 0x118   :  { %v743_v24 = vpop.f32.mrf.mxu0  ;;  %v615_v29 = vadd.f32 %v614_v21, %v1544_v31 }
 0x119   :  { %v742_v12 = vadd.f32 %v741_v10, %v699_v26 }
 0x11b   :  { %v760_v27 = vmax.f32 %v742_v12, 0.0 }
 0x11c   :  { %v657_v30 = vpop.f32.mrf.mxu2 }
 0x11d   :  { %v700_v25 = vpop.f32.mrf.mxu3  ;;  %v658_v32 = vadd.f32 %v657_v30, %v615_v29 }
 0x11f   :  { %v617_v33 = vpop.f32.mrf.mxu1  ;;  %v701_v34 = vadd.f32 %v700_v25, %v658_v32 }
 0x120   :  { %v746_v35 = vpop.f32.mrf.mxu0  ;;  %v618_v39 = vadd.f32 %v617_v33, %v1531_v20 }
 0x121   :  { %v744_v36 = vadd.f32 %v743_v24, %v701_v34 }
 0x123   :  { %v761_v38 = vmax.f32 %v744_v36, 0.0 }
 0x124   :  { %v660_v40 = vpop.f32.mrf.mxu2 }
 0x125   :  { %v703_v37 = vpop.f32.mrf.mxu3  ;;  %v1158_v41 = vpack.c.bf16 %v761_v38, %v760_v27  ;;  %v661_v42 = vadd.f32 %v660_v40, %v618_v39 }
 0x127   :  { %v619_v43 = vpop.f32.mrf.mxu1  ;;  %1164 = vst [vmem:[%s1587_s3 + $0x28] sm:$0xff] %v1158_v41   ;;  %v704_v31 = vadd.f32 %v703_v37, %v661_v42 }
 0x128   :  { %v748_v44 = vpop.f32.mrf.mxu0 }
 0x129   :  { %v747_v45 = vadd.f32 %v746_v35, %v704_v31 }
 0x12b   :  { %v762_v46 = vmax.f32 %v747_v45, 0.0 }
 0x12c   :  { %v662_v47 = vpop.f32.mrf.mxu2 }
 0x12d   :  { %v705_v17 = vpop.f32.mrf.mxu3  ;;  %v775_v48 = vpack.c.bf16 %v762_v46, %v762_v46 }
 0x12f   :  { %788 = vst [vmem:[%s1587_s3 + $0x30] sm:$0x1] %v775_v48 }

// kernel: dqn_forward.7
= control target key start
LH: loop header
LB: loop body
LE: loop exit
PB: predicated region body
PF: predicated region fallthrough
CT: control target
= control target key end

     0   :  { %s15891_s0 = inlined_call_operand.vmem [shape: bf16[2,3200], index: 0, kind: input, shape index: {}]   ;;  %s15892_s1 = inlined_call_operand.vmem [shape: bf16[3200,512], index: 1, kind: input, shape index: {}]   ;;  %s15893_s2 = inlined_call_operand.vmem [shape: f32[1,512], index: 2, kind: input, shape index: {}]   ;;  %s15894_s3 = inlined_call_operand.vmem [shape: bf16[512,128], index: 3, kind: input, shape index: {}]   ;;  %s15895_s4 = inlined_call_operand.vmem [shape: f32[1,128], index: 4, kind: input, shape index: {}]   ;;  %s15896_s5 = inlined_call_operand.hbm [shape: f32[2,128], index: 5, kind: output, shape index: {}]  }
   0x1   :  { %v6644_v0 = vld [vmem:[%s15892_s1 + $0xe0] sm:$0xf]  ;;  %v9888_v1 = vld [vmem:[%s15892_s1 + $0xec] sm:$0xf0] }
   0x2   :  { %v6772_v2 = vld [vmem:[%s15892_s1 + $0x1e0] sm:$0xf]  ;;  %v6645_v3 = vor.u32 %v9888_v1, %v6644_v0  ;;  %v9920_v4 = vld [vmem:[%s15892_s1 + $0x1ec] sm:$0xf0] }
   0x3   :  { %v6900_v5 = vld [vmem:[%s15892_s1 + $0x2e0] sm:$0xf]  ;;  %v9952_v6 = vld [vmem:[%s15892_s1 + $0x2ec] sm:$0xf0]  ;;  %v6773_v7 = vor.u32 %v9920_v4, %v6772_v2 }
   0x4   :  { %v6901_v8 = vor.u32 %v9952_v6, %v6900_v5  ;;  %v7028_v9 = vld [vmem:[%s15892_s1 + $0x3e0] sm:$0xf]  ;;  %v9984_v10 = vld [vmem:[%s15892_s1 + $0x3ec] sm:$0xf0]  ;;  %4893 = vmatpush.bf16.msra.mxu0 %v6645_v3 }
   0x5   :  { %v6628_v11 = vld [vmem:[%s15892_s1 + $0xc0] sm:$0xf]  ;;  %v7029_v12 = vor.u32 %v9984_v10, %v7028_v9  ;;  %v9884_v13 = vld [vmem:[%s15892_s1 + $0xcc] sm:$0xf0]  ;;  %4906 = vmatpush.bf16.msra.mxu1 %v6773_v7 }
   0x6   :  { %v6756_v14 = vld [vmem:[%s15892_s1 + $0x1c0] sm:$0xf]  ;;  %v9916_v15 = vld [vmem:[%s15892_s1 + $0x1cc] sm:$0xf0]  ;;  %4919 = vmatpush.bf16.msra.mxu2 %v6901_v8  ;;  %v6629_v16 = vor.u32 %v9884_v13, %v6628_v11 }
   0x7   :  { %v6757_v17 = vor.u32 %v9916_v15, %v6756_v14  ;;  %v6884_v18 = vld [vmem:[%s15892_s1 + $0x2c0] sm:$0xf]  ;;  %v9948_v19 = vld [vmem:[%s15892_s1 + $0x2cc] sm:$0xf0]  ;;  %4932 = vmatpush.bf16.msra.mxu3 %v7029_v12 }
   0x8   :  { %v7012_v20 = vld [vmem:[%s15892_s1 + $0x3c0] sm:$0xf]  ;;  %v6885_v21 = vor.u32 %v9948_v19, %v6884_v18  ;;  %v9980_v22 = vld [vmem:[%s15892_s1 + $0x3cc] sm:$0xf0]  ;;  %4894 = vmatpush.bf16.msra.mxu0 %v6629_v16 }
   0x9   :  { %v6612_v23 = vld [vmem:[%s15892_s1 + $0xa0] sm:$0xf]  ;;  %v9880_v24 = vld [vmem:[%s15892_s1 + $0xac] sm:$0xf0]  ;;  %v7013_v25 = vor.u32 %v9980_v22, %v7012_v20  ;;  %4907 = vmatpush.bf16.msra.mxu1 %v6757_v17 }
   0xa   :  { %v6740_v26 = vld [vmem:[%s15892_s1 + $0x1a0] sm:$0xf]  ;;  %v9912_v27 = vld [vmem:[%s15892_s1 + $0x1ac] sm:$0xf0]  ;;  %v6613_v29 = vor.u32 %v9880_v24, %v6612_v23  ;;  %4920 = vmatpush.bf16.msra.mxu2 %v6885_v21 }
   0xb   :  { %v6868_v28 = vld [vmem:[%s15892_s1 + $0x2a0] sm:$0xf]  ;;  %v9944_v30 = vld [vmem:[%s15892_s1 + $0x2ac] sm:$0xf0]  ;;  %v6741_v33 = vor.u32 %v9912_v27, %v6740_v26  ;;  %4933 = vmatpush.bf16.msra.mxu3 %v7013_v25 }
   0xc   :  { %v6996_v31 = vld [vmem:[%s15892_s1 + $0x3a0] sm:$0xf]  ;;  %v9976_v32 = vld [vmem:[%s15892_s1 + $0x3ac] sm:$0xf0]  ;;  %v6869_v34 = vor.u32 %v9944_v30, %v6868_v28  ;;  %4895 = vmatpush.bf16.msra.mxu0 %v6613_v29 }
   0xd   :  { %v6596_v35 = vld [vmem:[%s15892_s1 + $0x80] sm:$0xf]  ;;  %v9876_v36 = vld [vmem:[%s15892_s1 + $0x8c] sm:$0xf0]  ;;  %v6997_v38 = vor.u32 %v9976_v32, %v6996_v31  ;;  %4908 = vmatpush.bf16.msra.mxu1 %v6741_v33 }
   0xe   :  { %v6724_v37 = vld [vmem:[%s15892_s1 + $0x180] sm:$0xf]  ;;  %v9908_v39 = vld [vmem:[%s15892_s1 + $0x18c] sm:$0xf0]  ;;  %v6597_v44 = vor.u32 %v9876_v36, %v6596_v35  ;;  %4921 = vmatpush.bf16.msra.mxu2 %v6869_v34 }
   0xf   :  { %v6852_v40 = vld [vmem:[%s15892_s1 + $0x280] sm:$0xf]  ;;  %v9940_v41 = vld [vmem:[%s15892_s1 + $0x28c] sm:$0xf0]  ;;  %v6725_v45 = vor.u32 %v9908_v39, %v6724_v37  ;;  %4934 = vmatpush.bf16.msra.mxu3 %v6997_v38 }
  0x10   :  { %v6980_v42 = vld [vmem:[%s15892_s1 + $0x380] sm:$0xf]  ;;  %v9972_v43 = vld [vmem:[%s15892_s1 + $0x38c] sm:$0xf0]  ;;  %v6853_v46 = vor.u32 %v9940_v41, %v6852_v40  ;;  %4896 = vmatpush.bf16.msra.mxu0 %v6597_v44 }
  0x11   :  { %v6580_v47 = vld [vmem:[%s15892_s1 + $0x60] sm:$0xf]  ;;  %v9872_v48 = vld [vmem:[%s15892_s1 + $0x6c] sm:$0xf0]  ;;  %v6981_v50 = vor.u32 %v9972_v43, %v6980_v42  ;;  %4909 = vmatpush.bf16.msra.mxu1 %v6725_v45 }
  0x12   :  { %v6708_v49 = vld [vmem:[%s15892_s1 + $0x160] sm:$0xf]  ;;  %v9904_v51 = vld [vmem:[%s15892_s1 + $0x16c] sm:$0xf0]  ;;  %v6581_v56 = vor.u32 %v9872_v48, %v6580_v47  ;;  %4922 = vmatpush.bf16.msra.mxu2 %v6853_v46 }
  0x13   :  { %v6836_v52 = vld [vmem:[%s15892_s1 + $0x260] sm:$0xf]  ;;  %v9936_v53 = vld [vmem:[%s15892_s1 + $0x26c] sm:$0xf0]  ;;  %v6709_v57 = vor.u32 %v9904_v51, %v6708_v49  ;;  %4935 = vmatpush.bf16.msra.mxu3 %v6981_v50 }
  0x14   :  { %v6964_v54 = vld [vmem:[%s15892_s1 + $0x360] sm:$0xf]  ;;  %v9968_v55 = vld [vmem:[%s15892_s1 + $0x36c] sm:$0xf0]  ;;  %v6837_v58 = vor.u32 %v9936_v53, %v6836_v52  ;;  %4897 = vmatpush.bf16.msra.mxu0 %v6581_v56 }
  0x15   :  { %v6564_v59 = vld [vmem:[%s15892_s1 + $0x40] sm:$0xf]  ;;  %v9868_v60 = vld [vmem:[%s15892_s1 + $0x4c] sm:$0xf0]  ;;  %v6965_v62 = vor.u32 %v9968_v55, %v6964_v54  ;;  %4910 = vmatpush.bf16.msra.mxu1 %v6709_v57 }
  0x16   :  { %v6692_v61 = vld [vmem:[%s15892_s1 + $0x140] sm:$0xf]  ;;  %v9900_v63 = vld [vmem:[%s15892_s1 + $0x14c] sm:$0xf0]  ;;  %v6565_v4 = vor.u32 %v9868_v60, %v6564_v59  ;;  %4923 = vmatpush.bf16.msra.mxu2 %v6837_v58 }
  0x17   :  { %v6820_v0 = vld [vmem:[%s15892_s1 + $0x240] sm:$0xf]  ;;  %v9932_v1 = vld [vmem:[%s15892_s1 + $0x24c] sm:$0xf0]  ;;  %v6693_v5 = vor.u32 %v9900_v63, %v6692_v61  ;;  %4936 = vmatpush.bf16.msra.mxu3 %v6965_v62 }
  0x18   :  { %v6948_v2 = vld [vmem:[%s15892_s1 + $0x340] sm:$0xf]  ;;  %v9964_v3 = vld [vmem:[%s15892_s1 + $0x34c] sm:$0xf0]  ;;  %v6821_v6 = vor.u32 %v9932_v1, %v6820_v0  ;;  %4898 = vmatpush.bf16.msra.mxu0 %v6565_v4 }
  0x19   :  { %v6548_v7 = vld [vmem:[%s15892_s1 + $0x20] sm:$0xf]  ;;  %v9864_v8 = vld [vmem:[%s15892_s1 + $0x2c] sm:$0xf0]  ;;  %v6949_v10 = vor.u32 %v9964_v3, %v6948_v2  ;;  %4911 = vmatpush.bf16.msra.mxu1 %v6693_v5 }
  0x1a   :  { %v6676_v9 = vld [vmem:[%s15892_s1 + $0x120] sm:$0xf]  ;;  %v9896_v11 = vld [vmem:[%s15892_s1 + $0x12c] sm:$0xf0]  ;;  %v6549_v16 = vor.u32 %v9864_v8, %v6548_v7  ;;  %4924 = vmatpush.bf16.msra.mxu2 %v6821_v6 }
  0x1b   :  { %v6804_v12 = vld [vmem:[%s15892_s1 + $0x220] sm:$0xf]  ;;  %v9928_v13 = vld [vmem:[%s15892_s1 + $0x22c] sm:$0xf0]  ;;  %v6677_v19 = vor.u32 %v9896_v11, %v6676_v9  ;;  %4937 = vmatpush.bf16.msra.mxu3 %v6949_v10 }
  0x1c   :  { %v6932_v14 = vld [vmem:[%s15892_s1 + $0x320] sm:$0xf]  ;;  %v9960_v15 = vld [vmem:[%s15892_s1 + $0x32c] sm:$0xf0]  ;;  %v6805_v20 = vor.u32 %v9928_v13, %v6804_v12  ;;  %4899 = vmatpush.bf16.msra.mxu0 %v6549_v16 }
  0x1d   :  { %v6532_v17 = vld [vmem:[%s15892_s1] sm:$0xf]  ;;  %v9860_v18 = vld [vmem:[%s15892_s1 + $0xc] sm:$0xf0]  ;;  %v6933_v24 = vor.u32 %v9960_v15, %v6932_v14  ;;  %4912 = vmatpush.bf16.msra.mxu1 %v6677_v19 }
  0x1e   :  { %v6660_v21 = vld [vmem:[%s15892_s1 + $0x100] sm:$0xf]  ;;  %v9892_v22 = vld [vmem:[%s15892_s1 + $0x10c] sm:$0xf0]  ;;  %v6533_v31 = vor.u32 %v9860_v18, %v6532_v17  ;;  %4925 = vmatpush.bf16.msra.mxu2 %v6805_v20 }
  0x1f   :  { %v6788_v23 = vld [vmem:[%s15892_s1 + $0x200] sm:$0xf]  ;;  %v9924_v25 = vld [vmem:[%s15892_s1 + $0x20c] sm:$0xf0]  ;;  %v6661_v35 = vor.u32 %v9892_v22, %v6660_v21  ;;  %4938 = vmatpush.bf16.msra.mxu3 %v6933_v24 }
  0x20   :  { %v6916_v26 = vld [vmem:[%s15892_s1 + $0x300] sm:$0xf]  ;;  %v9956_v27 = vld [vmem:[%s15892_s1 + $0x30c] sm:$0xf0]  ;;  %v6789_v36 = vor.u32 %v9924_v25, %v6788_v23  ;;  %4900 = vmatpush.bf16.msra.mxu0 %v6533_v31 }
  0x21   :  { %v7156_v28 = vld [vmem:[%s15892_s1 + $0x4e0] sm:$0xf]  ;;  %v10016_v29 = vld [vmem:[%s15892_s1 + $0x4ec] sm:$0xf0]  ;;  %v6917_v39 = vor.u32 %v9956_v27, %v6916_v26  ;;  %4913 = vmatpush.bf16.msra.mxu1 %v6661_v35 }
  0x22   :  { %v7284_v30 = vld [vmem:[%s15892_s1 + $0x5e0] sm:$0xf]  ;;  %v10048_v32 = vld [vmem:[%s15892_s1 + $0x5ec] sm:$0xf0]  ;;  %v7157_v40 = vor.u32 %v10016_v29, %v7156_v28  ;;  %4926 = vmatpush.bf16.msra.mxu2 %v6789_v36 }
  0x23   :  { %v7412_v33 = vld [vmem:[%s15892_s1 + $0x6e0] sm:$0xf]  ;;  %v10080_v34 = vld [vmem:[%s15892_s1 + $0x6ec] sm:$0xf0]  ;;  %v7285_v41 = vor.u32 %v10048_v32, %v7284_v30  ;;  %4939 = vmatpush.bf16.msra.mxu3 %v6917_v39 }
  0x24   :  { %v7540_v37 = vld [vmem:[%s15892_s1 + $0x7e0] sm:$0xf]  ;;  %v10112_v38 = vld [vmem:[%s15892_s1 + $0x7ec] sm:$0xf0]  ;;  %v7413_v42 = vor.u32 %v10080_v34, %v7412_v33  ;;  %4945 = vmatpush.bf16.msrb.mxu0 %v7157_v40 }
  0x25   :  { %v7140_v43 = vld [vmem:[%s15892_s1 + $0x4c0] sm:$0xf]  ;;  %v10012_v44 = vld [vmem:[%s15892_s1 + $0x4cc] sm:$0xf0]  ;;  %v7541_v46 = vor.u32 %v10112_v38, %v7540_v37  ;;  %4958 = vmatpush.bf16.msrb.mxu1 %v7285_v41 }
  0x26   :  { %v7268_v45 = vld [vmem:[%s15892_s1 + $0x5c0] sm:$0xf]  ;;  %v10044_v47 = vld [vmem:[%s15892_s1 + $0x5cc] sm:$0xf0]  ;;  %v7141_v52 = vor.u32 %v10012_v44, %v7140_v43  ;;  %4971 = vmatpush.bf16.msrb.mxu2 %v7413_v42 }
  0x27   :  { %v7396_v48 = vld [vmem:[%s15892_s1 + $0x6c0] sm:$0xf]  ;;  %v10076_v49 = vld [vmem:[%s15892_s1 + $0x6cc] sm:$0xf0]  ;;  %v7269_v53 = vor.u32 %v10044_v47, %v7268_v45  ;;  %4984 = vmatpush.bf16.msrb.mxu3 %v7541_v46 }
  0x28   :  { %v7524_v50 = vld [vmem:[%s15892_s1 + $0x7c0] sm:$0xf]  ;;  %v10108_v51 = vld [vmem:[%s15892_s1 + $0x7cc] sm:$0xf0]  ;;  %v7397_v54 = vor.u32 %v10076_v49, %v7396_v48  ;;  %4946 = vmatpush.bf16.msrb.mxu0 %v7141_v52 }
  0x29   :  { %v7124_v55 = vld [vmem:[%s15892_s1 + $0x4a0] sm:$0xf]  ;;  %v10008_v56 = vld [vmem:[%s15892_s1 + $0x4ac] sm:$0xf0]  ;;  %v7525_v58 = vor.u32 %v10108_v51, %v7524_v50  ;;  %4959 = vmatpush.bf16.msrb.mxu1 %v7269_v53 }
  0x2a   :  { %v7252_v57 = vld [vmem:[%s15892_s1 + $0x5a0] sm:$0xf]  ;;  %v10040_v59 = vld [vmem:[%s15892_s1 + $0x5ac] sm:$0xf0]  ;;  %v7125_v0 = vor.u32 %v10008_v56, %v7124_v55  ;;  %4972 = vmatpush.bf16.msrb.mxu2 %v7397_v54 }
  0x2b   :  { %v7380_v60 = vld [vmem:[%s15892_s1 + $0x6a0] sm:$0xf]  ;;  %v10072_v61 = vld [vmem:[%s15892_s1 + $0x6ac] sm:$0xf0]  ;;  %v7253_v3 = vor.u32 %v10040_v59, %v7252_v57  ;;  %4985 = vmatpush.bf16.msrb.mxu3 %v7525_v58 }
  0x2c   :  { %v7508_v62 = vld [vmem:[%s15892_s1 + $0x7a0] sm:$0xf]  ;;  %v10104_v63 = vld [vmem:[%s15892_s1 + $0x7ac] sm:$0xf0]  ;;  %v7381_v4 = vor.u32 %v10072_v61, %v7380_v60  ;;  %4947 = vmatpush.bf16.msrb.mxu0 %v7125_v0  ;;  %v22_v61 = vld [vmem:[%s15891_s0 + $0x8] sm:$0xff] }
  0x2d   :  { %v7108_v1 = vld [vmem:[%s15892_s1 + $0x480] sm:$0xf]  ;;  %v10004_v5 = vld [vmem:[%s15892_s1 + $0x48c] sm:$0xf0]  ;;  %v7509_v7 = vor.u32 %v10104_v63, %v7508_v62  ;;  %4960 = vmatpush.bf16.msrb.mxu1 %v7253_v3 }
  0x2e   :  { %v21_v2 = vld [vmem:[%s15891_s0] sm:$0xff]  ;;  %v10036_v8 = vld [vmem:[%s15892_s1 + $0x58c] sm:$0xf0]  ;;  %v7109_v13 = vor.u32 %v10004_v5, %v7108_v1  ;;  %4973 = vmatpush.bf16.msrb.mxu2 %v7381_v4 }
  0x2f   :  { %v7236_v6 = vld [vmem:[%s15892_s1 + $0x580] sm:$0xf]  ;;  %836 = vst [vmem:[#allocation1] ss:$9 sm:$0xff] %v21_v2  ;;  %v10068_v10 = vld [vmem:[%s15892_s1 + $0x68c] sm:$0xf0]  ;;  %4986 = vmatpush.bf16.msrb.mxu3 %v7509_v7 }
  0x30   :  { %v7364_v9 = vld [vmem:[%s15892_s1 + $0x680] sm:$0xf]  ;;  %v10100_v12 = vld [vmem:[%s15892_s1 + $0x78c] sm:$0xf0]  ;;  %v7237_v14 = vor.u32 %v10036_v8, %v7236_v6  ;;  %4948 = vmatpush.bf16.msrb.mxu0 %v7109_v13 }
  0x31   :  { %v7492_v11 = vld [vmem:[%s15892_s1 + $0x780] sm:$0xf]  ;;  %v7365_v15 = vor.u32 %v10068_v10, %v7364_v9  ;;  %v10000_v17 = vld [vmem:[%s15892_s1 + $0x46c] sm:$0xf0] }
  0x32   :  { %v7092_v16 = vld [vmem:[%s15892_s1 + $0x460] sm:$0xf]  ;;  %v7493_v19 = vor.u32 %v10100_v12, %v7492_v11  ;;  %v10032_v20 = vld [vmem:[%s15892_s1 + $0x56c] sm:$0xf0]  ;;  %4961 = vmatpush.bf16.msrb.mxu1 %v7237_v14 }
  0x33   :  { %v7220_v18 = vld [vmem:[%s15892_s1 + $0x560] sm:$0xf]  ;;  %v10064_v22 = vld [vmem:[%s15892_s1 + $0x66c] sm:$0xf0]  ;;  %v7093_v26 = vor.u32 %v10000_v17, %v7092_v16  ;;  %4974 = vmatpush.bf16.msrb.mxu2 %v7365_v15 }
  0x34   :  { %v7348_v21 = vld [vmem:[%s15892_s1 + $0x660] sm:$0xf]  ;;  %v10096_v24 = vld [vmem:[%s15892_s1 + $0x76c] sm:$0xf0]  ;;  %v7221_v30 = vor.u32 %v10032_v20, %v7220_v18  ;;  %4987 = vmatpush.bf16.msrb.mxu3 %v7493_v19 }
  0x35   :  { %v7476_v23 = vld [vmem:[%s15892_s1 + $0x760] sm:$0xf]  ;;  %v7349_v31 = vor.u32 %v10064_v22, %v7348_v21  ;;  %v9996_v32 = vld [vmem:[%s15892_s1 + $0x44c] sm:$0xf0]  ;;  %4949 = vmatpush.bf16.msrb.mxu0 %v7093_v26 }
  0x36   :  { %v7076_v25 = vld [vmem:[%s15892_s1 + $0x440] sm:$0xf]  ;;  %v11073_v27 = vld [vmem:[#allocation1 + $0x12] sm:$0xff]  ;;  %v11085_v34 = vld [vmem:[#allocation1 + $0x9] sm:$0xff]  ;;  %v7477_v35 = vor.u32 %v10096_v24, %v7476_v23  ;;  %4962 = vmatpush.bf16.msrb.mxu1 %v7221_v30 }
  0x37   :  { %v11075_v28 = vld [vmem:[#allocation1] sm:$0xff]  ;;  %v10028_v36 = vld [vmem:[%s15892_s1 + $0x54c] sm:$0xf0]  ;;  %4927 = vmatmul.bf16.vlgmr.msra.gmra.mxu2 %v11073_v27  ;;  %v7077_v41 = vor.u32 %v9996_v32, %v7076_v25  ;;  %4914 = vmatmul.bf16.vlgmr.msra.gmra.mxu1 %v11085_v34  ;;  %v11148_v60 = vld [vmem:[#allocation1 + $0x36] sm:$0xff] }
  0x38   :  { %v11077_v29 = vld [vmem:[#allocation1 + $0x1b] sm:$0xff]  ;;  %v10060_v38 = vld [vmem:[%s15892_s1 + $0x64c] sm:$0xf0]  ;;  %4901 = vmatmul.bf16.vlgmr.msra.gmra.mxu0 %v11075_v28  ;;  %4975 = vmatpush.bf16.msrb.mxu2 %v7349_v31  ;;  %v11153_v0 = vld [vmem:[#allocation1 + $0x24] sm:$0xff] }
  0x39   :  { %v7204_v33 = vld [vmem:[%s15892_s1 + $0x540] sm:$0xf]  ;;  %v10092_v40 = vld [vmem:[%s15892_s1 + $0x74c] sm:$0xf0]  ;;  %4940 = vmatmul.bf16.vlgmr.msra.gmra.mxu3 %v11077_v29  ;;  %4950 = vmatpush.bf16.msrb.mxu0 %v7077_v41 }
  0x3a   :  { %v7332_v37 = vld [vmem:[%s15892_s1 + $0x640] sm:$0xf]  ;;  %v7205_v43 = vor.u32 %v10028_v36, %v7204_v33  ;;  %v9992_v45 = vld [vmem:[%s15892_s1 + $0x42c] sm:$0xf0]  ;;  %4988 = vmatpush.bf16.msrb.mxu3 %v7477_v35 }
  0x3b   :  { %v7460_v39 = vld [vmem:[%s15892_s1 + $0x740] sm:$0xf]  ;;  %v7333_v44 = vor.u32 %v10060_v38, %v7332_v37  ;;  %v10024_v47 = vld [vmem:[%s15892_s1 + $0x52c] sm:$0xf0] }
  0x3c   :  { %v7060_v42 = vld [vmem:[%s15892_s1 + $0x420] sm:$0xf]  ;;  %v7461_v48 = vor.u32 %v10092_v40, %v7460_v39  ;;  %v10056_v50 = vld [vmem:[%s15892_s1 + $0x62c] sm:$0xf0]  ;;  %4963 = vmatpush.bf16.msrb.mxu1 %v7205_v43 }
  0x3d   :  { %v7188_v46 = vld [vmem:[%s15892_s1 + $0x520] sm:$0xf]  ;;  %v10088_v52 = vld [vmem:[%s15892_s1 + $0x72c] sm:$0xf0]  ;;  %v7061_v55 = vor.u32 %v9992_v45, %v7060_v42  ;;  %4976 = vmatpush.bf16.msrb.mxu2 %v7333_v44 }
  0x3e   :  { %v7316_v49 = vld [vmem:[%s15892_s1 + $0x620] sm:$0xf]  ;;  %v9988_v54 = vld [vmem:[%s15892_s1 + $0x40c] sm:$0xf0]  ;;  %v7189_v62 = vor.u32 %v10024_v47, %v7188_v46  ;;  %4989 = vmatpush.bf16.msrb.mxu3 %v7461_v48 }
  0x3f   :  { %v7444_v51 = vld [vmem:[%s15892_s1 + $0x720] sm:$0xf]  ;;  %v10020_v57 = vld [vmem:[%s15892_s1 + $0x50c] sm:$0xf0]  ;;  %v7317_v63 = vor.u32 %v10056_v50, %v7316_v49  ;;  %4951 = vmatpush.bf16.msrb.mxu0 %v7061_v55 }
  0x40   :  { %v7044_v53 = vld [vmem:[%s15892_s1 + $0x400] sm:$0xf]  ;;  %v10052_v59 = vld [vmem:[%s15892_s1 + $0x60c] sm:$0xf0]  ;;  %v7445_v3 = vor.u32 %v10088_v52, %v7444_v51  ;;  %4964 = vmatpush.bf16.msrb.mxu1 %v7189_v62 }
  0x41   :  { %v7172_v56 = vld [vmem:[%s15892_s1 + $0x500] sm:$0xf]  ;;  %v11157_v2 = vld [vmem:[#allocation1 + $0x2d] sm:$0xff]  ;;  %v7045_v9 = vor.u32 %v9988_v54, %v7044_v53  ;;  %4977 = vmatpush.bf16.msrb.mxu2 %v7317_v63 }
  0x42   :  { %v7300_v58 = vld [vmem:[%s15892_s1 + $0x600] sm:$0xf]  ;;  %v10084_v5 = vld [vmem:[%s15892_s1 + $0x70c] sm:$0xf0]  ;;  %v7173_v13 = vor.u32 %v10020_v57, %v7172_v56  ;;  %4990 = vmatpush.bf16.msrb.mxu3 %v7445_v3 }
  0x43   :  { %v11155_v1 = vld [vmem:[#allocation1 + $0x3f] sm:$0xff]  ;;  %v10144_v7 = vld [vmem:[%s15892_s1 + $0x8ec] sm:$0xf0]  ;;  %v7301_v14 = vor.u32 %v10052_v59, %v7300_v58  ;;  %4952 = vmatpush.bf16.msrb.mxu0 %v7045_v9 }
  0x44   :  { %v7428_v4 = vld [vmem:[%s15892_s1 + $0x700] sm:$0xf]  ;;  %846 = vst [vmem:[#allocation1] ss:$9 sm:$0xff] %v22_v61  ;;  %v10176_v10 = vld [vmem:[%s15892_s1 + $0x9ec] sm:$0xf0]  ;;  %4965 = vmatpush.bf16.msrb.mxu1 %v7173_v13 }
  0x45   :  { %v7668_v6 = vld [vmem:[%s15892_s1 + $0x8e0] sm:$0xf]  ;;  %v10208_v12 = vld [vmem:[%s15892_s1 + $0xaec] sm:$0xf0]  ;;  %v7429_v17 = vor.u32 %v10084_v5, %v7428_v4  ;;  %4978 = vmatpush.bf16.msrb.mxu2 %v7301_v14 }
  0x46   :  { %v7796_v8 = vld [vmem:[%s15892_s1 + $0x9e0] sm:$0xf]  ;;  %v10240_v16 = vld [vmem:[%s15892_s1 + $0xbec] sm:$0xf0]  ;;  %v7669_v18 = vor.u32 %v10144_v7, %v7668_v6 }
  0x47   :  { %v7924_v11 = vld [vmem:[%s15892_s1 + $0xae0] sm:$0xf]  ;;  %v7797_v19 = vor.u32 %v10176_v10, %v7796_v8  ;;  %v10140_v22 = vld [vmem:[%s15892_s1 + $0x8cc] sm:$0xf0]  ;;  %4991 = vmatpush.bf16.msrb.mxu3 %v7429_v17  ;;  %4966 = vmatmul.bf16.vlgmr.msrb.gmra.mxu1 %v11157_v2 }
  0x48   :  { %v8052_v15 = vld [vmem:[%s15892_s1 + $0xbe0] sm:$0xf]  ;;  %v7925_v20 = vor.u32 %v10208_v12, %v7924_v11  ;;  %v10172_v25 = vld [vmem:[%s15892_s1 + $0x9cc] sm:$0xf0]  ;;  %4997 = vmatpush.bf16.msra.mxu0 %v7669_v18  ;;  %4979 = vmatmul.bf16.vlgmr.msrb.gmra.mxu2 %v11148_v60 }
  0x49   :  { %v7652_v21 = vld [vmem:[%s15892_s1 + $0x8c0] sm:$0xf]  ;;  %v8053_v24 = vor.u32 %v10240_v16, %v8052_v15  ;;  %v10204_v30 = vld [vmem:[%s15892_s1 + $0xacc] sm:$0xf0]  ;;  %5010 = vmatpush.bf16.msra.mxu1 %v7797_v19  ;;  %4953 = vmatmul.bf16.vlgmr.msrb.gmra.mxu0 %v11153_v0 }
  0x4a   :  { %v7780_v23 = vld [vmem:[%s15892_s1 + $0x9c0] sm:$0xf]  ;;  %v10236_v32 = vld [vmem:[%s15892_s1 + $0xbcc] sm:$0xf0]  ;;  %v7653_v33 = vor.u32 %v10140_v22, %v7652_v21  ;;  %5023 = vmatpush.bf16.msra.mxu2 %v7925_v20  ;;  %4992 = vmatmul.bf16.vlgmr.msrb.gmra.mxu3 %v11155_v1 }
  0x4b   :  { %v7908_v26 = vld [vmem:[%s15892_s1 + $0xac0] sm:$0xf]  ;;  %v7781_v35 = vor.u32 %v10172_v25, %v7780_v23  ;;  %v10136_v38 = vld [vmem:[%s15892_s1 + $0x8ac] sm:$0xf0]  ;;  %5036 = vmatpush.bf16.msra.mxu3 %v8053_v24 }
  0x4c   :  { %v8036_v31 = vld [vmem:[%s15892_s1 + $0xbc0] sm:$0xf]  ;;  %v7909_v36 = vor.u32 %v10204_v30, %v7908_v26  ;;  %v10168_v41 = vld [vmem:[%s15892_s1 + $0x9ac] sm:$0xf0]  ;;  %4998 = vmatpush.bf16.msra.mxu0 %v7653_v33 }
  0x4d   :  { %v7636_v37 = vld [vmem:[%s15892_s1 + $0x8a0] sm:$0xf]  ;;  %v8037_v40 = vor.u32 %v10236_v32, %v8036_v31  ;;  %v10200_v43 = vld [vmem:[%s15892_s1 + $0xaac] sm:$0xf0]  ;;  %5011 = vmatpush.bf16.msra.mxu1 %v7781_v35 }
  0x4e   :  { %v7764_v39 = vld [vmem:[%s15892_s1 + $0x9a0] sm:$0xf]  ;;  %v10232_v45 = vld [vmem:[%s15892_s1 + $0xbac] sm:$0xf0]  ;;  %v7637_v46 = vor.u32 %v10136_v38, %v7636_v37  ;;  %5024 = vmatpush.bf16.msra.mxu2 %v7909_v36 }
  0x4f   :  { %v7892_v42 = vld [vmem:[%s15892_s1 + $0xaa0] sm:$0xf]  ;;  %v7765_v47 = vor.u32 %v10168_v41, %v7764_v39  ;;  %v10132_v50 = vld [vmem:[%s15892_s1 + $0x88c] sm:$0xf0]  ;;  %5037 = vmatpush.bf16.msra.mxu3 %v8037_v40 }
  0x50   :  { %v8020_v44 = vld [vmem:[%s15892_s1 + $0xba0] sm:$0xf]  ;;  %v7893_v48 = vor.u32 %v10200_v43, %v7892_v42  ;;  %v10164_v53 = vld [vmem:[%s15892_s1 + $0x98c] sm:$0xf0]  ;;  %4999 = vmatpush.bf16.msra.mxu0 %v7637_v46 }
  0x51   :  { %v7620_v49 = vld [vmem:[%s15892_s1 + $0x880] sm:$0xf]  ;;  %v8021_v52 = vor.u32 %v10232_v45, %v8020_v44  ;;  %v10196_v55 = vld [vmem:[%s15892_s1 + $0xa8c] sm:$0xf0]  ;;  %5012 = vmatpush.bf16.msra.mxu1 %v7765_v47 }
  0x52   :  { %v7748_v51 = vld [vmem:[%s15892_s1 + $0x980] sm:$0xf]  ;;  %v10228_v57 = vld [vmem:[%s15892_s1 + $0xb8c] sm:$0xf0]  ;;  %v7621_v58 = vor.u32 %v10132_v50, %v7620_v49  ;;  %5025 = vmatpush.bf16.msra.mxu2 %v7893_v48 }
  0x53   :  { %v7876_v54 = vld [vmem:[%s15892_s1 + $0xa80] sm:$0xf]  ;;  %v7749_v59 = vor.u32 %v10164_v53, %v7748_v51  ;;  %v10128_v63 = vld [vmem:[%s15892_s1 + $0x86c] sm:$0xf0]  ;;  %5038 = vmatpush.bf16.msra.mxu3 %v8021_v52 }
  0x54   :  { %v8004_v56 = vld [vmem:[%s15892_s1 + $0xb80] sm:$0xf]  ;;  %v7877_v61 = vor.u32 %v10196_v55, %v7876_v54  ;;  %v10160_v5 = vld [vmem:[%s15892_s1 + $0x96c] sm:$0xf0]  ;;  %5000 = vmatpush.bf16.msra.mxu0 %v7621_v58 }
  0x55   :  { %v7604_v62 = vld [vmem:[%s15892_s1 + $0x860] sm:$0xf]  ;;  %v8005_v4 = vor.u32 %v10228_v57, %v8004_v56  ;;  %v10192_v7 = vld [vmem:[%s15892_s1 + $0xa6c] sm:$0xf0]  ;;  %5013 = vmatpush.bf16.msra.mxu1 %v7749_v59 }
  0x56   :  { %v7732_v3 = vld [vmem:[%s15892_s1 + $0x960] sm:$0xf]  ;;  %v10224_v9 = vld [vmem:[%s15892_s1 + $0xb6c] sm:$0xf0]  ;;  %v7605_v10 = vor.u32 %v10128_v63, %v7604_v62  ;;  %5026 = vmatpush.bf16.msra.mxu2 %v7877_v61 }
  0x57   :  { %v7860_v6 = vld [vmem:[%s15892_s1 + $0xa60] sm:$0xf]  ;;  %v7733_v11 = vor.u32 %v10160_v5, %v7732_v3  ;;  %v10124_v14 = vld [vmem:[%s15892_s1 + $0x84c] sm:$0xf0]  ;;  %5039 = vmatpush.bf16.msra.mxu3 %v8005_v4 }
  0x58   :  { %v7988_v8 = vld [vmem:[%s15892_s1 + $0xb60] sm:$0xf]  ;;  %v7861_v12 = vor.u32 %v10192_v7, %v7860_v6  ;;  %v10156_v17 = vld [vmem:[%s15892_s1 + $0x94c] sm:$0xf0]  ;;  %5001 = vmatpush.bf16.msra.mxu0 %v7605_v10 }
  0x59   :  { %v7588_v13 = vld [vmem:[%s15892_s1 + $0x840] sm:$0xf]  ;;  %v7989_v16 = vor.u32 %v10224_v9, %v7988_v8  ;;  %v10188_v19 = vld [vmem:[%s15892_s1 + $0xa4c] sm:$0xf0]  ;;  %5014 = vmatpush.bf16.msra.mxu1 %v7733_v11 }
  0x5a   :  { %v7716_v15 = vld [vmem:[%s15892_s1 + $0x940] sm:$0xf]  ;;  %v10220_v21 = vld [vmem:[%s15892_s1 + $0xb4c] sm:$0xf0]  ;;  %v7589_v22 = vor.u32 %v10124_v14, %v7588_v13  ;;  %5027 = vmatpush.bf16.msra.mxu2 %v7861_v12 }
  0x5b   :  { %v7844_v18 = vld [vmem:[%s15892_s1 + $0xa40] sm:$0xf]  ;;  %v7717_v23 = vor.u32 %v10156_v17, %v7716_v15  ;;  %v10120_v26 = vld [vmem:[%s15892_s1 + $0x82c] sm:$0xf0]  ;;  %5040 = vmatpush.bf16.msra.mxu3 %v7989_v16 }
  0x5c   :  { %v7972_v20 = vld [vmem:[%s15892_s1 + $0xb40] sm:$0xf]  ;;  %v7845_v24 = vor.u32 %v10188_v19, %v7844_v18  ;;  %v10152_v32 = vld [vmem:[%s15892_s1 + $0x92c] sm:$0xf0]  ;;  %5002 = vmatpush.bf16.msra.mxu0 %v7589_v22 }
  0x5d   :  { %v7572_v25 = vld [vmem:[%s15892_s1 + $0x820] sm:$0xf]  ;;  %v7973_v31 = vor.u32 %v10220_v21, %v7972_v20  ;;  %v10184_v35 = vld [vmem:[%s15892_s1 + $0xa2c] sm:$0xf0]  ;;  %5015 = vmatpush.bf16.msra.mxu1 %v7717_v23 }
  0x5e   :  { %v7700_v30 = vld [vmem:[%s15892_s1 + $0x920] sm:$0xf]  ;;  %v10216_v37 = vld [vmem:[%s15892_s1 + $0xb2c] sm:$0xf0]  ;;  %v7573_v38 = vor.u32 %v10120_v26, %v7572_v25  ;;  %5028 = vmatpush.bf16.msra.mxu2 %v7845_v24 }
  0x5f   :  { %v7828_v33 = vld [vmem:[%s15892_s1 + $0xa20] sm:$0xf]  ;;  %v10116_v40 = vld [vmem:[%s15892_s1 + $0x80c] sm:$0xf0]  ;;  %v7701_v41 = vor.u32 %v10152_v32, %v7700_v30  ;;  %5041 = vmatpush.bf16.msra.mxu3 %v7973_v31 }
  0x60   :  { %v7956_v36 = vld [vmem:[%s15892_s1 + $0xb20] sm:$0xf]  ;;  %v7829_v42 = vor.u32 %v10184_v35, %v7828_v33  ;;  %v10148_v44 = vld [vmem:[%s15892_s1 + $0x90c] sm:$0xf0]  ;;  %5003 = vmatpush.bf16.msra.mxu0 %v7573_v38 }
  0x61   :  { %v7556_v39 = vld [vmem:[%s15892_s1 + $0x800] sm:$0xf]  ;;  %v7957_v46 = vor.u32 %v10216_v37, %v7956_v36  ;;  %v10180_v47 = vld [vmem:[%s15892_s1 + $0xa0c] sm:$0xf0]  ;;  %5016 = vmatpush.bf16.msra.mxu1 %v7701_v41 }
  0x62   :  { %v7684_v43 = vld [vmem:[%s15892_s1 + $0x900] sm:$0xf]  ;;  %v10212_v49 = vld [vmem:[%s15892_s1 + $0xb0c] sm:$0xf0]  ;;  %v7557_v53 = vor.u32 %v10116_v40, %v7556_v39  ;;  %5029 = vmatpush.bf16.msra.mxu2 %v7829_v42 }
  0x63   :  { %v7812_v45 = vld [vmem:[%s15892_s1 + $0xa00] sm:$0xf]  ;;  %v10272_v51 = vld [vmem:[%s15892_s1 + $0xcec] sm:$0xf0]  ;;  %v7685_v57 = vor.u32 %v10148_v44, %v7684_v43  ;;  %5042 = vmatpush.bf16.msra.mxu3 %v7957_v46 }
  0x64   :  { %v7940_v48 = vld [vmem:[%s15892_s1 + $0xb00] sm:$0xf]  ;;  %v10304_v54 = vld [vmem:[%s15892_s1 + $0xdec] sm:$0xf0]  ;;  %v7813_v58 = vor.u32 %v10180_v47, %v7812_v45  ;;  %5004 = vmatpush.bf16.msra.mxu0 %v7557_v53 }
  0x65   :  { %v8180_v50 = vld [vmem:[%s15892_s1 + $0xce0] sm:$0xf]  ;;  %v10336_v56 = vld [vmem:[%s15892_s1 + $0xeec] sm:$0xf0]  ;;  %v7941_v62 = vor.u32 %v10212_v49, %v7940_v48  ;;  %5017 = vmatpush.bf16.msra.mxu1 %v7685_v57 }
  0x66   :  { %v8308_v52 = vld [vmem:[%s15892_s1 + $0xde0] sm:$0xf]  ;;  %v10368_v61 = vld [vmem:[%s15892_s1 + $0xfec] sm:$0xf0]  ;;  %v8181_v63 = vor.u32 %v10272_v51, %v8180_v50  ;;  %5030 = vmatpush.bf16.msra.mxu2 %v7813_v58 }
  0x67   :  { %v8436_v55 = vld [vmem:[%s15892_s1 + $0xee0] sm:$0xf]  ;;  %v8309_v3 = vor.u32 %v10304_v54, %v8308_v52  ;;  %v10268_v6 = vld [vmem:[%s15892_s1 + $0xccc] sm:$0xf0]  ;;  %5043 = vmatpush.bf16.msra.mxu3 %v7941_v62 }
  0x68   :  { %v8564_v59 = vld [vmem:[%s15892_s1 + $0xfe0] sm:$0xf]  ;;  %v8437_v4 = vor.u32 %v10336_v56, %v8436_v55  ;;  %v10300_v9 = vld [vmem:[%s15892_s1 + $0xdcc] sm:$0xf0]  ;;  %5049 = vmatpush.bf16.msrb.mxu0 %v8181_v63 }
  0x69   :  { %v8164_v5 = vld [vmem:[%s15892_s1 + $0xcc0] sm:$0xf]  ;;  %v8565_v8 = vor.u32 %v10368_v61, %v8564_v59  ;;  %v10332_v11 = vld [vmem:[%s15892_s1 + $0xecc] sm:$0xf0]  ;;  %5062 = vmatpush.bf16.msrb.mxu1 %v8309_v3 }
  0x6a   :  { %v8292_v7 = vld [vmem:[%s15892_s1 + $0xdc0] sm:$0xf]  ;;  %v10364_v14 = vld [vmem:[%s15892_s1 + $0xfcc] sm:$0xf0]  ;;  %v8165_v18 = vor.u32 %v10268_v6, %v8164_v5  ;;  %5075 = vmatpush.bf16.msrb.mxu2 %v8437_v4 }
  0x6b   :  { %v8420_v10 = vld [vmem:[%s15892_s1 + $0xec0] sm:$0xf]  ;;  %v11411_v15 = vld [vmem:[#allocation1 + $0x12] sm:$0xff]  ;;  %v11413_v16 = vld [vmem:[#allocation1 + $0x9] sm:$0xff]  ;;  %v8293_v19 = vor.u32 %v10300_v9, %v8292_v7  ;;  %5088 = vmatpush.bf16.msrb.mxu3 %v8565_v8 }
  0x6c   :  { %v11403_v12 = vld [vmem:[#allocation1] sm:$0xff]  ;;  %v8421_v20 = vor.u32 %v10332_v11, %v8420_v10  ;;  %v10264_v22 = vld [vmem:[%s15892_s1 + $0xcac] sm:$0xf0]  ;;  %5031 = vmatmul.bf16.vlgmr.msra.gmra.mxu2 %v11411_v15  ;;  %5018 = vmatmul.bf16.vlgmr.msra.gmra.mxu1 %v11413_v16 }
  0x6d   :  { %v8548_v13 = vld [vmem:[%s15892_s1 + $0xfc0] sm:$0xf]  ;;  %5005 = vmatmul.bf16.vlgmr.msra.gmra.mxu0 %v11403_v12  ;;  %v10296_v25 = vld [vmem:[%s15892_s1 + $0xdac] sm:$0xf0]  ;;  %5063 = vmatpush.bf16.msrb.mxu1 %v8293_v19 }
  0x6e   :  { %v11415_v17 = vld [vmem:[#allocation1 + $0x1b] sm:$0xff]  ;;  %v8549_v24 = vor.u32 %v10364_v14, %v8548_v13  ;;  %v10328_v30 = vld [vmem:[%s15892_s1 + $0xeac] sm:$0xf0]  ;;  %5050 = vmatpush.bf16.msrb.mxu0 %v8165_v18  ;;  %5076 = vmatpush.bf16.msrb.mxu2 %v8421_v20 }
  0x6f   :  { %v8148_v21 = vld [vmem:[%s15892_s1 + $0xca0] sm:$0xf]  ;;  %v10360_v32 = vld [vmem:[%s15892_s1 + $0xfac] sm:$0xf0]  ;;  %5044 = vmatmul.bf16.vlgmr.msra.gmra.mxu3 %v11415_v17 }
  0x70   :  { %v8276_v23 = vld [vmem:[%s15892_s1 + $0xda0] sm:$0xf]  ;;  %v8149_v33 = vor.u32 %v10264_v22, %v8148_v21  ;;  %v10260_v38 = vld [vmem:[%s15892_s1 + $0xc8c] sm:$0xf0]  ;;  %5089 = vmatpush.bf16.msrb.mxu3 %v8549_v24 }
  0x71   :  { %v8404_v26 = vld [vmem:[%s15892_s1 + $0xea0] sm:$0xf]  ;;  %v8277_v36 = vor.u32 %v10296_v25, %v8276_v23  ;;  %v10292_v40 = vld [vmem:[%s15892_s1 + $0xd8c] sm:$0xf0] }
  0x72   :  { %v8532_v31 = vld [vmem:[%s15892_s1 + $0xfa0] sm:$0xf]  ;;  %v8405_v37 = vor.u32 %v10328_v30, %v8404_v26  ;;  %v10324_v43 = vld [vmem:[%s15892_s1 + $0xe8c] sm:$0xf0] }
  0x73   :  { %v8132_v35 = vld [vmem:[%s15892_s1 + $0xc80] sm:$0xf]  ;;  %v8533_v41 = vor.u32 %v10360_v32, %v8532_v31  ;;  %v10356_v45 = vld [vmem:[%s15892_s1 + $0xf8c] sm:$0xf0] }
  0x74   :  { %v8260_v39 = vld [vmem:[%s15892_s1 + $0xd80] sm:$0xf] }
  0x75   :  { %v8388_v42 = vld [vmem:[%s15892_s1 + $0xe80] sm:$0xf] }
  0x76   :  { %v8516_v44 = vld [vmem:[%s15892_s1 + $0xf80] sm:$0xf] }
  0x77   :  { %10 = vsyncpa [#allocation3], 0  ;;  %5051 = vmatpush.bf16.msrb.mxu0 %v8149_v33  ;;  %v8133_v46 = vor.u32 %v10260_v38, %v8132_v35  ;;  %5064 = vmatpush.bf16.msrb.mxu1 %v8277_v36  ;;  %v8261_v47 = vor.u32 %v10292_v40, %v8260_v39  ;;  %v8389_v48 = vor.u32 %v10324_v43, %v8388_v42  ;;  %v8116_v49 = vld [vmem:[%s15892_s1 + $0xc60] sm:$0xf]  ;;  %v10256_v50 = vld [vmem:[%s15892_s1 + $0xc6c] sm:$0xf0] }
  0x78   :  { %5077 = vmatpush.bf16.msrb.mxu2 %v8405_v37  ;;  %v8244_v51 = vld [vmem:[%s15892_s1 + $0xd60] sm:$0xf]  ;;  %5090 = vmatpush.bf16.msrb.mxu3 %v8533_v41  ;;  %v8517_v52 = vor.u32 %v10356_v45, %v8516_v44  ;;  %v10288_v53 = vld [vmem:[%s15892_s1 + $0xd6c] sm:$0xf0]  ;;  %v8117_v58 = vor.u32 %v10256_v50, %v8116_v49  ;;  %s10724_s19 = smov [#allocation2]   ;;  %s6521_s23 = sshll.u32 %s15896_s5, 4  ;;  %s6522_s23 = int_to_ptr.hbm [resolvable:$true] %s6521_s23 }
  0x79   :  { %v8372_v54 = vld [vmem:[%s15892_s1 + $0xe60] sm:$0xf]  ;;  %v10320_v55 = vld [vmem:[%s15892_s1 + $0xe6c] sm:$0xf0]  ;;  %v8245_v59 = vor.u32 %v10288_v53, %v8244_v51  ;;  %s6519_s20 = sshll.u32 %s10724_s19, 4  ;;  %s6520_s20 = int_to_ptr.vmem [resolvable:$true] %s6519_s20 }
  0x7a   :  { %v8500_v56 = vld [vmem:[%s15892_s1 + $0xf60] sm:$0xf]  ;;  %v10352_v57 = vld [vmem:[%s15892_s1 + $0xf6c] sm:$0xf0]  ;;  %v8373_v61 = vor.u32 %v10320_v55, %v8372_v54 }
  0x7b   :  { %5052 = vmatpush.bf16.msrb.mxu0 %v8133_v46  ;;  %5065 = vmatpush.bf16.msrb.mxu1 %v8261_v47  ;;  %v8100_v62 = vld [vmem:[%s15892_s1 + $0xc40] sm:$0xf]  ;;  %v10252_v63 = vld [vmem:[%s15892_s1 + $0xc4c] sm:$0xf0]  ;;  %v8501_v4 = vor.u32 %v10352_v57, %v8500_v56  ;;  %v11577_v46 = vld [vmem:[#allocation1 + $0x24] sm:$0xff] }
  0x7c   :  { %5078 = vmatpush.bf16.msrb.mxu2 %v8389_v48  ;;  %v8228_v3 = vld [vmem:[%s15892_s1 + $0xd40] sm:$0xf]  ;;  %5091 = vmatpush.bf16.msrb.mxu3 %v8517_v52  ;;  %v10284_v5 = vld [vmem:[%s15892_s1 + $0xd4c] sm:$0xf0]  ;;  %v8101_v10 = vor.u32 %v10252_v63, %v8100_v62  ;;  %v11579_v47 = vld [vmem:[#allocation1 + $0x36] sm:$0xff] }
  0x7d   :  { %v8356_v6 = vld [vmem:[%s15892_s1 + $0xe40] sm:$0xf]  ;;  %v10316_v7 = vld [vmem:[%s15892_s1 + $0xe4c] sm:$0xf0]  ;;  %v8229_v13 = vor.u32 %v10284_v5, %v8228_v3 }
  0x7e   :  { %v8484_v8 = vld [vmem:[%s15892_s1 + $0xf40] sm:$0xf]  ;;  %v10348_v9 = vld [vmem:[%s15892_s1 + $0xf4c] sm:$0xf0]  ;;  %v8357_v14 = vor.u32 %v10316_v7, %v8356_v6 }
  0x7f   :  { %5053 = vmatpush.bf16.msrb.mxu0 %v8117_v58  ;;  %v8084_v11 = vld [vmem:[%s15892_s1 + $0xc20] sm:$0xf]  ;;  %5066 = vmatpush.bf16.msrb.mxu1 %v8245_v59  ;;  %v10248_v18 = vld [vmem:[%s15892_s1 + $0xc2c] sm:$0xf0]  ;;  %v8485_v21 = vor.u32 %v10348_v9, %v8484_v8 }
  0x80   :  { %5079 = vmatpush.bf16.msrb.mxu2 %v8373_v61  ;;  %v8212_v19 = vld [vmem:[%s15892_s1 + $0xd20] sm:$0xf]  ;;  %v10280_v20 = vld [vmem:[%s15892_s1 + $0xd2c] sm:$0xf0]  ;;  %5092 = vmatpush.bf16.msrb.mxu3 %v8501_v4  ;;  %v8085_v31 = vor.u32 %v10248_v18, %v8084_v11 }
  0x81   :  { %v8340_v22 = vld [vmem:[%s15892_s1 + $0xe20] sm:$0xf]  ;;  %v10312_v23 = vld [vmem:[%s15892_s1 + $0xe2c] sm:$0xf0]  ;;  %v8213_v37 = vor.u32 %v10280_v20, %v8212_v19 }
  0x82   :  { %v8468_v24 = vld [vmem:[%s15892_s1 + $0xf20] sm:$0xf]  ;;  %v10344_v25 = vld [vmem:[%s15892_s1 + $0xf2c] sm:$0xf0]  ;;  %v8341_v38 = vor.u32 %v10312_v23, %v8340_v22 }
  0x83   :  { %v8068_v26 = vld [vmem:[%s15892_s1 + $0xc00] sm:$0xf]  ;;  %v10244_v30 = vld [vmem:[%s15892_s1 + $0xc0c] sm:$0xf0]  ;;  %5054 = vmatpush.bf16.msrb.mxu0 %v8101_v10  ;;  %5067 = vmatpush.bf16.msrb.mxu1 %v8229_v13  ;;  %v8469_v43 = vor.u32 %v10344_v25, %v8468_v24 }
  0x84   :  { %v8196_v32 = vld [vmem:[%s15892_s1 + $0xd00] sm:$0xf]  ;;  %v10276_v33 = vld [vmem:[%s15892_s1 + $0xd0c] sm:$0xf0]  ;;  %5080 = vmatpush.bf16.msrb.mxu2 %v8357_v14  ;;  %5093 = vmatpush.bf16.msrb.mxu3 %v8485_v21  ;;  %v8069_v51 = vor.u32 %v10244_v30, %v8068_v26 }
  0x85   :  { %v8324_v35 = vld [vmem:[%s15892_s1 + $0xe00] sm:$0xf]  ;;  %v10308_v36 = vld [vmem:[%s15892_s1 + $0xe0c] sm:$0xf0]  ;;  %v8197_v54 = vor.u32 %v10276_v33, %v8196_v32 }
  0x86   :  { %v8452_v39 = vld [vmem:[%s15892_s1 + $0xf00] sm:$0xf]  ;;  %v10340_v40 = vld [vmem:[%s15892_s1 + $0xf0c] sm:$0xf0]  ;;  %v8325_v55 = vor.u32 %v10308_v36, %v8324_v35 }
  0x87   :  { %v8692_v41 = vld [vmem:[%s15892_s1 + $0x10e0] sm:$0xf]  ;;  %v10400_v42 = vld [vmem:[%s15892_s1 + $0x10ec] sm:$0xf0]  ;;  %5055 = vmatpush.bf16.msrb.mxu0 %v8085_v31  ;;  %5068 = vmatpush.bf16.msrb.mxu1 %v8213_v37  ;;  %v8453_v58 = vor.u32 %v10340_v40, %v8452_v39 }
  0x88   :  { %v8820_v44 = vld [vmem:[%s15892_s1 + $0x11e0] sm:$0xf]  ;;  %v10432_v45 = vld [vmem:[%s15892_s1 + $0x11ec] sm:$0xf0]  ;;  %5081 = vmatpush.bf16.msrb.mxu2 %v8341_v38  ;;  %5094 = vmatpush.bf16.msrb.mxu3 %v8469_v43  ;;  %v8693_v59 = vor.u32 %v10400_v42, %v8692_v41 }
  0x89   :  { %v11581_v48 = vld [vmem:[#allocation1 + $0x2d] sm:$0xff]  ;;  %v11583_v49 = vld [vmem:[#allocation1 + $0x3f] sm:$0xff]  ;;  %v8821_v61 = vor.u32 %v10432_v45, %v8820_v44 }
  0x8a   :  { %v23_v50 = vld [vmem:[%s15891_s0 + $0x10] sm:$0xff]  ;;  %v8948_v52 = vld [vmem:[%s15892_s1 + $0x12e0] sm:$0xf] }
  0x8b   :  { %v10464_v53 = vld [vmem:[%s15892_s1 + $0x12ec] sm:$0xf0]  ;;  %856 = vst [vmem:[#allocation1] ss:$9 sm:$0xff] %v23_v50  ;;  %v9076_v56 = vld [vmem:[%s15892_s1 + $0x13e0] sm:$0xf]  ;;  %5056 = vmatpush.bf16.msrb.mxu0 %v8069_v51  ;;  %5069 = vmatpush.bf16.msrb.mxu1 %v8197_v54 }
  0x8c   :  { %v10496_v57 = vld [vmem:[%s15892_s1 + $0x13ec] sm:$0xf0]  ;;  %v8949_v62 = vor.u32 %v10464_v53, %v8948_v52  ;;  %v8676_v63 = vld [vmem:[%s15892_s1 + $0x10c0] sm:$0xf]  ;;  %5082 = vmatpush.bf16.msrb.mxu2 %v8325_v55  ;;  %5095 = vmatpush.bf16.msrb.mxu3 %v8453_v58 }
  0x8d   :  { %v10396_v3 = vld [vmem:[%s15892_s1 + $0x10cc] sm:$0xf0]  ;;  %v8804_v4 = vld [vmem:[%s15892_s1 + $0x11c0] sm:$0xf]  ;;  %v9077_v5 = vor.u32 %v10496_v57, %v9076_v56 }
  0x8e   :  { %v10428_v6 = vld [vmem:[%s15892_s1 + $0x11cc] sm:$0xf0]  ;;  %v8932_v7 = vld [vmem:[%s15892_s1 + $0x12c0] sm:$0xf]  ;;  %v8677_v11 = vor.u32 %v10396_v3, %v8676_v63  ;;  %5057 = vmatmul.bf16.vlgmr.msrb.gmra.mxu0 %v11577_v46  ;;  %5070 = vmatmul.bf16.vlgmr.msrb.gmra.mxu1 %v11581_v48 }
  0x8f   :  { %v10460_v8 = vld [vmem:[%s15892_s1 + $0x12cc] sm:$0xf0]  ;;  %v9060_v9 = vld [vmem:[%s15892_s1 + $0x13c0] sm:$0xf]  ;;  %5101 = vmatpush.bf16.msra.mxu0 %v8693_v59  ;;  %5114 = vmatpush.bf16.msra.mxu1 %v8821_v61  ;;  %v8805_v13 = vor.u32 %v10428_v6, %v8804_v4 }
  0x90   :  { %v10492_v10 = vld [vmem:[%s15892_s1 + $0x13cc] sm:$0xf0]  ;;  %5127 = vmatpush.bf16.msra.mxu2 %v8949_v62  ;;  %v8933_v14 = vor.u32 %v10460_v8, %v8932_v7  ;;  %v8660_v18 = vld [vmem:[%s15892_s1 + $0x10a0] sm:$0xf]  ;;  %5140 = vmatpush.bf16.msra.mxu3 %v9077_v5 }
  0x91   :  { %v10392_v19 = vld [vmem:[%s15892_s1 + $0x10ac] sm:$0xf0]  ;;  %v8788_v20 = vld [vmem:[%s15892_s1 + $0x11a0] sm:$0xf]  ;;  %v9061_v21 = vor.u32 %v10492_v10, %v9060_v9  ;;  %5083 = vmatmul.bf16.vlgmr.msrb.gmra.mxu2 %v11579_v47  ;;  %5096 = vmatmul.bf16.vlgmr.msrb.gmra.mxu3 %v11583_v49 }
  0x92   :  { %v10424_v22 = vld [vmem:[%s15892_s1 + $0x11ac] sm:$0xf0]  ;;  %v8916_v23 = vld [vmem:[%s15892_s1 + $0x12a0] sm:$0xf]  ;;  %v8661_v30 = vor.u32 %v10392_v19, %v8660_v18 }
  0x93   :  { %v10456_v24 = vld [vmem:[%s15892_s1 + $0x12ac] sm:$0xf0]  ;;  %v9044_v25 = vld [vmem:[%s15892_s1 + $0x13a0] sm:$0xf]  ;;  %5102 = vmatpush.bf16.msra.mxu0 %v8677_v11  ;;  %5115 = vmatpush.bf16.msra.mxu1 %v8805_v13  ;;  %v8789_v31 = vor.u32 %v10424_v22, %v8788_v20 }
  0x94   :  { %v10488_v26 = vld [vmem:[%s15892_s1 + $0x13ac] sm:$0xf0]  ;;  %5128 = vmatpush.bf16.msra.mxu2 %v8933_v14  ;;  %v8917_v32 = vor.u32 %v10456_v24, %v8916_v23  ;;  %v8644_v33 = vld [vmem:[%s15892_s1 + $0x1080] sm:$0xf]  ;;  %5141 = vmatpush.bf16.msra.mxu3 %v9061_v21 }
  0x95   :  { %v10388_v35 = vld [vmem:[%s15892_s1 + $0x108c] sm:$0xf0]  ;;  %v8772_v36 = vld [vmem:[%s15892_s1 + $0x1180] sm:$0xf]  ;;  %v9045_v37 = vor.u32 %v10488_v26, %v9044_v25 }
  0x96   :  { %v10420_v38 = vld [vmem:[%s15892_s1 + $0x118c] sm:$0xf0]  ;;  %v8900_v39 = vld [vmem:[%s15892_s1 + $0x1280] sm:$0xf]  ;;  %v8645_v43 = vor.u32 %v10388_v35, %v8644_v33 }
  0x97   :  { %v10452_v40 = vld [vmem:[%s15892_s1 + $0x128c] sm:$0xf0]  ;;  %v9028_v41 = vld [vmem:[%s15892_s1 + $0x1380] sm:$0xf]  ;;  %5103 = vmatpush.bf16.msra.mxu0 %v8661_v30  ;;  %5116 = vmatpush.bf16.msra.mxu1 %v8789_v31  ;;  %v8773_v44 = vor.u32 %v10420_v38, %v8772_v36 }
  0x98   :  { %v10484_v42 = vld [vmem:[%s15892_s1 + $0x138c] sm:$0xf0]  ;;  %5129 = vmatpush.bf16.msra.mxu2 %v8917_v32  ;;  %v8901_v45 = vor.u32 %v10452_v40, %v8900_v39  ;;  %v8628_v50 = vld [vmem:[%s15892_s1 + $0x1060] sm:$0xf]  ;;  %5142 = vmatpush.bf16.msra.mxu3 %v9045_v37 }
  0x99   :  { %v10384_v51 = vld [vmem:[%s15892_s1 + $0x106c] sm:$0xf0]  ;;  %v8756_v52 = vld [vmem:[%s15892_s1 + $0x1160] sm:$0xf]  ;;  %v9029_v53 = vor.u32 %v10484_v42, %v9028_v41 }
  0x9a   :  { %v10416_v54 = vld [vmem:[%s15892_s1 + $0x116c] sm:$0xf0]  ;;  %v8884_v55 = vld [vmem:[%s15892_s1 + $0x1260] sm:$0xf]  ;;  %v8629_v59 = vor.u32 %v10384_v51, %v8628_v50 }
  0x9b   :  { %v10448_v56 = vld [vmem:[%s15892_s1 + $0x126c] sm:$0xf0]  ;;  %v9012_v57 = vld [vmem:[%s15892_s1 + $0x1360] sm:$0xf]  ;;  %5104 = vmatpush.bf16.msra.mxu0 %v8645_v43  ;;  %5117 = vmatpush.bf16.msra.mxu1 %v8773_v44  ;;  %v8757_v61 = vor.u32 %v10416_v54, %v8756_v52 }
  0x9c   :  { %v10480_v58 = vld [vmem:[%s15892_s1 + $0x136c] sm:$0xf0]  ;;  %5130 = vmatpush.bf16.msra.mxu2 %v8901_v45  ;;  %v8885_v62 = vor.u32 %v10448_v56, %v8884_v55  ;;  %v8612_v63 = vld [vmem:[%s15892_s1 + $0x1040] sm:$0xf]  ;;  %5143 = vmatpush.bf16.msra.mxu3 %v9029_v53 }
  0x9d   :  { %v10380_v3 = vld [vmem:[%s15892_s1 + $0x104c] sm:$0xf0]  ;;  %v8740_v4 = vld [vmem:[%s15892_s1 + $0x1140] sm:$0xf]  ;;  %v9013_v5 = vor.u32 %v10480_v58, %v9012_v57 }
  0x9e   :  { %v10412_v6 = vld [vmem:[%s15892_s1 + $0x114c] sm:$0xf0]  ;;  %v8868_v7 = vld [vmem:[%s15892_s1 + $0x1240] sm:$0xf]  ;;  %v8613_v11 = vor.u32 %v10380_v3, %v8612_v63 }
  0x9f   :  { %v10444_v8 = vld [vmem:[%s15892_s1 + $0x124c] sm:$0xf0]  ;;  %v8996_v9 = vld [vmem:[%s15892_s1 + $0x1340] sm:$0xf]  ;;  %5105 = vmatpush.bf16.msra.mxu0 %v8629_v59  ;;  %5118 = vmatpush.bf16.msra.mxu1 %v8757_v61  ;;  %v8741_v13 = vor.u32 %v10412_v6, %v8740_v4 }
  0xa0   :  { %v10476_v10 = vld [vmem:[%s15892_s1 + $0x134c] sm:$0xf0]  ;;  %5131 = vmatpush.bf16.msra.mxu2 %v8885_v62  ;;  %v8869_v14 = vor.u32 %v10444_v8, %v8868_v7  ;;  %v8596_v18 = vld [vmem:[%s15892_s1 + $0x1020] sm:$0xf]  ;;  %5144 = vmatpush.bf16.msra.mxu3 %v9013_v5 }
  0xa1   :  { %v10376_v19 = vld [vmem:[%s15892_s1 + $0x102c] sm:$0xf0]  ;;  %v8724_v20 = vld [vmem:[%s15892_s1 + $0x1120] sm:$0xf]  ;;  %v8997_v21 = vor.u32 %v10476_v10, %v8996_v9 }
  0xa2   :  { %v10408_v22 = vld [vmem:[%s15892_s1 + $0x112c] sm:$0xf0]  ;;  %v8852_v23 = vld [vmem:[%s15892_s1 + $0x1220] sm:$0xf]  ;;  %v8597_v30 = vor.u32 %v10376_v19, %v8596_v18 }
  0xa3   :  { %v10440_v24 = vld [vmem:[%s15892_s1 + $0x122c] sm:$0xf0]  ;;  %v8980_v25 = vld [vmem:[%s15892_s1 + $0x1320] sm:$0xf]  ;;  %5106 = vmatpush.bf16.msra.mxu0 %v8613_v11  ;;  %5119 = vmatpush.bf16.msra.mxu1 %v8741_v13  ;;  %v8725_v33 = vor.u32 %v10408_v22, %v8724_v20 }
  0xa4   :  { %v10472_v26 = vld [vmem:[%s15892_s1 + $0x132c] sm:$0xf0]  ;;  %v8580_v31 = vld [vmem:[%s15892_s1 + $0x1000] sm:$0xf]  ;;  %5132 = vmatpush.bf16.msra.mxu2 %v8869_v14  ;;  %v8853_v35 = vor.u32 %v10440_v24, %v8852_v23  ;;  %5145 = vmatpush.bf16.msra.mxu3 %v8997_v21 }
  0xa5   :  { %v10372_v32 = vld [vmem:[%s15892_s1 + $0x100c] sm:$0xf0]  ;;  %v8708_v36 = vld [vmem:[%s15892_s1 + $0x1100] sm:$0xf]  ;;  %v8981_v39 = vor.u32 %v10472_v26, %v8980_v25 }
  0xa6   :  { %v10404_v37 = vld [vmem:[%s15892_s1 + $0x110c] sm:$0xf0]  ;;  %v8836_v38 = vld [vmem:[%s15892_s1 + $0x1200] sm:$0xf]  ;;  %v8581_v50 = vor.u32 %v10372_v32, %v8580_v31 }
  0xa7   :  { %v10436_v40 = vld [vmem:[%s15892_s1 + $0x120c] sm:$0xf0]  ;;  %v8964_v41 = vld [vmem:[%s15892_s1 + $0x1300] sm:$0xf]  ;;  %5107 = vmatpush.bf16.msra.mxu0 %v8597_v30  ;;  %5120 = vmatpush.bf16.msra.mxu1 %v8725_v33  ;;  %v8709_v54 = vor.u32 %v10404_v37, %v8708_v36 }
  0xa8   :  { %v10468_v42 = vld [vmem:[%s15892_s1 + $0x130c] sm:$0xf0]  ;;  %v9204_v43 = vld [vmem:[%s15892_s1 + $0x14e0] sm:$0xf]  ;;  %5133 = vmatpush.bf16.msra.mxu2 %v8853_v35  ;;  %v8837_v55 = vor.u32 %v10436_v40, %v8836_v38  ;;  %5146 = vmatpush.bf16.msra.mxu3 %v8981_v39 }
  0xa9   :  { %v10528_v44 = vld [vmem:[%s15892_s1 + $0x14ec] sm:$0xf0]  ;;  %v9332_v45 = vld [vmem:[%s15892_s1 + $0x15e0] sm:$0xf]  ;;  %v8965_v58 = vor.u32 %v10468_v42, %v8964_v41 }
  0xaa   :  { %v10560_v51 = vld [vmem:[%s15892_s1 + $0x15ec] sm:$0xf0]  ;;  %v9460_v52 = vld [vmem:[%s15892_s1 + $0x16e0] sm:$0xf]  ;;  %v9205_v59 = vor.u32 %v10528_v44, %v9204_v43 }
  0xab   :  { %v10592_v53 = vld [vmem:[%s15892_s1 + $0x16ec] sm:$0xf0]  ;;  %v9588_v56 = vld [vmem:[%s15892_s1 + $0x17e0] sm:$0xf]  ;;  %v9333_v61 = vor.u32 %v10560_v51, %v9332_v45  ;;  %5108 = vmatpush.bf16.msra.mxu0 %v8581_v50  ;;  %5121 = vmatpush.bf16.msra.mxu1 %v8709_v54 }
  0xac   :  { %v10624_v57 = vld [vmem:[%s15892_s1 + $0x17ec] sm:$0xf0]  ;;  %v9461_v62 = vor.u32 %v10592_v53, %v9460_v52  ;;  %v9188_v63 = vld [vmem:[%s15892_s1 + $0x14c0] sm:$0xf]  ;;  %5134 = vmatpush.bf16.msra.mxu2 %v8837_v55  ;;  %5147 = vmatpush.bf16.msra.mxu3 %v8965_v58 }
  0xad   :  { %v10524_v3 = vld [vmem:[%s15892_s1 + $0x14cc] sm:$0xf0]  ;;  %v9316_v4 = vld [vmem:[%s15892_s1 + $0x15c0] sm:$0xf]  ;;  %v9589_v5 = vor.u32 %v10624_v57, %v9588_v56 }
  0xae   :  { %v10556_v6 = vld [vmem:[%s15892_s1 + $0x15cc] sm:$0xf0]  ;;  %v9444_v7 = vld [vmem:[%s15892_s1 + $0x16c0] sm:$0xf]  ;;  %v9189_v19 = vor.u32 %v10524_v3, %v9188_v63 }
  0xaf   :  { %v10588_v8 = vld [vmem:[%s15892_s1 + $0x16cc] sm:$0xf0]  ;;  %v11814_v9 = vld [vmem:[#allocation1] sm:$0xff]  ;;  %5153 = vmatpush.bf16.msrb.mxu0 %v9205_v59  ;;  %5166 = vmatpush.bf16.msrb.mxu1 %v9333_v61  ;;  %v9317_v20 = vor.u32 %v10556_v6, %v9316_v4 }
  0xb0   :  { %v9572_v10 = vld [vmem:[%s15892_s1 + $0x17c0] sm:$0xf]  ;;  %v10620_v11 = vld [vmem:[%s15892_s1 + $0x17cc] sm:$0xf0]  ;;  %5179 = vmatpush.bf16.msrb.mxu2 %v9461_v62  ;;  %v9445_v21 = vor.u32 %v10588_v8, %v9444_v7  ;;  %5192 = vmatpush.bf16.msrb.mxu3 %v9589_v5 }
  0xb1   :  { %v11822_v13 = vld [vmem:[#allocation1 + $0x12] sm:$0xff]  ;;  %v11824_v14 = vld [vmem:[#allocation1 + $0x9] sm:$0xff]  ;;  %v11826_v18 = vld [vmem:[#allocation1 + $0x1b] sm:$0xff]  ;;  %5109 = vmatmul.bf16.vlgmr.msra.gmra.mxu0 %v11814_v9  ;;  %v9573_v25 = vor.u32 %v10620_v11, %v9572_v10 }
  0xb2   :  { %v9172_v22 = vld [vmem:[%s15892_s1 + $0x14a0] sm:$0xf]  ;;  %v10520_v23 = vld [vmem:[%s15892_s1 + $0x14ac] sm:$0xf0]  ;;  %5135 = vmatmul.bf16.vlgmr.msra.gmra.mxu2 %v11822_v13  ;;  %5122 = vmatmul.bf16.vlgmr.msra.gmra.mxu1 %v11824_v14 }
  0xb3   :  { %v9300_v24 = vld [vmem:[%s15892_s1 + $0x15a0] sm:$0xf]  ;;  %v10552_v26 = vld [vmem:[%s15892_s1 + $0x15ac] sm:$0xf0]  ;;  %5148 = vmatmul.bf16.vlgmr.msra.gmra.mxu3 %v11826_v18  ;;  %5154 = vmatpush.bf16.msrb.mxu0 %v9189_v19  ;;  %v9173_v35 = vor.u32 %v10520_v23, %v9172_v22 }
  0xb4   :  { %v9428_v30 = vld [vmem:[%s15892_s1 + $0x16a0] sm:$0xf]  ;;  %v10584_v31 = vld [vmem:[%s15892_s1 + $0x16ac] sm:$0xf0]  ;;  %5167 = vmatpush.bf16.msrb.mxu1 %v9317_v20  ;;  %5180 = vmatpush.bf16.msrb.mxu2 %v9445_v21  ;;  %v9301_v36 = vor.u32 %v10552_v26, %v9300_v24 }
  0xb5   :  { %v9556_v32 = vld [vmem:[%s15892_s1 + $0x17a0] sm:$0xf]  ;;  %v10616_v33 = vld [vmem:[%s15892_s1 + $0x17ac] sm:$0xf0]  ;;  %v9429_v37 = vor.u32 %v10584_v31, %v9428_v30  ;;  %5193 = vmatpush.bf16.msrb.mxu3 %v9573_v25 }
  0xb6   :  { %v9156_v38 = vld [vmem:[%s15892_s1 + $0x1480] sm:$0xf]  ;;  %v10516_v39 = vld [vmem:[%s15892_s1 + $0x148c] sm:$0xf0]  ;;  %v9557_v41 = vor.u32 %v10616_v33, %v9556_v32 }
  0xb7   :  { %v9284_v40 = vld [vmem:[%s15892_s1 + $0x1580] sm:$0xf]  ;;  %v10548_v42 = vld [vmem:[%s15892_s1 + $0x158c] sm:$0xf0]  ;;  %5155 = vmatpush.bf16.msrb.mxu0 %v9173_v35  ;;  %v9157_v51 = vor.u32 %v10516_v39, %v9156_v38 }
  0xb8   :  { %v9412_v43 = vld [vmem:[%s15892_s1 + $0x1680] sm:$0xf]  ;;  %v10580_v44 = vld [vmem:[%s15892_s1 + $0x168c] sm:$0xf0]  ;;  %5168 = vmatpush.bf16.msrb.mxu1 %v9301_v36  ;;  %5181 = vmatpush.bf16.msrb.mxu2 %v9429_v37  ;;  %v9285_v52 = vor.u32 %v10548_v42, %v9284_v40 }
  0xb9   :  { %v9540_v45 = vld [vmem:[%s15892_s1 + $0x1780] sm:$0xf]  ;;  %v10612_v50 = vld [vmem:[%s15892_s1 + $0x178c] sm:$0xf0]  ;;  %v9413_v53 = vor.u32 %v10580_v44, %v9412_v43  ;;  %5194 = vmatpush.bf16.msrb.mxu3 %v9557_v41 }
  0xba   :  { %v9140_v54 = vld [vmem:[%s15892_s1 + $0x1460] sm:$0xf]  ;;  %v10512_v55 = vld [vmem:[%s15892_s1 + $0x146c] sm:$0xf0]  ;;  %v9541_v57 = vor.u32 %v10612_v50, %v9540_v45 }
  0xbb   :  { %v9268_v56 = vld [vmem:[%s15892_s1 + $0x1560] sm:$0xf]  ;;  %v10544_v58 = vld [vmem:[%s15892_s1 + $0x156c] sm:$0xf0]  ;;  %5156 = vmatpush.bf16.msrb.mxu0 %v9157_v51  ;;  %v9141_v3 = vor.u32 %v10512_v55, %v9140_v54 }
  0xbc   :  { %v9396_v59 = vld [vmem:[%s15892_s1 + $0x1660] sm:$0xf]  ;;  %v10576_v61 = vld [vmem:[%s15892_s1 + $0x166c] sm:$0xf0]  ;;  %5169 = vmatpush.bf16.msrb.mxu1 %v9285_v52  ;;  %5182 = vmatpush.bf16.msrb.mxu2 %v9413_v53  ;;  %v9269_v5 = vor.u32 %v10544_v58, %v9268_v56  ;;  %v4902_v52 = vpop.f32.mrf.mxu0 }
  0xbd   :  { %v9524_v62 = vld [vmem:[%s15892_s1 + $0x1760] sm:$0xf]  ;;  %v10608_v63 = vld [vmem:[%s15892_s1 + $0x176c] sm:$0xf0]  ;;  %v9397_v6 = vor.u32 %v10576_v61, %v9396_v59  ;;  %5195 = vmatpush.bf16.msrb.mxu3 %v9541_v57  ;;  %v4915_v61 = vpop.f32.mrf.mxu1 }
  0xbe   :  { %v9124_v4 = vld [vmem:[%s15892_s1 + $0x1440] sm:$0xf]  ;;  %v10508_v7 = vld [vmem:[%s15892_s1 + $0x144c] sm:$0xf0]  ;;  %v9525_v11 = vor.u32 %v10608_v63, %v9524_v62  ;;  %v9886_v63 = vld [vmem:[%s15892_s1 + $0xe4] sm:$0xf] }
  0xbf   :  { %v9252_v8 = vld [vmem:[%s15892_s1 + $0x1540] sm:$0xf]  ;;  %v10540_v10 = vld [vmem:[%s15892_s1 + $0x154c] sm:$0xf0]  ;;  %5157 = vmatpush.bf16.msrb.mxu0 %v9141_v3  ;;  %v9125_v24 = vor.u32 %v10508_v7, %v9124_v4  ;;  %v6646_v3 = vld [vmem:[%s15892_s1 + $0xf0] sm:$0xf0] }
  0xc0   :  { %v9380_v19 = vld [vmem:[%s15892_s1 + $0x1640] sm:$0xf]  ;;  %v10572_v20 = vld [vmem:[%s15892_s1 + $0x164c] sm:$0xf0]  ;;  %5170 = vmatpush.bf16.msrb.mxu1 %v9269_v5  ;;  %5183 = vmatpush.bf16.msrb.mxu2 %v9397_v6  ;;  %v9253_v30 = vor.u32 %v10540_v10, %v9252_v8  ;;  %v11991_v4 = vld [vmem:[#allocation1 + $0x24] sm:$0xff] }
  0xc1   :  { %v825_v21 = vld [vmem:[%s15893_s2] sm:$0xf]  ;;  %v10604_v23 = vld [vmem:[%s15892_s1 + $0x174c] sm:$0xf0]  ;;  %v9381_v31 = vor.u32 %v10572_v20, %v9380_v19  ;;  %5196 = vmatpush.bf16.msrb.mxu3 %v9525_v11  ;;  %v11993_v5 = vld [vmem:[#allocation1 + $0x36] sm:$0xff] }
  0xc2   :  { %v9508_v22 = vld [vmem:[%s15892_s1 + $0x1740] sm:$0xf]  ;;  %v10504_v26 = vld [vmem:[%s15892_s1 + $0x142c] sm:$0xf0]  ;;  %v827_v35 = vperm.slane %v825_v21, 0 }
  0xc3   :  { %v9108_v25 = vld [vmem:[%s15892_s1 + $0x1420] sm:$0xf]  ;;  %v10536_v33 = vld [vmem:[%s15892_s1 + $0x152c] sm:$0xf0]  ;;  %v9509_v36 = vor.u32 %v10604_v23, %v9508_v22  ;;  %5158 = vmatpush.bf16.msrb.mxu0 %v9125_v24  ;;  %v24_v10 = vld [vmem:[%s15891_s0 + $0x18] sm:$0x1] }
  0xc4   :  { %v9236_v32 = vld [vmem:[%s15892_s1 + $0x1520] sm:$0xf]  ;;  %v10568_v38 = vld [vmem:[%s15892_s1 + $0x162c] sm:$0xf0]  ;;  %v9109_v43 = vor.u32 %v10504_v26, %v9108_v25  ;;  %5171 = vmatpush.bf16.msrb.mxu1 %v9253_v30  ;;  %5184 = vmatpush.bf16.msrb.mxu2 %v9381_v31  ;;  %v4903_v59 = vadd.f32 %v4902_v52, %v827_v35  ;;  %v9918_v19 = vld [vmem:[%s15892_s1 + $0x1e4] sm:$0xf]  ;;  %v4928_v25 = vpop.f32.mrf.mxu2 }
  0xc5   :  { %v9364_v37 = vld [vmem:[%s15892_s1 + $0x1620] sm:$0xf]  ;;  %v10600_v40 = vld [vmem:[%s15892_s1 + $0x172c] sm:$0xf0]  ;;  %v9237_v53 = vor.u32 %v10536_v33, %v9236_v32  ;;  %5197 = vmatpush.bf16.msrb.mxu3 %v9509_v36  ;;  %v6774_v20 = vld [vmem:[%s15892_s1 + $0x1f0] sm:$0xf0]  ;;  %v4941_v32 = vpop.f32.mrf.mxu3  ;;  %v6649_v33 = vor.u32 %v9886_v63, %v6646_v3 }
  0xc6   :  { %v9492_v39 = vld [vmem:[%s15892_s1 + $0x1720] sm:$0xf]  ;;  %v10500_v42 = vld [vmem:[%s15892_s1 + $0x140c] sm:$0xf0]  ;;  %v9365_v54 = vor.u32 %v10568_v38, %v9364_v37  ;;  %v4916_v8 = vadd.f32 %v4915_v61, %v4903_v59  ;;  %v9950_v23 = vld [vmem:[%s15892_s1 + $0x2e4] sm:$0xf]  ;;  %v6777_v35 = vor.u32 %v9918_v19, %v6774_v20 }
  0xc7   :  { %v9092_v41 = vld [vmem:[%s15892_s1 + $0x1400] sm:$0xf]  ;;  %v10532_v45 = vld [vmem:[%s15892_s1 + $0x150c] sm:$0xf0]  ;;  %v9493_v62 = vor.u32 %v10600_v40, %v9492_v39  ;;  %5159 = vmatpush.bf16.msrb.mxu0 %v9109_v43  ;;  %v6902_v24 = vld [vmem:[%s15892_s1 + $0x2f0] sm:$0xf0] }
  0xc8   :  { %v9220_v44 = vld [vmem:[%s15892_s1 + $0x1500] sm:$0xf]  ;;  %v10564_v51 = vld [vmem:[%s15892_s1 + $0x160c] sm:$0xf0]  ;;  %v9093_v11 = vor.u32 %v10500_v42, %v9092_v41  ;;  %5172 = vmatpush.bf16.msrb.mxu1 %v9237_v53  ;;  %5185 = vmatpush.bf16.msrb.mxu2 %v9365_v54  ;;  %v4929_v31 = vadd.f32 %v4928_v25, %v4916_v8  ;;  %v9882_v38 = vld [vmem:[%s15892_s1 + $0xc4] sm:$0xf]  ;;  %v6905_v39 = vor.u32 %v9950_v23, %v6902_v24 }
  0xc9   :  { %v9348_v50 = vld [vmem:[%s15892_s1 + $0x1600] sm:$0xf]  ;;  %v10596_v56 = vld [vmem:[%s15892_s1 + $0x170c] sm:$0xf0]  ;;  %v9221_v21 = vor.u32 %v10532_v45, %v9220_v44  ;;  %5198 = vmatpush.bf16.msrb.mxu3 %v9493_v62  ;;  %v6630_v40 = vld [vmem:[%s15892_s1 + $0xd0] sm:$0xf0]  ;;  %v4904_v44 = vpop.f32.mrf.mxu0 }
  0xca   :  { %v9476_v55 = vld [vmem:[%s15892_s1 + $0x1700] sm:$0xf]  ;;  %v10656_v58 = vld [vmem:[%s15892_s1 + $0x18ec] sm:$0xf0]  ;;  %v9349_v22 = vor.u32 %v10564_v51, %v9348_v50  ;;  %v9914_v41 = vld [vmem:[%s15892_s1 + $0x1c4] sm:$0xf]  ;;  %v4942_v43 = vadd.f32 %v4941_v32, %v4929_v31  ;;  %v4917_v51 = vpop.f32.mrf.mxu1  ;;  %v6633_v53 = vor.u32 %v9882_v38, %v6630_v40 }
  0xcb   :  { %v9716_v57 = vld [vmem:[%s15892_s1 + $0x18e0] sm:$0xf]  ;;  %v11995_v6 = vld [vmem:[#allocation1 + $0x2d] sm:$0xff]  ;;  %v9477_v26 = vor.u32 %v10596_v56, %v9476_v55  ;;  %5160 = vmatpush.bf16.msrb.mxu0 %v9093_v11  ;;  %v9946_v45 = vld [vmem:[%s15892_s1 + $0x2c4] sm:$0xf] }
  0xcc   :  { %v11997_v7 = vld [vmem:[#allocation1 + $0x3f] sm:$0xff]  ;;  %v9717_v30 = vor.u32 %v10656_v58, %v9716_v57  ;;  %v10652_v37 = vld [vmem:[%s15892_s1 + $0x18cc] sm:$0xf0]  ;;  %v6758_v42 = vld [vmem:[%s15892_s1 + $0x1d0] sm:$0xf0]  ;;  %5173 = vmatpush.bf16.msrb.mxu1 %v9221_v21  ;;  %5186 = vmatpush.bf16.msrb.mxu2 %v9349_v22  ;;  %v4930_v8 = vpop.f32.mrf.mxu2 }
  0xcd   :  { %866 = vst [vmem:[#allocation1] ss:$9 sm:$0xff] %v24_v10  ;;  %v9700_v36 = vld [vmem:[%s15892_s1 + $0x18c0] sm:$0xf]  ;;  %v6886_v50 = vld [vmem:[%s15892_s1 + $0x2d0] sm:$0xf0]  ;;  %5199 = vmatpush.bf16.msrb.mxu3 %v9477_v26  ;;  %v6761_v54 = vor.u32 %v9914_v41, %v6758_v42  ;;  %v4943_v11 = vpop.f32.mrf.mxu3 }
  0xce   :  { %v9701_v52 = vor.u32 %v10652_v37, %v9700_v36  ;;  %v9684_v55 = vld [vmem:[%s15892_s1 + $0x18a0] sm:$0xf]  ;;  %v10648_v56 = vld [vmem:[%s15892_s1 + $0x18ac] sm:$0xf0]  ;;  %v9878_v57 = vld [vmem:[%s15892_s1 + $0xa4] sm:$0xf]  ;;  %5161 = vmatmul.bf16.vlgmr.msrb.gmra.mxu0 %v11991_v4  ;;  %v6889_v58 = vor.u32 %v9946_v45, %v6886_v50 }
  0xcf   :  { %5205 = vmatpush.bf16.msra.mxu0 %v9717_v30  ;;  %v6614_v59 = vld [vmem:[%s15892_s1 + $0xb0] sm:$0xf0]  ;;  %v9910_v61 = vld [vmem:[%s15892_s1 + $0x1a4] sm:$0xf]  ;;  %5187 = vmatmul.bf16.vlgmr.msrb.gmra.mxu2 %v11993_v5  ;;  %v9685_v10 = vor.u32 %v10648_v56, %v9684_v55  ;;  %v9668_v21 = vld [vmem:[%s15892_s1 + $0x1880] sm:$0xf] }
  0xd0   :  { %5218 = vmatpush.bf16.msra.mxu1 %v6649_v33  ;;  %5231 = vmatpush.bf16.msra.mxu2 %v6777_v35  ;;  %v6742_v62 = vld [vmem:[%s15892_s1 + $0x1b0] sm:$0xf0]  ;;  %v9942_v63 = vld [vmem:[%s15892_s1 + $0x2a4] sm:$0xf]  ;;  %v6617_v19 = vor.u32 %v9878_v57, %v6614_v59  ;;  %v10644_v22 = vld [vmem:[%s15892_s1 + $0x188c] sm:$0xf0] }
  0xd1   :  { %5244 = vmatpush.bf16.msra.mxu3 %v6905_v39  ;;  %5174 = vmatmul.bf16.vlgmr.msrb.gmra.mxu1 %v11995_v6  ;;  %v6870_v3 = vld [vmem:[%s15892_s1 + $0x2b0] sm:$0xf0]  ;;  %v6745_v20 = vor.u32 %v9910_v61, %v6742_v62  ;;  %v9874_v23 = vld [vmem:[%s15892_s1 + $0x84] sm:$0xf]  ;;  %v9669_v33 = vor.u32 %v10644_v22, %v9668_v21  ;;  %v4954_v35 = vpop.f32.mrf.mxu0  ;;  %v9652_v38 = vld [vmem:[%s15892_s1 + $0x1860] sm:$0xf] }
  0xd2   :  { %5200 = vmatmul.bf16.vlgmr.msrb.gmra.mxu3 %v11997_v7  ;;  %v6873_v24 = vor.u32 %v9942_v63, %v6870_v3  ;;  %v6598_v25 = vld [vmem:[%s15892_s1 + $0x90] sm:$0xf0]  ;;  %v9906_v26 = vld [vmem:[%s15892_s1 + $0x184] sm:$0xf]  ;;  %v10640_v39 = vld [vmem:[%s15892_s1 + $0x186c] sm:$0xf0]  ;;  %v4955_v41 = vadd.f32 %v4954_v35, %v4942_v43  ;;  %v4967_v42 = vpop.f32.mrf.mxu1 }
  0xd3   :  { %5206 = vmatpush.bf16.msra.mxu0 %v9701_v52  ;;  %v6726_v30 = vld [vmem:[%s15892_s1 + $0x190] sm:$0xf0]  ;;  %v9938_v31 = vld [vmem:[%s15892_s1 + $0x284] sm:$0xf]  ;;  %v6601_v36 = vor.u32 %v9874_v23, %v6598_v25  ;;  %v9636_v57 = vld [vmem:[%s15892_s1 + $0x1840] sm:$0xf] }
  0xd4   :  { %5219 = vmatpush.bf16.msra.mxu1 %v6633_v53  ;;  %5232 = vmatpush.bf16.msra.mxu2 %v6761_v54  ;;  %v6854_v32 = vld [vmem:[%s15892_s1 + $0x290] sm:$0xf0]  ;;  %v6729_v37 = vor.u32 %v9906_v26, %v6726_v30  ;;  %v9870_v40 = vld [vmem:[%s15892_s1 + $0x64] sm:$0xf]  ;;  %v4968_v53 = vadd.f32 %v4967_v42, %v4955_v41  ;;  %v9653_v54 = vor.u32 %v10640_v39, %v9652_v38  ;;  %v4980_v61 = vpop.f32.mrf.mxu2  ;;  %v9620_v26 = vld [vmem:[%s15892_s1 + $0x1820] sm:$0xf] }
  0xd5   :  { %5245 = vmatpush.bf16.msra.mxu3 %v6889_v58  ;;  %v6857_v44 = vor.u32 %v9938_v31, %v6854_v32  ;;  %v6582_v45 = vld [vmem:[%s15892_s1 + $0x70] sm:$0xf0]  ;;  %v9902_v50 = vld [vmem:[%s15892_s1 + $0x164] sm:$0xf]  ;;  %v10636_v58 = vld [vmem:[%s15892_s1 + $0x184c] sm:$0xf0]  ;;  %v4993_v11 = vpop.f32.mrf.mxu3 }
  0xd6   :  { %v6710_v51 = vld [vmem:[%s15892_s1 + $0x170] sm:$0xf0]  ;;  %v9934_v52 = vld [vmem:[%s15892_s1 + $0x264] sm:$0xf]  ;;  %v6585_v55 = vor.u32 %v9870_v40, %v6582_v45  ;;  %v9637_v21 = vor.u32 %v10636_v58, %v9636_v57  ;;  %v10632_v30 = vld [vmem:[%s15892_s1 + $0x182c] sm:$0xf0] }
  0xd7   :  { %5207 = vmatpush.bf16.msra.mxu0 %v9685_v10  ;;  %v6838_v43 = vld [vmem:[%s15892_s1 + $0x270] sm:$0xf0]  ;;  %v6713_v56 = vor.u32 %v9902_v50, %v6710_v51  ;;  %v9866_v59 = vld [vmem:[%s15892_s1 + $0x44] sm:$0xf]  ;;  %v4981_v10 = vadd.f32 %v4980_v61, %v4968_v53  ;;  %v9621_v40 = vor.u32 %v10632_v30, %v9620_v26  ;;  %v9604_v41 = vld [vmem:[%s15892_s1 + $0x1800] sm:$0xf] }
  0xd8   :  { %5220 = vmatpush.bf16.msra.mxu1 %v6617_v19  ;;  %5233 = vmatpush.bf16.msra.mxu2 %v6745_v20  ;;  %v6841_v62 = vor.u32 %v9934_v52, %v6838_v43  ;;  %v6566_v63 = vld [vmem:[%s15892_s1 + $0x50] sm:$0xf0]  ;;  %v9898_v3 = vld [vmem:[%s15892_s1 + $0x144] sm:$0xf]  ;;  %v10628_v42 = vld [vmem:[%s15892_s1 + $0x180c] sm:$0xf0] }
  0xd9   :  { %5246 = vmatpush.bf16.msra.mxu3 %v6873_v24  ;;  %v6694_v8 = vld [vmem:[%s15892_s1 + $0x150] sm:$0xf0]  ;;  %v9930_v19 = vld [vmem:[%s15892_s1 + $0x244] sm:$0xf]  ;;  %v12138_v22 = vadd.f32 %v4993_v11, %v4981_v10  ;;  %v4956_v23 = vpop.f32.mrf.mxu0  ;;  %v6569_v24 = vor.u32 %v9866_v59, %v6566_v63 }
  0xda   :  { %v6822_v20 = vld [vmem:[%s15892_s1 + $0x250] sm:$0xf0]  ;;  %v6697_v25 = vor.u32 %v9898_v3, %v6694_v8  ;;  %v9862_v31 = vld [vmem:[%s15892_s1 + $0x24] sm:$0xf]  ;;  %v4969_v32 = vpop.f32.mrf.mxu1 }
  0xdb   :  { %5208 = vmatpush.bf16.msra.mxu0 %v9669_v33  ;;  %v6825_v33 = vor.u32 %v9930_v19, %v6822_v20  ;;  %v6550_v35 = vld [vmem:[%s15892_s1 + $0x30] sm:$0xf0]  ;;  %v9926_v38 = vld [vmem:[%s15892_s1 + $0x224] sm:$0xf] }
  0xdc   :  { %5221 = vmatpush.bf16.msra.mxu1 %v6601_v36  ;;  %5234 = vmatpush.bf16.msra.mxu2 %v6729_v37  ;;  %v9894_v36 = vld [vmem:[%s15892_s1 + $0x124] sm:$0xf]  ;;  %v6678_v37 = vld [vmem:[%s15892_s1 + $0x130] sm:$0xf0]  ;;  %v4982_v43 = vpop.f32.mrf.mxu2 }
  0xdd   :  { %5247 = vmatpush.bf16.msra.mxu3 %v6857_v44  ;;  %v6806_v39 = vld [vmem:[%s15892_s1 + $0x230] sm:$0xf0]  ;;  %v6553_v44 = vor.u32 %v9862_v31, %v6550_v35  ;;  %v6681_v45 = vor.u32 %v9894_v36, %v6678_v37  ;;  %v9858_v50 = vld [vmem:[%s15892_s1 + $0x4] sm:$0xf]  ;;  %v4995_v57 = vpop.f32.mrf.mxu3 }
  0xde   :  { %v6534_v51 = vld [vmem:[%s15892_s1 + $0x10] sm:$0xf0]  ;;  %v9890_v52 = vld [vmem:[%s15892_s1 + $0x104] sm:$0xf]  ;;  %v6809_v53 = vor.u32 %v9926_v38, %v6806_v39 }
  0xdf   :  { %5209 = vmatpush.bf16.msra.mxu0 %v9653_v54  ;;  %v6662_v54 = vld [vmem:[%s15892_s1 + $0x110] sm:$0xf0]  ;;  %v9982_v58 = vld [vmem:[%s15892_s1 + $0x3e4] sm:$0xf]  ;;  %v6537_v10 = vor.u32 %v9858_v50, %v6534_v51 }
  0xe0   :  { %5222 = vmatpush.bf16.msra.mxu1 %v6585_v55  ;;  %5235 = vmatpush.bf16.msra.mxu2 %v6713_v56  ;;  %v9922_v55 = vld [vmem:[%s15892_s1 + $0x204] sm:$0xf]  ;;  %v6790_v56 = vld [vmem:[%s15892_s1 + $0x210] sm:$0xf0]  ;;  %v6665_v11 = vor.u32 %v9890_v52, %v6662_v54 }
  0xe1   :  { %5248 = vmatpush.bf16.msra.mxu3 %v6841_v62  ;;  %v7030_v59 = vld [vmem:[%s15892_s1 + $0x3f0] sm:$0xf0]  ;;  %v10014_v61 = vld [vmem:[%s15892_s1 + $0x4e4] sm:$0xf]  ;;  %v9605_v62 = vor.u32 %v10628_v42, %v9604_v41 }
  0xe2   :  { %v7158_v63 = vld [vmem:[%s15892_s1 + $0x4f0] sm:$0xf0]  ;;  %v10046_v3 = vld [vmem:[%s15892_s1 + $0x5e4] sm:$0xf]  ;;  %v7033_v23 = vor.u32 %v9982_v58, %v7030_v59 }
  0xe3   :  { %5210 = vmatpush.bf16.msra.mxu0 %v9637_v21  ;;  %v7286_v8 = vld [vmem:[%s15892_s1 + $0x5f0] sm:$0xf0]  ;;  %v10078_v19 = vld [vmem:[%s15892_s1 + $0x6e4] sm:$0xf]  ;;  %v6793_v21 = vor.u32 %v9922_v55, %v6790_v56 }
  0xe4   :  { %5223 = vmatpush.bf16.msra.mxu1 %v6569_v24  ;;  %5236 = vmatpush.bf16.msra.mxu2 %v6697_v25  ;;  %v7414_v20 = vld [vmem:[%s15892_s1 + $0x6f0] sm:$0xf0]  ;;  %v7161_v24 = vor.u32 %v10014_v61, %v7158_v63  ;;  %v7289_v25 = vor.u32 %v10046_v3, %v7286_v8  ;;  %v9978_v26 = vld [vmem:[%s15892_s1 + $0x3c4] sm:$0xf] }
  0xe5   :  { %5249 = vmatpush.bf16.msra.mxu3 %v6825_v33  ;;  %v7014_v30 = vld [vmem:[%s15892_s1 + $0x3d0] sm:$0xf0]  ;;  %v10010_v31 = vld [vmem:[%s15892_s1 + $0x4c4] sm:$0xf]  ;;  %v7417_v32 = vor.u32 %v10078_v19, %v7414_v20 }
  0xe6   :  { %v7142_v33 = vld [vmem:[%s15892_s1 + $0x4d0] sm:$0xf0]  ;;  %v10042_v35 = vld [vmem:[%s15892_s1 + $0x5c4] sm:$0xf] }
  0xe7   :  { %5211 = vmatpush.bf16.msra.mxu0 %v9621_v40  ;;  %v7270_v36 = vld [vmem:[%s15892_s1 + $0x5d0] sm:$0xf0]  ;;  %v867_v37 = vld [vmem:[#allocation1] sm:$0xff]  ;;  %v7017_v40 = vor.u32 %v9978_v26, %v7014_v30  ;;  %v7145_v41 = vor.u32 %v10010_v31, %v7142_v33 }
  0xe8   :  { %5224 = vmatpush.bf16.msra.mxu1 %v6553_v44  ;;  %5237 = vmatpush.bf16.msra.mxu2 %v6681_v45  ;;  %v10074_v38 = vld [vmem:[%s15892_s1 + $0x6c4] sm:$0xf]  ;;  %v7398_v39 = vld [vmem:[%s15892_s1 + $0x6d0] sm:$0xf0]  ;;  %v7273_v42 = vor.u32 %v10042_v35, %v7270_v36 }
  0xe9   :  { %5250 = vmatpush.bf16.msra.mxu3 %v6809_v53  ;;  %v9974_v44 = vld [vmem:[%s15892_s1 + $0x3a4] sm:$0xf]  ;;  %v6998_v45 = vld [vmem:[%s15892_s1 + $0x3b0] sm:$0xf0]  ;;  %v7401_v51 = vor.u32 %v10074_v38, %v7398_v39 }
  0xea   :  { %v10006_v50 = vld [vmem:[%s15892_s1 + $0x4a4] sm:$0xf]  ;;  %v7126_v52 = vld [vmem:[%s15892_s1 + $0x4b0] sm:$0xf0]  ;;  %v7001_v56 = vor.u32 %v9974_v44, %v6998_v45 }
  0xeb   :  { %5212 = vmatpush.bf16.msra.mxu0 %v9605_v62  ;;  %v10038_v43 = vld [vmem:[%s15892_s1 + $0x5a4] sm:$0xf]  ;;  %v7254_v53 = vld [vmem:[%s15892_s1 + $0x5b0] sm:$0xf0]  ;;  %v7129_v57 = vor.u32 %v10006_v50, %v7126_v52 }
  0xec   :  { %5225 = vmatpush.bf16.msra.mxu1 %v6537_v10  ;;  %5238 = vmatpush.bf16.msra.mxu2 %v6665_v11  ;;  %v10070_v54 = vld [vmem:[%s15892_s1 + $0x6a4] sm:$0xf]  ;;  %v7382_v55 = vld [vmem:[%s15892_s1 + $0x6b0] sm:$0xf0]  ;;  %v7257_v58 = vor.u32 %v10038_v43, %v7254_v53  ;;  %v5006_v11 = vpop.f32.mrf.mxu0 }
  0xed   :  { %5251 = vmatpush.bf16.msra.mxu3 %v6793_v21  ;;  %v9970_v59 = vld [vmem:[%s15892_s1 + $0x384] sm:$0xf]  ;;  %v6982_v61 = vld [vmem:[%s15892_s1 + $0x390] sm:$0xf0]  ;;  %v7385_v63 = vor.u32 %v10070_v54, %v7382_v55  ;;  %v5007_v21 = vadd.f32 %v5006_v11, %v12138_v22 }
  0xee   :  { %5213 = vmatmul.bf16.vlgmr.msra.gmra.mxu0 %v867_v37  ;;  %v10002_v62 = vld [vmem:[%s15892_s1 + $0x484] sm:$0xf]  ;;  %v7110_v3 = vld [vmem:[%s15892_s1 + $0x490] sm:$0xf0] }
  0xef   :  { %5257 = vmatpush.bf16.msrb.mxu0 %v7033_v23  ;;  %5239 = vmatmul.bf16.vlgmr.msra.gmra.mxu2 %v11085_v34  ;;  %v10034_v8 = vld [vmem:[%s15892_s1 + $0x584] sm:$0xf]  ;;  %v7238_v10 = vld [vmem:[%s15892_s1 + $0x590] sm:$0xf0]  ;;  %v6985_v23 = vor.u32 %v9970_v59, %v6982_v61  ;;  %v5032_v52 = vpop.f32.mrf.mxu2 }
  0xf0   :  { %5270 = vmatpush.bf16.msrb.mxu1 %v7161_v24  ;;  %5283 = vmatpush.bf16.msrb.mxu2 %v7289_v25  ;;  %v10066_v19 = vld [vmem:[%s15892_s1 + $0x684] sm:$0xf]  ;;  %v7366_v20 = vld [vmem:[%s15892_s1 + $0x690] sm:$0xf0]  ;;  %v5019_v24 = vpop.f32.mrf.mxu1  ;;  %v7113_v25 = vor.u32 %v10002_v62, %v7110_v3  ;;  %v7241_v26 = vor.u32 %v10034_v8, %v7238_v10 }
  0xf1   :  { %5296 = vmatpush.bf16.msrb.mxu3 %v7417_v32  ;;  %5226 = vmatmul.bf16.vlgmr.msra.gmra.mxu1 %v11075_v28  ;;  %v9966_v30 = vld [vmem:[%s15892_s1 + $0x364] sm:$0xf]  ;;  %v6966_v31 = vld [vmem:[%s15892_s1 + $0x370] sm:$0xf0]  ;;  %v7369_v22 = vor.u32 %v10066_v19, %v7366_v20  ;;  %v5020_v33 = vadd.f32 %v5019_v24, %v5007_v21 }
  0xf2   :  { %5252 = vmatmul.bf16.vlgmr.msra.gmra.mxu3 %v11073_v27  ;;  %v9998_v32 = vld [vmem:[%s15892_s1 + $0x464] sm:$0xf]  ;;  %v7094_v35 = vld [vmem:[%s15892_s1 + $0x470] sm:$0xf0] }
  0xf3   :  { %5258 = vmatpush.bf16.msrb.mxu0 %v7017_v40  ;;  %v10030_v36 = vld [vmem:[%s15892_s1 + $0x564] sm:$0xf]  ;;  %v7222_v37 = vld [vmem:[%s15892_s1 + $0x570] sm:$0xf0]  ;;  %v6969_v40 = vor.u32 %v9966_v30, %v6966_v31  ;;  %v5033_v55 = vadd.f32 %v5032_v52, %v5020_v33 }
  0xf4   :  { %5271 = vmatpush.bf16.msrb.mxu1 %v7145_v41  ;;  %5284 = vmatpush.bf16.msrb.mxu2 %v7273_v42  ;;  %v10062_v38 = vld [vmem:[%s15892_s1 + $0x664] sm:$0xf]  ;;  %v7350_v39 = vld [vmem:[%s15892_s1 + $0x670] sm:$0xf0]  ;;  %v7097_v41 = vor.u32 %v9998_v32, %v7094_v35  ;;  %v7225_v42 = vor.u32 %v10030_v36, %v7222_v37  ;;  %v5008_v59 = vpop.f32.mrf.mxu0 }
  0xf5   :  { %5297 = vmatpush.bf16.msrb.mxu3 %v7401_v51  ;;  %v9962_v44 = vld [vmem:[%s15892_s1 + $0x344] sm:$0xf]  ;;  %v6950_v45 = vld [vmem:[%s15892_s1 + $0x350] sm:$0xf0]  ;;  %v7353_v51 = vor.u32 %v10062_v38, %v7350_v39 }
  0xf6   :  { %v9994_v50 = vld [vmem:[%s15892_s1 + $0x444] sm:$0xf]  ;;  %v7078_v43 = vld [vmem:[%s15892_s1 + $0x450] sm:$0xf0]  ;;  %v6953_v61 = vor.u32 %v9962_v44, %v6950_v45 }
  0xf7   :  { %5259 = vmatpush.bf16.msrb.mxu0 %v7001_v56  ;;  %v10026_v53 = vld [vmem:[%s15892_s1 + $0x544] sm:$0xf]  ;;  %v7206_v54 = vld [vmem:[%s15892_s1 + $0x550] sm:$0xf0]  ;;  %v5045_v56 = vpop.f32.mrf.mxu3  ;;  %v7081_v3 = vor.u32 %v9994_v50, %v7078_v43 }
  0xf8   :  { %5272 = vmatpush.bf16.msrb.mxu1 %v7129_v57  ;;  %5285 = vmatpush.bf16.msrb.mxu2 %v7257_v58  ;;  %v10058_v57 = vld [vmem:[%s15892_s1 + $0x644] sm:$0xf]  ;;  %v7334_v58 = vld [vmem:[%s15892_s1 + $0x650] sm:$0xf0]  ;;  %v5021_v62 = vpop.f32.mrf.mxu1  ;;  %v7209_v8 = vor.u32 %v10026_v53, %v7206_v54 }
  0xf9   :  { %5298 = vmatpush.bf16.msrb.mxu3 %v7385_v63  ;;  %v12336_v63 = vadd.f32 %v5045_v56, %v5033_v55  ;;  %v9958_v10 = vld [vmem:[%s15892_s1 + $0x324] sm:$0xf]  ;;  %v6934_v11 = vld [vmem:[%s15892_s1 + $0x330] sm:$0xf0]  ;;  %v7337_v20 = vor.u32 %v10058_v57, %v7334_v58 }
  0xfa   :  { %v9990_v19 = vld [vmem:[%s15892_s1 + $0x424] sm:$0xf]  ;;  %v7062_v21 = vld [vmem:[%s15892_s1 + $0x430] sm:$0xf0]  ;;  %v6937_v30 = vor.u32 %v9958_v10, %v6934_v11 }
  0xfb   :  { %5260 = vmatpush.bf16.msrb.mxu0 %v6985_v23  ;;  %v10022_v23 = vld [vmem:[%s15892_s1 + $0x524] sm:$0xf]  ;;  %v7190_v24 = vld [vmem:[%s15892_s1 + $0x530] sm:$0xf0] }
  0xfc   :  { %5273 = vmatpush.bf16.msrb.mxu1 %v7113_v25  ;;  %5286 = vmatpush.bf16.msrb.mxu2 %v7241_v26  ;;  %v10054_v25 = vld [vmem:[%s15892_s1 + $0x624] sm:$0xf]  ;;  %v7318_v26 = vld [vmem:[%s15892_s1 + $0x630] sm:$0xf0]  ;;  %v7193_v33 = vor.u32 %v10022_v23, %v7190_v24 }
  0xfd   :  { %5299 = vmatpush.bf16.msrb.mxu3 %v7369_v22  ;;  %v9954_v31 = vld [vmem:[%s15892_s1 + $0x304] sm:$0xf]  ;;  %v6918_v32 = vld [vmem:[%s15892_s1 + $0x310] sm:$0xf0]  ;;  %v7065_v22 = vor.u32 %v9990_v19, %v7062_v21  ;;  %v7321_v38 = vor.u32 %v10054_v25, %v7318_v26 }
  0xfe   :  { %v9986_v35 = vld [vmem:[%s15892_s1 + $0x404] sm:$0xf]  ;;  %v7046_v36 = vld [vmem:[%s15892_s1 + $0x410] sm:$0xf0]  ;;  %v6921_v52 = vor.u32 %v9954_v31, %v6918_v32 }
  0xff   :  { %5261 = vmatpush.bf16.msrb.mxu0 %v6969_v40  ;;  %v10018_v37 = vld [vmem:[%s15892_s1 + $0x504] sm:$0xf]  ;;  %v7174_v39 = vld [vmem:[%s15892_s1 + $0x510] sm:$0xf0]  ;;  %v7049_v55 = vor.u32 %v9986_v35, %v7046_v36 }
 0x100   :  { %5274 = vmatpush.bf16.msrb.mxu1 %v7097_v41  ;;  %5287 = vmatpush.bf16.msrb.mxu2 %v7225_v42  ;;  %v10050_v40 = vld [vmem:[%s15892_s1 + $0x604] sm:$0xf]  ;;  %v7302_v41 = vld [vmem:[%s15892_s1 + $0x610] sm:$0xf0]  ;;  %v5034_v42 = vpop.f32.mrf.mxu2  ;;  %v7177_v56 = vor.u32 %v10018_v37, %v7174_v39 }
 0x101   :  { %5300 = vmatpush.bf16.msrb.mxu3 %v7353_v51  ;;  %v10110_v44 = vld [vmem:[%s15892_s1 + $0x7e4] sm:$0xf]  ;;  %v7542_v45 = vld [vmem:[%s15892_s1 + $0x7f0] sm:$0xf0]  ;;  %v5047_v51 = vpop.f32.mrf.mxu3  ;;  %v7305_v59 = vor.u32 %v10050_v40, %v7302_v41 }
 0x102   :  { %v10142_v50 = vld [vmem:[%s15892_s1 + $0x8e4] sm:$0xf]  ;;  %v7670_v43 = vld [vmem:[%s15892_s1 + $0x8f0] sm:$0xf0] }
 0x103   :  { %5262 = vmatpush.bf16.msrb.mxu0 %v6953_v61  ;;  %v10174_v53 = vld [vmem:[%s15892_s1 + $0x9e4] sm:$0xf]  ;;  %v7798_v54 = vld [vmem:[%s15892_s1 + $0x9f0] sm:$0xf0]  ;;  %v7545_v61 = vor.u32 %v10110_v44, %v7542_v45  ;;  %v7673_v62 = vor.u32 %v10142_v50, %v7670_v43 }
 0x104   :  { %5275 = vmatpush.bf16.msrb.mxu1 %v7081_v3  ;;  %5288 = vmatpush.bf16.msrb.mxu2 %v7209_v8  ;;  %v10206_v57 = vld [vmem:[%s15892_s1 + $0xae4] sm:$0xf]  ;;  %v7926_v58 = vld [vmem:[%s15892_s1 + $0xaf0] sm:$0xf0]  ;;  %v7801_v3 = vor.u32 %v10174_v53, %v7798_v54 }
 0x105   :  { %5301 = vmatpush.bf16.msrb.mxu3 %v7337_v20  ;;  %v10106_v8 = vld [vmem:[%s15892_s1 + $0x7c4] sm:$0xf]  ;;  %v7526_v10 = vld [vmem:[%s15892_s1 + $0x7d0] sm:$0xf0]  ;;  %v7929_v19 = vor.u32 %v10206_v57, %v7926_v58 }
 0x106   :  { %v10138_v11 = vld [vmem:[%s15892_s1 + $0x8c4] sm:$0xf]  ;;  %v7654_v20 = vld [vmem:[%s15892_s1 + $0x8d0] sm:$0xf0]  ;;  %v7529_v26 = vor.u32 %v10106_v8, %v7526_v10 }
 0x107   :  { %5263 = vmatpush.bf16.msrb.mxu0 %v6937_v30  ;;  %v10170_v21 = vld [vmem:[%s15892_s1 + $0x9c4] sm:$0xf]  ;;  %v7782_v23 = vld [vmem:[%s15892_s1 + $0x9d0] sm:$0xf0]  ;;  %v7657_v30 = vor.u32 %v10138_v11, %v7654_v20 }
 0x108   :  { %5276 = vmatpush.bf16.msrb.mxu1 %v7065_v22  ;;  %5289 = vmatpush.bf16.msrb.mxu2 %v7193_v33  ;;  %v10202_v24 = vld [vmem:[%s15892_s1 + $0xac4] sm:$0xf]  ;;  %v7910_v25 = vld [vmem:[%s15892_s1 + $0xad0] sm:$0xf0]  ;;  %v7785_v31 = vor.u32 %v10170_v21, %v7782_v23 }
 0x109   :  { %5302 = vmatpush.bf16.msrb.mxu3 %v7321_v38  ;;  %v10102_v32 = vld [vmem:[%s15892_s1 + $0x7a4] sm:$0xf]  ;;  %v7510_v22 = vld [vmem:[%s15892_s1 + $0x7b0] sm:$0xf0]  ;;  %v7913_v35 = vor.u32 %v10202_v24, %v7910_v25 }
 0x10a   :  { %v10134_v33 = vld [vmem:[%s15892_s1 + $0x8a4] sm:$0xf]  ;;  %v7638_v36 = vld [vmem:[%s15892_s1 + $0x8b0] sm:$0xf0]  ;;  %v7513_v41 = vor.u32 %v10102_v32, %v7510_v22 }
 0x10b   :  { %5264 = vmatpush.bf16.msrb.mxu0 %v6921_v52  ;;  %v10166_v37 = vld [vmem:[%s15892_s1 + $0x9a4] sm:$0xf]  ;;  %v7766_v38 = vld [vmem:[%s15892_s1 + $0x9b0] sm:$0xf0]  ;;  %v7641_v42 = vor.u32 %v10134_v33, %v7638_v36 }
 0x10c   :  { %5277 = vmatpush.bf16.msrb.mxu1 %v7049_v55  ;;  %5290 = vmatpush.bf16.msrb.mxu2 %v7177_v56  ;;  %v10198_v39 = vld [vmem:[%s15892_s1 + $0xaa4] sm:$0xf]  ;;  %v7894_v40 = vld [vmem:[%s15892_s1 + $0xab0] sm:$0xf0]  ;;  %v7769_v44 = vor.u32 %v10166_v37, %v7766_v38  ;;  %v5058_v55 = vpop.f32.mrf.mxu0 }
 0x10d   :  { %5303 = vmatpush.bf16.msrb.mxu3 %v7305_v59  ;;  %v10098_v45 = vld [vmem:[%s15892_s1 + $0x784] sm:$0xf]  ;;  %v7494_v50 = vld [vmem:[%s15892_s1 + $0x790] sm:$0xf0]  ;;  %v7897_v52 = vor.u32 %v10198_v39, %v7894_v40  ;;  %v5059_v58 = vadd.f32 %v5058_v55, %v12336_v63 }
 0x10e   :  { %5265 = vmatmul.bf16.vlgmr.msrb.gmra.mxu0 %v11077_v29  ;;  %v10130_v51 = vld [vmem:[%s15892_s1 + $0x884] sm:$0xf]  ;;  %v7622_v43 = vld [vmem:[%s15892_s1 + $0x890] sm:$0xf0]  ;;  %v7497_v59 = vor.u32 %v10098_v45, %v7494_v50 }
 0x10f   :  { %5309 = vmatpush.bf16.msra.mxu0 %v7545_v61  ;;  %5291 = vmatmul.bf16.vlgmr.msrb.gmra.mxu2 %v11157_v2  ;;  %v10162_v53 = vld [vmem:[%s15892_s1 + $0x984] sm:$0xf]  ;;  %v7750_v54 = vld [vmem:[%s15892_s1 + $0x990] sm:$0xf0]  ;;  %v5071_v61 = vpop.f32.mrf.mxu1 }
 0x110   :  { %5322 = vmatpush.bf16.msra.mxu1 %v7673_v62  ;;  %5335 = vmatpush.bf16.msra.mxu2 %v7801_v3  ;;  %v10194_v56 = vld [vmem:[%s15892_s1 + $0xa84] sm:$0xf]  ;;  %v7878_v57 = vld [vmem:[%s15892_s1 + $0xa90] sm:$0xf0]  ;;  %v7625_v62 = vor.u32 %v10130_v51, %v7622_v43  ;;  %v7753_v3 = vor.u32 %v10162_v53, %v7750_v54 }
 0x111   :  { %5348 = vmatpush.bf16.msra.mxu3 %v7929_v19  ;;  %5278 = vmatmul.bf16.vlgmr.msrb.gmra.mxu1 %v11153_v0  ;;  %v10094_v8 = vld [vmem:[%s15892_s1 + $0x764] sm:$0xf]  ;;  %v7478_v10 = vld [vmem:[%s15892_s1 + $0x770] sm:$0xf0]  ;;  %v7881_v63 = vor.u32 %v10194_v56, %v7878_v57  ;;  %v5072_v19 = vadd.f32 %v5071_v61, %v5059_v58 }
 0x112   :  { %5304 = vmatmul.bf16.vlgmr.msrb.gmra.mxu3 %v11148_v60  ;;  %v10126_v11 = vld [vmem:[%s15892_s1 + $0x864] sm:$0xf]  ;;  %v7606_v20 = vld [vmem:[%s15892_s1 + $0x870] sm:$0xf0] }
 0x113   :  { %5310 = vmatpush.bf16.msra.mxu0 %v7529_v26  ;;  %v10158_v21 = vld [vmem:[%s15892_s1 + $0x964] sm:$0xf]  ;;  %v7734_v23 = vld [vmem:[%s15892_s1 + $0x970] sm:$0xf0]  ;;  %v7481_v26 = vor.u32 %v10094_v8, %v7478_v10 }
 0x114   :  { %5323 = vmatpush.bf16.msra.mxu1 %v7657_v30  ;;  %5336 = vmatpush.bf16.msra.mxu2 %v7785_v31  ;;  %v10190_v24 = vld [vmem:[%s15892_s1 + $0xa64] sm:$0xf]  ;;  %v7862_v25 = vld [vmem:[%s15892_s1 + $0xa70] sm:$0xf0]  ;;  %v7609_v30 = vor.u32 %v10126_v11, %v7606_v20  ;;  %v7737_v31 = vor.u32 %v10158_v21, %v7734_v23  ;;  %v5084_v36 = vpop.f32.mrf.mxu2  ;;  %v5060_v45 = vpop.f32.mrf.mxu0 }
 0x115   :  { %5349 = vmatpush.bf16.msra.mxu3 %v7913_v35  ;;  %v10090_v32 = vld [vmem:[%s15892_s1 + $0x744] sm:$0xf]  ;;  %v7462_v22 = vld [vmem:[%s15892_s1 + $0x750] sm:$0xf0]  ;;  %v7865_v35 = vor.u32 %v10190_v24, %v7862_v25  ;;  %v5085_v40 = vadd.f32 %v5084_v36, %v5072_v19 }
 0x116   :  { %v10122_v33 = vld [vmem:[%s15892_s1 + $0x844] sm:$0xf]  ;;  %v7590_v37 = vld [vmem:[%s15892_s1 + $0x850] sm:$0xf0]  ;;  %v7465_v50 = vor.u32 %v10090_v32, %v7462_v22 }
 0x117   :  { %5311 = vmatpush.bf16.msra.mxu0 %v7513_v41  ;;  %v10154_v38 = vld [vmem:[%s15892_s1 + $0x944] sm:$0xf]  ;;  %v7718_v39 = vld [vmem:[%s15892_s1 + $0x950] sm:$0xf0]  ;;  %v5097_v41 = vpop.f32.mrf.mxu3  ;;  %v5073_v51 = vpop.f32.mrf.mxu1  ;;  %v7593_v43 = vor.u32 %v10122_v33, %v7590_v37 }
 0x118   :  { %5324 = vmatpush.bf16.msra.mxu1 %v7641_v42  ;;  %5337 = vmatpush.bf16.msra.mxu2 %v7769_v44  ;;  %v10186_v42 = vld [vmem:[%s15892_s1 + $0xa44] sm:$0xf]  ;;  %v7846_v44 = vld [vmem:[%s15892_s1 + $0xa50] sm:$0xf0]  ;;  %v7721_v53 = vor.u32 %v10154_v38, %v7718_v39 }
 0x119   :  { %5350 = vmatpush.bf16.msra.mxu3 %v7897_v52  ;;  %v12535_v52 = vadd.f32 %v5097_v41, %v5085_v40  ;;  %v10086_v54 = vld [vmem:[%s15892_s1 + $0x724] sm:$0xf]  ;;  %v7446_v55 = vld [vmem:[%s15892_s1 + $0x730] sm:$0xf0]  ;;  %v7849_v57 = vor.u32 %v10186_v42, %v7846_v44 }
 0x11a   :  { %v10118_v56 = vld [vmem:[%s15892_s1 + $0x824] sm:$0xf]  ;;  %v7574_v58 = vld [vmem:[%s15892_s1 + $0x830] sm:$0xf0]  ;;  %v7449_v8 = vor.u32 %v10086_v54, %v7446_v55 }
 0x11b   :  { %5312 = vmatpush.bf16.msra.mxu0 %v7497_v59  ;;  %v10150_v59 = vld [vmem:[%s15892_s1 + $0x924] sm:$0xf]  ;;  %v7702_v61 = vld [vmem:[%s15892_s1 + $0x930] sm:$0xf0] }
 0x11c   :  { %5325 = vmatpush.bf16.msra.mxu1 %v7625_v62  ;;  %5338 = vmatpush.bf16.msra.mxu2 %v7753_v3  ;;  %v10182_v62 = vld [vmem:[%s15892_s1 + $0xa24] sm:$0xf]  ;;  %v7830_v3 = vld [vmem:[%s15892_s1 + $0xa30] sm:$0xf0]  ;;  %v7705_v19 = vor.u32 %v10150_v59, %v7702_v61 }
 0x11d   :  { %5351 = vmatpush.bf16.msra.mxu3 %v7881_v63  ;;  %v10082_v10 = vld [vmem:[%s15892_s1 + $0x704] sm:$0xf]  ;;  %v7430_v11 = vld [vmem:[%s15892_s1 + $0x710] sm:$0xf0]  ;;  %v7577_v63 = vor.u32 %v10118_v56, %v7574_v58  ;;  %v7833_v24 = vor.u32 %v10182_v62, %v7830_v3 }
 0x11e   :  { %v10114_v20 = vld [vmem:[%s15892_s1 + $0x804] sm:$0xf]  ;;  %v7558_v21 = vld [vmem:[%s15892_s1 + $0x810] sm:$0xf0]  ;;  %v7433_v36 = vor.u32 %v10082_v10, %v7430_v11 }
 0x11f   :  { %5313 = vmatpush.bf16.msra.mxu0 %v7481_v26  ;;  %v10146_v23 = vld [vmem:[%s15892_s1 + $0x904] sm:$0xf]  ;;  %v7686_v25 = vld [vmem:[%s15892_s1 + $0x910] sm:$0xf0]  ;;  %v7561_v40 = vor.u32 %v10114_v20, %v7558_v21 }
 0x120   :  { %5326 = vmatpush.bf16.msra.mxu1 %v7609_v30  ;;  %5339 = vmatpush.bf16.msra.mxu2 %v7737_v31  ;;  %v10178_v26 = vld [vmem:[%s15892_s1 + $0xa04] sm:$0xf]  ;;  %v7814_v30 = vld [vmem:[%s15892_s1 + $0xa10] sm:$0xf0]  ;;  %v5086_v31 = vpop.f32.mrf.mxu2  ;;  %v7689_v41 = vor.u32 %v10146_v23, %v7686_v25 }
 0x121   :  { %5352 = vmatpush.bf16.msra.mxu3 %v7865_v35  ;;  %v10238_v32 = vld [vmem:[%s15892_s1 + $0xbe4] sm:$0xf]  ;;  %v8054_v22 = vld [vmem:[%s15892_s1 + $0xbf0] sm:$0xf0]  ;;  %v5099_v35 = vpop.f32.mrf.mxu3  ;;  %v7817_v45 = vor.u32 %v10178_v26, %v7814_v30 }
 0x122   :  { %v10270_v33 = vld [vmem:[%s15892_s1 + $0xce4] sm:$0xf]  ;;  %v8182_v37 = vld [vmem:[%s15892_s1 + $0xcf0] sm:$0xf0] }
 0x123   :  { %5314 = vmatpush.bf16.msra.mxu0 %v7465_v50  ;;  %v10302_v38 = vld [vmem:[%s15892_s1 + $0xde4] sm:$0xf]  ;;  %v8310_v39 = vld [vmem:[%s15892_s1 + $0xdf0] sm:$0xf0]  ;;  %v8057_v50 = vor.u32 %v10238_v32, %v8054_v22  ;;  %v8185_v51 = vor.u32 %v10270_v33, %v8182_v37 }
 0x124   :  { %5327 = vmatpush.bf16.msra.mxu1 %v7593_v43  ;;  %5340 = vmatpush.bf16.msra.mxu2 %v7721_v53  ;;  %v10334_v42 = vld [vmem:[%s15892_s1 + $0xee4] sm:$0xf]  ;;  %v8438_v44 = vld [vmem:[%s15892_s1 + $0xef0] sm:$0xf0]  ;;  %v8313_v43 = vor.u32 %v10302_v38, %v8310_v39 }
 0x125   :  { %5353 = vmatpush.bf16.msra.mxu3 %v7849_v57  ;;  %v10234_v53 = vld [vmem:[%s15892_s1 + $0xbc4] sm:$0xf]  ;;  %v8038_v54 = vld [vmem:[%s15892_s1 + $0xbd0] sm:$0xf0]  ;;  %v8441_v56 = vor.u32 %v10334_v42, %v8438_v44 }
 0x126   :  { %v10266_v55 = vld [vmem:[%s15892_s1 + $0xcc4] sm:$0xf]  ;;  %v8166_v57 = vld [vmem:[%s15892_s1 + $0xcd0] sm:$0xf0]  ;;  %v8041_v3 = vor.u32 %v10234_v53, %v8038_v54 }
 0x127   :  { %5315 = vmatpush.bf16.msra.mxu0 %v7449_v8  ;;  %v10298_v58 = vld [vmem:[%s15892_s1 + $0xdc4] sm:$0xf]  ;;  %v8294_v59 = vld [vmem:[%s15892_s1 + $0xdd0] sm:$0xf0]  ;;  %v8169_v8 = vor.u32 %v10266_v55, %v8166_v57 }
 0x128   :  { %5328 = vmatpush.bf16.msra.mxu1 %v7577_v63  ;;  %5341 = vmatpush.bf16.msra.mxu2 %v7705_v19  ;;  %v10330_v61 = vld [vmem:[%s15892_s1 + $0xec4] sm:$0xf]  ;;  %v8422_v62 = vld [vmem:[%s15892_s1 + $0xed0] sm:$0xf0]  ;;  %v8297_v10 = vor.u32 %v10298_v58, %v8294_v59 }
 0x129   :  { %5354 = vmatpush.bf16.msra.mxu3 %v7833_v24  ;;  %v10230_v11 = vld [vmem:[%s15892_s1 + $0xba4] sm:$0xf]  ;;  %v8022_v63 = vld [vmem:[%s15892_s1 + $0xbb0] sm:$0xf0]  ;;  %v8425_v20 = vor.u32 %v10330_v61, %v8422_v62 }
 0x12a   :  { %v10262_v19 = vld [vmem:[%s15892_s1 + $0xca4] sm:$0xf]  ;;  %v8150_v21 = vld [vmem:[%s15892_s1 + $0xcb0] sm:$0xf0]  ;;  %v8025_v30 = vor.u32 %v10230_v11, %v8022_v63 }
 0x12b   :  { %5316 = vmatpush.bf16.msra.mxu0 %v7433_v36  ;;  %v10294_v23 = vld [vmem:[%s15892_s1 + $0xda4] sm:$0xf]  ;;  %v8278_v24 = vld [vmem:[%s15892_s1 + $0xdb0] sm:$0xf0]  ;;  %v8153_v31 = vor.u32 %v10262_v19, %v8150_v21 }
 0x12c   :  { %5329 = vmatpush.bf16.msra.mxu1 %v7561_v40  ;;  %5342 = vmatpush.bf16.msra.mxu2 %v7689_v41  ;;  %v10326_v25 = vld [vmem:[%s15892_s1 + $0xea4] sm:$0xf]  ;;  %v8406_v26 = vld [vmem:[%s15892_s1 + $0xeb0] sm:$0xf0]  ;;  %v8281_v32 = vor.u32 %v10294_v23, %v8278_v24 }
 0x12d   :  { %5355 = vmatpush.bf16.msra.mxu3 %v7817_v45  ;;  %v10226_v22 = vld [vmem:[%s15892_s1 + $0xb84] sm:$0xf]  ;;  %v8006_v33 = vld [vmem:[%s15892_s1 + $0xb90] sm:$0xf0]  ;;  %v8409_v36 = vor.u32 %v10326_v25, %v8406_v26 }
 0x12e   :  { %5317 = vmatmul.bf16.vlgmr.msra.gmra.mxu0 %v11155_v1  ;;  %v10258_v35 = vld [vmem:[%s15892_s1 + $0xc84] sm:$0xf]  ;;  %v8134_v37 = vld [vmem:[%s15892_s1 + $0xc90] sm:$0xf0]  ;;  %v5110_v40 = vpop.f32.mrf.mxu0  ;;  %v8009_v45 = vor.u32 %v10226_v22, %v8006_v33 }
 0x12f   :  { %5361 = vmatpush.bf16.msrb.mxu0 %v8057_v50  ;;  %5343 = vmatmul.bf16.vlgmr.msra.gmra.mxu2 %v11413_v16  ;;  %v10290_v38 = vld [vmem:[%s15892_s1 + $0xd84] sm:$0xf]  ;;  %v8262_v39 = vld [vmem:[%s15892_s1 + $0xd90] sm:$0xf0]  ;;  %v5111_v44 = vadd.f32 %v5110_v40, %v12535_v52  ;;  %v5123_v50 = vpop.f32.mrf.mxu1 }
 0x130   :  { %5374 = vmatpush.bf16.msrb.mxu1 %v8185_v51  ;;  %5387 = vmatpush.bf16.msrb.mxu2 %v8313_v43  ;;  %v10322_v41 = vld [vmem:[%s15892_s1 + $0xe84] sm:$0xf]  ;;  %v8390_v42 = vld [vmem:[%s15892_s1 + $0xe90] sm:$0xf0]  ;;  %v8137_v51 = vor.u32 %v10258_v35, %v8134_v37  ;;  %v8265_v43 = vor.u32 %v10290_v38, %v8262_v39 }
 0x131   :  { %5400 = vmatpush.bf16.msrb.mxu3 %v8441_v56  ;;  %5330 = vmatmul.bf16.vlgmr.msra.gmra.mxu1 %v11403_v12  ;;  %v10222_v53 = vld [vmem:[%s15892_s1 + $0xb64] sm:$0xf]  ;;  %v7990_v54 = vld [vmem:[%s15892_s1 + $0xb70] sm:$0xf0]  ;;  %v8393_v52 = vor.u32 %v10322_v41, %v8390_v42  ;;  %v5124_v56 = vadd.f32 %v5123_v50, %v5111_v44 }
 0x132   :  { %5356 = vmatmul.bf16.vlgmr.msra.gmra.mxu3 %v11411_v15  ;;  %v10254_v55 = vld [vmem:[%s15892_s1 + $0xc64] sm:$0xf]  ;;  %v8118_v57 = vld [vmem:[%s15892_s1 + $0xc70] sm:$0xf0] }
 0x133   :  { %5362 = vmatpush.bf16.msrb.mxu0 %v8041_v3  ;;  %v10286_v58 = vld [vmem:[%s15892_s1 + $0xd64] sm:$0xf]  ;;  %v8246_v59 = vld [vmem:[%s15892_s1 + $0xd70] sm:$0xf0]  ;;  %v7993_v3 = vor.u32 %v10222_v53, %v7990_v54 }
 0x134   :  { %5375 = vmatpush.bf16.msrb.mxu1 %v8169_v8  ;;  %5388 = vmatpush.bf16.msrb.mxu2 %v8297_v10  ;;  %v10318_v61 = vld [vmem:[%s15892_s1 + $0xe64] sm:$0xf]  ;;  %v8374_v62 = vld [vmem:[%s15892_s1 + $0xe70] sm:$0xf0]  ;;  %v8121_v8 = vor.u32 %v10254_v55, %v8118_v57  ;;  %v8249_v10 = vor.u32 %v10286_v58, %v8246_v59 }
 0x135   :  { %5401 = vmatpush.bf16.msrb.mxu3 %v8425_v20  ;;  %v10218_v11 = vld [vmem:[%s15892_s1 + $0xb44] sm:$0xf]  ;;  %v7974_v63 = vld [vmem:[%s15892_s1 + $0xb50] sm:$0xf0]  ;;  %v8377_v20 = vor.u32 %v10318_v61, %v8374_v62  ;;  %v5136_v21 = vpop.f32.mrf.mxu2 }
 0x136   :  { %v10250_v19 = vld [vmem:[%s15892_s1 + $0xc44] sm:$0xf]  ;;  %v8102_v23 = vld [vmem:[%s15892_s1 + $0xc50] sm:$0xf0]  ;;  %v5137_v26 = vadd.f32 %v5136_v21, %v5124_v56  ;;  %v5112_v22 = vpop.f32.mrf.mxu0  ;;  %v7977_v33 = vor.u32 %v10218_v11, %v7974_v63 }
 0x137   :  { %5363 = vmatpush.bf16.msrb.mxu0 %v8025_v30  ;;  %v10282_v24 = vld [vmem:[%s15892_s1 + $0xd44] sm:$0xf]  ;;  %v8230_v25 = vld [vmem:[%s15892_s1 + $0xd50] sm:$0xf0]  ;;  %v5149_v30 = vpop.f32.mrf.mxu3  ;;  %v5125_v35 = vpop.f32.mrf.mxu1  ;;  %v8105_v37 = vor.u32 %v10250_v19, %v8102_v23 }
 0x138   :  { %5376 = vmatpush.bf16.msrb.mxu1 %v8153_v31  ;;  %5389 = vmatpush.bf16.msrb.mxu2 %v8281_v32  ;;  %v10314_v31 = vld [vmem:[%s15892_s1 + $0xe44] sm:$0xf]  ;;  %v8358_v32 = vld [vmem:[%s15892_s1 + $0xe50] sm:$0xf0]  ;;  %v8233_v38 = vor.u32 %v10282_v24, %v8230_v25 }
 0x139   :  { %5402 = vmatpush.bf16.msrb.mxu3 %v8409_v36  ;;  %v12734_v36 = vadd.f32 %v5149_v30, %v5137_v26  ;;  %v10214_v39 = vld [vmem:[%s15892_s1 + $0xb24] sm:$0xf]  ;;  %v7958_v40 = vld [vmem:[%s15892_s1 + $0xb30] sm:$0xf0]  ;;  %v8361_v42 = vor.u32 %v10314_v31, %v8358_v32 }
 0x13a   :  { %v10246_v41 = vld [vmem:[%s15892_s1 + $0xc24] sm:$0xf]  ;;  %v8086_v44 = vld [vmem:[%s15892_s1 + $0xc30] sm:$0xf0]  ;;  %v7961_v53 = vor.u32 %v10214_v39, %v7958_v40 }
 0x13b   :  { %5364 = vmatpush.bf16.msrb.mxu0 %v8009_v45  ;;  %v10278_v45 = vld [vmem:[%s15892_s1 + $0xd24] sm:$0xf]  ;;  %v8214_v50 = vld [vmem:[%s15892_s1 + $0xd30] sm:$0xf0] }
 0x13c   :  { %5377 = vmatpush.bf16.msrb.mxu1 %v8137_v51  ;;  %5390 = vmatpush.bf16.msrb.mxu2 %v8265_v43  ;;  %v10310_v51 = vld [vmem:[%s15892_s1 + $0xe24] sm:$0xf]  ;;  %v8342_v43 = vld [vmem:[%s15892_s1 + $0xe30] sm:$0xf0]  ;;  %v8217_v56 = vor.u32 %v10278_v45, %v8214_v50 }
 0x13d   :  { %5403 = vmatpush.bf16.msrb.mxu3 %v8393_v52  ;;  %v10210_v54 = vld [vmem:[%s15892_s1 + $0xb04] sm:$0xf]  ;;  %v7942_v55 = vld [vmem:[%s15892_s1 + $0xb10] sm:$0xf0]  ;;  %v8089_v52 = vor.u32 %v10246_v41, %v8086_v44  ;;  %v8345_v61 = vor.u32 %v10310_v51, %v8342_v43 }
 0x13e   :  { %v10242_v57 = vld [vmem:[%s15892_s1 + $0xc04] sm:$0xf]  ;;  %v8070_v58 = vld [vmem:[%s15892_s1 + $0xc10] sm:$0xf0]  ;;  %v7945_v21 = vor.u32 %v10210_v54, %v7942_v55 }
 0x13f   :  { %5365 = vmatpush.bf16.msrb.mxu0 %v7993_v3  ;;  %v10274_v59 = vld [vmem:[%s15892_s1 + $0xd04] sm:$0xf]  ;;  %v8198_v62 = vld [vmem:[%s15892_s1 + $0xd10] sm:$0xf0]  ;;  %v8073_v26 = vor.u32 %v10242_v57, %v8070_v58 }
 0x140   :  { %5378 = vmatpush.bf16.msrb.mxu1 %v8121_v8  ;;  %5391 = vmatpush.bf16.msrb.mxu2 %v8249_v10  ;;  %v10306_v3 = vld [vmem:[%s15892_s1 + $0xe04] sm:$0xf]  ;;  %v8326_v8 = vld [vmem:[%s15892_s1 + $0xe10] sm:$0xf0]  ;;  %v5138_v10 = vpop.f32.mrf.mxu2  ;;  %v8201_v30 = vor.u32 %v10274_v59, %v8198_v62 }
 0x141   :  { %5404 = vmatpush.bf16.msrb.mxu3 %v8377_v20  ;;  %v10366_v11 = vld [vmem:[%s15892_s1 + $0xfe4] sm:$0xf]  ;;  %v8566_v63 = vld [vmem:[%s15892_s1 + $0xff0] sm:$0xf0]  ;;  %v5151_v20 = vpop.f32.mrf.mxu3  ;;  %v8329_v22 = vor.u32 %v10306_v3, %v8326_v8 }
 0x142   :  { %v10398_v19 = vld [vmem:[%s15892_s1 + $0x10e4] sm:$0xf]  ;;  %v8694_v23 = vld [vmem:[%s15892_s1 + $0x10f0] sm:$0xf0] }
 0x143   :  { %5366 = vmatpush.bf16.msrb.mxu0 %v7977_v33  ;;  %v10430_v24 = vld [vmem:[%s15892_s1 + $0x11e4] sm:$0xf]  ;;  %v8822_v25 = vld [vmem:[%s15892_s1 + $0x11f0] sm:$0xf0]  ;;  %v8569_v33 = vor.u32 %v10366_v11, %v8566_v63  ;;  %v8697_v35 = vor.u32 %v10398_v19, %v8694_v23 }
 0x144   :  { %5379 = vmatpush.bf16.msrb.mxu1 %v8105_v37  ;;  %5392 = vmatpush.bf16.msrb.mxu2 %v8233_v38  ;;  %v10462_v31 = vld [vmem:[%s15892_s1 + $0x12e4] sm:$0xf]  ;;  %v8950_v32 = vld [vmem:[%s15892_s1 + $0x12f0] sm:$0xf0]  ;;  %v8825_v37 = vor.u32 %v10430_v24, %v8822_v25 }
 0x145   :  { %5405 = vmatpush.bf16.msrb.mxu3 %v8361_v42  ;;  %v10362_v38 = vld [vmem:[%s15892_s1 + $0xfc4] sm:$0xf]  ;;  %v8550_v39 = vld [vmem:[%s15892_s1 + $0xfd0] sm:$0xf0]  ;;  %v8953_v41 = vor.u32 %v10462_v31, %v8950_v32 }
 0x146   :  { %v10394_v40 = vld [vmem:[%s15892_s1 + $0x10c4] sm:$0xf]  ;;  %v8678_v42 = vld [vmem:[%s15892_s1 + $0x10d0] sm:$0xf0]  ;;  %v8553_v43 = vor.u32 %v10362_v38, %v8550_v39 }
 0x147   :  { %5367 = vmatpush.bf16.msrb.mxu0 %v7961_v53  ;;  %v10426_v44 = vld [vmem:[%s15892_s1 + $0x11c4] sm:$0xf]  ;;  %v8806_v45 = vld [vmem:[%s15892_s1 + $0x11d0] sm:$0xf0]  ;;  %v8681_v53 = vor.u32 %v10394_v40, %v8678_v42 }
 0x148   :  { %5380 = vmatpush.bf16.msrb.mxu1 %v8089_v52  ;;  %5393 = vmatpush.bf16.msrb.mxu2 %v8217_v56  ;;  %v10458_v50 = vld [vmem:[%s15892_s1 + $0x12c4] sm:$0xf]  ;;  %v8934_v51 = vld [vmem:[%s15892_s1 + $0x12d0] sm:$0xf0]  ;;  %v8809_v54 = vor.u32 %v10426_v44, %v8806_v45 }
 0x149   :  { %5406 = vmatpush.bf16.msrb.mxu3 %v8345_v61  ;;  %v10358_v55 = vld [vmem:[%s15892_s1 + $0xfa4] sm:$0xf]  ;;  %v8534_v52 = vld [vmem:[%s15892_s1 + $0xfb0] sm:$0xf0]  ;;  %v8937_v57 = vor.u32 %v10458_v50, %v8934_v51 }
 0x14a   :  { %v10390_v56 = vld [vmem:[%s15892_s1 + $0x10a4] sm:$0xf]  ;;  %v8662_v58 = vld [vmem:[%s15892_s1 + $0x10b0] sm:$0xf0]  ;;  %v8537_v8 = vor.u32 %v10358_v55, %v8534_v52 }
 0x14b   :  { %5368 = vmatpush.bf16.msrb.mxu0 %v7945_v21  ;;  %v10422_v59 = vld [vmem:[%s15892_s1 + $0x11a4] sm:$0xf]  ;;  %v8790_v61 = vld [vmem:[%s15892_s1 + $0x11b0] sm:$0xf0]  ;;  %v8665_v10 = vor.u32 %v10390_v56, %v8662_v58 }
 0x14c   :  { %5381 = vmatpush.bf16.msrb.mxu1 %v8073_v26  ;;  %5394 = vmatpush.bf16.msrb.mxu2 %v8201_v30  ;;  %v10454_v62 = vld [vmem:[%s15892_s1 + $0x12a4] sm:$0xf]  ;;  %v8918_v3 = vld [vmem:[%s15892_s1 + $0x12b0] sm:$0xf0]  ;;  %v8793_v11 = vor.u32 %v10422_v59, %v8790_v61  ;;  %v5162_v26 = vpop.f32.mrf.mxu0 }
 0x14d   :  { %5407 = vmatpush.bf16.msrb.mxu3 %v8329_v22  ;;  %v10354_v63 = vld [vmem:[%s15892_s1 + $0xf84] sm:$0xf]  ;;  %v8518_v19 = vld [vmem:[%s15892_s1 + $0xf90] sm:$0xf0]  ;;  %v8921_v21 = vor.u32 %v10454_v62, %v8918_v3  ;;  %v5163_v32 = vadd.f32 %v5162_v26, %v12734_v36 }
 0x14e   :  { %5369 = vmatmul.bf16.vlgmr.msrb.gmra.mxu0 %v11415_v17  ;;  %v10386_v20 = vld [vmem:[%s15892_s1 + $0x1084] sm:$0xf]  ;;  %v8646_v23 = vld [vmem:[%s15892_s1 + $0x1090] sm:$0xf0]  ;;  %v8521_v22 = vor.u32 %v10354_v63, %v8518_v19 }
 0x14f   :  { %5413 = vmatpush.bf16.msra.mxu0 %v8569_v33  ;;  %5395 = vmatmul.bf16.vlgmr.msrb.gmra.mxu2 %v11581_v48  ;;  %v10418_v24 = vld [vmem:[%s15892_s1 + $0x1184] sm:$0xf]  ;;  %v8774_v25 = vld [vmem:[%s15892_s1 + $0x1190] sm:$0xf0]  ;;  %v5175_v33 = vpop.f32.mrf.mxu1 }
 0x150   :  { %5426 = vmatpush.bf16.msra.mxu1 %v8697_v35  ;;  %5439 = vmatpush.bf16.msra.mxu2 %v8825_v37  ;;  %v10450_v30 = vld [vmem:[%s15892_s1 + $0x1284] sm:$0xf]  ;;  %v8902_v31 = vld [vmem:[%s15892_s1 + $0x1290] sm:$0xf0]  ;;  %v8649_v35 = vor.u32 %v10386_v20, %v8646_v23  ;;  %v8777_v37 = vor.u32 %v10418_v24, %v8774_v25 }
 0x151   :  { %5452 = vmatpush.bf16.msra.mxu3 %v8953_v41  ;;  %5382 = vmatmul.bf16.vlgmr.msrb.gmra.mxu1 %v11577_v46  ;;  %v10350_v38 = vld [vmem:[%s15892_s1 + $0xf64] sm:$0xf]  ;;  %v8502_v39 = vld [vmem:[%s15892_s1 + $0xf70] sm:$0xf0]  ;;  %v8905_v36 = vor.u32 %v10450_v30, %v8902_v31  ;;  %v5176_v41 = vadd.f32 %v5175_v33, %v5163_v32 }
 0x152   :  { %5408 = vmatmul.bf16.vlgmr.msrb.gmra.mxu3 %v11579_v47  ;;  %v10382_v40 = vld [vmem:[%s15892_s1 + $0x1064] sm:$0xf]  ;;  %v8630_v42 = vld [vmem:[%s15892_s1 + $0x1070] sm:$0xf0]  ;;  %v5188_v58 = vpop.f32.mrf.mxu2 }
 0x153   :  { %5414 = vmatpush.bf16.msra.mxu0 %v8553_v43  ;;  %v10414_v44 = vld [vmem:[%s15892_s1 + $0x1164] sm:$0xf]  ;;  %v8758_v45 = vld [vmem:[%s15892_s1 + $0x1170] sm:$0xf0]  ;;  %v8505_v43 = vor.u32 %v10350_v38, %v8502_v39  ;;  %v5189_v3 = vadd.f32 %v5188_v58, %v5176_v41 }
 0x154   :  { %5427 = vmatpush.bf16.msra.mxu1 %v8681_v53  ;;  %5440 = vmatpush.bf16.msra.mxu2 %v8809_v54  ;;  %v10446_v50 = vld [vmem:[%s15892_s1 + $0x1264] sm:$0xf]  ;;  %v8886_v51 = vld [vmem:[%s15892_s1 + $0x1270] sm:$0xf0]  ;;  %v8633_v53 = vor.u32 %v10382_v40, %v8630_v42  ;;  %v8761_v54 = vor.u32 %v10414_v44, %v8758_v45  ;;  %v5164_v63 = vpop.f32.mrf.mxu0 }
 0x155   :  { %5453 = vmatpush.bf16.msra.mxu3 %v8937_v57  ;;  %v10346_v55 = vld [vmem:[%s15892_s1 + $0xf44] sm:$0xf]  ;;  %v8486_v52 = vld [vmem:[%s15892_s1 + $0xf50] sm:$0xf0]  ;;  %v8889_v57 = vor.u32 %v10446_v50, %v8886_v51 }
 0x156   :  { %v10378_v56 = vld [vmem:[%s15892_s1 + $0x1044] sm:$0xf]  ;;  %v8614_v59 = vld [vmem:[%s15892_s1 + $0x1050] sm:$0xf0]  ;;  %v8489_v19 = vor.u32 %v10346_v55, %v8486_v52 }
 0x157   :  { %5415 = vmatpush.bf16.msra.mxu0 %v8537_v8  ;;  %v10410_v61 = vld [vmem:[%s15892_s1 + $0x1144] sm:$0xf]  ;;  %v8742_v62 = vld [vmem:[%s15892_s1 + $0x1150] sm:$0xf0]  ;;  %v5201_v8 = vpop.f32.mrf.mxu3  ;;  %v5177_v20 = vpop.f32.mrf.mxu1  ;;  %v8617_v23 = vor.u32 %v10378_v56, %v8614_v59 }
 0x158   :  { %5428 = vmatpush.bf16.msra.mxu1 %v8665_v10  ;;  %5441 = vmatpush.bf16.msra.mxu2 %v8793_v11  ;;  %v10442_v10 = vld [vmem:[%s15892_s1 + $0x1244] sm:$0xf]  ;;  %v8870_v11 = vld [vmem:[%s15892_s1 + $0x1250] sm:$0xf0]  ;;  %v8745_v24 = vor.u32 %v10410_v61, %v8742_v62 }
 0x159   :  { %5454 = vmatpush.bf16.msra.mxu3 %v8921_v21  ;;  %v12933_v21 = vadd.f32 %v5201_v8, %v5189_v3  ;;  %v10342_v25 = vld [vmem:[%s15892_s1 + $0xf24] sm:$0xf]  ;;  %v8470_v26 = vld [vmem:[%s15892_s1 + $0xf30] sm:$0xf0]  ;;  %v8873_v31 = vor.u32 %v10442_v10, %v8870_v11 }
 0x15a   :  { %v10374_v30 = vld [vmem:[%s15892_s1 + $0x1024] sm:$0xf]  ;;  %v8598_v32 = vld [vmem:[%s15892_s1 + $0x1030] sm:$0xf0]  ;;  %v8473_v38 = vor.u32 %v10342_v25, %v8470_v26 }
 0x15b   :  { %5416 = vmatpush.bf16.msra.mxu0 %v8521_v22  ;;  %v10406_v22 = vld [vmem:[%s15892_s1 + $0x1124] sm:$0xf]  ;;  %v8726_v33 = vld [vmem:[%s15892_s1 + $0x1130] sm:$0xf0] }
 0x15c   :  { %5429 = vmatpush.bf16.msra.mxu1 %v8649_v35  ;;  %5442 = vmatpush.bf16.msra.mxu2 %v8777_v37  ;;  %v10438_v35 = vld [vmem:[%s15892_s1 + $0x1224] sm:$0xf]  ;;  %v8854_v37 = vld [vmem:[%s15892_s1 + $0x1230] sm:$0xf0]  ;;  %v8729_v41 = vor.u32 %v10406_v22, %v8726_v33 }
 0x15d   :  { %5455 = vmatpush.bf16.msra.mxu3 %v8905_v36  ;;  %v10338_v39 = vld [vmem:[%s15892_s1 + $0xf04] sm:$0xf]  ;;  %v8454_v40 = vld [vmem:[%s15892_s1 + $0xf10] sm:$0xf0]  ;;  %v8601_v36 = vor.u32 %v10374_v30, %v8598_v32  ;;  %v8857_v50 = vor.u32 %v10438_v35, %v8854_v37 }
 0x15e   :  { %v10370_v42 = vld [vmem:[%s15892_s1 + $0x1004] sm:$0xf]  ;;  %v8582_v44 = vld [vmem:[%s15892_s1 + $0x1010] sm:$0xf0]  ;;  %v8457_v58 = vor.u32 %v10338_v39, %v8454_v40 }
 0x15f   :  { %5417 = vmatpush.bf16.msra.mxu0 %v8505_v43  ;;  %v10402_v45 = vld [vmem:[%s15892_s1 + $0x1104] sm:$0xf]  ;;  %v8710_v51 = vld [vmem:[%s15892_s1 + $0x1110] sm:$0xf0]  ;;  %v8585_v3 = vor.u32 %v10370_v42, %v8582_v44 }
 0x160   :  { %5430 = vmatpush.bf16.msra.mxu1 %v8633_v53  ;;  %5443 = vmatpush.bf16.msra.mxu2 %v8761_v54  ;;  %v10434_v43 = vld [vmem:[%s15892_s1 + $0x1204] sm:$0xf]  ;;  %v8838_v53 = vld [vmem:[%s15892_s1 + $0x1210] sm:$0xf0]  ;;  %v5190_v54 = vpop.f32.mrf.mxu2  ;;  %v8713_v8 = vor.u32 %v10402_v45, %v8710_v51 }
 0x161   :  { %5456 = vmatpush.bf16.msra.mxu3 %v8889_v57  ;;  %v10494_v55 = vld [vmem:[%s15892_s1 + $0x13e4] sm:$0xf]  ;;  %v9078_v52 = vld [vmem:[%s15892_s1 + $0x13f0] sm:$0xf0]  ;;  %v5203_v57 = vpop.f32.mrf.mxu3  ;;  %v8841_v63 = vor.u32 %v10434_v43, %v8838_v53 }
 0x162   :  { %v10526_v56 = vld [vmem:[%s15892_s1 + $0x14e4] sm:$0xf]  ;;  %v9206_v59 = vld [vmem:[%s15892_s1 + $0x14f0] sm:$0xf0] }
 0x163   :  { %5418 = vmatpush.bf16.msra.mxu0 %v8489_v19  ;;  %v10558_v61 = vld [vmem:[%s15892_s1 + $0x15e4] sm:$0xf]  ;;  %v9334_v62 = vld [vmem:[%s15892_s1 + $0x15f0] sm:$0xf0]  ;;  %v9081_v19 = vor.u32 %v10494_v55, %v9078_v52  ;;  %v9209_v20 = vor.u32 %v10526_v56, %v9206_v59 }
 0x164   :  { %5431 = vmatpush.bf16.msra.mxu1 %v8617_v23  ;;  %5444 = vmatpush.bf16.msra.mxu2 %v8745_v24  ;;  %v10590_v10 = vld [vmem:[%s15892_s1 + $0x16e4] sm:$0xf]  ;;  %v9462_v11 = vld [vmem:[%s15892_s1 + $0x16f0] sm:$0xf0]  ;;  %v9337_v23 = vor.u32 %v10558_v61, %v9334_v62 }
 0x165   :  { %5457 = vmatpush.bf16.msra.mxu3 %v8873_v31  ;;  %v10490_v24 = vld [vmem:[%s15892_s1 + $0x13c4] sm:$0xf]  ;;  %v9062_v25 = vld [vmem:[%s15892_s1 + $0x13d0] sm:$0xf0]  ;;  %v9465_v30 = vor.u32 %v10590_v10, %v9462_v11  ;;  %v10692_v11 = vld [vmem:[%s15893_s2] sm:$0xf] }
 0x166   :  { %v10522_v26 = vld [vmem:[%s15892_s1 + $0x14c4] sm:$0xf]  ;;  %v9190_v31 = vld [vmem:[%s15892_s1 + $0x14d0] sm:$0xf0]  ;;  %v9065_v37 = vor.u32 %v10490_v24, %v9062_v25 }
 0x167   :  { %5419 = vmatpush.bf16.msra.mxu0 %v8473_v38  ;;  %v10554_v32 = vld [vmem:[%s15892_s1 + $0x15c4] sm:$0xf]  ;;  %v9318_v22 = vld [vmem:[%s15892_s1 + $0x15d0] sm:$0xf0]  ;;  %v9193_v38 = vor.u32 %v10522_v26, %v9190_v31 }
 0x168   :  { %5432 = vmatpush.bf16.msra.mxu1 %v8601_v36  ;;  %5445 = vmatpush.bf16.msra.mxu2 %v8729_v41  ;;  %v10586_v33 = vld [vmem:[%s15892_s1 + $0x16c4] sm:$0xf]  ;;  %v9446_v35 = vld [vmem:[%s15892_s1 + $0x16d0] sm:$0xf0]  ;;  %v9321_v39 = vor.u32 %v10554_v32, %v9318_v22 }
 0x169   :  { %5458 = vmatpush.bf16.msra.mxu3 %v8857_v50  ;;  %v10486_v40 = vld [vmem:[%s15892_s1 + $0x13a4] sm:$0xf]  ;;  %v9046_v36 = vld [vmem:[%s15892_s1 + $0x13b0] sm:$0xf0]  ;;  %v9449_v42 = vor.u32 %v10586_v33, %v9446_v35 }
 0x16a   :  { %v10518_v41 = vld [vmem:[%s15892_s1 + $0x14a4] sm:$0xf]  ;;  %v9174_v44 = vld [vmem:[%s15892_s1 + $0x14b0] sm:$0xf0]  ;;  %v9049_v53 = vor.u32 %v10486_v40, %v9046_v36 }
 0x16b   :  { %5420 = vmatpush.bf16.msra.mxu0 %v8457_v58  ;;  %v10550_v45 = vld [vmem:[%s15892_s1 + $0x15a4] sm:$0xf]  ;;  %v9302_v50 = vld [vmem:[%s15892_s1 + $0x15b0] sm:$0xf0]  ;;  %v9177_v54 = vor.u32 %v10518_v41, %v9174_v44 }
 0x16c   :  { %5433 = vmatpush.bf16.msra.mxu1 %v8585_v3  ;;  %5446 = vmatpush.bf16.msra.mxu2 %v8713_v8  ;;  %v10582_v51 = vld [vmem:[%s15892_s1 + $0x16a4] sm:$0xf]  ;;  %v9430_v43 = vld [vmem:[%s15892_s1 + $0x16b0] sm:$0xf0]  ;;  %v9305_v55 = vor.u32 %v10550_v45, %v9302_v50  ;;  %v5214_v3 = vpop.f32.mrf.mxu0 }
 0x16d   :  { %5459 = vmatpush.bf16.msra.mxu3 %v8841_v63  ;;  %v10482_v52 = vld [vmem:[%s15892_s1 + $0x1384] sm:$0xf]  ;;  %v9030_v56 = vld [vmem:[%s15892_s1 + $0x1390] sm:$0xf0]  ;;  %v9433_v58 = vor.u32 %v10582_v51, %v9430_v43  ;;  %v828_v63 = vperm.slane %v10692_v11, 1 }
 0x16e   :  { %5421 = vmatmul.bf16.vlgmr.msra.gmra.mxu0 %v11583_v49  ;;  %v10514_v57 = vld [vmem:[%s15892_s1 + $0x1484] sm:$0xf]  ;;  %v9158_v59 = vld [vmem:[%s15892_s1 + $0x1490] sm:$0xf0]  ;;  %v5227_v31 = vpop.f32.mrf.mxu1 }
 0x16f   :  { %5465 = vmatpush.bf16.msrb.mxu0 %v9081_v19  ;;  %5447 = vmatmul.bf16.vlgmr.msra.gmra.mxu2 %v11824_v14  ;;  %v10546_v61 = vld [vmem:[%s15892_s1 + $0x1584] sm:$0xf]  ;;  %v9286_v62 = vld [vmem:[%s15892_s1 + $0x1590] sm:$0xf0]  ;;  %v13087_v19 = vadd.f32 %v5214_v3, %v12933_v21 }
 0x170   :  { %5478 = vmatpush.bf16.msrb.mxu1 %v9209_v20  ;;  %5491 = vmatpush.bf16.msrb.mxu2 %v9337_v23  ;;  %v10578_v8 = vld [vmem:[%s15892_s1 + $0x1684] sm:$0xf]  ;;  %v9414_v10 = vld [vmem:[%s15892_s1 + $0x1690] sm:$0xf0]  ;;  %v9033_v20 = vor.u32 %v10482_v52, %v9030_v56  ;;  %v9161_v23 = vor.u32 %v10514_v57, %v9158_v59  ;;  %v9289_v24 = vor.u32 %v10546_v61, %v9286_v62 }
 0x171   :  { %5504 = vmatpush.bf16.msrb.mxu3 %v9465_v30  ;;  %5434 = vmatmul.bf16.vlgmr.msra.gmra.mxu1 %v11814_v9  ;;  %v10478_v25 = vld [vmem:[%s15892_s1 + $0x1364] sm:$0xf]  ;;  %v9014_v26 = vld [vmem:[%s15892_s1 + $0x1370] sm:$0xf0]  ;;  %v9417_v21 = vor.u32 %v10578_v8, %v9414_v10 }
 0x172   :  { %5460 = vmatmul.bf16.vlgmr.msra.gmra.mxu3 %v11822_v13  ;;  %v10510_v30 = vld [vmem:[%s15892_s1 + $0x1464] sm:$0xf]  ;;  %v9142_v32 = vld [vmem:[%s15892_s1 + $0x1470] sm:$0xf0] }
 0x173   :  { %5466 = vmatpush.bf16.msrb.mxu0 %v9065_v37  ;;  %v10542_v22 = vld [vmem:[%s15892_s1 + $0x1564] sm:$0xf]  ;;  %v9270_v33 = vld [vmem:[%s15892_s1 + $0x1570] sm:$0xf0]  ;;  %v9145_v40 = vor.u32 %v10510_v30, %v9142_v32 }
 0x174   :  { %5479 = vmatpush.bf16.msrb.mxu1 %v9193_v38  ;;  %5492 = vmatpush.bf16.msrb.mxu2 %v9321_v39  ;;  %v10574_v35 = vld [vmem:[%s15892_s1 + $0x1664] sm:$0xf]  ;;  %v9398_v37 = vld [vmem:[%s15892_s1 + $0x1670] sm:$0xf0]  ;;  %v5228_v38 = vadd.f32 %v5227_v31, %v828_v63  ;;  %v9017_v39 = vor.u32 %v10478_v25, %v9014_v26  ;;  %v9273_v36 = vor.u32 %v10542_v22, %v9270_v33  ;;  %v5216_v57 = vpop.f32.mrf.mxu0 }
 0x175   :  { %5505 = vmatpush.bf16.msrb.mxu3 %v9449_v42  ;;  %v10474_v41 = vld [vmem:[%s15892_s1 + $0x1344] sm:$0xf]  ;;  %v8998_v42 = vld [vmem:[%s15892_s1 + $0x1350] sm:$0xf0]  ;;  %v9401_v45 = vor.u32 %v10574_v35, %v9398_v37  ;;  %v9921_v57 = vld [vmem:[%s15892_s1 + $0x1f4] sm:$0xf0] }
 0x176   :  { %v10506_v44 = vld [vmem:[%s15892_s1 + $0x1444] sm:$0xf]  ;;  %v9126_v50 = vld [vmem:[%s15892_s1 + $0x1450] sm:$0xf0]  ;;  %v5229_v11 = vpop.f32.mrf.mxu1 }
 0x177   :  { %5467 = vmatpush.bf16.msrb.mxu0 %v9049_v53  ;;  %v10538_v51 = vld [vmem:[%s15892_s1 + $0x1544] sm:$0xf]  ;;  %v9254_v43 = vld [vmem:[%s15892_s1 + $0x1550] sm:$0xf0]  ;;  %v5240_v53 = vpop.f32.mrf.mxu2  ;;  %v9129_v59 = vor.u32 %v10506_v44, %v9126_v50 }
 0x178   :  { %5480 = vmatpush.bf16.msrb.mxu1 %v9177_v54  ;;  %5493 = vmatpush.bf16.msrb.mxu2 %v9305_v55  ;;  %v5253_v54 = vpop.f32.mrf.mxu3  ;;  %v10570_v55 = vld [vmem:[%s15892_s1 + $0x1644] sm:$0xf]  ;;  %v9382_v52 = vld [vmem:[%s15892_s1 + $0x1650] sm:$0xf0]  ;;  %v5241_v56 = vadd.f32 %v5240_v53, %v5228_v38  ;;  %v9257_v61 = vor.u32 %v10538_v51, %v9254_v43  ;;  %v6652_v53 = vld [vmem:[%s15892_s1 + $0xe8] sm:$0xf] }
 0x179   :  { %5506 = vmatpush.bf16.msrb.mxu3 %v9433_v58  ;;  %v9001_v58 = vor.u32 %v10474_v41, %v8998_v42  ;;  %v10470_v62 = vld [vmem:[%s15892_s1 + $0x1324] sm:$0xf]  ;;  %v8982_v3 = vld [vmem:[%s15892_s1 + $0x1330] sm:$0xf0]  ;;  %v9385_v63 = vor.u32 %v10570_v55, %v9382_v52 }
 0x17a   :  { %v10502_v8 = vld [vmem:[%s15892_s1 + $0x1424] sm:$0xf]  ;;  %v13146_v10 = vadd.f32 %v5253_v54, %v5241_v56  ;;  %v9366_v26 = vld [vmem:[%s15892_s1 + $0x1630] sm:$0xf0]  ;;  %v8985_v30 = vor.u32 %v10470_v62, %v8982_v3  ;;  %v9889_v54 = vld [vmem:[%s15892_s1 + $0xf4] sm:$0xf0] }
 0x17b   :  { %5468 = vmatpush.bf16.msrb.mxu0 %v9033_v20  ;;  %v9110_v20 = vld [vmem:[%s15892_s1 + $0x1430] sm:$0xf0]  ;;  %v10566_v25 = vld [vmem:[%s15892_s1 + $0x1624] sm:$0xf]  ;;  %v6780_v56 = vld [vmem:[%s15892_s1 + $0x1e8] sm:$0xf]  ;;  %v6653_v62 = vor.u32 %v9889_v54, %v6652_v53 }
 0x17c   :  { %5481 = vmatpush.bf16.msrb.mxu1 %v9161_v23  ;;  %5494 = vmatpush.bf16.msrb.mxu2 %v9289_v24  ;;  %v10534_v23 = vld [vmem:[%s15892_s1 + $0x1524] sm:$0xf]  ;;  %v9238_v24 = vld [vmem:[%s15892_s1 + $0x1530] sm:$0xf0]  ;;  %v9113_v32 = vor.u32 %v10502_v8, %v9110_v20  ;;  %v9369_v38 = vor.u32 %v10566_v25, %v9366_v26  ;;  %v6764_v25 = vld [vmem:[%s15892_s1 + $0x1c8] sm:$0xf] }
 0x17d   :  { %5507 = vmatpush.bf16.msrb.mxu3 %v9417_v21  ;;  %v10466_v31 = vld [vmem:[%s15892_s1 + $0x1304] sm:$0xf]  ;;  %v8966_v21 = vld [vmem:[%s15892_s1 + $0x1310] sm:$0xf0]  ;;  %v9241_v22 = vor.u32 %v10534_v23, %v9238_v24  ;;  %v6636_v23 = vld [vmem:[%s15892_s1 + $0xc8] sm:$0xf] }
 0x17e   :  { %v10498_v33 = vld [vmem:[%s15892_s1 + $0x1404] sm:$0xf]  ;;  %v9094_v35 = vld [vmem:[%s15892_s1 + $0x1410] sm:$0xf0]  ;;  %v8969_v51 = vor.u32 %v10466_v31, %v8966_v21  ;;  %v9885_v24 = vld [vmem:[%s15892_s1 + $0xd4] sm:$0xf0] }
 0x17f   :  { %5469 = vmatpush.bf16.msrb.mxu0 %v9017_v39  ;;  %v10530_v37 = vld [vmem:[%s15892_s1 + $0x1504] sm:$0xf]  ;;  %v9222_v39 = vld [vmem:[%s15892_s1 + $0x1510] sm:$0xf0]  ;;  %v5242_v41 = vpop.f32.mrf.mxu2  ;;  %v9097_v55 = vor.u32 %v10498_v33, %v9094_v35  ;;  %v9917_v26 = vld [vmem:[%s15892_s1 + $0x1d4] sm:$0xf0]  ;;  %v6637_v21 = vor.u32 %v9885_v24, %v6636_v23 }
 0x180   :  { %5482 = vmatpush.bf16.msrb.mxu1 %v9145_v40  ;;  %5495 = vmatpush.bf16.msrb.mxu2 %v9273_v36  ;;  %v10562_v40 = vld [vmem:[%s15892_s1 + $0x1604] sm:$0xf]  ;;  %v9350_v36 = vld [vmem:[%s15892_s1 + $0x1610] sm:$0xf0]  ;;  %v5255_v42 = vpop.f32.mrf.mxu3  ;;  %v9225_v52 = vor.u32 %v10530_v37, %v9222_v39  ;;  %v6765_v35 = vor.u32 %v9917_v26, %v6764_v25  ;;  %v9881_v39 = vld [vmem:[%s15892_s1 + $0xb4] sm:$0xf0] }
 0x181   :  { %5508 = vmatpush.bf16.msrb.mxu3 %v9401_v45  ;;  %v10622_v44 = vld [vmem:[%s15892_s1 + $0x17e4] sm:$0xf]  ;;  %v9590_v45 = vld [vmem:[%s15892_s1 + $0x17f0] sm:$0xf0]  ;;  %v6604_v54 = vld [vmem:[%s15892_s1 + $0x88] sm:$0xf] }
 0x182   :  { %v10654_v50 = vld [vmem:[%s15892_s1 + $0x18e4] sm:$0xf]  ;;  %v9718_v43 = vld [vmem:[%s15892_s1 + $0x18f0] sm:$0xf0]  ;;  %v6588_v24 = vld [vmem:[%s15892_s1 + $0x68] sm:$0xf] }
 0x183   :  { %5470 = vmatpush.bf16.msrb.mxu0 %v9001_v58  ;;  %v9353_v58 = vor.u32 %v10562_v40, %v9350_v36  ;;  %v10618_v3 = vld [vmem:[%s15892_s1 + $0x17c4] sm:$0xf]  ;;  %v9574_v8 = vld [vmem:[%s15892_s1 + $0x17d0] sm:$0xf0]  ;;  %v6748_v40 = vld [vmem:[%s15892_s1 + $0x1a8] sm:$0xf] }
 0x184   :  { %5483 = vmatpush.bf16.msrb.mxu1 %v9129_v59  ;;  %5496 = vmatpush.bf16.msrb.mxu2 %v9257_v61  ;;  %v9593_v59 = vor.u32 %v10622_v44, %v9590_v45  ;;  %v9721_v61 = vor.u32 %v10654_v50, %v9718_v43  ;;  %v10650_v11 = vld [vmem:[%s15892_s1 + $0x18c4] sm:$0xf]  ;;  %v9702_v20 = vld [vmem:[%s15892_s1 + $0x18d0] sm:$0xf0]  ;;  %v9913_v36 = vld [vmem:[%s15892_s1 + $0x1b4] sm:$0xf0] }
 0x185   :  { %5509 = vmatpush.bf16.msrb.mxu3 %v9385_v63  ;;  %v6781_v63 = vor.u32 %v9921_v57, %v6780_v56  ;;  %v9705_v31 = vor.u32 %v10650_v11, %v9702_v20  ;;  %v10646_v33 = vld [vmem:[%s15892_s1 + $0x18a4] sm:$0xf]  ;;  %v9686_v37 = vld [vmem:[%s15892_s1 + $0x18b0] sm:$0xf0]  ;;  %v6749_v43 = vor.u32 %v9913_v36, %v6748_v40  ;;  %v9909_v56 = vld [vmem:[%s15892_s1 + $0x194] sm:$0xf0] }
 0x186   :  { %v9689_v42 = vor.u32 %v10646_v33, %v9686_v37  ;;  %v10610_v45 = vld [vmem:[%s15892_s1 + $0x1784] sm:$0xf]  ;;  %v9542_v50 = vld [vmem:[%s15892_s1 + $0x1790] sm:$0xf0]  ;;  %v9873_v25 = vld [vmem:[%s15892_s1 + $0x74] sm:$0xf0] }
 0x187   :  { %5471 = vmatpush.bf16.msrb.mxu0 %v8985_v30  ;;  %v9577_v30 = vor.u32 %v10618_v3, %v9574_v8  ;;  %v9670_v53 = vld [vmem:[%s15892_s1 + $0x1890] sm:$0xf0]  ;;  %v9545_v57 = vor.u32 %v10610_v45, %v9542_v50  ;;  %v10638_v8 = vld [vmem:[%s15892_s1 + $0x1864] sm:$0xf]  ;;  %v6716_v26 = vld [vmem:[%s15892_s1 + $0x168] sm:$0xf] }
 0x188   :  { %5484 = vmatpush.bf16.msrb.mxu1 %v9113_v32  ;;  %5497 = vmatpush.bf16.msrb.mxu2 %v9241_v22  ;;  %v10614_v32 = vld [vmem:[%s15892_s1 + $0x17a4] sm:$0xf]  ;;  %v9558_v22 = vld [vmem:[%s15892_s1 + $0x17b0] sm:$0xf0]  ;;  %v6572_v40 = vld [vmem:[%s15892_s1 + $0x48] sm:$0xf] }
 0x189   :  { %5510 = vmatpush.bf16.msrb.mxu3 %v9369_v38  ;;  %v6620_v38 = vld [vmem:[%s15892_s1 + $0xa8] sm:$0xf]  ;;  %v9561_v41 = vor.u32 %v10614_v32, %v9558_v22  ;;  %v9526_v3 = vld [vmem:[%s15892_s1 + $0x1770] sm:$0xf0]  ;;  %v6589_v32 = vor.u32 %v9873_v25, %v6588_v24  ;;  %v10602_v22 = vld [vmem:[%s15892_s1 + $0x1744] sm:$0xf] }
 0x18a   :  { %v6621_v44 = vor.u32 %v9881_v39, %v6620_v38  ;;  %v9654_v23 = vld [vmem:[%s15892_s1 + $0x1870] sm:$0xf0]  ;;  %v9869_v36 = vld [vmem:[%s15892_s1 + $0x54] sm:$0xf0]  ;;  %v10626_v25 = vld [vmem:[%s15892_s1 + $0x1804] sm:$0xf] }
 0x18b   :  { %5472 = vmatpush.bf16.msrb.mxu0 %v8969_v51  ;;  %v10642_v51 = vld [vmem:[%s15892_s1 + $0x1884] sm:$0xf]  ;;  %v9510_v33 = vld [vmem:[%s15892_s1 + $0x1750] sm:$0xf0]  ;;  %v9901_v45 = vld [vmem:[%s15892_s1 + $0x154] sm:$0xf0] }
 0x18c   :  { %5485 = vmatpush.bf16.msrb.mxu1 %v9097_v55  ;;  %5498 = vmatpush.bf16.msrb.mxu2 %v9225_v52  ;;  %v9877_v55 = vld [vmem:[%s15892_s1 + $0x94] sm:$0xf0]  ;;  %v6732_v52 = vld [vmem:[%s15892_s1 + $0x188] sm:$0xf]  ;;  %v9638_v39 = vld [vmem:[%s15892_s1 + $0x1850] sm:$0xf0]  ;;  %v9513_v50 = vor.u32 %v10602_v22, %v9510_v33 }
 0x18d   :  { %5511 = vmatpush.bf16.msrb.mxu3 %v9353_v58  ;;  %v5266_v58 = vpop.f32.mrf.mxu0  ;;  %v6733_v20 = vor.u32 %v9909_v56, %v6732_v52  ;;  %v9494_v52 = vld [vmem:[%s15892_s1 + $0x1730] sm:$0xf0]  ;;  %v10630_v56 = vld [vmem:[%s15892_s1 + $0x1824] sm:$0xf]  ;;  %v9893_v22 = vld [vmem:[%s15892_s1 + $0x114] sm:$0xf0] }
 0x18e   :  { %5473 = vmatmul.bf16.vlgmr.msrb.gmra.mxu0 %v11826_v18  ;;  %v5267_v11 = vadd.f32 %v5266_v58, %v13146_v10  ;;  %v9905_v10 = vld [vmem:[%s15892_s1 + $0x174] sm:$0xf0] }
 0x18f   :  { %5517 = vmatpush.bf16.msra.mxu0 %v9593_v59  ;;  %5499 = vmatmul.bf16.vlgmr.msrb.gmra.mxu2 %v11995_v6  ;;  %v9673_v59 = vor.u32 %v10642_v51, %v9670_v53  ;;  %v6717_v38 = vor.u32 %v9905_v10, %v6716_v26  ;;  %v9606_v26 = vld [vmem:[%s15892_s1 + $0x1810] sm:$0xf0]  ;;  %v6540_v10 = vld [vmem:[%s15892_s1 + $0x8] sm:$0xf] }
 0x190   :  { %5530 = vmatpush.bf16.msra.mxu1 %v9721_v61  ;;  %5543 = vmatpush.bf16.msra.mxu2 %v6653_v62  ;;  %v6605_v61 = vor.u32 %v9877_v55, %v6604_v54  ;;  %v10606_v62 = vld [vmem:[%s15892_s1 + $0x1764] sm:$0xf]  ;;  %v6573_v54 = vor.u32 %v9869_v36, %v6572_v40  ;;  %v9985_v40 = vld [vmem:[%s15892_s1 + $0x3f4] sm:$0xf0]  ;;  %v7164_v36 = vld [vmem:[%s15892_s1 + $0x4e8] sm:$0xf] }
 0x191   :  { %5556 = vmatpush.bf16.msra.mxu3 %v6781_v63  ;;  %5486 = vmatmul.bf16.vlgmr.msrb.gmra.mxu1 %v11991_v4  ;;  %v5279_v63 = vpop.f32.mrf.mxu1  ;;  %v10598_v55 = vld [vmem:[%s15892_s1 + $0x1724] sm:$0xf] }
 0x192   :  { %5512 = vmatmul.bf16.vlgmr.msrb.gmra.mxu3 %v11993_v5  ;;  %v5292_v37 = vpop.f32.mrf.mxu2 }
 0x193   :  { %5518 = vmatpush.bf16.msra.mxu0 %v9577_v30  ;;  %v5280_v30 = vadd.f32 %v5279_v63, %v5267_v11  ;;  %v9497_v11 = vor.u32 %v10598_v55, %v9494_v52  ;;  %v10594_v63 = vld [vmem:[%s15892_s1 + $0x1704] sm:$0xf]  ;;  %v6892_v52 = vld [vmem:[%s15892_s1 + $0x2c8] sm:$0xf] }
 0x194   :  { %5531 = vmatpush.bf16.msra.mxu1 %v9705_v31  ;;  %5544 = vmatpush.bf16.msra.mxu2 %v6637_v21  ;;  %v9529_v31 = vor.u32 %v10606_v62, %v9526_v3  ;;  %v9657_v21 = vor.u32 %v10638_v8, %v9654_v23  ;;  %v9865_v62 = vld [vmem:[%s15892_s1 + $0x34] sm:$0xf0]  ;;  %v6684_v3 = vld [vmem:[%s15892_s1 + $0x128] sm:$0xf] }
 0x195   :  { %5557 = vmatpush.bf16.msra.mxu3 %v6765_v35  ;;  %v10634_v35 = vld [vmem:[%s15892_s1 + $0x1844] sm:$0xf]  ;;  %v9897_v8 = vld [vmem:[%s15892_s1 + $0x134] sm:$0xf0] }
 0x196   :  { %v9641_v53 = vor.u32 %v10634_v35, %v9638_v39  ;;  %v6908_v35 = vld [vmem:[%s15892_s1 + $0x2e8] sm:$0xf] }
 0x197   :  { %5519 = vmatpush.bf16.msra.mxu0 %v9561_v41  ;;  %v5293_v41 = vadd.f32 %v5292_v37, %v5280_v30  ;;  %v9953_v37 = vld [vmem:[%s15892_s1 + $0x2f4] sm:$0xf0] }
 0x198   :  { %5532 = vmatpush.bf16.msra.mxu1 %v9689_v42  ;;  %5545 = vmatpush.bf16.msra.mxu2 %v6621_v44  ;;  %v5305_v42 = vpop.f32.mrf.mxu3  ;;  %v6700_v44 = vld [vmem:[%s15892_s1 + $0x148] sm:$0xf] }
 0x199   :  { %5558 = vmatpush.bf16.msra.mxu3 %v6749_v43  ;;  %v13336_v51 = vadd.f32 %v5305_v42, %v5293_v41  ;;  %v5268_v43 = vpop.f32.mrf.mxu0  ;;  %v6701_v58 = vor.u32 %v9901_v45, %v6700_v44  ;;  %v10017_v41 = vld [vmem:[%s15892_s1 + $0x4f4] sm:$0xf0]  ;;  %v9609_v42 = vor.u32 %v10626_v25, %v9606_v26  ;;  %v7292_v45 = vld [vmem:[%s15892_s1 + $0x5e8] sm:$0xf] }
 0x19a   :  { %v5294_v30 = vpop.f32.mrf.mxu2  ;;  %v7165_v55 = vor.u32 %v10017_v41, %v7164_v36  ;;  %v7004_v25 = vld [vmem:[%s15892_s1 + $0x3a8] sm:$0xf]  ;;  %v9973_v41 = vld [vmem:[%s15892_s1 + $0x394] sm:$0xf0] }
 0x19b   :  { %5520 = vmatpush.bf16.msra.mxu0 %v9545_v57  ;;  %v5281_v57 = vpop.f32.mrf.mxu1  ;;  %v7132_v30 = vld [vmem:[%s15892_s1 + $0x4a8] sm:$0xf] }
 0x19c   :  { %5533 = vmatpush.bf16.msra.mxu1 %v9673_v59  ;;  %5546 = vmatpush.bf16.msra.mxu2 %v6605_v61  ;;  %v9622_v59 = vld [vmem:[%s15892_s1 + $0x1830] sm:$0xf0]  ;;  %v6556_v61 = vld [vmem:[%s15892_s1 + $0x28] sm:$0xf] }
 0x19d   :  { %5559 = vmatpush.bf16.msra.mxu3 %v6733_v20  ;;  %v9478_v20 = vld [vmem:[%s15892_s1 + $0x1710] sm:$0xf0]  ;;  %v9625_v23 = vor.u32 %v10630_v56, %v9622_v59  ;;  %v6557_v24 = vor.u32 %v9865_v62, %v6556_v61  ;;  %v9949_v56 = vld [vmem:[%s15892_s1 + $0x2d4] sm:$0xf0]  ;;  %v7020_v57 = vld [vmem:[%s15892_s1 + $0x3c8] sm:$0xf] }
 0x19e   :  { %v9481_v39 = vor.u32 %v10594_v63, %v9478_v20  ;;  %v9981_v59 = vld [vmem:[%s15892_s1 + $0x3d4] sm:$0xf0]  ;;  %v7148_v61 = vld [vmem:[%s15892_s1 + $0x4c8] sm:$0xf] }
 0x19f   :  { %5521 = vmatpush.bf16.msra.mxu0 %v9529_v31  ;;  %v6685_v31 = vor.u32 %v9897_v8, %v6684_v3  ;;  %v10013_v62 = vld [vmem:[%s15892_s1 + $0x4d4] sm:$0xf0]  ;;  %v7276_v3 = vld [vmem:[%s15892_s1 + $0x5c8] sm:$0xf]  ;;  %v7021_v63 = vor.u32 %v9981_v59, %v7020_v57 }
 0x1a0   :  { %5534 = vmatpush.bf16.msra.mxu1 %v9657_v21  ;;  %5547 = vmatpush.bf16.msra.mxu2 %v6589_v32  ;;  %v9861_v21 = vld [vmem:[%s15892_s1 + $0x14] sm:$0xf0]  ;;  %v6668_v32 = vld [vmem:[%s15892_s1 + $0x108] sm:$0xf]  ;;  %v5307_v33 = vpop.f32.mrf.mxu3  ;;  %v7149_v20 = vor.u32 %v10013_v62, %v7148_v61 }
 0x1a1   :  { %5560 = vmatpush.bf16.msra.mxu3 %v6717_v38  ;;  %v7036_v38 = vld [vmem:[%s15892_s1 + $0x3e8] sm:$0xf]  ;;  %v6541_v44 = vor.u32 %v9861_v21, %v6540_v10  ;;  %v6669_v43 = vor.u32 %v9893_v22, %v6668_v32  ;;  %v10045_v8 = vld [vmem:[%s15892_s1 + $0x5d4] sm:$0xf0]  ;;  %v10693_v21 = vld [vmem:[#allocation1] sm:$0xff] }
 0x1a2   :  { %v7277_v26 = vor.u32 %v10045_v8, %v7276_v3  ;;  %v9977_v10 = vld [vmem:[%s15892_s1 + $0x3b4] sm:$0xf0]  ;;  %v7260_v32 = vld [vmem:[%s15892_s1 + $0x5a8] sm:$0xf] }
 0x1a3   :  { %5522 = vmatpush.bf16.msra.mxu0 %v9513_v50  ;;  %v10049_v50 = vld [vmem:[%s15892_s1 + $0x5f4] sm:$0xf0]  ;;  %v6844_v57 = vld [vmem:[%s15892_s1 + $0x268] sm:$0xf] }
 0x1a4   :  { %5535 = vmatpush.bf16.msra.mxu1 %v9641_v53  ;;  %5548 = vmatpush.bf16.msra.mxu2 %v6573_v54  ;;  %v6909_v53 = vor.u32 %v9953_v37, %v6908_v35  ;;  %v7037_v54 = vor.u32 %v9985_v40, %v7036_v38  ;;  %v10041_v22 = vld [vmem:[%s15892_s1 + $0x5b4] sm:$0xf0]  ;;  %v7005_v35 = vor.u32 %v9977_v10, %v7004_v25  ;;  %v6860_v38 = vld [vmem:[%s15892_s1 + $0x288] sm:$0xf] }
 0x1a5   :  { %5561 = vmatpush.bf16.msra.mxu3 %v6701_v58  ;;  %v7293_v58 = vor.u32 %v10049_v50, %v7292_v45  ;;  %v6988_v40 = vld [vmem:[%s15892_s1 + $0x388] sm:$0xf]  ;;  %v7261_v36 = vor.u32 %v10041_v22, %v7260_v32  ;;  %v9969_v62 = vld [vmem:[%s15892_s1 + $0x374] sm:$0xf0] }
 0x1a6   :  { %v7244_v50 = vld [vmem:[%s15892_s1 + $0x588] sm:$0xf]  ;;  %v10001_v8 = vld [vmem:[%s15892_s1 + $0x474] sm:$0xf0] }
 0x1a7   :  { %5523 = vmatpush.bf16.msra.mxu0 %v9497_v11  ;;  %v6893_v11 = vor.u32 %v9949_v56, %v6892_v52  ;;  %v6989_v52 = vor.u32 %v9973_v41, %v6988_v40  ;;  %v6972_v59 = vld [vmem:[%s15892_s1 + $0x368] sm:$0xf]  ;;  %v9997_v22 = vld [vmem:[%s15892_s1 + $0x454] sm:$0xf0] }
 0x1a8   :  { %5536 = vmatpush.bf16.msra.mxu1 %v9625_v23  ;;  %5549 = vmatpush.bf16.msra.mxu2 %v6557_v24  ;;  %v6876_v23 = vld [vmem:[%s15892_s1 + $0x2a8] sm:$0xf]  ;;  %v9945_v24 = vld [vmem:[%s15892_s1 + $0x2b4] sm:$0xf0] }
 0x1a9   :  { %5562 = vmatpush.bf16.msra.mxu3 %v6685_v31  ;;  %v10009_v31 = vld [vmem:[%s15892_s1 + $0x4b4] sm:$0xf0]  ;;  %v6877_v33 = vor.u32 %v9945_v24, %v6876_v23  ;;  %v7100_v3 = vld [vmem:[%s15892_s1 + $0x468] sm:$0xf]  ;;  %v6973_v23 = vor.u32 %v9969_v62, %v6972_v59 }
 0x1aa   :  { %v7133_v37 = vor.u32 %v10009_v31, %v7132_v30  ;;  %v7101_v24 = vor.u32 %v10001_v8, %v7100_v3  ;;  %v6828_v25 = vld [vmem:[%s15892_s1 + $0x248] sm:$0xf]  ;;  %v9957_v8 = vld [vmem:[%s15892_s1 + $0x314] sm:$0xf0] }
 0x1ab   :  { %5524 = vmatpush.bf16.msra.mxu0 %v9481_v39  ;;  %v9941_v39 = vld [vmem:[%s15892_s1 + $0x294] sm:$0xf0]  ;;  %v5318_v45 = vpop.f32.mrf.mxu0  ;;  %v6956_v10 = vld [vmem:[%s15892_s1 + $0x348] sm:$0xf] }
 0x1ac   :  { %5537 = vmatpush.bf16.msra.mxu1 %v9609_v42  ;;  %5550 = vmatpush.bf16.msra.mxu2 %v6541_v44  ;;  %v7116_v42 = vld [vmem:[%s15892_s1 + $0x488] sm:$0xf]  ;;  %v10005_v44 = vld [vmem:[%s15892_s1 + $0x494] sm:$0xf0] }
 0x1ad   :  { %5563 = vmatpush.bf16.msra.mxu3 %v6669_v43  ;;  %v10037_v43 = vld [vmem:[%s15892_s1 + $0x594] sm:$0xf0]  ;;  %v7117_v56 = vor.u32 %v10005_v44, %v7116_v42  ;;  %v7084_v32 = vld [vmem:[%s15892_s1 + $0x448] sm:$0xf] }
 0x1ae   :  { %5525 = vmatmul.bf16.vlgmr.msra.gmra.mxu0 %v11997_v7  ;;  %v7085_v44 = vor.u32 %v9997_v22, %v7084_v32  ;;  %v6796_v59 = vld [vmem:[%s15892_s1 + $0x208] sm:$0xf]  ;;  %v10113_v32 = vld [vmem:[%s15892_s1 + $0x7f4] sm:$0xf0] }
 0x1af   :  { %5569 = vmatpush.bf16.msrb.mxu0 %v6909_v53  ;;  %5538 = vmatmul.bf16.vlgmr.msra.gmra.mxu1 %v10693_v21  ;;  %v5319_v53 = vadd.f32 %v5318_v45, %v13336_v51  ;;  %v7245_v51 = vor.u32 %v10037_v43, %v7244_v50  ;;  %v9965_v21 = vld [vmem:[%s15892_s1 + $0x354] sm:$0xf0]  ;;  %v6812_v45 = vld [vmem:[%s15892_s1 + $0x228] sm:$0xf] }
 0x1b0   :  { %5582 = vmatpush.bf16.msrb.mxu1 %v7037_v54  ;;  %5595 = vmatpush.bf16.msrb.mxu2 %v7165_v55  ;;  %v6861_v54 = vor.u32 %v9941_v39, %v6860_v38  ;;  %v5331_v55 = vpop.f32.mrf.mxu1  ;;  %v10029_v38 = vld [vmem:[%s15892_s1 + $0x554] sm:$0xf0]  ;;  %v6957_v42 = vor.u32 %v9965_v21, %v6956_v10  ;;  %v6940_v43 = vld [vmem:[%s15892_s1 + $0x328] sm:$0xf] }
 0x1b1   :  { %5608 = vmatpush.bf16.msrb.mxu3 %v7293_v58  ;;  %5551 = vmatmul.bf16.vlgmr.msra.gmra.mxu2 %v11075_v28  ;;  %v9937_v58 = vld [vmem:[%s15892_s1 + $0x274] sm:$0xf0]  ;;  %v5332_v61 = vadd.f32 %v5331_v55, %v5319_v53  ;;  %v7068_v55 = vld [vmem:[%s15892_s1 + $0x428] sm:$0xf] }
 0x1b2   :  { %5564 = vmatmul.bf16.vlgmr.msra.gmra.mxu3 %v11085_v34  ;;  %v5344_v31 = vpop.f32.mrf.mxu2  ;;  %v9929_v50 = vld [vmem:[%s15892_s1 + $0x234] sm:$0xf0]  ;;  %v6924_v3 = vld [vmem:[%s15892_s1 + $0x308] sm:$0xf] }
 0x1b3   :  { %5570 = vmatpush.bf16.msrb.mxu0 %v6893_v11  ;;  %v7228_v11 = vld [vmem:[%s15892_s1 + $0x568] sm:$0xf]  ;;  %v5320_v39 = vpop.f32.mrf.mxu0  ;;  %v10081_v10 = vld [vmem:[%s15892_s1 + $0x6f4] sm:$0xf0] }
 0x1b4   :  { %5583 = vmatpush.bf16.msrb.mxu1 %v7021_v63  ;;  %5596 = vmatpush.bf16.msrb.mxu2 %v7149_v20  ;;  %v10033_v63 = vld [vmem:[%s15892_s1 + $0x574] sm:$0xf0]  ;;  %v6845_v20 = vor.u32 %v9937_v58, %v6844_v57  ;;  %v6813_v58 = vor.u32 %v9929_v50, %v6812_v45  ;;  %v7676_v22 = vld [vmem:[%s15892_s1 + $0x8e8] sm:$0xf] }
 0x1b5   :  { %5609 = vmatpush.bf16.msrb.mxu3 %v7277_v26  ;;  %v9933_v26 = vld [vmem:[%s15892_s1 + $0x254] sm:$0xf0]  ;;  %v7229_v30 = vor.u32 %v10033_v63, %v7228_v11  ;;  %v7052_v11 = vld [vmem:[%s15892_s1 + $0x408] sm:$0xf] }
 0x1b6   :  { %v6829_v40 = vor.u32 %v9933_v26, %v6828_v25  ;;  %v10025_v57 = vld [vmem:[%s15892_s1 + $0x534] sm:$0xf0]  ;;  %v7420_v26 = vld [vmem:[%s15892_s1 + $0x6e8] sm:$0xf] }
 0x1b7   :  { %5571 = vmatpush.bf16.msrb.mxu0 %v6877_v33  ;;  %v5345_v33 = vadd.f32 %v5344_v31, %v5332_v61  ;;  %v10177_v39 = vld [vmem:[%s15892_s1 + $0x9f4] sm:$0xf0]  ;;  %v7404_v45 = vld [vmem:[%s15892_s1 + $0x6c8] sm:$0xf] }
 0x1b8   :  { %5584 = vmatpush.bf16.msrb.mxu1 %v7005_v35  ;;  %5597 = vmatpush.bf16.msrb.mxu2 %v7133_v37  ;;  %v5357_v35 = vpop.f32.mrf.mxu3  ;;  %v7212_v37 = vld [vmem:[%s15892_s1 + $0x548] sm:$0xf]  ;;  %v10077_v50 = vld [vmem:[%s15892_s1 + $0x6d4] sm:$0xf0] }
 0x1b9   :  { %5610 = vmatpush.bf16.msrb.mxu3 %v7261_v36  ;;  %v5333_v36 = vpop.f32.mrf.mxu1  ;;  %v13534_v41 = vadd.f32 %v5357_v35, %v5345_v33  ;;  %v7213_v53 = vor.u32 %v10029_v38, %v7212_v37  ;;  %v10145_v33 = vld [vmem:[%s15892_s1 + $0x8f4] sm:$0xf0]  ;;  %v6925_v35 = vor.u32 %v9957_v8, %v6924_v3  ;;  %v7804_v38 = vld [vmem:[%s15892_s1 + $0x9e8] sm:$0xf] }
 0x1ba   :  { %v5346_v25 = vpop.f32.mrf.mxu2  ;;  %v7421_v36 = vor.u32 %v10081_v10, %v7420_v26  ;;  %v7516_v3 = vld [vmem:[%s15892_s1 + $0x7a8] sm:$0xf] }
 0x1bb   :  { %5572 = vmatpush.bf16.msrb.mxu0 %v6861_v54  ;;  %v9961_v54 = vld [vmem:[%s15892_s1 + $0x334] sm:$0xf0] }
 0x1bc   :  { %5585 = vmatpush.bf16.msrb.mxu1 %v6989_v52  ;;  %5598 = vmatpush.bf16.msrb.mxu2 %v7117_v56  ;;  %v9993_v52 = vld [vmem:[%s15892_s1 + $0x434] sm:$0xf0]  ;;  %v7196_v56 = vld [vmem:[%s15892_s1 + $0x528] sm:$0xf]  ;;  %v6941_v61 = vor.u32 %v9961_v54, %v6940_v43 }
 0x1bd   :  { %5611 = vmatpush.bf16.msrb.mxu3 %v7245_v51  ;;  %v9925_v51 = vld [vmem:[%s15892_s1 + $0x214] sm:$0xf0]  ;;  %v7069_v62 = vor.u32 %v9993_v52, %v7068_v55  ;;  %v7197_v63 = vor.u32 %v10025_v57, %v7196_v56  ;;  %v7532_v43 = vld [vmem:[%s15892_s1 + $0x7c8] sm:$0xf] }
 0x1be   :  { %v6797_v21 = vor.u32 %v9925_v51, %v6796_v59  ;;  %v10109_v54 = vld [vmem:[%s15892_s1 + $0x7d4] sm:$0xf0]  ;;  %v7660_v55 = vld [vmem:[%s15892_s1 + $0x8c8] sm:$0xf] }
 0x1bf   :  { %5573 = vmatpush.bf16.msrb.mxu0 %v6845_v20  ;;  %v9989_v20 = vld [vmem:[%s15892_s1 + $0x414] sm:$0xf0]  ;;  %v7788_v56 = vld [vmem:[%s15892_s1 + $0x9c8] sm:$0xf]  ;;  %v7533_v59 = vor.u32 %v10109_v54, %v7532_v43 }
 0x1c0   :  { %5586 = vmatpush.bf16.msrb.mxu1 %v6973_v23  ;;  %5599 = vmatpush.bf16.msrb.mxu2 %v7101_v24  ;;  %v7180_v23 = vld [vmem:[%s15892_s1 + $0x508] sm:$0xf]  ;;  %v10021_v24 = vld [vmem:[%s15892_s1 + $0x514] sm:$0xf0]  ;;  %v5359_v31 = vpop.f32.mrf.mxu3  ;;  %v7053_v37 = vor.u32 %v9989_v20, %v7052_v11 }
 0x1c1   :  { %5612 = vmatpush.bf16.msrb.mxu3 %v7229_v30  ;;  %v7548_v30 = vld [vmem:[%s15892_s1 + $0x7e8] sm:$0xf]  ;;  %v10141_v52 = vld [vmem:[%s15892_s1 + $0x8d4] sm:$0xf0] }
 0x1c2   :  { %v10173_v57 = vld [vmem:[%s15892_s1 + $0x9d4] sm:$0xf0]  ;;  %v7661_v51 = vor.u32 %v10141_v52, %v7660_v55  ;;  %v7612_v52 = vld [vmem:[%s15892_s1 + $0x868] sm:$0xf] }
 0x1c3   :  { %5574 = vmatpush.bf16.msrb.mxu0 %v6829_v40  ;;  %v7181_v40 = vor.u32 %v10021_v24, %v7180_v23  ;;  %v7789_v8 = vor.u32 %v10173_v57, %v7788_v56  ;;  %v10105_v11 = vld [vmem:[%s15892_s1 + $0x7b4] sm:$0xf0]  ;;  %v7772_v23 = vld [vmem:[%s15892_s1 + $0x9a8] sm:$0xf] }
 0x1c4   :  { %5587 = vmatpush.bf16.msrb.mxu1 %v6957_v42  ;;  %5600 = vmatpush.bf16.msrb.mxu2 %v7085_v44  ;;  %v7549_v42 = vor.u32 %v10113_v32, %v7548_v30  ;;  %v7677_v44 = vor.u32 %v10145_v33, %v7676_v22  ;;  %v10137_v20 = vld [vmem:[%s15892_s1 + $0x8b4] sm:$0xf0]  ;;  %v7517_v26 = vor.u32 %v10105_v11, %v7516_v3  ;;  %v7372_v30 = vld [vmem:[%s15892_s1 + $0x688] sm:$0xf] }
 0x1c5   :  { %5613 = vmatpush.bf16.msrb.mxu3 %v7213_v53  ;;  %v7805_v53 = vor.u32 %v10177_v39, %v7804_v38  ;;  %v10169_v24 = vld [vmem:[%s15892_s1 + $0x9b4] sm:$0xf0]  ;;  %v7628_v33 = vld [vmem:[%s15892_s1 + $0x888] sm:$0xf] }
 0x1c6   :  { %v10069_v31 = vld [vmem:[%s15892_s1 + $0x694] sm:$0xf0]  ;;  %v7773_v32 = vor.u32 %v10169_v24, %v7772_v23  ;;  %v7756_v38 = vld [vmem:[%s15892_s1 + $0x988] sm:$0xf] }
 0x1c7   :  { %5575 = vmatpush.bf16.msrb.mxu0 %v6813_v58  ;;  %v7405_v58 = vor.u32 %v10077_v50, %v7404_v45  ;;  %v10101_v22 = vld [vmem:[%s15892_s1 + $0x794] sm:$0xf0]  ;;  %v7356_v50 = vld [vmem:[%s15892_s1 + $0x668] sm:$0xf] }
 0x1c8   :  { %5588 = vmatpush.bf16.msrb.mxu1 %v6941_v61  ;;  %5601 = vmatpush.bf16.msrb.mxu2 %v7069_v62  ;;  %v7388_v61 = vld [vmem:[%s15892_s1 + $0x6a8] sm:$0xf]  ;;  %v10073_v62 = vld [vmem:[%s15892_s1 + $0x6b4] sm:$0xf0] }
 0x1c9   :  { %5614 = vmatpush.bf16.msrb.mxu3 %v7197_v63  ;;  %v7644_v63 = vld [vmem:[%s15892_s1 + $0x8a8] sm:$0xf]  ;;  %v7389_v25 = vor.u32 %v10073_v62, %v7388_v61  ;;  %v10165_v39 = vld [vmem:[%s15892_s1 + $0x994] sm:$0xf0] }
 0x1ca   :  { %v7645_v10 = vor.u32 %v10137_v20, %v7644_v63  ;;  %v10065_v43 = vld [vmem:[%s15892_s1 + $0x674] sm:$0xf0]  ;;  %v7740_v57 = vld [vmem:[%s15892_s1 + $0x968] sm:$0xf] }
 0x1cb   :  { %5576 = vmatpush.bf16.msrb.mxu0 %v6797_v21  ;;  %v7500_v21 = vld [vmem:[%s15892_s1 + $0x788] sm:$0xf]  ;;  %v10097_v55 = vld [vmem:[%s15892_s1 + $0x774] sm:$0xf0] }
 0x1cc   :  { %5589 = vmatpush.bf16.msrb.mxu1 %v6925_v35  ;;  %5602 = vmatpush.bf16.msrb.mxu2 %v7053_v37  ;;  %v10133_v35 = vld [vmem:[%s15892_s1 + $0x894] sm:$0xf0]  ;;  %v5370_v37 = vpop.f32.mrf.mxu0  ;;  %v7340_v62 = vld [vmem:[%s15892_s1 + $0x648] sm:$0xf] }
 0x1cd   :  { %5615 = vmatpush.bf16.msrb.mxu3 %v7181_v40  ;;  %v5371_v40 = vadd.f32 %v5370_v37, %v13534_v41  ;;  %v7629_v45 = vor.u32 %v10133_v35, %v7628_v33  ;;  %v7757_v41 = vor.u32 %v10165_v39, %v7756_v38  ;;  %v10129_v56 = vld [vmem:[%s15892_s1 + $0x874] sm:$0xf0]  ;;  %v7596_v23 = vld [vmem:[%s15892_s1 + $0x848] sm:$0xf] }
 0x1ce   :  { %5577 = vmatmul.bf16.vlgmr.msrb.gmra.mxu0 %v11073_v27  ;;  %v7613_v61 = vor.u32 %v10129_v56, %v7612_v52  ;;  %v10061_v3 = vld [vmem:[%s15892_s1 + $0x654] sm:$0xf0]  ;;  %v7324_v37 = vld [vmem:[%s15892_s1 + $0x628] sm:$0xf] }
 0x1cf   :  { %5621 = vmatpush.bf16.msra.mxu0 %v7421_v36  ;;  %5603 = vmatmul.bf16.vlgmr.msrb.gmra.mxu2 %v11153_v0  ;;  %v7373_v36 = vor.u32 %v10069_v31, %v7372_v30  ;;  %v10093_v20 = vld [vmem:[%s15892_s1 + $0x754] sm:$0xf0]  ;;  %v7452_v39 = vld [vmem:[%s15892_s1 + $0x728] sm:$0xf] }
 0x1d0   :  { %5634 = vmatpush.bf16.msra.mxu1 %v7549_v42  ;;  %5647 = vmatpush.bf16.msra.mxu2 %v7677_v44  ;;  %v5383_v42 = vpop.f32.mrf.mxu1  ;;  %v7501_v44 = vor.u32 %v10101_v22, %v7500_v21  ;;  %v10125_v24 = vld [vmem:[%s15892_s1 + $0x854] sm:$0xf0]  ;;  %v7341_v21 = vor.u32 %v10061_v3, %v7340_v62  ;;  %v7436_v52 = vld [vmem:[%s15892_s1 + $0x708] sm:$0xf] }
 0x1d1   :  { %5660 = vmatpush.bf16.msra.mxu3 %v7805_v53  ;;  %5590 = vmatmul.bf16.vlgmr.msrb.gmra.mxu1 %v11077_v29  ;;  %v7484_v53 = vld [vmem:[%s15892_s1 + $0x768] sm:$0xf]  ;;  %v5384_v54 = vadd.f32 %v5383_v42, %v5371_v40  ;;  %v10157_v30 = vld [vmem:[%s15892_s1 + $0x954] sm:$0xf0]  ;;  %v7597_v35 = vor.u32 %v10125_v24, %v7596_v23 }
 0x1d2   :  { %5616 = vmatmul.bf16.vlgmr.msrb.gmra.mxu3 %v11157_v2  ;;  %v5396_v63 = vpop.f32.mrf.mxu2  ;;  %v10057_v38 = vld [vmem:[%s15892_s1 + $0x634] sm:$0xf0]  ;;  %v7580_v42 = vld [vmem:[%s15892_s1 + $0x828] sm:$0xf] }
 0x1d3   :  { %5622 = vmatpush.bf16.msra.mxu0 %v7405_v58  ;;  %v10161_v58 = vld [vmem:[%s15892_s1 + $0x974] sm:$0xf0]  ;;  %v7932_v3 = vld [vmem:[%s15892_s1 + $0xae8] sm:$0xf] }
 0x1d4   :  { %5635 = vmatpush.bf16.msra.mxu1 %v7533_v59  ;;  %5648 = vmatpush.bf16.msra.mxu2 %v7661_v51  ;;  %v7357_v59 = vor.u32 %v10065_v43, %v7356_v50  ;;  %v7485_v51 = vor.u32 %v10097_v55, %v7484_v53  ;;  %v7741_v11 = vor.u32 %v10161_v58, %v7740_v57  ;;  %v5372_v31 = vpop.f32.mrf.mxu0  ;;  %v10153_v50 = vld [vmem:[%s15892_s1 + $0x934] sm:$0xf0]  ;;  %v7308_v53 = vld [vmem:[%s15892_s1 + $0x608] sm:$0xf] }
 0x1d5   :  { %5661 = vmatpush.bf16.msra.mxu3 %v7789_v8  ;;  %v7468_v8 = vld [vmem:[%s15892_s1 + $0x748] sm:$0xf]  ;;  %v7325_v43 = vor.u32 %v10057_v38, %v7324_v37  ;;  %v10085_v56 = vld [vmem:[%s15892_s1 + $0x714] sm:$0xf0] }
 0x1d6   :  { %v7469_v33 = vor.u32 %v10093_v20, %v7468_v8  ;;  %v7564_v57 = vld [vmem:[%s15892_s1 + $0x808] sm:$0xf]  ;;  %v10209_v8 = vld [vmem:[%s15892_s1 + $0xaf4] sm:$0xf0] }
 0x1d7   :  { %5623 = vmatpush.bf16.msra.mxu0 %v7389_v25  ;;  %v5397_v25 = vadd.f32 %v5396_v63, %v5384_v54  ;;  %v10241_v23 = vld [vmem:[%s15892_s1 + $0xbf4] sm:$0xf0]  ;;  %v8188_v24 = vld [vmem:[%s15892_s1 + $0xce8] sm:$0xf] }
 0x1d8   :  { %5636 = vmatpush.bf16.msra.mxu1 %v7517_v26  ;;  %5649 = vmatpush.bf16.msra.mxu2 %v7645_v10  ;;  %v5409_v26 = vpop.f32.mrf.mxu3  ;;  %v7724_v10 = vld [vmem:[%s15892_s1 + $0x948] sm:$0xf]  ;;  %v10305_v31 = vld [vmem:[%s15892_s1 + $0xdf4] sm:$0xf0] }
 0x1d9   :  { %5662 = vmatpush.bf16.msra.mxu3 %v7773_v32  ;;  %v5385_v32 = vpop.f32.mrf.mxu1  ;;  %v13733_v22 = vadd.f32 %v5409_v26, %v5397_v25  ;;  %v7725_v40 = vor.u32 %v10157_v30, %v7724_v10  ;;  %v10273_v25 = vld [vmem:[%s15892_s1 + $0xcf4] sm:$0xf0]  ;;  %v7437_v26 = vor.u32 %v10085_v56, %v7436_v52  ;;  %v8316_v30 = vld [vmem:[%s15892_s1 + $0xde8] sm:$0xf] }
 0x1da   :  { %v5398_v62 = vpop.f32.mrf.mxu2  ;;  %v7933_v32 = vor.u32 %v10209_v8, %v7932_v3  ;;  %v7916_v37 = vld [vmem:[%s15892_s1 + $0xac8] sm:$0xf]  ;;  %v10205_v38 = vld [vmem:[%s15892_s1 + $0xad4] sm:$0xf0] }
 0x1db   :  { %5624 = vmatpush.bf16.msra.mxu0 %v7373_v36  ;;  %v10089_v36 = vld [vmem:[%s15892_s1 + $0x734] sm:$0xf0]  ;;  %v8028_v52 = vld [vmem:[%s15892_s1 + $0xba8] sm:$0xf] }
 0x1dc   :  { %5637 = vmatpush.bf16.msra.mxu1 %v7501_v44  ;;  %5650 = vmatpush.bf16.msra.mxu2 %v7629_v45  ;;  %v10121_v44 = vld [vmem:[%s15892_s1 + $0x834] sm:$0xf0]  ;;  %v7708_v45 = vld [vmem:[%s15892_s1 + $0x928] sm:$0xf]  ;;  %v7453_v54 = vor.u32 %v10089_v36, %v7452_v39 }
 0x1dd   :  { %5663 = vmatpush.bf16.msra.mxu3 %v7757_v41  ;;  %v10053_v41 = vld [vmem:[%s15892_s1 + $0x614] sm:$0xf0]  ;;  %v7581_v55 = vor.u32 %v10121_v44, %v7580_v42  ;;  %v7709_v58 = vor.u32 %v10153_v50, %v7708_v45  ;;  %v8044_v39 = vld [vmem:[%s15892_s1 + $0xbc8] sm:$0xf] }
 0x1de   :  { %v7309_v20 = vor.u32 %v10053_v41, %v7308_v53  ;;  %v10237_v36 = vld [vmem:[%s15892_s1 + $0xbd4] sm:$0xf0]  ;;  %v8172_v42 = vld [vmem:[%s15892_s1 + $0xcc8] sm:$0xf] }
 0x1df   :  { %5625 = vmatpush.bf16.msra.mxu0 %v7357_v59  ;;  %v10117_v59 = vld [vmem:[%s15892_s1 + $0x814] sm:$0xf0]  ;;  %v8300_v45 = vld [vmem:[%s15892_s1 + $0xdc8] sm:$0xf]  ;;  %v8045_v53 = vor.u32 %v10237_v36, %v8044_v39 }
 0x1e0   :  { %5638 = vmatpush.bf16.msra.mxu1 %v7485_v51  ;;  %5651 = vmatpush.bf16.msra.mxu2 %v7613_v61  ;;  %v7692_v51 = vld [vmem:[%s15892_s1 + $0x908] sm:$0xf]  ;;  %v10149_v61 = vld [vmem:[%s15892_s1 + $0x914] sm:$0xf0]  ;;  %v5411_v63 = vpop.f32.mrf.mxu3  ;;  %v7565_v10 = vor.u32 %v10117_v59, %v7564_v57 }
 0x1e1   :  { %5664 = vmatpush.bf16.msra.mxu3 %v7741_v11  ;;  %v8060_v11 = vld [vmem:[%s15892_s1 + $0xbe8] sm:$0xf]  ;;  %v10269_v44 = vld [vmem:[%s15892_s1 + $0xcd4] sm:$0xf0] }
 0x1e2   :  { %v10301_v50 = vld [vmem:[%s15892_s1 + $0xdd4] sm:$0xf0]  ;;  %v8173_v41 = vor.u32 %v10269_v44, %v8172_v42  ;;  %v8124_v44 = vld [vmem:[%s15892_s1 + $0xc68] sm:$0xf] }
 0x1e3   :  { %5626 = vmatpush.bf16.msra.mxu0 %v7341_v21  ;;  %v7693_v21 = vor.u32 %v10149_v61, %v7692_v51  ;;  %v8301_v56 = vor.u32 %v10301_v50, %v8300_v45  ;;  %v10233_v57 = vld [vmem:[%s15892_s1 + $0xbb4] sm:$0xf0]  ;;  %v8284_v51 = vld [vmem:[%s15892_s1 + $0xda8] sm:$0xf] }
 0x1e4   :  { %5639 = vmatpush.bf16.msra.mxu1 %v7469_v33  ;;  %5652 = vmatpush.bf16.msra.mxu2 %v7597_v35  ;;  %v8061_v33 = vor.u32 %v10241_v23, %v8060_v11  ;;  %v8189_v35 = vor.u32 %v10273_v25, %v8188_v24  ;;  %v10265_v59 = vld [vmem:[%s15892_s1 + $0xcb4] sm:$0xf0]  ;;  %v8029_v3 = vor.u32 %v10233_v57, %v8028_v52  ;;  %v7884_v11 = vld [vmem:[%s15892_s1 + $0xa88] sm:$0xf] }
 0x1e5   :  { %5665 = vmatpush.bf16.msra.mxu3 %v7725_v40  ;;  %v8317_v40 = vor.u32 %v10305_v31, %v8316_v30  ;;  %v10297_v61 = vld [vmem:[%s15892_s1 + $0xdb4] sm:$0xf0]  ;;  %v8140_v25 = vld [vmem:[%s15892_s1 + $0xc88] sm:$0xf] }
 0x1e6   :  { %v10197_v63 = vld [vmem:[%s15892_s1 + $0xa94] sm:$0xf0]  ;;  %v8285_v23 = vor.u32 %v10297_v61, %v8284_v51  ;;  %v8268_v30 = vld [vmem:[%s15892_s1 + $0xd88] sm:$0xf] }
 0x1e7   :  { %5627 = vmatpush.bf16.msra.mxu0 %v7325_v43  ;;  %v7917_v43 = vor.u32 %v10205_v38, %v7916_v37  ;;  %v10229_v24 = vld [vmem:[%s15892_s1 + $0xb94] sm:$0xf0]  ;;  %v7868_v38 = vld [vmem:[%s15892_s1 + $0xa68] sm:$0xf] }
 0x1e8   :  { %5640 = vmatpush.bf16.msra.mxu1 %v7453_v54  ;;  %5653 = vmatpush.bf16.msra.mxu2 %v7581_v55  ;;  %v7900_v54 = vld [vmem:[%s15892_s1 + $0xaa8] sm:$0xf]  ;;  %v10201_v55 = vld [vmem:[%s15892_s1 + $0xab4] sm:$0xf0] }
 0x1e9   :  { %5666 = vmatpush.bf16.msra.mxu3 %v7709_v58  ;;  %v8156_v58 = vld [vmem:[%s15892_s1 + $0xca8] sm:$0xf]  ;;  %v7901_v62 = vor.u32 %v10201_v55, %v7900_v54  ;;  %v10293_v31 = vld [vmem:[%s15892_s1 + $0xd94] sm:$0xf0] }
 0x1ea   :  { %v8157_v8 = vor.u32 %v10265_v59, %v8156_v58  ;;  %v10193_v39 = vld [vmem:[%s15892_s1 + $0xa74] sm:$0xf0]  ;;  %v8252_v50 = vld [vmem:[%s15892_s1 + $0xd68] sm:$0xf] }
 0x1eb   :  { %5628 = vmatpush.bf16.msra.mxu0 %v7309_v20  ;;  %v8012_v20 = vld [vmem:[%s15892_s1 + $0xb88] sm:$0xf]  ;;  %v10225_v42 = vld [vmem:[%s15892_s1 + $0xb74] sm:$0xf0] }
 0x1ec   :  { %5641 = vmatpush.bf16.msra.mxu1 %v7437_v26  ;;  %5654 = vmatpush.bf16.msra.mxu2 %v7565_v10  ;;  %v10261_v26 = vld [vmem:[%s15892_s1 + $0xc94] sm:$0xf0]  ;;  %v5422_v10 = vpop.f32.mrf.mxu0  ;;  %v7852_v55 = vld [vmem:[%s15892_s1 + $0xa48] sm:$0xf] }
 0x1ed   :  { %5667 = vmatpush.bf16.msra.mxu3 %v7693_v21  ;;  %v5423_v21 = vadd.f32 %v5422_v10, %v13733_v22  ;;  %v8141_v37 = vor.u32 %v10261_v26, %v8140_v25  ;;  %v8269_v22 = vor.u32 %v10293_v31, %v8268_v30  ;;  %v10257_v45 = vld [vmem:[%s15892_s1 + $0xc74] sm:$0xf0]  ;;  %v8108_v51 = vld [vmem:[%s15892_s1 + $0xc48] sm:$0xf] }
 0x1ee   :  { %5629 = vmatmul.bf16.vlgmr.msra.gmra.mxu0 %v11148_v60  ;;  %v8125_v54 = vor.u32 %v10257_v45, %v8124_v44  ;;  %v10189_v52 = vld [vmem:[%s15892_s1 + $0xa54] sm:$0xf0]  ;;  %v7836_v10 = vld [vmem:[%s15892_s1 + $0xa28] sm:$0xf] }
 0x1ef   :  { %5673 = vmatpush.bf16.msrb.mxu0 %v7933_v32  ;;  %5655 = vmatmul.bf16.vlgmr.msra.gmra.mxu2 %v11403_v12  ;;  %v7885_v32 = vor.u32 %v10197_v63, %v7884_v11  ;;  %v10221_v59 = vld [vmem:[%s15892_s1 + $0xb54] sm:$0xf0]  ;;  %v7964_v31 = vld [vmem:[%s15892_s1 + $0xb28] sm:$0xf] }
 0x1f0   :  { %5686 = vmatpush.bf16.msrb.mxu1 %v8061_v33  ;;  %5699 = vmatpush.bf16.msrb.mxu2 %v8189_v35  ;;  %v5435_v33 = vpop.f32.mrf.mxu1  ;;  %v8013_v35 = vor.u32 %v10229_v24, %v8012_v20  ;;  %v10253_v61 = vld [vmem:[%s15892_s1 + $0xc54] sm:$0xf0]  ;;  %v7853_v20 = vor.u32 %v10189_v52, %v7852_v55  ;;  %v7948_v44 = vld [vmem:[%s15892_s1 + $0xb08] sm:$0xf] }
 0x1f1   :  { %5712 = vmatpush.bf16.msrb.mxu3 %v8317_v40  ;;  %5642 = vmatmul.bf16.vlgmr.msra.gmra.mxu1 %v11155_v1  ;;  %v7996_v40 = vld [vmem:[%s15892_s1 + $0xb68] sm:$0xf]  ;;  %v5436_v36 = vadd.f32 %v5435_v33, %v5423_v21  ;;  %v10285_v11 = vld [vmem:[%s15892_s1 + $0xd54] sm:$0xf0]  ;;  %v8109_v26 = vor.u32 %v10253_v61, %v8108_v51 }
 0x1f2   :  { %5668 = vmatmul.bf16.vlgmr.msra.gmra.mxu3 %v11413_v16  ;;  %v5448_v58 = vpop.f32.mrf.mxu2  ;;  %v10185_v30 = vld [vmem:[%s15892_s1 + $0xa34] sm:$0xf0]  ;;  %v8092_v33 = vld [vmem:[%s15892_s1 + $0xc28] sm:$0xf] }
 0x1f3   :  { %5674 = vmatpush.bf16.msrb.mxu0 %v7917_v43  ;;  %v10289_v43 = vld [vmem:[%s15892_s1 + $0xd74] sm:$0xf0]  ;;  %v8444_v52 = vld [vmem:[%s15892_s1 + $0xee8] sm:$0xf] }
 0x1f4   :  { %5687 = vmatpush.bf16.msrb.mxu1 %v8045_v53  ;;  %5700 = vmatpush.bf16.msrb.mxu2 %v8173_v41  ;;  %v7869_v53 = vor.u32 %v10193_v39, %v7868_v38  ;;  %v7997_v41 = vor.u32 %v10225_v42, %v7996_v40  ;;  %v8253_v57 = vor.u32 %v10289_v43, %v8252_v50  ;;  %v5424_v63 = vpop.f32.mrf.mxu0  ;;  %v10281_v38 = vld [vmem:[%s15892_s1 + $0xd34] sm:$0xf0]  ;;  %v7820_v40 = vld [vmem:[%s15892_s1 + $0xa08] sm:$0xf] }
 0x1f5   :  { %5713 = vmatpush.bf16.msrb.mxu3 %v8301_v56  ;;  %v7980_v56 = vld [vmem:[%s15892_s1 + $0xb48] sm:$0xf]  ;;  %v7837_v39 = vor.u32 %v10185_v30, %v7836_v10  ;;  %v10213_v45 = vld [vmem:[%s15892_s1 + $0xb14] sm:$0xf0] }
 0x1f6   :  { %v7981_v25 = vor.u32 %v10221_v59, %v7980_v56  ;;  %v8076_v50 = vld [vmem:[%s15892_s1 + $0xc08] sm:$0xf]  ;;  %v10337_v56 = vld [vmem:[%s15892_s1 + $0xef4] sm:$0xf0] }
 0x1f7   :  { %5675 = vmatpush.bf16.msrb.mxu0 %v7901_v62  ;;  %v5449_v62 = vadd.f32 %v5448_v58, %v5436_v36  ;;  %v10369_v51 = vld [vmem:[%s15892_s1 + $0xff4] sm:$0xf0]  ;;  %v8700_v61 = vld [vmem:[%s15892_s1 + $0x10e8] sm:$0xf] }
 0x1f8   :  { %5688 = vmatpush.bf16.msrb.mxu1 %v8029_v3  ;;  %5701 = vmatpush.bf16.msrb.mxu2 %v8157_v8  ;;  %v5461_v3 = vpop.f32.mrf.mxu3  ;;  %v8236_v8 = vld [vmem:[%s15892_s1 + $0xd48] sm:$0xf]  ;;  %v10433_v63 = vld [vmem:[%s15892_s1 + $0x11f4] sm:$0xf0] }
 0x1f9   :  { %5714 = vmatpush.bf16.msrb.mxu3 %v8285_v23  ;;  %v5437_v23 = vpop.f32.mrf.mxu1  ;;  %v13932_v24 = vadd.f32 %v5461_v3, %v5449_v62  ;;  %v8237_v21 = vor.u32 %v10285_v11, %v8236_v8  ;;  %v10401_v62 = vld [vmem:[%s15892_s1 + $0x10f4] sm:$0xf0]  ;;  %v7949_v3 = vor.u32 %v10213_v45, %v7948_v44  ;;  %v8828_v11 = vld [vmem:[%s15892_s1 + $0x11e8] sm:$0xf] }
 0x1fa   :  { %v5450_v55 = vpop.f32.mrf.mxu2  ;;  %v8445_v23 = vor.u32 %v10337_v56, %v8444_v52  ;;  %v8428_v10 = vld [vmem:[%s15892_s1 + $0xec8] sm:$0xf]  ;;  %v10333_v30 = vld [vmem:[%s15892_s1 + $0xed4] sm:$0xf0] }
 0x1fb   :  { %5676 = vmatpush.bf16.msrb.mxu0 %v7885_v32  ;;  %v10217_v32 = vld [vmem:[%s15892_s1 + $0xb34] sm:$0xf0]  ;;  %v8540_v44 = vld [vmem:[%s15892_s1 + $0xfa8] sm:$0xf] }
 0x1fc   :  { %5689 = vmatpush.bf16.msrb.mxu1 %v8013_v35  ;;  %5702 = vmatpush.bf16.msrb.mxu2 %v8141_v37  ;;  %v10249_v35 = vld [vmem:[%s15892_s1 + $0xc34] sm:$0xf0]  ;;  %v8220_v37 = vld [vmem:[%s15892_s1 + $0xd28] sm:$0xf]  ;;  %v7965_v36 = vor.u32 %v10217_v32, %v7964_v31 }
 0x1fd   :  { %5715 = vmatpush.bf16.msrb.mxu3 %v8269_v22  ;;  %v10181_v22 = vld [vmem:[%s15892_s1 + $0xa14] sm:$0xf0]  ;;  %v8093_v42 = vor.u32 %v10249_v35, %v8092_v33  ;;  %v8221_v43 = vor.u32 %v10281_v38, %v8220_v37  ;;  %v8556_v31 = vld [vmem:[%s15892_s1 + $0xfc8] sm:$0xf] }
 0x1fe   :  { %v7821_v59 = vor.u32 %v10181_v22, %v7820_v40  ;;  %v10365_v32 = vld [vmem:[%s15892_s1 + $0xfd4] sm:$0xf0]  ;;  %v8684_v33 = vld [vmem:[%s15892_s1 + $0x10c8] sm:$0xf] }
 0x1ff   :  { %5677 = vmatpush.bf16.msrb.mxu0 %v7869_v53  ;;  %v10245_v53 = vld [vmem:[%s15892_s1 + $0xc14] sm:$0xf0]  ;;  %v8812_v37 = vld [vmem:[%s15892_s1 + $0x11c8] sm:$0xf]  ;;  %v8557_v40 = vor.u32 %v10365_v32, %v8556_v31 }
 0x200   :  { %5690 = vmatpush.bf16.msrb.mxu1 %v7997_v41  ;;  %5703 = vmatpush.bf16.msrb.mxu2 %v8125_v54  ;;  %v8204_v41 = vld [vmem:[%s15892_s1 + $0xd08] sm:$0xf]  ;;  %v10277_v54 = vld [vmem:[%s15892_s1 + $0xd14] sm:$0xf0]  ;;  %v5463_v58 = vpop.f32.mrf.mxu3  ;;  %v8077_v8 = vor.u32 %v10245_v53, %v8076_v50 }
 0x201   :  { %5716 = vmatpush.bf16.msrb.mxu3 %v8253_v57  ;;  %v8572_v57 = vld [vmem:[%s15892_s1 + $0xfe8] sm:$0xf]  ;;  %v10397_v35 = vld [vmem:[%s15892_s1 + $0x10d4] sm:$0xf0] }
 0x202   :  { %v10429_v38 = vld [vmem:[%s15892_s1 + $0x11d4] sm:$0xf0]  ;;  %v8685_v22 = vor.u32 %v10397_v35, %v8684_v33  ;;  %v8636_v35 = vld [vmem:[%s15892_s1 + $0x1068] sm:$0xf] }
 0x203   :  { %5678 = vmatpush.bf16.msrb.mxu0 %v7853_v20  ;;  %v8205_v20 = vor.u32 %v10277_v54, %v8204_v41  ;;  %v8813_v45 = vor.u32 %v10429_v38, %v8812_v37  ;;  %v10361_v50 = vld [vmem:[%s15892_s1 + $0xfb4] sm:$0xf0]  ;;  %v8796_v41 = vld [vmem:[%s15892_s1 + $0x11a8] sm:$0xf] }
 0x204   :  { %5691 = vmatpush.bf16.msrb.mxu1 %v7981_v25  ;;  %5704 = vmatpush.bf16.msrb.mxu2 %v8109_v26  ;;  %v8573_v25 = vor.u32 %v10369_v51, %v8572_v57  ;;  %v8701_v26 = vor.u32 %v10401_v62, %v8700_v61  ;;  %v10393_v53 = vld [vmem:[%s15892_s1 + $0x10b4] sm:$0xf0]  ;;  %v8541_v52 = vor.u32 %v10361_v50, %v8540_v44  ;;  %v8396_v57 = vld [vmem:[%s15892_s1 + $0xe88] sm:$0xf] }
 0x205   :  { %5717 = vmatpush.bf16.msrb.mxu3 %v8237_v21  ;;  %v8829_v21 = vor.u32 %v10433_v63, %v8828_v11  ;;  %v10425_v54 = vld [vmem:[%s15892_s1 + $0x11b4] sm:$0xf0]  ;;  %v8652_v62 = vld [vmem:[%s15892_s1 + $0x1088] sm:$0xf] }
 0x206   :  { %v10325_v58 = vld [vmem:[%s15892_s1 + $0xe94] sm:$0xf0]  ;;  %v8797_v51 = vor.u32 %v10425_v54, %v8796_v41  ;;  %v8780_v11 = vld [vmem:[%s15892_s1 + $0x1188] sm:$0xf] }
 0x207   :  { %5679 = vmatpush.bf16.msrb.mxu0 %v7837_v39  ;;  %v8429_v39 = vor.u32 %v10333_v30, %v8428_v10  ;;  %v10357_v61 = vld [vmem:[%s15892_s1 + $0xf94] sm:$0xf0]  ;;  %v8380_v30 = vld [vmem:[%s15892_s1 + $0xe68] sm:$0xf] }
 0x208   :  { %5692 = vmatpush.bf16.msrb.mxu1 %v7965_v36  ;;  %5705 = vmatpush.bf16.msrb.mxu2 %v8093_v42  ;;  %v8412_v36 = vld [vmem:[%s15892_s1 + $0xea8] sm:$0xf]  ;;  %v10329_v42 = vld [vmem:[%s15892_s1 + $0xeb4] sm:$0xf0] }
 0x209   :  { %5718 = vmatpush.bf16.msrb.mxu3 %v8221_v43  ;;  %v8668_v43 = vld [vmem:[%s15892_s1 + $0x10a8] sm:$0xf]  ;;  %v8413_v55 = vor.u32 %v10329_v42, %v8412_v36  ;;  %v10421_v63 = vld [vmem:[%s15892_s1 + $0x1194] sm:$0xf0] }
 0x20a   :  { %v8669_v56 = vor.u32 %v10393_v53, %v8668_v43  ;;  %v10321_v31 = vld [vmem:[%s15892_s1 + $0xe74] sm:$0xf0]  ;;  %v8764_v38 = vld [vmem:[%s15892_s1 + $0x1168] sm:$0xf] }
 0x20b   :  { %5680 = vmatpush.bf16.msrb.mxu0 %v7821_v59  ;;  %v8524_v59 = vld [vmem:[%s15892_s1 + $0xf88] sm:$0xf]  ;;  %v10353_v33 = vld [vmem:[%s15892_s1 + $0xf74] sm:$0xf0] }
 0x20c   :  { %5693 = vmatpush.bf16.msrb.mxu1 %v7949_v3  ;;  %5706 = vmatpush.bf16.msrb.mxu2 %v8077_v8  ;;  %v10389_v3 = vld [vmem:[%s15892_s1 + $0x1094] sm:$0xf0]  ;;  %v5474_v8 = vpop.f32.mrf.mxu0  ;;  %v8364_v42 = vld [vmem:[%s15892_s1 + $0xe48] sm:$0xf] }
 0x20d   :  { %5719 = vmatpush.bf16.msrb.mxu3 %v8205_v20  ;;  %v5475_v20 = vadd.f32 %v5474_v8, %v13932_v24  ;;  %v8653_v10 = vor.u32 %v10389_v3, %v8652_v62  ;;  %v8781_v24 = vor.u32 %v10421_v63, %v8780_v11  ;;  %v10385_v37 = vld [vmem:[%s15892_s1 + $0x1074] sm:$0xf0]  ;;  %v8620_v41 = vld [vmem:[%s15892_s1 + $0x1048] sm:$0xf] }
 0x20e   :  { %5681 = vmatmul.bf16.vlgmr.msrb.gmra.mxu0 %v11411_v15  ;;  %v8637_v36 = vor.u32 %v10385_v37, %v8636_v35  ;;  %v10317_v44 = vld [vmem:[%s15892_s1 + $0xe54] sm:$0xf0]  ;;  %v8348_v8 = vld [vmem:[%s15892_s1 + $0xe28] sm:$0xf] }
 0x20f   :  { %5725 = vmatpush.bf16.msra.mxu0 %v8445_v23  ;;  %5707 = vmatmul.bf16.vlgmr.msrb.gmra.mxu2 %v11577_v46  ;;  %v8397_v23 = vor.u32 %v10325_v58, %v8396_v57  ;;  %v10349_v53 = vld [vmem:[%s15892_s1 + $0xf54] sm:$0xf0]  ;;  %v8476_v63 = vld [vmem:[%s15892_s1 + $0xf28] sm:$0xf] }
 0x210   :  { %5738 = vmatpush.bf16.msra.mxu1 %v8573_v25  ;;  %5751 = vmatpush.bf16.msra.mxu2 %v8701_v26  ;;  %v5487_v25 = vpop.f32.mrf.mxu1  ;;  %v8525_v26 = vor.u32 %v10357_v61, %v8524_v59  ;;  %v10381_v54 = vld [vmem:[%s15892_s1 + $0x1054] sm:$0xf0]  ;;  %v8365_v59 = vor.u32 %v10317_v44, %v8364_v42  ;;  %v8460_v35 = vld [vmem:[%s15892_s1 + $0xf08] sm:$0xf] }
 0x211   :  { %5764 = vmatpush.bf16.msra.mxu3 %v8829_v21  ;;  %5694 = vmatmul.bf16.vlgmr.msrb.gmra.mxu1 %v11415_v17  ;;  %v8508_v21 = vld [vmem:[%s15892_s1 + $0xf68] sm:$0xf]  ;;  %v5488_v32 = vadd.f32 %v5487_v25, %v5475_v20  ;;  %v10413_v57 = vld [vmem:[%s15892_s1 + $0x1154] sm:$0xf0]  ;;  %v8621_v3 = vor.u32 %v10381_v54, %v8620_v41 }
 0x212   :  { %5720 = vmatmul.bf16.vlgmr.msrb.gmra.mxu3 %v11581_v48  ;;  %v5500_v43 = vpop.f32.mrf.mxu2  ;;  %v10313_v11 = vld [vmem:[%s15892_s1 + $0xe34] sm:$0xf0]  ;;  %v8604_v25 = vld [vmem:[%s15892_s1 + $0x1028] sm:$0xf] }
 0x213   :  { %5726 = vmatpush.bf16.msra.mxu0 %v8429_v39  ;;  %v10417_v39 = vld [vmem:[%s15892_s1 + $0x1174] sm:$0xf0]  ;;  %v8956_v44 = vld [vmem:[%s15892_s1 + $0x12e8] sm:$0xf] }
 0x214   :  { %5739 = vmatpush.bf16.msra.mxu1 %v8557_v40  ;;  %5752 = vmatpush.bf16.msra.mxu2 %v8685_v22  ;;  %v8381_v40 = vor.u32 %v10321_v31, %v8380_v30  ;;  %v8509_v22 = vor.u32 %v10353_v33, %v8508_v21  ;;  %v8765_v50 = vor.u32 %v10417_v39, %v8764_v38  ;;  %v5476_v58 = vpop.f32.mrf.mxu0  ;;  %v10409_v30 = vld [vmem:[%s15892_s1 + $0x1134] sm:$0xf0]  ;;  %v8332_v21 = vld [vmem:[%s15892_s1 + $0xe08] sm:$0xf] }
 0x215   :  { %5765 = vmatpush.bf16.msra.mxu3 %v8813_v45  ;;  %v8492_v45 = vld [vmem:[%s15892_s1 + $0xf48] sm:$0xf]  ;;  %v8349_v31 = vor.u32 %v10313_v11, %v8348_v8  ;;  %v10341_v37 = vld [vmem:[%s15892_s1 + $0xf14] sm:$0xf0] }
 0x216   :  { %v8493_v62 = vor.u32 %v10349_v53, %v8492_v45  ;;  %v8588_v38 = vld [vmem:[%s15892_s1 + $0x1008] sm:$0xf]  ;;  %v10465_v45 = vld [vmem:[%s15892_s1 + $0x12f4] sm:$0xf0] }
 0x217   :  { %5727 = vmatpush.bf16.msra.mxu0 %v8413_v55  ;;  %v5501_v55 = vadd.f32 %v5500_v43, %v5488_v32  ;;  %v10497_v41 = vld [vmem:[%s15892_s1 + $0x13f4] sm:$0xf0]  ;;  %v9212_v54 = vld [vmem:[%s15892_s1 + $0x14e8] sm:$0xf] }
 0x218   :  { %5740 = vmatpush.bf16.msra.mxu1 %v8541_v52  ;;  %5753 = vmatpush.bf16.msra.mxu2 %v8669_v56  ;;  %v5513_v52 = vpop.f32.mrf.mxu3  ;;  %v8748_v56 = vld [vmem:[%s15892_s1 + $0x1148] sm:$0xf]  ;;  %v10561_v58 = vld [vmem:[%s15892_s1 + $0x15f4] sm:$0xf0] }
 0x219   :  { %5766 = vmatpush.bf16.msra.mxu3 %v8797_v51  ;;  %v5489_v51 = vpop.f32.mrf.mxu1  ;;  %v14131_v61 = vadd.f32 %v5513_v52, %v5501_v55  ;;  %v8749_v20 = vor.u32 %v10413_v57, %v8748_v56  ;;  %v10529_v55 = vld [vmem:[%s15892_s1 + $0x14f4] sm:$0xf0]  ;;  %v8461_v52 = vor.u32 %v10341_v37, %v8460_v35  ;;  %v9340_v57 = vld [vmem:[%s15892_s1 + $0x15e8] sm:$0xf] }
 0x21a   :  { %v5502_v42 = vpop.f32.mrf.mxu2  ;;  %v8957_v51 = vor.u32 %v10465_v45, %v8956_v44  ;;  %v8940_v8 = vld [vmem:[%s15892_s1 + $0x12c8] sm:$0xf]  ;;  %v10461_v11 = vld [vmem:[%s15892_s1 + $0x12d4] sm:$0xf0] }
 0x21b   :  { %5728 = vmatpush.bf16.msra.mxu0 %v8397_v23  ;;  %v10345_v23 = vld [vmem:[%s15892_s1 + $0xf34] sm:$0xf0]  ;;  %v9052_v35 = vld [vmem:[%s15892_s1 + $0x13a8] sm:$0xf] }
 0x21c   :  { %5741 = vmatpush.bf16.msra.mxu1 %v8525_v26  ;;  %5754 = vmatpush.bf16.msra.mxu2 %v8653_v10  ;;  %v10377_v26 = vld [vmem:[%s15892_s1 + $0x1034] sm:$0xf0]  ;;  %v8732_v10 = vld [vmem:[%s15892_s1 + $0x1128] sm:$0xf]  ;;  %v8477_v32 = vor.u32 %v10345_v23, %v8476_v63 }
 0x21d   :  { %5767 = vmatpush.bf16.msra.mxu3 %v8781_v24  ;;  %v10309_v24 = vld [vmem:[%s15892_s1 + $0xe14] sm:$0xf0]  ;;  %v8605_v33 = vor.u32 %v10377_v26, %v8604_v25  ;;  %v8733_v39 = vor.u32 %v10409_v30, %v8732_v10  ;;  %v9068_v63 = vld [vmem:[%s15892_s1 + $0x13c8] sm:$0xf] }
 0x21e   :  { %v8333_v53 = vor.u32 %v10309_v24, %v8332_v21  ;;  %v10493_v23 = vld [vmem:[%s15892_s1 + $0x13d4] sm:$0xf0]  ;;  %v9196_v25 = vld [vmem:[%s15892_s1 + $0x14c8] sm:$0xf] }
 0x21f   :  { %5729 = vmatpush.bf16.msra.mxu0 %v8381_v40  ;;  %v10373_v40 = vld [vmem:[%s15892_s1 + $0x1014] sm:$0xf0]  ;;  %v9324_v10 = vld [vmem:[%s15892_s1 + $0x15c8] sm:$0xf]  ;;  %v9069_v21 = vor.u32 %v10493_v23, %v9068_v63 }
 0x220   :  { %5742 = vmatpush.bf16.msra.mxu1 %v8509_v22  ;;  %5755 = vmatpush.bf16.msra.mxu2 %v8637_v36  ;;  %v8716_v22 = vld [vmem:[%s15892_s1 + $0x1108] sm:$0xf]  ;;  %v10405_v36 = vld [vmem:[%s15892_s1 + $0x1114] sm:$0xf0]  ;;  %v5515_v43 = vpop.f32.mrf.mxu3  ;;  %v8589_v56 = vor.u32 %v10373_v40, %v8588_v38 }
 0x221   :  { %5768 = vmatpush.bf16.msra.mxu3 %v8765_v50  ;;  %v9084_v50 = vld [vmem:[%s15892_s1 + $0x13e8] sm:$0xf]  ;;  %v10525_v26 = vld [vmem:[%s15892_s1 + $0x14d4] sm:$0xf0] }
 0x222   :  { %v10557_v30 = vld [vmem:[%s15892_s1 + $0x15d4] sm:$0xf0]  ;;  %v9197_v24 = vor.u32 %v10525_v26, %v9196_v25  ;;  %v9148_v26 = vld [vmem:[%s15892_s1 + $0x1468] sm:$0xf] }
 0x223   :  { %5730 = vmatpush.bf16.msra.mxu0 %v8365_v59  ;;  %v8717_v59 = vor.u32 %v10405_v36, %v8716_v22  ;;  %v9325_v37 = vor.u32 %v10557_v30, %v9324_v10  ;;  %v10489_v38 = vld [vmem:[%s15892_s1 + $0x13b4] sm:$0xf0]  ;;  %v9308_v22 = vld [vmem:[%s15892_s1 + $0x15a8] sm:$0xf] }
 0x224   :  { %5743 = vmatpush.bf16.msra.mxu1 %v8493_v62  ;;  %5756 = vmatpush.bf16.msra.mxu2 %v8621_v3  ;;  %v9085_v62 = vor.u32 %v10497_v41, %v9084_v50  ;;  %v9213_v3 = vor.u32 %v10529_v55, %v9212_v54  ;;  %v10521_v40 = vld [vmem:[%s15892_s1 + $0x14b4] sm:$0xf0]  ;;  %v9053_v44 = vor.u32 %v10489_v38, %v9052_v35  ;;  %v8908_v50 = vld [vmem:[%s15892_s1 + $0x1288] sm:$0xf] }
 0x225   :  { %5769 = vmatpush.bf16.msra.mxu3 %v8749_v20  ;;  %v9341_v20 = vor.u32 %v10561_v58, %v9340_v57  ;;  %v10553_v36 = vld [vmem:[%s15892_s1 + $0x15b4] sm:$0xf0]  ;;  %v9164_v55 = vld [vmem:[%s15892_s1 + $0x1488] sm:$0xf] }
 0x226   :  { %v10453_v43 = vld [vmem:[%s15892_s1 + $0x1294] sm:$0xf0]  ;;  %v9309_v41 = vor.u32 %v10553_v36, %v9308_v22  ;;  %v9292_v57 = vld [vmem:[%s15892_s1 + $0x1588] sm:$0xf] }
 0x227   :  { %5731 = vmatpush.bf16.msra.mxu0 %v8349_v31  ;;  %v8941_v31 = vor.u32 %v10461_v11, %v8940_v8  ;;  %v10485_v54 = vld [vmem:[%s15892_s1 + $0x1394] sm:$0xf0]  ;;  %v8892_v11 = vld [vmem:[%s15892_s1 + $0x1268] sm:$0xf] }
 0x228   :  { %5744 = vmatpush.bf16.msra.mxu1 %v8477_v32  ;;  %5757 = vmatpush.bf16.msra.mxu2 %v8605_v33  ;;  %v8924_v32 = vld [vmem:[%s15892_s1 + $0x12a8] sm:$0xf]  ;;  %v10457_v33 = vld [vmem:[%s15892_s1 + $0x12b4] sm:$0xf0] }
 0x229   :  { %5770 = vmatpush.bf16.msra.mxu3 %v8733_v39  ;;  %v9180_v39 = vld [vmem:[%s15892_s1 + $0x14a8] sm:$0xf]  ;;  %v8925_v42 = vor.u32 %v10457_v33, %v8924_v32  ;;  %v10549_v58 = vld [vmem:[%s15892_s1 + $0x1594] sm:$0xf0] }
 0x22a   :  { %v9181_v45 = vor.u32 %v10521_v40, %v9180_v39  ;;  %v10449_v63 = vld [vmem:[%s15892_s1 + $0x1274] sm:$0xf0]  ;;  %v9276_v30 = vld [vmem:[%s15892_s1 + $0x1568] sm:$0xf] }
 0x22b   :  { %5732 = vmatpush.bf16.msra.mxu0 %v8333_v53  ;;  %v9036_v53 = vld [vmem:[%s15892_s1 + $0x1388] sm:$0xf]  ;;  %v10481_v25 = vld [vmem:[%s15892_s1 + $0x1374] sm:$0xf0]  ;;  %v8893_v32 = vor.u32 %v10449_v63, %v8892_v11 }
 0x22c   :  { %5745 = vmatpush.bf16.msra.mxu1 %v8461_v52  ;;  %5758 = vmatpush.bf16.msra.mxu2 %v8589_v56  ;;  %v10517_v52 = vld [vmem:[%s15892_s1 + $0x1494] sm:$0xf0]  ;;  %v5526_v56 = vpop.f32.mrf.mxu0  ;;  %v9004_v39 = vld [vmem:[%s15892_s1 + $0x1348] sm:$0xf] }
 0x22d   :  { %5771 = vmatpush.bf16.msra.mxu3 %v8717_v59  ;;  %v5527_v59 = vadd.f32 %v5526_v56, %v14131_v61  ;;  %v9165_v8 = vor.u32 %v10517_v52, %v9164_v55  ;;  %v9293_v61 = vor.u32 %v10549_v58, %v9292_v57  ;;  %v10513_v10 = vld [vmem:[%s15892_s1 + $0x1474] sm:$0xf0]  ;;  %v9132_v36 = vld [vmem:[%s15892_s1 + $0x1448] sm:$0xf] }
 0x22e   :  { %5733 = vmatmul.bf16.vlgmr.msra.gmra.mxu0 %v11579_v47  ;;  %v9149_v35 = vor.u32 %v10513_v10, %v9148_v26  ;;  %v10445_v38 = vld [vmem:[%s15892_s1 + $0x1254] sm:$0xf0]  ;;  %v8860_v57 = vld [vmem:[%s15892_s1 + $0x1228] sm:$0xf] }
 0x22f   :  { %5777 = vmatpush.bf16.msrb.mxu0 %v8957_v51  ;;  %5759 = vmatmul.bf16.vlgmr.msra.gmra.mxu2 %v11814_v9  ;;  %v8909_v51 = vor.u32 %v10453_v43, %v8908_v50  ;;  %v10477_v22 = vld [vmem:[%s15892_s1 + $0x1354] sm:$0xf0]  ;;  %v9244_v63 = vld [vmem:[%s15892_s1 + $0x1528] sm:$0xf] }
 0x230   :  { %5790 = vmatpush.bf16.msrb.mxu1 %v9085_v62  ;;  %5803 = vmatpush.bf16.msrb.mxu2 %v9213_v3  ;;  %v5539_v62 = vpop.f32.mrf.mxu1  ;;  %v9037_v3 = vor.u32 %v10485_v54, %v9036_v53  ;;  %v10541_v50 = vld [vmem:[%s15892_s1 + $0x1554] sm:$0xf0]  ;;  %v9005_v52 = vor.u32 %v10477_v22, %v9004_v39  ;;  %v9468_v39 = vld [vmem:[%s15892_s1 + $0x16e8] sm:$0xf] }
 0x231   :  { %5816 = vmatpush.bf16.msrb.mxu3 %v9341_v20  ;;  %5746 = vmatmul.bf16.vlgmr.msra.gmra.mxu1 %v11583_v49  ;;  %v9020_v20 = vld [vmem:[%s15892_s1 + $0x1368] sm:$0xf]  ;;  %v14291_v23 = vadd.f32 %v5539_v62, %v5527_v59  ;;  %v10441_v58 = vld [vmem:[%s15892_s1 + $0x1234] sm:$0xf0] }
 0x232   :  { %5772 = vmatmul.bf16.vlgmr.msra.gmra.mxu3 %v11824_v14  ;;  %v9021_v33 = vor.u32 %v10481_v25, %v9020_v20  ;;  %v8988_v59 = vld [vmem:[%s15892_s1 + $0x1328] sm:$0xf]  ;;  %v10505_v11 = vld [vmem:[%s15892_s1 + $0x1434] sm:$0xf0] }
 0x233   :  { %5778 = vmatpush.bf16.msrb.mxu0 %v8941_v31  ;;  %v10545_v31 = vld [vmem:[%s15892_s1 + $0x1574] sm:$0xf0]  ;;  %v8844_v25 = vld [vmem:[%s15892_s1 + $0x1208] sm:$0xf] }
 0x234   :  { %5791 = vmatpush.bf16.msrb.mxu1 %v9069_v21  ;;  %5804 = vmatpush.bf16.msrb.mxu2 %v9197_v24  ;;  %v10694_v21 = vld [vmem:[%s15893_s2] sm:$0xf]  ;;  %v9277_v40 = vor.u32 %v10545_v31, %v9276_v30  ;;  %v10537_v20 = vld [vmem:[%s15892_s1 + $0x1534] sm:$0xf0]  ;;  %v8972_v31 = vld [vmem:[%s15892_s1 + $0x1308] sm:$0xf] }
 0x235   :  { %5817 = vmatpush.bf16.msrb.mxu3 %v9325_v37  ;;  %v829_v24 = vperm.slane %v10694_v21, 2  ;;  %v8876_v37 = vld [vmem:[%s15892_s1 + $0x1248] sm:$0xf]  ;;  %v5565_v53 = vpop.f32.mrf.mxu3  ;;  %v10437_v26 = vld [vmem:[%s15892_s1 + $0x1214] sm:$0xf0] }
 0x236   :  { %v8877_v54 = vor.u32 %v10445_v38, %v8876_v37  ;;  %v10469_v21 = vld [vmem:[%s15892_s1 + $0x1314] sm:$0xf0]  ;;  %v9596_v22 = vld [vmem:[%s15892_s1 + $0x17e8] sm:$0xf] }
 0x237   :  { %5779 = vmatpush.bf16.msrb.mxu0 %v8925_v42  ;;  %v10509_v42 = vld [vmem:[%s15892_s1 + $0x1454] sm:$0xf0] }
 0x238   :  { %5792 = vmatpush.bf16.msrb.mxu1 %v9053_v44  ;;  %5805 = vmatpush.bf16.msrb.mxu2 %v9181_v45  ;;  %v5552_v44 = vpop.f32.mrf.mxu2  ;;  %v9260_v45 = vld [vmem:[%s15892_s1 + $0x1548] sm:$0xf]  ;;  %v5541_v55 = vpop.f32.mrf.mxu1  ;;  %v9133_v56 = vor.u32 %v10509_v42, %v9132_v36  ;;  %v10533_v37 = vld [vmem:[%s15892_s1 + $0x1514] sm:$0xf0]  ;;  %v8845_v42 = vor.u32 %v10437_v26, %v8844_v25 }
 0x239   :  { %5818 = vmatpush.bf16.msrb.mxu3 %v9309_v41  ;;  %v5553_v43 = vadd.f32 %v5552_v44, %v829_v24  ;;  %v5528_v41 = vpop.f32.mrf.mxu0  ;;  %v9261_v62 = vor.u32 %v10541_v50, %v9260_v45  ;;  %v9100_v24 = vld [vmem:[%s15892_s1 + $0x1408] sm:$0xf]  ;;  %v10625_v44 = vld [vmem:[%s15892_s1 + $0x17f4] sm:$0xf0] }
 0x23a   :  { %v9724_v45 = vld [vmem:[%s15892_s1 + $0x18e8] sm:$0xf]  ;;  %v10657_v50 = vld [vmem:[%s15892_s1 + $0x18f4] sm:$0xf0]  ;;  %v9887_v41 = vld [vmem:[%s15892_s1 + $0xec] sm:$0xf] }
 0x23b   :  { %5780 = vmatpush.bf16.msrb.mxu0 %v8909_v51  ;;  %v14344_v51 = vadd.f32 %v5565_v53, %v5553_v43  ;;  %v8973_v43 = vor.u32 %v10469_v21, %v8972_v31  ;;  %v10585_v31 = vld [vmem:[%s15892_s1 + $0x16b4] sm:$0xf0]  ;;  %v9564_v21 = vld [vmem:[%s15892_s1 + $0x17a8] sm:$0xf] }
 0x23c   :  { %5793 = vmatpush.bf16.msrb.mxu1 %v9037_v3  ;;  %5806 = vmatpush.bf16.msrb.mxu2 %v9165_v8  ;;  %v10473_v3 = vld [vmem:[%s15892_s1 + $0x1334] sm:$0xf0]  ;;  %v9116_v8 = vld [vmem:[%s15892_s1 + $0x1428] sm:$0xf] }
 0x23d   :  { %5819 = vmatpush.bf16.msrb.mxu3 %v9293_v61  ;;  %v8861_v61 = vor.u32 %v10441_v58, %v8860_v57  ;;  %v8989_v10 = vor.u32 %v10473_v3, %v8988_v59  ;;  %v9117_v30 = vor.u32 %v10505_v11, %v9116_v8  ;;  %v5567_v36 = vpop.f32.mrf.mxu3  ;;  %v9725_v57 = vor.u32 %v10657_v50, %v9724_v45  ;;  %v9452_v58 = vld [vmem:[%s15892_s1 + $0x16c8] sm:$0xf]  ;;  %v10589_v59 = vld [vmem:[%s15892_s1 + $0x16d4] sm:$0xf0] }
 0x23e   :  { %v10621_v8 = vld [vmem:[%s15892_s1 + $0x17d4] sm:$0xf0]  ;;  %v9708_v11 = vld [vmem:[%s15892_s1 + $0x18c8] sm:$0xf]  ;;  %v9453_v25 = vor.u32 %v10589_v59, %v9452_v58 }
 0x23f   :  { %5781 = vmatpush.bf16.msrb.mxu0 %v8893_v32  ;;  %v9245_v32 = vor.u32 %v10537_v20, %v9244_v63  ;;  %v10653_v63 = vld [vmem:[%s15892_s1 + $0x18d4] sm:$0xf0]  ;;  %v9883_v20 = vld [vmem:[%s15892_s1 + $0xcc] sm:$0xf]  ;;  %v9420_v36 = vld [vmem:[%s15892_s1 + $0x1688] sm:$0xf] }
 0x240   :  { %5794 = vmatpush.bf16.msrb.mxu1 %v9021_v33  ;;  %5807 = vmatpush.bf16.msrb.mxu2 %v9149_v35  ;;  %v10501_v33 = vld [vmem:[%s15892_s1 + $0x1414] sm:$0xf0]  ;;  %v9228_v35 = vld [vmem:[%s15892_s1 + $0x1508] sm:$0xf]  ;;  %v5554_v38 = vpop.f32.mrf.mxu2 }
 0x241   :  { %5820 = vmatpush.bf16.msrb.mxu3 %v9277_v40  ;;  %v10593_v40 = vld [vmem:[%s15892_s1 + $0x16f4] sm:$0xf0]  ;;  %v9101_v53 = vor.u32 %v10501_v33, %v9100_v24  ;;  %v9229_v55 = vor.u32 %v10533_v37, %v9228_v35  ;;  %v9692_v33 = vld [vmem:[%s15892_s1 + $0x18a8] sm:$0xf]  ;;  %v9879_v37 = vld [vmem:[%s15892_s1 + $0xac] sm:$0xf] }
 0x242   :  { %v10649_v35 = vld [vmem:[%s15892_s1 + $0x18b4] sm:$0xf0]  ;;  %v6622_v38 = vld [vmem:[%s15892_s1 + $0xb8] sm:$0xf0]  ;;  %v9404_v58 = vld [vmem:[%s15892_s1 + $0x1668] sm:$0xf] }
 0x243   :  { %5782 = vmatpush.bf16.msrb.mxu0 %v8877_v54  ;;  %v6654_v54 = vld [vmem:[%s15892_s1 + $0xf8] sm:$0xf0]  ;;  %v6625_v45 = vor.u32 %v9879_v37, %v6622_v38  ;;  %v10613_v50 = vld [vmem:[%s15892_s1 + $0x1794] sm:$0xf0]  ;;  %v9644_v38 = vld [vmem:[%s15892_s1 + $0x1848] sm:$0xf] }
 0x244   :  { %5795 = vmatpush.bf16.msrb.mxu1 %v9005_v52  ;;  %5808 = vmatpush.bf16.msrb.mxu2 %v9133_v56  ;;  %v9469_v52 = vor.u32 %v10593_v40, %v9468_v39  ;;  %v9597_v56 = vor.u32 %v10625_v44, %v9596_v22  ;;  %v6657_v3 = vor.u32 %v9887_v41, %v6654_v54  ;;  %v9548_v44 = vld [vmem:[%s15892_s1 + $0x1788] sm:$0xf]  ;;  %v9875_v41 = vld [vmem:[%s15892_s1 + $0x8c] sm:$0xf]  ;;  %v6606_v54 = vld [vmem:[%s15892_s1 + $0x98] sm:$0xf0] }
 0x245   :  { %5821 = vmatpush.bf16.msrb.mxu3 %v9261_v62  ;;  %v9580_v62 = vld [vmem:[%s15892_s1 + $0x17c8] sm:$0xf]  ;;  %v9693_v22 = vor.u32 %v10649_v35, %v9692_v33  ;;  %v10577_v59 = vld [vmem:[%s15892_s1 + $0x1674] sm:$0xf0] }
 0x246   :  { %v9581_v26 = vor.u32 %v10621_v8, %v9580_v62  ;;  %v9532_v62 = vld [vmem:[%s15892_s1 + $0x1768] sm:$0xf]  ;;  %v10605_v37 = vld [vmem:[%s15892_s1 + $0x1754] sm:$0xf0] }
 0x247   :  { %5783 = vmatpush.bf16.msrb.mxu0 %v8861_v61  ;;  %v6638_v61 = vld [vmem:[%s15892_s1 + $0xd8] sm:$0xf0] }
 0x248   :  { %5796 = vmatpush.bf16.msrb.mxu1 %v8989_v10  ;;  %5809 = vmatpush.bf16.msrb.mxu2 %v9117_v30  ;;  %v9709_v10 = vor.u32 %v10653_v63, %v9708_v11  ;;  %v9436_v30 = vld [vmem:[%s15892_s1 + $0x16a8] sm:$0xf]  ;;  %v6641_v24 = vor.u32 %v9883_v20, %v6638_v61  ;;  %v6609_v11 = vor.u32 %v9875_v41, %v6606_v54  ;;  %v10609_v63 = vld [vmem:[%s15892_s1 + $0x1774] sm:$0xf0] }
 0x249   :  { %5822 = vmatpush.bf16.msrb.mxu3 %v9245_v32  ;;  %v10617_v32 = vld [vmem:[%s15892_s1 + $0x17b4] sm:$0xf0]  ;;  %v9437_v39 = vor.u32 %v10585_v31, %v9436_v30  ;;  %v9660_v20 = vld [vmem:[%s15892_s1 + $0x1868] sm:$0xf]  ;;  %v9533_v30 = vor.u32 %v10609_v63, %v9532_v62  ;;  %v9863_v62 = vld [vmem:[%s15892_s1 + $0x2c] sm:$0xf] }
 0x24a   :  { %v9565_v40 = vor.u32 %v10617_v32, %v9564_v21  ;;  %v10641_v61 = vld [vmem:[%s15892_s1 + $0x1874] sm:$0xf0]  ;;  %v9388_v21 = vld [vmem:[%s15892_s1 + $0x1648] sm:$0xf] }
 0x24b   :  { %5784 = vmatpush.bf16.msrb.mxu0 %v8845_v42  ;;  %v10581_v42 = vld [vmem:[%s15892_s1 + $0x1694] sm:$0xf0]  ;;  %v9661_v31 = vor.u32 %v10641_v61, %v9660_v20  ;;  %v9516_v32 = vld [vmem:[%s15892_s1 + $0x1748] sm:$0xf] }
 0x24c   :  { %5797 = vmatpush.bf16.msrb.mxu1 %v8973_v43  ;;  %5810 = vmatpush.bf16.msrb.mxu2 %v9101_v53  ;;  %v9676_v43 = vld [vmem:[%s15892_s1 + $0x1888] sm:$0xf]  ;;  %v10645_v53 = vld [vmem:[%s15892_s1 + $0x1894] sm:$0xf0] }
 0x24d   :  { %5823 = vmatpush.bf16.msrb.mxu3 %v9229_v55  ;;  %v9421_v55 = vor.u32 %v10581_v42, %v9420_v36  ;;  %v9867_v36 = vld [vmem:[%s15892_s1 + $0x4c] sm:$0xf]  ;;  %v6574_v42 = vld [vmem:[%s15892_s1 + $0x58] sm:$0xf0]  ;;  %v9372_v41 = vld [vmem:[%s15892_s1 + $0x1628] sm:$0xf] }
 0x24e   :  { %5785 = vmatmul.bf16.vlgmr.msrb.gmra.mxu0 %v11822_v13  ;;  %v5591_v8 = vpop.f32.mrf.mxu1  ;;  %v10569_v54 = vld [vmem:[%s15892_s1 + $0x1634] sm:$0xf0] }
 0x24f   :  { %5829 = vmatpush.bf16.msra.mxu0 %v9469_v52  ;;  %5811 = vmatmul.bf16.vlgmr.msrb.gmra.mxu2 %v11991_v4  ;;  %v5578_v52 = vpop.f32.mrf.mxu0  ;;  %v10565_v63 = vld [vmem:[%s15892_s1 + $0x1614] sm:$0xf0] }
 0x250   :  { %5842 = vmatpush.bf16.msra.mxu1 %v9597_v56  ;;  %5855 = vmatpush.bf16.msra.mxu2 %v9725_v57  ;;  %v9549_v56 = vor.u32 %v10613_v50, %v9548_v44  ;;  %v9677_v57 = vor.u32 %v10645_v53, %v9676_v43  ;;  %v9517_v43 = vor.u32 %v10605_v37, %v9516_v32  ;;  %v9951_v37 = vld [vmem:[%s15892_s1 + $0x2ec] sm:$0xf] }
 0x251   :  { %5868 = vmatpush.bf16.msra.mxu3 %v6657_v3  ;;  %5798 = vmatmul.bf16.vlgmr.msrb.gmra.mxu1 %v11826_v18  ;;  %v5579_v3 = vadd.f32 %v5578_v52, %v14344_v51  ;;  %v6590_v51 = vld [vmem:[%s15892_s1 + $0x78] sm:$0xf0] }
 0x252   :  { %5824 = vmatmul.bf16.vlgmr.msrb.gmra.mxu3 %v11995_v6  ;;  %v5604_v33 = vpop.f32.mrf.mxu2 }
 0x253   :  { %5830 = vmatpush.bf16.msra.mxu0 %v9453_v25  ;;  %v9871_v25 = vld [vmem:[%s15892_s1 + $0x6c] sm:$0xf] }
 0x254   :  { %5843 = vmatpush.bf16.msra.mxu1 %v9581_v26  ;;  %5856 = vmatpush.bf16.msra.mxu2 %v9709_v10  ;;  %v5592_v26 = vadd.f32 %v5591_v8, %v5579_v3  ;;  %v9405_v10 = vor.u32 %v10577_v59, %v9404_v58  ;;  %v6593_v35 = vor.u32 %v9871_v25, %v6590_v51  ;;  %v9628_v58 = vld [vmem:[%s15892_s1 + $0x1828] sm:$0xf]  ;;  %v10633_v59 = vld [vmem:[%s15892_s1 + $0x1834] sm:$0xf0]  ;;  %v6558_v3 = vld [vmem:[%s15892_s1 + $0x38] sm:$0xf0] }
 0x255   :  { %5869 = vmatpush.bf16.msra.mxu3 %v6641_v24  ;;  %v10573_v24 = vld [vmem:[%s15892_s1 + $0x1654] sm:$0xf0]  ;;  %v9373_v8 = vor.u32 %v10569_v54, %v9372_v41  ;;  %v9629_v61 = vor.u32 %v10633_v59, %v9628_v58  ;;  %v9484_v25 = vld [vmem:[%s15892_s1 + $0x1708] sm:$0xf]  ;;  %v6894_v58 = vld [vmem:[%s15892_s1 + $0x2d8] sm:$0xf0] }
 0x256   :  { %v9389_v44 = vor.u32 %v10573_v24, %v9388_v21  ;;  %v5593_v52 = vpop.f32.mrf.mxu1  ;;  %v10597_v51 = vld [vmem:[%s15892_s1 + $0x1714] sm:$0xf0]  ;;  %v9859_v21 = vld [vmem:[%s15892_s1 + $0xc] sm:$0xf]  ;;  %v6542_v24 = vld [vmem:[%s15892_s1 + $0x18] sm:$0xf0] }
 0x257   :  { %5831 = vmatpush.bf16.msra.mxu0 %v9437_v39  ;;  %v10637_v39 = vld [vmem:[%s15892_s1 + $0x1854] sm:$0xf0]  ;;  %v5580_v50 = vpop.f32.mrf.mxu0  ;;  %v6766_v52 = vld [vmem:[%s15892_s1 + $0x1d8] sm:$0xf0]  ;;  %v9979_v59 = vld [vmem:[%s15892_s1 + $0x3cc] sm:$0xf] }
 0x258   :  { %5844 = vmatpush.bf16.msra.mxu1 %v9565_v40  ;;  %5857 = vmatpush.bf16.msra.mxu2 %v9693_v22  ;;  %v5605_v40 = vadd.f32 %v5604_v33, %v5592_v26  ;;  %v5617_v22 = vpop.f32.mrf.mxu3  ;;  %v9645_v53 = vor.u32 %v10637_v39, %v9644_v38  ;;  %v9612_v26 = vld [vmem:[%s15892_s1 + $0x1808] sm:$0xf]  ;;  %v9919_v33 = vld [vmem:[%s15892_s1 + $0x1ec] sm:$0xf]  ;;  %v6910_v39 = vld [vmem:[%s15892_s1 + $0x2f8] sm:$0xf0] }
 0x259   :  { %5870 = vmatpush.bf16.msra.mxu3 %v6625_v45  ;;  %v7166_v50 = vld [vmem:[%s15892_s1 + $0x4f8] sm:$0xf0]  ;;  %v6913_v41 = vor.u32 %v9951_v37, %v6910_v39 }
 0x25a   :  { %v14534_v45 = vadd.f32 %v5617_v22, %v5605_v40  ;;  %v9983_v40 = vld [vmem:[%s15892_s1 + $0x3ec] sm:$0xf]  ;;  %v7038_v22 = vld [vmem:[%s15892_s1 + $0x3f8] sm:$0xf0] }
 0x25b   :  { %5832 = vmatpush.bf16.msra.mxu0 %v9421_v55  ;;  %v9500_v55 = vld [vmem:[%s15892_s1 + $0x1728] sm:$0xf]  ;;  %v7041_v54 = vor.u32 %v9983_v40, %v7038_v22  ;;  %v6734_v39 = vld [vmem:[%s15892_s1 + $0x198] sm:$0xf0]  ;;  %v9939_v40 = vld [vmem:[%s15892_s1 + $0x28c] sm:$0xf] }
 0x25c   :  { %5845 = vmatpush.bf16.msra.mxu1 %v9549_v56  ;;  %5858 = vmatpush.bf16.msra.mxu2 %v9677_v57  ;;  %v6577_v56 = vor.u32 %v9867_v36, %v6574_v42  ;;  %v10601_v57 = vld [vmem:[%s15892_s1 + $0x1734] sm:$0xf0]  ;;  %v9485_v36 = vor.u32 %v10597_v51, %v9484_v25  ;;  %v6750_v25 = vld [vmem:[%s15892_s1 + $0x1b8] sm:$0xf0]  ;;  %v9943_v51 = vld [vmem:[%s15892_s1 + $0x2ac] sm:$0xf] }
 0x25d   :  { %5871 = vmatpush.bf16.msra.mxu3 %v6609_v11  ;;  %v9356_v11 = vld [vmem:[%s15892_s1 + $0x1608] sm:$0xf]  ;;  %v9501_v20 = vor.u32 %v10601_v57, %v9500_v55  ;;  %v9915_v55 = vld [vmem:[%s15892_s1 + $0x1cc] sm:$0xf] }
 0x25e   :  { %v9357_v38 = vor.u32 %v10565_v63, %v9356_v11  ;;  %v6769_v11 = vor.u32 %v9915_v55, %v6766_v52 }
 0x25f   :  { %5833 = vmatpush.bf16.msra.mxu0 %v9405_v10  ;;  %v5606_v10 = vpop.f32.mrf.mxu2 }
 0x260   :  { %5846 = vmatpush.bf16.msra.mxu1 %v9533_v30  ;;  %5859 = vmatpush.bf16.msra.mxu2 %v9661_v31  ;;  %v6561_v30 = vor.u32 %v9863_v62, %v6558_v3  ;;  %v10629_v31 = vld [vmem:[%s15892_s1 + $0x1814] sm:$0xf0]  ;;  %v5619_v32 = vpop.f32.mrf.mxu3  ;;  %v7022_v62 = vld [vmem:[%s15892_s1 + $0x3d8] sm:$0xf0]  ;;  %v10011_v3 = vld [vmem:[%s15892_s1 + $0x4cc] sm:$0xf] }
 0x261   :  { %5872 = vmatpush.bf16.msra.mxu3 %v6593_v35  ;;  %v6782_v35 = vld [vmem:[%s15892_s1 + $0x1f8] sm:$0xf0]  ;;  %v9613_v42 = vor.u32 %v10629_v31, %v9612_v26 }
 0x262   :  { %v6878_v10 = vld [vmem:[%s15892_s1 + $0x2b8] sm:$0xf0] }
 0x263   :  { %5834 = vmatpush.bf16.msra.mxu0 %v9389_v44  ;;  %v10015_v44 = vld [vmem:[%s15892_s1 + $0x4ec] sm:$0xf]  ;;  %v7006_v31 = vld [vmem:[%s15892_s1 + $0x3b8] sm:$0xf0] }
 0x264   :  { %5847 = vmatpush.bf16.msra.mxu1 %v9517_v43  ;;  %5860 = vmatpush.bf16.msra.mxu2 %v9645_v53  ;;  %v6545_v43 = vor.u32 %v9859_v21, %v6542_v24  ;;  %v6785_v53 = vor.u32 %v9919_v33, %v6782_v35  ;;  %v7169_v57 = vor.u32 %v10015_v44, %v7166_v50  ;;  %v10695_v21 = vld [vmem:[#allocation1] sm:$0xff]  ;;  %v10007_v24 = vld [vmem:[%s15892_s1 + $0x4ac] sm:$0xf]  ;;  %v7134_v32 = vld [vmem:[%s15892_s1 + $0x4b8] sm:$0xf0] }
 0x265   :  { %5873 = vmatpush.bf16.msra.mxu3 %v6577_v56  ;;  %v9947_v56 = vld [vmem:[%s15892_s1 + $0x2cc] sm:$0xf]  ;;  %v6881_v35 = vor.u32 %v9943_v51, %v6878_v10  ;;  %v7137_v22 = vor.u32 %v10007_v24, %v7134_v32  ;;  %v6958_v32 = vld [vmem:[%s15892_s1 + $0x358] sm:$0xf0] }
 0x266   :  { %v6897_v63 = vor.u32 %v9947_v56, %v6894_v58  ;;  %v10003_v50 = vld [vmem:[%s15892_s1 + $0x48c] sm:$0xf] }
 0x267   :  { %5835 = vmatpush.bf16.msra.mxu0 %v9373_v8  ;;  %v7150_v8 = vld [vmem:[%s15892_s1 + $0x4d8] sm:$0xf0]  ;;  %v9903_v56 = vld [vmem:[%s15892_s1 + $0x16c] sm:$0xf] }
 0x268   :  { %5848 = vmatpush.bf16.msra.mxu1 %v9501_v20  ;;  %5861 = vmatpush.bf16.msra.mxu2 %v9629_v61  ;;  %v7025_v20 = vor.u32 %v9979_v59, %v7022_v62  ;;  %v9911_v61 = vld [vmem:[%s15892_s1 + $0x1ac] sm:$0xf]  ;;  %v7153_v26 = vor.u32 %v10011_v3, %v7150_v8  ;;  %v6846_v62 = vld [vmem:[%s15892_s1 + $0x278] sm:$0xf0] }
 0x269   :  { %5874 = vmatpush.bf16.msra.mxu3 %v6561_v30  ;;  %v9975_v30 = vld [vmem:[%s15892_s1 + $0x3ac] sm:$0xf]  ;;  %v6753_v33 = vor.u32 %v9911_v61, %v6750_v25  ;;  %v6974_v8 = vld [vmem:[%s15892_s1 + $0x378] sm:$0xf0] }
 0x26a   :  { %v7009_v37 = vor.u32 %v9975_v30, %v7006_v31  ;;  %v9935_v58 = vld [vmem:[%s15892_s1 + $0x26c] sm:$0xf] }
 0x26b   :  { %5836 = vmatpush.bf16.msra.mxu0 %v9357_v38  ;;  %v9907_v38 = vld [vmem:[%s15892_s1 + $0x18c] sm:$0xf]  ;;  %v5630_v44 = vpop.f32.mrf.mxu0  ;;  %v6849_v61 = vor.u32 %v9935_v58, %v6846_v62 }
 0x26c   :  { %5849 = vmatpush.bf16.msra.mxu1 %v9485_v36  ;;  %5862 = vmatpush.bf16.msra.mxu2 %v9613_v42  ;;  %v9971_v36 = vld [vmem:[%s15892_s1 + $0x38c] sm:$0xf]  ;;  %v6990_v42 = vld [vmem:[%s15892_s1 + $0x398] sm:$0xf0] }
 0x26d   :  { %5875 = vmatpush.bf16.msra.mxu3 %v6545_v43  ;;  %v7118_v43 = vld [vmem:[%s15892_s1 + $0x498] sm:$0xf0]  ;;  %v6993_v52 = vor.u32 %v9971_v36, %v6990_v42  ;;  %v9967_v3 = vld [vmem:[%s15892_s1 + $0x36c] sm:$0xf] }
 0x26e   :  { %5837 = vmatmul.bf16.vlgmr.msra.gmra.mxu0 %v11993_v5  ;;  %v6977_v25 = vor.u32 %v9967_v3, %v6974_v8  ;;  %v9899_v51 = vld [vmem:[%s15892_s1 + $0x14c] sm:$0xf]  ;;  %v6798_v8 = vld [vmem:[%s15892_s1 + $0x218] sm:$0xf0] }
 0x26f   :  { %5881 = vmatpush.bf16.msrb.mxu0 %v6785_v53  ;;  %5863 = vmatmul.bf16.vlgmr.msra.gmra.mxu2 %v10695_v21  ;;  %v5631_v53 = vadd.f32 %v5630_v44, %v14534_v45  ;;  %v7121_v45 = vor.u32 %v10003_v50, %v7118_v43  ;;  %v9931_v10 = vld [vmem:[%s15892_s1 + $0x24c] sm:$0xf]  ;;  %v6830_v21 = vld [vmem:[%s15892_s1 + $0x258] sm:$0xf0] }
 0x270   :  { %5894 = vmatpush.bf16.msrb.mxu1 %v6913_v41  ;;  %5907 = vmatpush.bf16.msrb.mxu2 %v7041_v54  ;;  %v6737_v41 = vor.u32 %v9907_v38, %v6734_v39  ;;  %v5643_v54 = vpop.f32.mrf.mxu1  ;;  %v9963_v24 = vld [vmem:[%s15892_s1 + $0x34c] sm:$0xf]  ;;  %v7086_v38 = vld [vmem:[%s15892_s1 + $0x458] sm:$0xf0]  ;;  %v6833_v36 = vor.u32 %v9931_v10, %v6830_v21 }
 0x271   :  { %5920 = vmatpush.bf16.msrb.mxu3 %v7169_v57  ;;  %5850 = vmatmul.bf16.vlgmr.msra.gmra.mxu1 %v11997_v7  ;;  %v6718_v57 = vld [vmem:[%s15892_s1 + $0x178] sm:$0xf0]  ;;  %v5644_v59 = vadd.f32 %v5643_v54, %v5631_v53  ;;  %v6961_v42 = vor.u32 %v9963_v24, %v6958_v32  ;;  %v9895_v44 = vld [vmem:[%s15892_s1 + $0x12c] sm:$0xf] }
 0x272   :  { %5876 = vmatmul.bf16.vlgmr.msra.gmra.mxu3 %v11075_v28  ;;  %v6862_v28 = vld [vmem:[%s15892_s1 + $0x298] sm:$0xf0]  ;;  %v5656_v31 = vpop.f32.mrf.mxu2  ;;  %v9927_v43 = vld [vmem:[%s15892_s1 + $0x22c] sm:$0xf] }
 0x273   :  { %5882 = vmatpush.bf16.msrb.mxu0 %v6769_v11  ;;  %v6865_v55 = vor.u32 %v9939_v40, %v6862_v28  ;;  %v9999_v11 = vld [vmem:[%s15892_s1 + $0x46c] sm:$0xf]  ;;  %v5632_v39 = vpop.f32.mrf.mxu0  ;;  %v6686_v50 = vld [vmem:[%s15892_s1 + $0x138] sm:$0xf0] }
 0x274   :  { %5895 = vmatpush.bf16.msrb.mxu1 %v6897_v63  ;;  %5908 = vmatpush.bf16.msrb.mxu2 %v7025_v20  ;;  %v7102_v63 = vld [vmem:[%s15892_s1 + $0x478] sm:$0xf0]  ;;  %v6721_v20 = vor.u32 %v9903_v56, %v6718_v57  ;;  %v9959_v54 = vld [vmem:[%s15892_s1 + $0x32c] sm:$0xf]  ;;  %v6689_v57 = vor.u32 %v9895_v44, %v6686_v50 }
 0x275   :  { %5921 = vmatpush.bf16.msrb.mxu3 %v7153_v26  ;;  %v6702_v26 = vld [vmem:[%s15892_s1 + $0x158] sm:$0xf0]  ;;  %v7105_v30 = vor.u32 %v9999_v11, %v7102_v63  ;;  %v9891_v58 = vld [vmem:[%s15892_s1 + $0x10c] sm:$0xf] }
 0x276   :  { %v6705_v40 = vor.u32 %v9899_v51, %v6702_v26  ;;  %v7070_v56 = vld [vmem:[%s15892_s1 + $0x438] sm:$0xf0]  ;;  %v9923_v3 = vld [vmem:[%s15892_s1 + $0x20c] sm:$0xf] }
 0x277   :  { %5883 = vmatpush.bf16.msrb.mxu0 %v6753_v33  ;;  %v5657_v33 = vadd.f32 %v5656_v31, %v5644_v59  ;;  %v9955_v11 = vld [vmem:[%s15892_s1 + $0x30c] sm:$0xf]  ;;  %v7294_v10 = vld [vmem:[%s15892_s1 + $0x5f8] sm:$0xf0] }
 0x278   :  { %5896 = vmatpush.bf16.msrb.mxu1 %v6881_v35  ;;  %5909 = vmatpush.bf16.msrb.mxu2 %v7009_v37  ;;  %v5669_v35 = vpop.f32.mrf.mxu3  ;;  %v9995_v37 = vld [vmem:[%s15892_s1 + $0x44c] sm:$0xf]  ;;  %v7422_v24 = vld [vmem:[%s15892_s1 + $0x6f8] sm:$0xf0] }
 0x279   :  { %5922 = vmatpush.bf16.msrb.mxu3 %v7137_v22  ;;  %v5645_v22 = vpop.f32.mrf.mxu1  ;;  %v14732_v28 = vadd.f32 %v5669_v35, %v5657_v33  ;;  %v7089_v53 = vor.u32 %v9995_v37, %v7086_v38  ;;  %v10047_v26 = vld [vmem:[%s15892_s1 + $0x5ec] sm:$0xf]  ;;  %v7550_v33 = vld [vmem:[%s15892_s1 + $0x7f8] sm:$0xf0]  ;;  %v6801_v35 = vor.u32 %v9923_v3, %v6798_v8 }
 0x27a   :  { %v5658_v51 = vpop.f32.mrf.mxu2  ;;  %v10111_v32 = vld [vmem:[%s15892_s1 + $0x7ec] sm:$0xf]  ;;  %v7678_v39 = vld [vmem:[%s15892_s1 + $0x8f8] sm:$0xf0]  ;;  %v7297_v22 = vor.u32 %v10047_v26, %v7294_v10 }
 0x27b   :  { %5884 = vmatpush.bf16.msrb.mxu0 %v6737_v41  ;;  %v6814_v41 = vld [vmem:[%s15892_s1 + $0x238] sm:$0xf0]  ;;  %v10143_v38 = vld [vmem:[%s15892_s1 + $0x8ec] sm:$0xf] }
 0x27c   :  { %5897 = vmatpush.bf16.msrb.mxu1 %v6865_v55  ;;  %5910 = vmatpush.bf16.msrb.mxu2 %v6993_v52  ;;  %v6942_v55 = vld [vmem:[%s15892_s1 + $0x338] sm:$0xf0]  ;;  %v9991_v52 = vld [vmem:[%s15892_s1 + $0x42c] sm:$0xf]  ;;  %v6817_v59 = vor.u32 %v9927_v43, %v6814_v41 }
 0x27d   :  { %5923 = vmatpush.bf16.msrb.mxu3 %v7121_v45  ;;  %v6670_v45 = vld [vmem:[%s15892_s1 + $0x118] sm:$0xf0]  ;;  %v6945_v62 = vor.u32 %v9959_v54, %v6942_v55  ;;  %v7073_v63 = vor.u32 %v9991_v52, %v7070_v56  ;;  %v10043_v44 = vld [vmem:[%s15892_s1 + $0x5cc] sm:$0xf] }
 0x27e   :  { %v6673_v21 = vor.u32 %v9891_v58, %v6670_v45  ;;  %v7278_v50 = vld [vmem:[%s15892_s1 + $0x5d8] sm:$0xf0]  ;;  %v10075_v43 = vld [vmem:[%s15892_s1 + $0x6cc] sm:$0xf] }
 0x27f   :  { %5885 = vmatpush.bf16.msrb.mxu0 %v6721_v20  ;;  %v6926_v20 = vld [vmem:[%s15892_s1 + $0x318] sm:$0xf0]  ;;  %v10107_v54 = vld [vmem:[%s15892_s1 + $0x7cc] sm:$0xf] }
 0x280   :  { %5898 = vmatpush.bf16.msrb.mxu1 %v6849_v61  ;;  %5911 = vmatpush.bf16.msrb.mxu2 %v6977_v25  ;;  %v9987_v61 = vld [vmem:[%s15892_s1 + $0x40c] sm:$0xf]  ;;  %v7054_v25 = vld [vmem:[%s15892_s1 + $0x418] sm:$0xf0]  ;;  %v5671_v31 = vpop.f32.mrf.mxu3  ;;  %v6929_v37 = vor.u32 %v9955_v11, %v6926_v20 }
 0x281   :  { %5924 = vmatpush.bf16.msrb.mxu3 %v7105_v30  ;;  %v10079_v30 = vld [vmem:[%s15892_s1 + $0x6ec] sm:$0xf]  ;;  %v7406_v41 = vld [vmem:[%s15892_s1 + $0x6d8] sm:$0xf0] }
 0x282   :  { %v7534_v55 = vld [vmem:[%s15892_s1 + $0x7d8] sm:$0xf0]  ;;  %v10139_v52 = vld [vmem:[%s15892_s1 + $0x8cc] sm:$0xf]  ;;  %v7409_v58 = vor.u32 %v10075_v43, %v7406_v41 }
 0x283   :  { %5886 = vmatpush.bf16.msrb.mxu0 %v6705_v40  ;;  %v7057_v40 = vor.u32 %v9987_v61, %v7054_v25  ;;  %v7662_v56 = vld [vmem:[%s15892_s1 + $0x8d8] sm:$0xf0]  ;;  %v7537_v45 = vor.u32 %v10107_v54, %v7534_v55  ;;  %v10071_v3 = vld [vmem:[%s15892_s1 + $0x6ac] sm:$0xf] }
 0x284   :  { %5899 = vmatpush.bf16.msrb.mxu1 %v6833_v36  ;;  %5912 = vmatpush.bf16.msrb.mxu2 %v6961_v42  ;;  %v7425_v36 = vor.u32 %v10079_v30, %v7422_v24  ;;  %v7553_v42 = vor.u32 %v10111_v32, %v7550_v33  ;;  %v7665_v8 = vor.u32 %v10139_v52, %v7662_v56  ;;  %v7390_v11 = vld [vmem:[%s15892_s1 + $0x6b8] sm:$0xf0]  ;;  %v10135_v61 = vld [vmem:[%s15892_s1 + $0x8ac] sm:$0xf] }
 0x285   :  { %5925 = vmatpush.bf16.msrb.mxu3 %v7089_v53  ;;  %v7681_v53 = vor.u32 %v10143_v38, %v7678_v39  ;;  %v7518_v20 = vld [vmem:[%s15892_s1 + $0x7b8] sm:$0xf0]  ;;  %v7393_v51 = vor.u32 %v10071_v3, %v7390_v11  ;;  %v10035_v10 = vld [vmem:[%s15892_s1 + $0x58c] sm:$0xf] }
 0x286   :  { %v7246_v30 = vld [vmem:[%s15892_s1 + $0x598] sm:$0xf0]  ;;  %v10099_v31 = vld [vmem:[%s15892_s1 + $0x78c] sm:$0xf] }
 0x287   :  { %5887 = vmatpush.bf16.msrb.mxu0 %v6689_v57  ;;  %v7281_v57 = vor.u32 %v10043_v44, %v7278_v50  ;;  %v10131_v32 = vld [vmem:[%s15892_s1 + $0x88c] sm:$0xf]  ;;  %v7630_v33 = vld [vmem:[%s15892_s1 + $0x898] sm:$0xf0] }
 0x288   :  { %5900 = vmatpush.bf16.msrb.mxu1 %v6817_v59  ;;  %5913 = vmatpush.bf16.msrb.mxu2 %v6945_v62  ;;  %v10039_v59 = vld [vmem:[%s15892_s1 + $0x5ac] sm:$0xf]  ;;  %v7262_v62 = vld [vmem:[%s15892_s1 + $0x5b8] sm:$0xf0] }
 0x289   :  { %5926 = vmatpush.bf16.msrb.mxu3 %v7073_v63  ;;  %v10103_v63 = vld [vmem:[%s15892_s1 + $0x7ac] sm:$0xf]  ;;  %v7265_v25 = vor.u32 %v10039_v59, %v7262_v62  ;;  %v7358_v50 = vld [vmem:[%s15892_s1 + $0x678] sm:$0xf0] }
 0x28a   :  { %v7521_v26 = vor.u32 %v10103_v63, %v7518_v20  ;;  %v10095_v43 = vld [vmem:[%s15892_s1 + $0x76c] sm:$0xf]  ;;  %v7614_v54 = vld [vmem:[%s15892_s1 + $0x878] sm:$0xf0] }
 0x28b   :  { %5888 = vmatpush.bf16.msrb.mxu0 %v6673_v21  ;;  %v7502_v21 = vld [vmem:[%s15892_s1 + $0x798] sm:$0xf0]  ;;  %v5682_v24 = vpop.f32.mrf.mxu0  ;;  %v10127_v41 = vld [vmem:[%s15892_s1 + $0x86c] sm:$0xf] }
 0x28c   :  { %5901 = vmatpush.bf16.msrb.mxu1 %v6801_v35  ;;  %5914 = vmatpush.bf16.msrb.mxu2 %v6929_v37  ;;  %v5683_v35 = vadd.f32 %v5682_v24, %v14732_v28  ;;  %v7249_v37 = vor.u32 %v10035_v10, %v7246_v30  ;;  %v7633_v28 = vor.u32 %v10131_v32, %v7630_v33  ;;  %v7342_v3 = vld [vmem:[%s15892_s1 + $0x658] sm:$0xf0]  ;;  %v10087_v32 = vld [vmem:[%s15892_s1 + $0x72c] sm:$0xf] }
 0x28d   :  { %5927 = vmatpush.bf16.msrb.mxu3 %v7057_v40  ;;  %v7505_v40 = vor.u32 %v10099_v31, %v7502_v21  ;;  %v7617_v59 = vor.u32 %v10127_v41, %v7614_v54  ;;  %v7470_v11 = vld [vmem:[%s15892_s1 + $0x758] sm:$0xf0]  ;;  %v10055_v31 = vld [vmem:[%s15892_s1 + $0x62c] sm:$0xf] }
 0x28e   :  { %5889 = vmatmul.bf16.vlgmr.msrb.gmra.mxu0 %v11085_v34  ;;  %v10067_v34 = vld [vmem:[%s15892_s1 + $0x68c] sm:$0xf]  ;;  %v5695_v38 = vpop.f32.mrf.mxu1  ;;  %v7326_v24 = vld [vmem:[%s15892_s1 + $0x638] sm:$0xf0] }
 0x28f   :  { %5933 = vmatpush.bf16.msra.mxu0 %v7297_v22  ;;  %5915 = vmatmul.bf16.vlgmr.msrb.gmra.mxu2 %v11077_v29  ;;  %v7646_v29 = vld [vmem:[%s15892_s1 + $0x8b8] sm:$0xf0]  ;;  %v10031_v22 = vld [vmem:[%s15892_s1 + $0x56c] sm:$0xf]  ;;  %v5696_v44 = vadd.f32 %v5695_v38, %v5683_v35 }
 0x290   :  { %5946 = vmatpush.bf16.msra.mxu1 %v7425_v36  ;;  %5959 = vmatpush.bf16.msra.mxu2 %v7553_v42  ;;  %v7230_v36 = vld [vmem:[%s15892_s1 + $0x578] sm:$0xf0]  ;;  %v10063_v42 = vld [vmem:[%s15892_s1 + $0x66c] sm:$0xf] }
 0x291   :  { %5972 = vmatpush.bf16.msra.mxu3 %v7681_v53  ;;  %5902 = vmatmul.bf16.vlgmr.msrb.gmra.mxu1 %v11073_v27  ;;  %v7374_v27 = vld [vmem:[%s15892_s1 + $0x698] sm:$0xf0]  ;;  %v7233_v55 = vor.u32 %v10031_v22, %v7230_v36  ;;  %v7361_v52 = vor.u32 %v10063_v42, %v7358_v50  ;;  %v10119_v35 = vld [vmem:[%s15892_s1 + $0x82c] sm:$0xf]  ;;  %v7329_v22 = vor.u32 %v10055_v31, %v7326_v24 }
 0x292   :  { %5928 = vmatmul.bf16.vlgmr.msrb.gmra.mxu3 %v11153_v0  ;;  %v7649_v0 = vor.u32 %v10135_v61, %v7646_v29  ;;  %v7377_v39 = vor.u32 %v10067_v34, %v7374_v27  ;;  %v7486_v53 = vld [vmem:[%s15892_s1 + $0x778] sm:$0xf0]  ;;  %v5708_v62 = vpop.f32.mrf.mxu2  ;;  %v10123_v61 = vld [vmem:[%s15892_s1 + $0x84c] sm:$0xf] }
 0x293   :  { %5934 = vmatpush.bf16.msra.mxu0 %v7281_v57  ;;  %v7489_v56 = vor.u32 %v10095_v43, %v7486_v53  ;;  %v10027_v57 = vld [vmem:[%s15892_s1 + $0x54c] sm:$0xf]  ;;  %v5709_v63 = vadd.f32 %v5708_v62, %v5696_v44  ;;  %v7598_v29 = vld [vmem:[%s15892_s1 + $0x858] sm:$0xf0] }
 0x294   :  { %5947 = vmatpush.bf16.msra.mxu1 %v7409_v58  ;;  %5960 = vmatpush.bf16.msra.mxu2 %v7537_v45  ;;  %v7214_v58 = vld [vmem:[%s15892_s1 + $0x558] sm:$0xf0]  ;;  %v10059_v45 = vld [vmem:[%s15892_s1 + $0x64c] sm:$0xf]  ;;  %v7601_v21 = vor.u32 %v10123_v61, %v7598_v29 }
 0x295   :  { %5973 = vmatpush.bf16.msra.mxu3 %v7665_v8  ;;  %v10091_v8 = vld [vmem:[%s15892_s1 + $0x74c] sm:$0xf]  ;;  %v5721_v20 = vpop.f32.mrf.mxu3  ;;  %v7345_v30 = vor.u32 %v10059_v45, %v7342_v3  ;;  %v7198_v27 = vld [vmem:[%s15892_s1 + $0x538] sm:$0xf0] }
 0x296   :  { %v14931_v10 = vadd.f32 %v5721_v20, %v5709_v63  ;;  %v7473_v34 = vor.u32 %v10091_v8, %v7470_v11  ;;  %v7454_v33 = vld [vmem:[%s15892_s1 + $0x738] sm:$0xf0]  ;;  %v10051_v42 = vld [vmem:[%s15892_s1 + $0x60c] sm:$0xf] }
 0x297   :  { %5935 = vmatpush.bf16.msra.mxu0 %v7265_v25  ;;  %v5684_v25 = vpop.f32.mrf.mxu0  ;;  %v7457_v36 = vor.u32 %v10087_v32, %v7454_v33  ;;  %v10083_v44 = vld [vmem:[%s15892_s1 + $0x70c] sm:$0xf]  ;;  %v7438_v43 = vld [vmem:[%s15892_s1 + $0x718] sm:$0xf0] }
 0x298   :  { %5948 = vmatpush.bf16.msra.mxu1 %v7393_v51  ;;  %5961 = vmatpush.bf16.msra.mxu2 %v7521_v26  ;;  %v7217_v51 = vor.u32 %v10027_v57, %v7214_v58  ;;  %v5697_v26 = vpop.f32.mrf.mxu1  ;;  %v10115_v53 = vld [vmem:[%s15892_s1 + $0x80c] sm:$0xf]  ;;  %v7566_v41 = vld [vmem:[%s15892_s1 + $0x818] sm:$0xf0]  ;;  %v7441_v8 = vor.u32 %v10083_v44, %v7438_v43 }
 0x299   :  { %5974 = vmatpush.bf16.msra.mxu3 %v7649_v0  ;;  %v10023_v0 = vld [vmem:[%s15892_s1 + $0x52c] sm:$0xf]  ;;  %v7934_v45 = vld [vmem:[%s15892_s1 + $0xaf8] sm:$0xf0]  ;;  %v7569_v20 = vor.u32 %v10115_v53, %v7566_v41 }
 0x29a   :  { %v7201_v38 = vor.u32 %v10023_v0, %v7198_v27  ;;  %v5710_v54 = vpop.f32.mrf.mxu2  ;;  %v8062_v62 = vld [vmem:[%s15892_s1 + $0xbf8] sm:$0xf0]  ;;  %v10271_v11 = vld [vmem:[%s15892_s1 + $0xcec] sm:$0xf] }
 0x29b   :  { %5936 = vmatpush.bf16.msra.mxu0 %v7249_v37  ;;  %v7582_v37 = vld [vmem:[%s15892_s1 + $0x838] sm:$0xf0]  ;;  %v10235_v27 = vld [vmem:[%s15892_s1 + $0xbcc] sm:$0xf] }
 0x29c   :  { %5949 = vmatpush.bf16.msra.mxu1 %v7377_v39  ;;  %5962 = vmatpush.bf16.msra.mxu2 %v7505_v40  ;;  %v10019_v39 = vld [vmem:[%s15892_s1 + $0x50c] sm:$0xf]  ;;  %v7182_v40 = vld [vmem:[%s15892_s1 + $0x518] sm:$0xf0]  ;;  %v7585_v50 = vor.u32 %v10119_v35, %v7582_v37 }
 0x29d   :  { %5975 = vmatpush.bf16.msra.mxu3 %v7633_v28  ;;  %v7310_v28 = vld [vmem:[%s15892_s1 + $0x618] sm:$0xf0]  ;;  %v5723_v57 = vpop.f32.mrf.mxu3  ;;  %v7185_v58 = vor.u32 %v10019_v39, %v7182_v40  ;;  %v10167_v37 = vld [vmem:[%s15892_s1 + $0x9ac] sm:$0xf] }
 0x29e   :  { %v7313_v3 = vor.u32 %v10051_v42, %v7310_v28  ;;  %v8190_v63 = vld [vmem:[%s15892_s1 + $0xcf8] sm:$0xf0]  ;;  %v10199_v39 = vld [vmem:[%s15892_s1 + $0xaac] sm:$0xf] }
 0x29f   :  { %5937 = vmatpush.bf16.msra.mxu0 %v7233_v55  ;;  %v10175_v55 = vld [vmem:[%s15892_s1 + $0x9ec] sm:$0xf]  ;;  %v7790_v26 = vld [vmem:[%s15892_s1 + $0x9d8] sm:$0xf0] }
 0x2a0   :  { %5950 = vmatpush.bf16.msra.mxu1 %v7361_v52  ;;  %5963 = vmatpush.bf16.msra.mxu2 %v7489_v56  ;;  %v7806_v52 = vld [vmem:[%s15892_s1 + $0x9f8] sm:$0xf0]  ;;  %v10207_v56 = vld [vmem:[%s15892_s1 + $0xaec] sm:$0xf] }
 0x2a1   :  { %5976 = vmatpush.bf16.msra.mxu3 %v7617_v59  ;;  %v10239_v59 = vld [vmem:[%s15892_s1 + $0xbec] sm:$0xf]  ;;  %v7809_v61 = vor.u32 %v10175_v55, %v7806_v52  ;;  %v7937_v29 = vor.u32 %v10207_v56, %v7934_v45  ;;  %v7918_v0 = vld [vmem:[%s15892_s1 + $0xad8] sm:$0xf0] }
 0x2a2   :  { %v8065_v25 = vor.u32 %v10239_v59, %v8062_v62  ;;  %v8046_v31 = vld [vmem:[%s15892_s1 + $0xbd8] sm:$0xf0]  ;;  %v10195_v53 = vld [vmem:[%s15892_s1 + $0xa8c] sm:$0xf] }
 0x2a3   :  { %5938 = vmatpush.bf16.msra.mxu0 %v7217_v51  ;;  %v10171_v51 = vld [vmem:[%s15892_s1 + $0x9cc] sm:$0xf]  ;;  %v8174_v24 = vld [vmem:[%s15892_s1 + $0xcd8] sm:$0xf0]  ;;  %v8049_v35 = vor.u32 %v10235_v27, %v8046_v31 }
 0x2a4   :  { %5951 = vmatpush.bf16.msra.mxu1 %v7345_v30  ;;  %5964 = vmatpush.bf16.msra.mxu2 %v7473_v34  ;;  %v10203_v30 = vld [vmem:[%s15892_s1 + $0xacc] sm:$0xf]  ;;  %v8193_v34 = vor.u32 %v10271_v11, %v8190_v63  ;;  %v7793_v32 = vor.u32 %v10171_v51, %v7790_v26  ;;  %v8030_v42 = vld [vmem:[%s15892_s1 + $0xbb8] sm:$0xf0] }
 0x2a5   :  { %5977 = vmatpush.bf16.msra.mxu3 %v7601_v21  ;;  %v10267_v21 = vld [vmem:[%s15892_s1 + $0xccc] sm:$0xf]  ;;  %v7921_v33 = vor.u32 %v10203_v30, %v7918_v0  ;;  %v8158_v28 = vld [vmem:[%s15892_s1 + $0xcb8] sm:$0xf0] }
 0x2a6   :  { %v8177_v40 = vor.u32 %v10267_v21, %v8174_v24  ;;  %v7886_v41 = vld [vmem:[%s15892_s1 + $0xa98] sm:$0xf0]  ;;  %v10227_v54 = vld [vmem:[%s15892_s1 + $0xb8c] sm:$0xf] }
 0x2a7   :  { %5939 = vmatpush.bf16.msra.mxu0 %v7201_v38  ;;  %v7774_v38 = vld [vmem:[%s15892_s1 + $0x9b8] sm:$0xf0]  ;;  %v10259_v56 = vld [vmem:[%s15892_s1 + $0xc8c] sm:$0xf]  ;;  %v7889_v62 = vor.u32 %v10195_v53, %v7886_v41 }
 0x2a8   :  { %5952 = vmatpush.bf16.msra.mxu1 %v7329_v22  ;;  %5965 = vmatpush.bf16.msra.mxu2 %v7457_v36  ;;  %v7902_v22 = vld [vmem:[%s15892_s1 + $0xab8] sm:$0xf0]  ;;  %v10231_v36 = vld [vmem:[%s15892_s1 + $0xbac] sm:$0xf]  ;;  %v7777_v44 = vor.u32 %v10167_v37, %v7774_v38 }
 0x2a9   :  { %5978 = vmatpush.bf16.msra.mxu3 %v7585_v50  ;;  %v7905_v50 = vor.u32 %v10199_v39, %v7902_v22  ;;  %v8033_v43 = vor.u32 %v10231_v36, %v8030_v42  ;;  %v8014_v55 = vld [vmem:[%s15892_s1 + $0xb98] sm:$0xf0]  ;;  %v10191_v63 = vld [vmem:[%s15892_s1 + $0xa6c] sm:$0xf] }
 0x2aa   :  { %v8142_v57 = vld [vmem:[%s15892_s1 + $0xc98] sm:$0xf0]  ;;  %v10255_v51 = vld [vmem:[%s15892_s1 + $0xc6c] sm:$0xf] }
 0x2ab   :  { %5940 = vmatpush.bf16.msra.mxu0 %v7185_v58  ;;  %v5734_v52 = vpop.f32.mrf.mxu0  ;;  %v7742_v11 = vld [vmem:[%s15892_s1 + $0x978] sm:$0xf0]  ;;  %v10155_v27 = vld [vmem:[%s15892_s1 + $0x94c] sm:$0xf] }
 0x2ac   :  { %5953 = vmatpush.bf16.msra.mxu1 %v7313_v3  ;;  %5966 = vmatpush.bf16.msra.mxu2 %v7441_v8  ;;  %v5735_v58 = vadd.f32 %v5734_v52, %v14931_v10  ;;  %v8017_v3 = vor.u32 %v10227_v54, %v8014_v55  ;;  %v10159_v8 = vld [vmem:[%s15892_s1 + $0x96c] sm:$0xf]  ;;  %v8145_v10 = vor.u32 %v10259_v56, %v8142_v57  ;;  %v8126_v26 = vld [vmem:[%s15892_s1 + $0xc78] sm:$0xf0] }
 0x2ad   :  { %5979 = vmatpush.bf16.msra.mxu3 %v7569_v20  ;;  %v7745_v30 = vor.u32 %v10159_v8, %v7742_v11  ;;  %v7726_v31 = vld [vmem:[%s15892_s1 + $0x958] sm:$0xf0]  ;;  %v10187_v21 = vld [vmem:[%s15892_s1 + $0xa4c] sm:$0xf]  ;;  %v8129_v24 = vor.u32 %v10255_v51, %v8126_v26 }
 0x2ae   :  { %5941 = vmatmul.bf16.vlgmr.msra.gmra.mxu0 %v11157_v2  ;;  %v10263_v2 = vld [vmem:[%s15892_s1 + $0xcac] sm:$0xf]  ;;  %v5747_v59 = vpop.f32.mrf.mxu1  ;;  %v7982_v37 = vld [vmem:[%s15892_s1 + $0xb58] sm:$0xf0]  ;;  %v7729_v42 = vor.u32 %v10155_v27, %v7726_v31 }
 0x2af   :  { %5985 = vmatpush.bf16.msrb.mxu0 %v7809_v61  ;;  %5967 = vmatmul.bf16.vlgmr.msra.gmra.mxu2 %v11155_v1  ;;  %v7758_v1 = vld [vmem:[%s15892_s1 + $0x998] sm:$0xf0]  ;;  %v5748_v20 = vadd.f32 %v5747_v59, %v5735_v58  ;;  %v10215_v41 = vld [vmem:[%s15892_s1 + $0xb2c] sm:$0xf] }
 0x2b0   :  { %5998 = vmatpush.bf16.msrb.mxu1 %v7937_v29  ;;  %6011 = vmatpush.bf16.msrb.mxu2 %v8065_v25  ;;  %v7870_v61 = vld [vmem:[%s15892_s1 + $0xa78] sm:$0xf0]  ;;  %v10223_v29 = vld [vmem:[%s15892_s1 + $0xb6c] sm:$0xf] }
 0x2b1   :  { %6024 = vmatpush.bf16.msrb.mxu3 %v8193_v34  ;;  %5954 = vmatmul.bf16.vlgmr.msra.gmra.mxu1 %v11148_v60  ;;  %v10163_v60 = vld [vmem:[%s15892_s1 + $0x98c] sm:$0xf]  ;;  %v7998_v25 = vld [vmem:[%s15892_s1 + $0xb78] sm:$0xf0]  ;;  %v7873_v34 = vor.u32 %v10191_v63, %v7870_v61 }
 0x2b2   :  { %5980 = vmatmul.bf16.vlgmr.msra.gmra.mxu3 %v11403_v12  ;;  %v8161_v12 = vor.u32 %v10263_v2, %v8158_v28  ;;  %v7761_v45 = vor.u32 %v10163_v60, %v7758_v1  ;;  %v8001_v0 = vor.u32 %v10223_v29, %v7998_v25  ;;  %v8110_v22 = vld [vmem:[%s15892_s1 + $0xc58] sm:$0xf0]  ;;  %v10183_v1 = vld [vmem:[%s15892_s1 + $0xa2c] sm:$0xf] }
 0x2b3   :  { %5986 = vmatpush.bf16.msrb.mxu0 %v7793_v32  ;;  %v5760_v32 = vpop.f32.mrf.mxu2  ;;  %v5736_v36 = vpop.f32.mrf.mxu0  ;;  %v7710_v60 = vld [vmem:[%s15892_s1 + $0x938] sm:$0xf0]  ;;  %v10247_v55 = vld [vmem:[%s15892_s1 + $0xc2c] sm:$0xf] }
 0x2b4   :  { %5999 = vmatpush.bf16.msrb.mxu1 %v7921_v33  ;;  %6012 = vmatpush.bf16.msrb.mxu2 %v8049_v35  ;;  %v7854_v33 = vld [vmem:[%s15892_s1 + $0xa58] sm:$0xf0]  ;;  %v10219_v35 = vld [vmem:[%s15892_s1 + $0xb4c] sm:$0xf]  ;;  %v5761_v38 = vadd.f32 %v5760_v32, %v5748_v20 }
 0x2b5   :  { %6025 = vmatpush.bf16.msrb.mxu3 %v8177_v40  ;;  %v5773_v39 = vpop.f32.mrf.mxu3  ;;  %v10251_v40 = vld [vmem:[%s15892_s1 + $0xc4c] sm:$0xf]  ;;  %v7966_v54 = vld [vmem:[%s15892_s1 + $0xb38] sm:$0xf0] }
 0x2b6   :  { %v5749_v2 = vpop.f32.mrf.mxu1  ;;  %v15130_v28 = vadd.f32 %v5773_v39, %v5761_v38  ;;  %v8113_v53 = vor.u32 %v10251_v40, %v8110_v22  ;;  %v8094_v52 = vld [vmem:[%s15892_s1 + $0xc38] sm:$0xf0]  ;;  %v10147_v57 = vld [vmem:[%s15892_s1 + $0x90c] sm:$0xf]  ;;  %v7969_v59 = vor.u32 %v10215_v41, %v7966_v54 }
 0x2b7   :  { %5987 = vmatpush.bf16.msrb.mxu0 %v7777_v44  ;;  %v7857_v44 = vor.u32 %v10187_v21, %v7854_v33  ;;  %v7694_v58 = vld [vmem:[%s15892_s1 + $0x918] sm:$0xf0]  ;;  %v10211_v8 = vld [vmem:[%s15892_s1 + $0xb0c] sm:$0xf]  ;;  %v8097_v11 = vor.u32 %v10247_v55, %v8094_v52 }
 0x2b8   :  { %6000 = vmatpush.bf16.msrb.mxu1 %v7905_v50  ;;  %6013 = vmatpush.bf16.msrb.mxu2 %v8033_v43  ;;  %v7985_v50 = vor.u32 %v10219_v35, %v7982_v37  ;;  %v10151_v43 = vld [vmem:[%s15892_s1 + $0x92c] sm:$0xf]  ;;  %v7950_v63 = vld [vmem:[%s15892_s1 + $0xb18] sm:$0xf0] }
 0x2b9   :  { %6026 = vmatpush.bf16.msrb.mxu3 %v8161_v12  ;;  %v7838_v12 = vld [vmem:[%s15892_s1 + $0xa38] sm:$0xf0]  ;;  %v7713_v56 = vor.u32 %v10151_v43, %v7710_v60  ;;  %v10303_v29 = vld [vmem:[%s15892_s1 + $0xdec] sm:$0xf]  ;;  %v7953_v21 = vor.u32 %v10211_v8, %v7950_v63 }
 0x2ba   :  { %v8078_v20 = vld [vmem:[%s15892_s1 + $0xc18] sm:$0xf0]  ;;  %v10335_v51 = vld [vmem:[%s15892_s1 + $0xeec] sm:$0xf] }
 0x2bb   :  { %5988 = vmatpush.bf16.msrb.mxu0 %v7761_v45  ;;  %v7841_v45 = vor.u32 %v10183_v1, %v7838_v12  ;;  %v5762_v61 = vpop.f32.mrf.mxu2  ;;  %v8318_v25 = vld [vmem:[%s15892_s1 + $0xdf8] sm:$0xf0]  ;;  %v10299_v39 = vld [vmem:[%s15892_s1 + $0xdcc] sm:$0xf] }
 0x2bc   :  { %6001 = vmatpush.bf16.msrb.mxu1 %v7889_v62  ;;  %6014 = vmatpush.bf16.msrb.mxu2 %v8017_v3  ;;  %v10179_v62 = vld [vmem:[%s15892_s1 + $0xa0c] sm:$0xf]  ;;  %v7822_v3 = vld [vmem:[%s15892_s1 + $0xa18] sm:$0xf0]  ;;  %v8321_v35 = vor.u32 %v10303_v29, %v8318_v25 }
 0x2bd   :  { %6027 = vmatpush.bf16.msrb.mxu3 %v8145_v10  ;;  %v10243_v10 = vld [vmem:[%s15892_s1 + $0xc0c] sm:$0xf]  ;;  %v5775_v26 = vpop.f32.mrf.mxu3  ;;  %v8574_v27 = vld [vmem:[%s15892_s1 + $0xff8] sm:$0xf0]  ;;  %v7825_v31 = vor.u32 %v10179_v62, %v7822_v3 }
 0x2be   :  { %v8702_v32 = vld [vmem:[%s15892_s1 + $0x10f8] sm:$0xf0]  ;;  %v8081_v33 = vor.u32 %v10243_v10, %v8078_v20  ;;  %v10331_v22 = vld [vmem:[%s15892_s1 + $0xecc] sm:$0xf] }
 0x2bf   :  { %5989 = vmatpush.bf16.msrb.mxu0 %v7745_v30  ;;  %v7697_v30 = vor.u32 %v10147_v57, %v7694_v58  ;;  %v8302_v40 = vld [vmem:[%s15892_s1 + $0xdd8] sm:$0xf0]  ;;  %v10363_v2 = vld [vmem:[%s15892_s1 + $0xfcc] sm:$0xf] }
 0x2c0   :  { %6002 = vmatpush.bf16.msrb.mxu1 %v7873_v34  ;;  %6015 = vmatpush.bf16.msrb.mxu2 %v8001_v0  ;;  %v8446_v34 = vld [vmem:[%s15892_s1 + $0xef8] sm:$0xf0]  ;;  %v10367_v0 = vld [vmem:[%s15892_s1 + $0xfec] sm:$0xf]  ;;  %v8305_v60 = vor.u32 %v10299_v39, %v8302_v40 }
 0x2c1   :  { %6028 = vmatpush.bf16.msrb.mxu3 %v8129_v24  ;;  %v10399_v24 = vld [vmem:[%s15892_s1 + $0x10ec] sm:$0xf]  ;;  %v8449_v37 = vor.u32 %v10335_v51, %v8446_v34  ;;  %v8577_v38 = vor.u32 %v10367_v0, %v8574_v27  ;;  %v8686_v43 = vld [vmem:[%s15892_s1 + $0x10d8] sm:$0xf0] }
 0x2c2   :  { %v8705_v36 = vor.u32 %v10399_v24, %v8702_v32  ;;  %v10295_v12 = vld [vmem:[%s15892_s1 + $0xdac] sm:$0xf]  ;;  %v8286_v41 = vld [vmem:[%s15892_s1 + $0xdb8] sm:$0xf0] }
 0x2c3   :  { %5990 = vmatpush.bf16.msrb.mxu0 %v7729_v42  ;;  %v8430_v42 = vld [vmem:[%s15892_s1 + $0xed8] sm:$0xf0]  ;;  %v10327_v54 = vld [vmem:[%s15892_s1 + $0xeac] sm:$0xf] }
 0x2c4   :  { %6003 = vmatpush.bf16.msrb.mxu1 %v7857_v44  ;;  %6016 = vmatpush.bf16.msrb.mxu2 %v7985_v50  ;;  %v8558_v44 = vld [vmem:[%s15892_s1 + $0xfd8] sm:$0xf0]  ;;  %v10395_v50 = vld [vmem:[%s15892_s1 + $0x10cc] sm:$0xf]  ;;  %v8433_v1 = vor.u32 %v10331_v22, %v8430_v42 }
 0x2c5   :  { %6029 = vmatpush.bf16.msrb.mxu3 %v8113_v53  ;;  %v8561_v53 = vor.u32 %v10363_v2, %v8558_v44  ;;  %v8689_v55 = vor.u32 %v10395_v50, %v8686_v43  ;;  %v8414_v52 = vld [vmem:[%s15892_s1 + $0xeb8] sm:$0xf0]  ;;  %v10323_v3 = vld [vmem:[%s15892_s1 + $0xe8c] sm:$0xf] }
 0x2c6   :  { %v8542_v57 = vld [vmem:[%s15892_s1 + $0xfb8] sm:$0xf0]  ;;  %v10387_v20 = vld [vmem:[%s15892_s1 + $0x108c] sm:$0xf] }
 0x2c7   :  { %5991 = vmatpush.bf16.msrb.mxu0 %v7713_v56  ;;  %v10359_v56 = vld [vmem:[%s15892_s1 + $0xfac] sm:$0xf]  ;;  %v8670_v58 = vld [vmem:[%s15892_s1 + $0x10b8] sm:$0xf0] }
 0x2c8   :  { %6004 = vmatpush.bf16.msrb.mxu1 %v7841_v45  ;;  %6017 = vmatpush.bf16.msrb.mxu2 %v7969_v59  ;;  %v8289_v45 = vor.u32 %v10295_v12, %v8286_v41  ;;  %v8417_v59 = vor.u32 %v10327_v54, %v8414_v52  ;;  %v8545_v62 = vor.u32 %v10359_v56, %v8542_v57  ;;  %v8398_v8 = vld [vmem:[%s15892_s1 + $0xe98] sm:$0xf0]  ;;  %v10287_v34 = vld [vmem:[%s15892_s1 + $0xd6c] sm:$0xf] }
 0x2c9   :  { %6030 = vmatpush.bf16.msrb.mxu3 %v8097_v11  ;;  %v10355_v11 = vld [vmem:[%s15892_s1 + $0xf8c] sm:$0xf]  ;;  %v8526_v63 = vld [vmem:[%s15892_s1 + $0xf98] sm:$0xf0]  ;;  %v8401_v26 = vor.u32 %v10323_v3, %v8398_v8 }
 0x2ca   :  { %v8654_v61 = vld [vmem:[%s15892_s1 + $0x1098] sm:$0xf0]  ;;  %v10319_v27 = vld [vmem:[%s15892_s1 + $0xe6c] sm:$0xf] }
 0x2cb   :  { %5992 = vmatpush.bf16.msrb.mxu0 %v7697_v30  ;;  %v5786_v10 = vpop.f32.mrf.mxu0  ;;  %v8529_v30 = vor.u32 %v10355_v11, %v8526_v63  ;;  %v8254_v0 = vld [vmem:[%s15892_s1 + $0xd78] sm:$0xf0]  ;;  %v10351_v24 = vld [vmem:[%s15892_s1 + $0xf6c] sm:$0xf] }
 0x2cc   :  { %6005 = vmatpush.bf16.msrb.mxu1 %v7825_v31  ;;  %6018 = vmatpush.bf16.msrb.mxu2 %v7953_v21  ;;  %v5787_v29 = vadd.f32 %v5786_v10, %v15130_v28  ;;  %v8657_v28 = vor.u32 %v10387_v20, %v8654_v61  ;;  %v8382_v21 = vld [vmem:[%s15892_s1 + $0xe78] sm:$0xf0]  ;;  %v10283_v40 = vld [vmem:[%s15892_s1 + $0xd4c] sm:$0xf] }
 0x2cd   :  { %6031 = vmatpush.bf16.msrb.mxu3 %v8081_v33  ;;  %v8510_v32 = vld [vmem:[%s15892_s1 + $0xf78] sm:$0xf0]  ;;  %v10383_v33 = vld [vmem:[%s15892_s1 + $0x106c] sm:$0xf] }
 0x2ce   :  { %5993 = vmatmul.bf16.vlgmr.msrb.gmra.mxu0 %v11413_v16  ;;  %v10391_v16 = vld [vmem:[%s15892_s1 + $0x10ac] sm:$0xf]  ;;  %v5799_v51 = vpop.f32.mrf.mxu1  ;;  %v8513_v39 = vor.u32 %v10351_v24, %v8510_v32  ;;  %v8238_v22 = vld [vmem:[%s15892_s1 + $0xd58] sm:$0xf0] }
 0x2cf   :  { %6037 = vmatpush.bf16.msra.mxu0 %v8321_v35  ;;  %6019 = vmatmul.bf16.vlgmr.msrb.gmra.mxu2 %v11415_v17  ;;  %v8270_v17 = vld [vmem:[%s15892_s1 + $0xd98] sm:$0xf0]  ;;  %v5800_v31 = vadd.f32 %v5799_v51, %v5787_v29  ;;  %v10347_v50 = vld [vmem:[%s15892_s1 + $0xf4c] sm:$0xf]  ;;  %v8241_v54 = vor.u32 %v10283_v40, %v8238_v22 }
 0x2d0   :  { %6050 = vmatpush.bf16.msra.mxu1 %v8449_v37  ;;  %6063 = vmatpush.bf16.msra.mxu2 %v8577_v38  ;;  %v8638_v35 = vld [vmem:[%s15892_s1 + $0x1078] sm:$0xf0]  ;;  %v8257_v37 = vor.u32 %v10287_v34, %v8254_v0  ;;  %v8385_v38 = vor.u32 %v10319_v27, %v8382_v21  ;;  %v10375_v3 = vld [vmem:[%s15892_s1 + $0x102c] sm:$0xf] }
 0x2d1   :  { %6076 = vmatpush.bf16.msra.mxu3 %v8705_v36  ;;  %6006 = vmatmul.bf16.vlgmr.msrb.gmra.mxu1 %v11411_v15  ;;  %v10291_v15 = vld [vmem:[%s15892_s1 + $0xd8c] sm:$0xf]  ;;  %v8641_v42 = vor.u32 %v10383_v33, %v8638_v35  ;;  %v8366_v44 = vld [vmem:[%s15892_s1 + $0xe58] sm:$0xf0] }
 0x2d2   :  { %6032 = vmatmul.bf16.vlgmr.msrb.gmra.mxu3 %v11577_v46  ;;  %v8673_v46 = vor.u32 %v10391_v16, %v8670_v58  ;;  %v8273_v25 = vor.u32 %v10291_v15, %v8270_v17  ;;  %v10315_v36 = vld [vmem:[%s15892_s1 + $0xe4c] sm:$0xf]  ;;  %v5812_v2 = vpop.f32.mrf.mxu2  ;;  %v8494_v43 = vld [vmem:[%s15892_s1 + $0xf58] sm:$0xf0] }
 0x2d3   :  { %6038 = vmatpush.bf16.msra.mxu0 %v8305_v60  ;;  %v5813_v60 = vadd.f32 %v5812_v2, %v5800_v31  ;;  %v8622_v12 = vld [vmem:[%s15892_s1 + $0x1058] sm:$0xf0]  ;;  %v5788_v41 = vpop.f32.mrf.mxu0  ;;  %v8369_v56 = vor.u32 %v10315_v36, %v8366_v44  ;;  %v8497_v57 = vor.u32 %v10347_v50, %v8494_v43  ;;  %v10279_v16 = vld [vmem:[%s15892_s1 + $0xd2c] sm:$0xf] }
 0x2d4   :  { %6051 = vmatpush.bf16.msra.mxu1 %v8433_v1  ;;  %6064 = vmatpush.bf16.msra.mxu2 %v8561_v53  ;;  %v10379_v53 = vld [vmem:[%s15892_s1 + $0x104c] sm:$0xf]  ;;  %v8222_v58 = vld [vmem:[%s15892_s1 + $0xd38] sm:$0xf0] }
 0x2d5   :  { %6077 = vmatpush.bf16.msra.mxu3 %v8689_v55  ;;  %v5825_v1 = vpop.f32.mrf.mxu3  ;;  %v10343_v15 = vld [vmem:[%s15892_s1 + $0xf2c] sm:$0xf]  ;;  %v8478_v17 = vld [vmem:[%s15892_s1 + $0xf38] sm:$0xf0]  ;;  %v8225_v8 = vor.u32 %v10279_v16, %v8222_v58 }
 0x2d6   :  { %v5801_v55 = vpop.f32.mrf.mxu1  ;;  %v15329_v52 = vadd.f32 %v5825_v1, %v5813_v60  ;;  %v10275_v11 = vld [vmem:[%s15892_s1 + $0xd0c] sm:$0xf]  ;;  %v8206_v63 = vld [vmem:[%s15892_s1 + $0xd18] sm:$0xf0]  ;;  %v8481_v20 = vor.u32 %v10343_v15, %v8478_v17 }
 0x2d7   :  { %6039 = vmatpush.bf16.msra.mxu0 %v8289_v45  ;;  %v10311_v45 = vld [vmem:[%s15892_s1 + $0xe2c] sm:$0xf]  ;;  %v8334_v29 = vld [vmem:[%s15892_s1 + $0xe18] sm:$0xf0]  ;;  %v8209_v24 = vor.u32 %v10275_v11, %v8206_v63 }
 0x2d8   :  { %6052 = vmatpush.bf16.msra.mxu1 %v8417_v59  ;;  %6065 = vmatpush.bf16.msra.mxu2 %v8545_v62  ;;  %v8625_v59 = vor.u32 %v10379_v53, %v8622_v12  ;;  %v8350_v62 = vld [vmem:[%s15892_s1 + $0xe38] sm:$0xf0]  ;;  %v10307_v61 = vld [vmem:[%s15892_s1 + $0xe0c] sm:$0xf] }
 0x2d9   :  { %6078 = vmatpush.bf16.msra.mxu3 %v8673_v46  ;;  %v8606_v46 = vld [vmem:[%s15892_s1 + $0x1038] sm:$0xf0]  ;;  %v8353_v10 = vor.u32 %v10311_v45, %v8350_v62  ;;  %v10431_v27 = vld [vmem:[%s15892_s1 + $0x11ec] sm:$0xf] }
 0x2da   :  { %v8609_v51 = vor.u32 %v10375_v3, %v8606_v46  ;;  %v8590_v34 = vld [vmem:[%s15892_s1 + $0x1018] sm:$0xf0]  ;;  %v5814_v0 = vpop.f32.mrf.mxu2  ;;  %v10463_v31 = vld [vmem:[%s15892_s1 + $0x12ec] sm:$0xf] }
 0x2db   :  { %6040 = vmatpush.bf16.msra.mxu0 %v8273_v25  ;;  %v10339_v25 = vld [vmem:[%s15892_s1 + $0xf0c] sm:$0xf]  ;;  %v8958_v32 = vld [vmem:[%s15892_s1 + $0x12f8] sm:$0xf0] }
 0x2dc   :  { %6053 = vmatpush.bf16.msra.mxu1 %v8401_v26  ;;  %6066 = vmatpush.bf16.msra.mxu2 %v8529_v30  ;;  %v8462_v26 = vld [vmem:[%s15892_s1 + $0xf18] sm:$0xf0]  ;;  %v10371_v30 = vld [vmem:[%s15892_s1 + $0x100c] sm:$0xf] }
 0x2dd   :  { %6079 = vmatpush.bf16.msra.mxu3 %v8657_v28  ;;  %v8830_v28 = vld [vmem:[%s15892_s1 + $0x11f8] sm:$0xf0]  ;;  %v5827_v21 = vpop.f32.mrf.mxu3  ;;  %v10495_v33 = vld [vmem:[%s15892_s1 + $0x13ec] sm:$0xf]  ;;  %v8593_v22 = vor.u32 %v10371_v30, %v8590_v34 }
 0x2de   :  { %v9086_v35 = vld [vmem:[%s15892_s1 + $0x13f8] sm:$0xf0]  ;;  %v8833_v36 = vor.u32 %v10431_v27, %v8830_v28  ;;  %v10427_v44 = vld [vmem:[%s15892_s1 + $0x11cc] sm:$0xf] }
 0x2df   :  { %6041 = vmatpush.bf16.msra.mxu0 %v8257_v37  ;;  %v8337_v37 = vor.u32 %v10307_v61, %v8334_v29  ;;  %v9214_v40 = vld [vmem:[%s15892_s1 + $0x14f8] sm:$0xf0]  ;;  %v9089_v2 = vor.u32 %v10495_v33, %v9086_v35  ;;  %v10459_v43 = vld [vmem:[%s15892_s1 + $0x12cc] sm:$0xf] }
 0x2e0   :  { %6054 = vmatpush.bf16.msra.mxu1 %v8385_v38  ;;  %6067 = vmatpush.bf16.msra.mxu2 %v8513_v39  ;;  %v8465_v38 = vor.u32 %v10339_v25, %v8462_v26  ;;  %v10527_v39 = vld [vmem:[%s15892_s1 + $0x14ec] sm:$0xf]  ;;  %v8814_v50 = vld [vmem:[%s15892_s1 + $0x11d8] sm:$0xf0] }
 0x2e1   :  { %6080 = vmatpush.bf16.msra.mxu3 %v8641_v42  ;;  %v8961_v42 = vor.u32 %v10463_v31, %v8958_v32  ;;  %v9217_v60 = vor.u32 %v10527_v39, %v9214_v40  ;;  %v8942_v1 = vld [vmem:[%s15892_s1 + $0x12d8] sm:$0xf0]  ;;  %v10491_v53 = vld [vmem:[%s15892_s1 + $0x13cc] sm:$0xf]  ;;  %v8817_v55 = vor.u32 %v10427_v44, %v8814_v50 }
 0x2e2   :  { %v9070_v12 = vld [vmem:[%s15892_s1 + $0x13d8] sm:$0xf0]  ;;  %v10523_v41 = vld [vmem:[%s15892_s1 + $0x14cc] sm:$0xf] }
 0x2e3   :  { %6042 = vmatpush.bf16.msra.mxu0 %v8241_v54  ;;  %v9198_v54 = vld [vmem:[%s15892_s1 + $0x14d8] sm:$0xf0]  ;;  %v10423_v16 = vld [vmem:[%s15892_s1 + $0x11ac] sm:$0xf] }
 0x2e4   :  { %6055 = vmatpush.bf16.msra.mxu1 %v8369_v56  ;;  %6068 = vmatpush.bf16.msra.mxu2 %v8497_v57  ;;  %v8945_v56 = vor.u32 %v10459_v43, %v8942_v1  ;;  %v9073_v57 = vor.u32 %v10491_v53, %v9070_v12  ;;  %v8798_v58 = vld [vmem:[%s15892_s1 + $0x11b8] sm:$0xf0]  ;;  %v10455_v45 = vld [vmem:[%s15892_s1 + $0x12ac] sm:$0xf] }
 0x2e5   :  { %6081 = vmatpush.bf16.msra.mxu3 %v8625_v59  ;;  %v9201_v59 = vor.u32 %v10523_v41, %v9198_v54  ;;  %v8926_v62 = vld [vmem:[%s15892_s1 + $0x12b8] sm:$0xf0]  ;;  %v10487_v15 = vld [vmem:[%s15892_s1 + $0x13ac] sm:$0xf]  ;;  %v8801_v46 = vor.u32 %v10423_v16, %v8798_v58 }
 0x2e6   :  { %v9054_v17 = vld [vmem:[%s15892_s1 + $0x13b8] sm:$0xf0]  ;;  %v10451_v63 = vld [vmem:[%s15892_s1 + $0x128c] sm:$0xf] }
 0x2e7   :  { %6043 = vmatpush.bf16.msra.mxu0 %v8225_v8  ;;  %v9182_v3 = vld [vmem:[%s15892_s1 + $0x14b8] sm:$0xf0]  ;;  %v8929_v8 = vor.u32 %v10455_v45, %v8926_v62  ;;  %v9057_v11 = vor.u32 %v10487_v15, %v9054_v17  ;;  %v10515_v25 = vld [vmem:[%s15892_s1 + $0x148c] sm:$0xf] }
 0x2e8   :  { %6056 = vmatpush.bf16.msra.mxu1 %v8353_v10  ;;  %6069 = vmatpush.bf16.msra.mxu2 %v8481_v20  ;;  %v8910_v10 = vld [vmem:[%s15892_s1 + $0x1298] sm:$0xf0]  ;;  %v10483_v20 = vld [vmem:[%s15892_s1 + $0x138c] sm:$0xf] }
 0x2e9   :  { %6082 = vmatpush.bf16.msra.mxu3 %v8609_v51  ;;  %v9038_v61 = vld [vmem:[%s15892_s1 + $0x1398] sm:$0xf0]  ;;  %v8913_v0 = vor.u32 %v10451_v63, %v8910_v10  ;;  %v10415_v28 = vld [vmem:[%s15892_s1 + $0x116c] sm:$0xf] }
 0x2ea   :  { %v9166_v51 = vld [vmem:[%s15892_s1 + $0x1498] sm:$0xf0]  ;;  %v9041_v27 = vor.u32 %v10483_v20, %v9038_v61  ;;  %v10447_v21 = vld [vmem:[%s15892_s1 + $0x126c] sm:$0xf] }
 0x2eb   :  { %6044 = vmatpush.bf16.msra.mxu0 %v8209_v24  ;;  %v5838_v29 = vpop.f32.mrf.mxu0  ;;  %v8766_v31 = vld [vmem:[%s15892_s1 + $0x1178] sm:$0xf0]  ;;  %v10479_v33 = vld [vmem:[%s15892_s1 + $0x136c] sm:$0xf] }
 0x2ec   :  { %6057 = vmatpush.bf16.msra.mxu1 %v8337_v37  ;;  %6070 = vmatpush.bf16.msra.mxu2 %v8465_v38  ;;  %v5839_v26 = vadd.f32 %v5838_v29, %v15329_v52  ;;  %v9169_v52 = vor.u32 %v10515_v25, %v9166_v51  ;;  %v8894_v32 = vld [vmem:[%s15892_s1 + $0x1278] sm:$0xf0]  ;;  %v10511_v37 = vld [vmem:[%s15892_s1 + $0x146c] sm:$0xf]  ;;  %v8769_v39 = vor.u32 %v10415_v28, %v8766_v31 }
 0x2ed   :  { %6083 = vmatpush.bf16.msra.mxu3 %v8593_v22  ;;  %v9022_v35 = vld [vmem:[%s15892_s1 + $0x1378] sm:$0xf0]  ;;  %v8897_v40 = vor.u32 %v10447_v21, %v8894_v32  ;;  %v10507_v12 = vld [vmem:[%s15892_s1 + $0x144c] sm:$0xf] }
 0x2ee   :  { %6045 = vmatmul.bf16.vlgmr.msra.gmra.mxu0 %v11581_v48  ;;  %v10519_v48 = vld [vmem:[%s15892_s1 + $0x14ac] sm:$0xf]  ;;  %v5851_v34 = vpop.f32.mrf.mxu1  ;;  %v9150_v38 = vld [vmem:[%s15892_s1 + $0x1478] sm:$0xf0]  ;;  %v9025_v22 = vor.u32 %v10479_v33, %v9022_v35 }
 0x2ef   :  { %6089 = vmatpush.bf16.msrb.mxu0 %v8833_v36  ;;  %6071 = vmatmul.bf16.vlgmr.msra.gmra.mxu2 %v11583_v49  ;;  %v8782_v49 = vld [vmem:[%s15892_s1 + $0x1198] sm:$0xf0]  ;;  %v5852_v24 = vadd.f32 %v5851_v34, %v5839_v26  ;;  %v10411_v36 = vld [vmem:[%s15892_s1 + $0x114c] sm:$0xf]  ;;  %v9153_v44 = vor.u32 %v10511_v37, %v9150_v38 }
 0x2f0   :  { %6102 = vmatpush.bf16.msrb.mxu1 %v8961_v42  ;;  %6115 = vmatpush.bf16.msrb.mxu2 %v9089_v2  ;;  %v8750_v42 = vld [vmem:[%s15892_s1 + $0x1158] sm:$0xf0]  ;;  %v10443_v2 = vld [vmem:[%s15892_s1 + $0x124c] sm:$0xf] }
 0x2f1   :  { %6128 = vmatpush.bf16.msrb.mxu3 %v9217_v60  ;;  %6058 = vmatmul.bf16.vlgmr.msra.gmra.mxu1 %v11579_v47  ;;  %v10419_v47 = vld [vmem:[%s15892_s1 + $0x118c] sm:$0xf]  ;;  %v8878_v43 = vld [vmem:[%s15892_s1 + $0x1258] sm:$0xf0] }
 0x2f2   :  { %6084 = vmatmul.bf16.vlgmr.msra.gmra.mxu3 %v11814_v9  ;;  %v9185_v9 = vor.u32 %v10519_v48, %v9182_v3  ;;  %v8785_v30 = vor.u32 %v10419_v47, %v8782_v49  ;;  %v5864_v50 = vpop.f32.mrf.mxu2  ;;  %v10475_v60 = vld [vmem:[%s15892_s1 + $0x134c] sm:$0xf]  ;;  %v9006_v1 = vld [vmem:[%s15892_s1 + $0x1358] sm:$0xf0]  ;;  %v8881_v16 = vor.u32 %v10443_v2, %v8878_v43 }
 0x2f3   :  { %6090 = vmatpush.bf16.msrb.mxu0 %v8817_v55  ;;  %v15522_v53 = vadd.f32 %v5864_v50, %v5852_v24  ;;  %v9134_v41 = vld [vmem:[%s15892_s1 + $0x1458] sm:$0xf0]  ;;  %v5840_v55 = vpop.f32.mrf.mxu0  ;;  %v9009_v58 = vor.u32 %v10475_v60, %v9006_v1  ;;  %v10407_v45 = vld [vmem:[%s15892_s1 + $0x112c] sm:$0xf] }
 0x2f4   :  { %6103 = vmatpush.bf16.msrb.mxu1 %v8945_v56  ;;  %6116 = vmatpush.bf16.msrb.mxu2 %v9073_v57  ;;  %v8753_v56 = vor.u32 %v10411_v36, %v8750_v42  ;;  %v10439_v62 = vld [vmem:[%s15892_s1 + $0x122c] sm:$0xf]  ;;  %v9137_v15 = vor.u32 %v10507_v12, %v9134_v41  ;;  %v8862_v17 = vld [vmem:[%s15892_s1 + $0x1238] sm:$0xf0] }
 0x2f5   :  { %6129 = vmatpush.bf16.msrb.mxu3 %v9201_v59  ;;  %v15530_v54 = vpop.f32.mrf.mxu3  ;;  %v8734_v59 = vld [vmem:[%s15892_s1 + $0x1138] sm:$0xf0]  ;;  %v10471_v48 = vld [vmem:[%s15892_s1 + $0x132c] sm:$0xf]  ;;  %v8865_v63 = vor.u32 %v10439_v62, %v8862_v17 }
 0x2f6   :  { %v5853_v57 = vpop.f32.mrf.mxu1  ;;  %v8990_v3 = vld [vmem:[%s15892_s1 + $0x1338] sm:$0xf0]  ;;  %v10403_v47 = vld [vmem:[%s15892_s1 + $0x110c] sm:$0xf] }
 0x2f7   :  { %6091 = vmatpush.bf16.msrb.mxu0 %v8801_v46  ;;  %v10503_v46 = vld [vmem:[%s15892_s1 + $0x142c] sm:$0xf]  ;;  %v8718_v49 = vld [vmem:[%s15892_s1 + $0x1118] sm:$0xf0] }
 0x2f8   :  { %6104 = vmatpush.bf16.msrb.mxu1 %v8929_v8  ;;  %6117 = vmatpush.bf16.msrb.mxu2 %v9057_v11  ;;  %v9118_v8 = vld [vmem:[%s15892_s1 + $0x1438] sm:$0xf0]  ;;  %v8737_v11 = vor.u32 %v10407_v45, %v8734_v59  ;;  %v10435_v10 = vld [vmem:[%s15892_s1 + $0x120c] sm:$0xf]  ;;  %v8721_v31 = vor.u32 %v10403_v47, %v8718_v49  ;;  %v10696_v45 = vld [vmem:[%s15893_s2] sm:$0xf] }
 0x2f9   :  { %6130 = vmatpush.bf16.msrb.mxu3 %v9185_v9  ;;  %v8993_v9 = vor.u32 %v10471_v48, %v8990_v3  ;;  %v8846_v20 = vld [vmem:[%s15892_s1 + $0x1218] sm:$0xf0]  ;;  %v10467_v61 = vld [vmem:[%s15892_s1 + $0x130c] sm:$0xf]  ;;  %v9121_v29 = vor.u32 %v10503_v46, %v9118_v8  ;;  %v830_v59 = vperm.slane %v10696_v45, 3 }
 0x2fa   :  { %v8974_v25 = vld [vmem:[%s15892_s1 + $0x1318] sm:$0xf0]  ;;  %v10499_v51 = vld [vmem:[%s15892_s1 + $0x140c] sm:$0xf]  ;;  %v8849_v32 = vor.u32 %v10435_v10, %v8846_v20 }
 0x2fb   :  { %6092 = vmatpush.bf16.msrb.mxu0 %v8785_v30  ;;  %v9102_v26 = vld [vmem:[%s15892_s1 + $0x1418] sm:$0xf0]  ;;  %v5866_v30 = vpop.f32.mrf.mxu2  ;;  %v10559_v34 = vld [vmem:[%s15892_s1 + $0x15ec] sm:$0xf]  ;;  %v8977_v33 = vor.u32 %v10467_v61, %v8974_v25 }
 0x2fc   :  { %6105 = vmatpush.bf16.msrb.mxu1 %v8913_v0  ;;  %6118 = vmatpush.bf16.msrb.mxu2 %v9041_v27  ;;  %v9342_v0 = vld [vmem:[%s15892_s1 + $0x15f8] sm:$0xf0]  ;;  %v10591_v27 = vld [vmem:[%s15892_s1 + $0x16ec] sm:$0xf]  ;;  %v9105_v38 = vor.u32 %v10499_v51, %v9102_v26 }
 0x2fd   :  { %6131 = vmatpush.bf16.msrb.mxu3 %v9169_v52  ;;  %v5879_v28 = vpop.f32.mrf.mxu3  ;;  %v9470_v21 = vld [vmem:[%s15892_s1 + $0x16f8] sm:$0xf0]  ;;  %v10623_v52 = vld [vmem:[%s15892_s1 + $0x17ec] sm:$0xf] }
 0x2fe   :  { %v9598_v24 = vld [vmem:[%s15892_s1 + $0x17f8] sm:$0xf0]  ;;  %v10655_v35 = vld [vmem:[%s15892_s1 + $0x18ec] sm:$0xf] }
 0x2ff   :  { %6093 = vmatpush.bf16.msrb.mxu0 %v8769_v39  ;;  %v9726_v37 = vld [vmem:[%s15892_s1 + $0x18f8] sm:$0xf0]  ;;  %v9345_v39 = vor.u32 %v10559_v34, %v9342_v0  ;;  %v10555_v36 = vld [vmem:[%s15892_s1 + $0x15cc] sm:$0xf] }
 0x300   :  { %6106 = vmatpush.bf16.msrb.mxu1 %v8897_v40  ;;  %6119 = vmatpush.bf16.msrb.mxu2 %v9025_v22  ;;  %v9473_v40 = vor.u32 %v10591_v27, %v9470_v21  ;;  %v9601_v22 = vor.u32 %v10623_v52, %v9598_v24  ;;  %v9326_v42 = vld [vmem:[%s15892_s1 + $0x15d8] sm:$0xf0]  ;;  %v10587_v2 = vld [vmem:[%s15892_s1 + $0x16cc] sm:$0xf] }
 0x301   :  { %6132 = vmatpush.bf16.msrb.mxu3 %v9153_v44  ;;  %v9729_v44 = vor.u32 %v10655_v35, %v9726_v37  ;;  %v9454_v50 = vld [vmem:[%s15892_s1 + $0x16d8] sm:$0xf0]  ;;  %v10619_v43 = vld [vmem:[%s15892_s1 + $0x17cc] sm:$0xf]  ;;  %v9329_v41 = vor.u32 %v10555_v36, %v9326_v42 }
 0x302   :  { %v9582_v60 = vld [vmem:[%s15892_s1 + $0x17d8] sm:$0xf0]  ;;  %v10651_v1 = vld [vmem:[%s15892_s1 + $0x18cc] sm:$0xf] }
 0x303   :  { %6094 = vmatpush.bf16.msrb.mxu0 %v8753_v56  ;;  %v9710_v12 = vld [vmem:[%s15892_s1 + $0x18d8] sm:$0xf0]  ;;  %v10551_v55 = vld [vmem:[%s15892_s1 + $0x15ac] sm:$0xf]  ;;  %v9457_v56 = vor.u32 %v10587_v2, %v9454_v50  ;;  %v9585_v57 = vor.u32 %v10619_v43, %v9582_v60 }
 0x304   :  { %6107 = vmatpush.bf16.msrb.mxu1 %v8881_v16  ;;  %6120 = vmatpush.bf16.msrb.mxu2 %v9009_v58  ;;  %v9310_v16 = vld [vmem:[%s15892_s1 + $0x15b8] sm:$0xf0]  ;;  %v10583_v58 = vld [vmem:[%s15892_s1 + $0x16ac] sm:$0xf]  ;;  %v9713_v62 = vor.u32 %v10651_v1, %v9710_v12 }
 0x305   :  { %6133 = vmatpush.bf16.msrb.mxu3 %v9137_v15  ;;  %v9438_v15 = vld [vmem:[%s15892_s1 + $0x16b8] sm:$0xf0]  ;;  %v10615_v17 = vld [vmem:[%s15892_s1 + $0x17ac] sm:$0xf]  ;;  %v9313_v46 = vor.u32 %v10551_v55, %v9310_v16 }
 0x306   :  { %v9566_v48 = vld [vmem:[%s15892_s1 + $0x17b8] sm:$0xf0]  ;;  %v9441_v8 = vor.u32 %v10583_v58, %v9438_v15  ;;  %v10643_v10 = vld [vmem:[%s15892_s1 + $0x188c] sm:$0xf] }
 0x307   :  { %6095 = vmatpush.bf16.msrb.mxu0 %v8737_v11  ;;  %v9694_v3 = vld [vmem:[%s15892_s1 + $0x18b8] sm:$0xf0]  ;;  %v9569_v11 = vor.u32 %v10615_v17, %v9566_v48  ;;  %v10543_v26 = vld [vmem:[%s15892_s1 + $0x156c] sm:$0xf] }
 0x308   :  { %6108 = vmatpush.bf16.msrb.mxu1 %v8865_v63  ;;  %6121 = vmatpush.bf16.msrb.mxu2 %v8993_v9  ;;  %v9294_v47 = vld [vmem:[%s15892_s1 + $0x1598] sm:$0xf0]  ;;  %v10575_v34 = vld [vmem:[%s15892_s1 + $0x166c] sm:$0xf] }
 0x309   :  { %6134 = vmatpush.bf16.msrb.mxu3 %v9121_v29  ;;  %v9422_v63 = vld [vmem:[%s15892_s1 + $0x1698] sm:$0xf0]  ;;  %v10607_v21 = vld [vmem:[%s15892_s1 + $0x176c] sm:$0xf] }
 0x30a   :  { %v9550_v9 = vld [vmem:[%s15892_s1 + $0x1798] sm:$0xf0]  ;;  %v10639_v24 = vld [vmem:[%s15892_s1 + $0x186c] sm:$0xf] }
 0x30b   :  { %6096 = vmatpush.bf16.msrb.mxu0 %v8721_v31  ;;  %v9678_v20 = vld [vmem:[%s15892_s1 + $0x1898] sm:$0xf0]  ;;  %v5890_v29 = vpop.f32.mrf.mxu0  ;;  %v10635_v1 = vld [vmem:[%s15892_s1 + $0x184c] sm:$0xf] }
 0x30c   :  { %6109 = vmatpush.bf16.msrb.mxu1 %v8849_v32  ;;  %6122 = vmatpush.bf16.msrb.mxu2 %v8977_v33  ;;  %v9278_v30 = vld [vmem:[%s15892_s1 + $0x1578] sm:$0xf0]  ;;  %v9681_v28 = vor.u32 %v10643_v10, %v9678_v20  ;;  %v10535_v58 = vld [vmem:[%s15892_s1 + $0x152c] sm:$0xf] }
 0x30d   :  { %6135 = vmatpush.bf16.msrb.mxu3 %v9105_v38  ;;  %v9406_v31 = vld [vmem:[%s15892_s1 + $0x1678] sm:$0xf0]  ;;  %v9281_v35 = vor.u32 %v10543_v26, %v9278_v30  ;;  %v10599_v48 = vld [vmem:[%s15892_s1 + $0x172c] sm:$0xf] }
 0x30e   :  { %6097 = vmatmul.bf16.vlgmr.msrb.gmra.mxu0 %v11824_v14  ;;  %v10647_v14 = vld [vmem:[%s15892_s1 + $0x18ac] sm:$0xf]  ;;  %v5903_v27 = vpop.f32.mrf.mxu1  ;;  %v9534_v52 = vld [vmem:[%s15892_s1 + $0x1778] sm:$0xf0]  ;;  %v9409_v37 = vor.u32 %v10575_v34, %v9406_v31  ;;  %v10672_v31 = vld [vmem:[%s15894_s3 + $0x70] sm:$0xff] }
 0x30f   :  { %6141 = vmatpush.bf16.msra.mxu0 %v9345_v39  ;;  %6123 = vmatmul.bf16.vlgmr.msrb.gmra.mxu2 %v11826_v18  ;;  %v5878_v18 = vadd.f32 %v15530_v54, %v830_v59  ;;  %v9697_v49 = vor.u32 %v10647_v14, %v9694_v3  ;;  %v10611_v54 = vld [vmem:[%s15892_s1 + $0x178c] sm:$0xf]  ;;  %v9662_v32 = vld [vmem:[%s15892_s1 + $0x1878] sm:$0xf0]  ;;  %v9537_v38 = vor.u32 %v10607_v21, %v9534_v52  ;;  %v10680_v21 = vld [vmem:[%s15894_s3 + $0xb0] sm:$0xff] }
 0x310   :  { %6154 = vmatpush.bf16.msra.mxu1 %v9473_v40  ;;  %6167 = vmatpush.bf16.msra.mxu2 %v9601_v22  ;;  %v9553_v51 = vor.u32 %v10611_v54, %v9550_v9  ;;  %v10539_v39 = vld [vmem:[%s15892_s1 + $0x154c] sm:$0xf]  ;;  %v9262_v40 = vld [vmem:[%s15892_s1 + $0x1558] sm:$0xf0]  ;;  %v9665_v42 = vor.u32 %v10639_v24, %v9662_v32  ;;  %v10697_v52 = vld [vmem:[#allocation1] sm:$0xff] }
 0x311   :  { %6180 = vmatpush.bf16.msra.mxu3 %v9729_v44  ;;  %6110 = vmatmul.bf16.vlgmr.msrb.gmra.mxu1 %v11822_v13  ;;  %v10547_v13 = vld [vmem:[%s15892_s1 + $0x158c] sm:$0xf]  ;;  %v5891_v0 = vadd.f32 %v5890_v29, %v5878_v18  ;;  %v9390_v2 = vld [vmem:[%s15892_s1 + $0x1658] sm:$0xf0] }
 0x312   :  { %6136 = vmatmul.bf16.vlgmr.msrb.gmra.mxu3 %v11991_v4  ;;  %v10579_v4 = vld [vmem:[%s15892_s1 + $0x168c] sm:$0xf]  ;;  %v9297_v61 = vor.u32 %v10547_v13, %v9294_v47  ;;  %v5916_v36 = vpop.f32.mrf.mxu2  ;;  %v9518_v50 = vld [vmem:[%s15892_s1 + $0x1758] sm:$0xf0] }
 0x313   :  { %6142 = vmatpush.bf16.msra.mxu0 %v9329_v41  ;;  %v9425_v25 = vor.u32 %v10579_v4, %v9422_v63  ;;  %v5904_v33 = vadd.f32 %v5903_v27, %v5891_v0  ;;  %v10571_v22 = vld [vmem:[%s15892_s1 + $0x164c] sm:$0xf]  ;;  %v9646_v12 = vld [vmem:[%s15892_s1 + $0x1858] sm:$0xf0]  ;;  %v9265_v41 = vor.u32 %v10539_v39, %v9262_v40 }
 0x314   :  { %6155 = vmatpush.bf16.msra.mxu1 %v9457_v56  ;;  %6168 = vmatpush.bf16.msra.mxu2 %v9585_v57  ;;  %v10603_v44 = vld [vmem:[%s15892_s1 + $0x174c] sm:$0xf]  ;;  %v5892_v56 = vpop.f32.mrf.mxu0  ;;  %v9393_v57 = vor.u32 %v10571_v22, %v9390_v2  ;;  %v9246_v45 = vld [vmem:[%s15892_s1 + $0x1538] sm:$0xf0]  ;;  %v9649_v15 = vor.u32 %v10635_v1, %v9646_v12  ;;  %v10668_v12 = vld [vmem:[%s15894_s3 + $0x50] sm:$0xff] }
 0x315   :  { %6181 = vmatpush.bf16.msra.mxu3 %v9713_v62  ;;  %v5917_v43 = vadd.f32 %v5916_v36, %v5904_v33  ;;  %v5929_v60 = vpop.f32.mrf.mxu3  ;;  %v9521_v16 = vor.u32 %v10603_v44, %v9518_v50  ;;  %v10567_v59 = vld [vmem:[%s15892_s1 + $0x162c] sm:$0xf]  ;;  %v9374_v17 = vld [vmem:[%s15892_s1 + $0x1638] sm:$0xf0]  ;;  %v10662_v33 = vld [vmem:[%s15894_s3 + $0x20] sm:$0xff] }
 0x316   :  { %v5905_v62 = vpop.f32.mrf.mxu1  ;;  %v9502_v14 = vld [vmem:[%s15892_s1 + $0x1738] sm:$0xf0]  ;;  %v10631_v3 = vld [vmem:[%s15892_s1 + $0x182c] sm:$0xf] }
 0x317   :  { %6143 = vmatpush.bf16.msra.mxu0 %v9313_v46  ;;  %v15732_v55 = vadd.f32 %v5929_v60, %v5917_v43  ;;  %v9630_v46 = vld [vmem:[%s15892_s1 + $0x1838] sm:$0xf0]  ;;  %v9505_v18 = vor.u32 %v10599_v48, %v9502_v14  ;;  %v10531_v13 = vld [vmem:[%s15892_s1 + $0x150c] sm:$0xf]  ;;  %v10660_v43 = vld [vmem:[%s15894_s3 + $0x10] sm:$0xff]  ;;  %v6195_v48 = vmax.f32 %v15522_v53, 0.0 }
 0x318   :  { %6156 = vmatpush.bf16.msra.mxu1 %v9441_v8  ;;  %6169 = vmatpush.bf16.msra.mxu2 %v9569_v11  ;;  %v9249_v8 = vor.u32 %v10535_v58, %v9246_v45  ;;  %v9377_v11 = vor.u32 %v10567_v59, %v9374_v17  ;;  %v9230_v47 = vld [vmem:[%s15892_s1 + $0x1518] sm:$0xf0]  ;;  %v10563_v4 = vld [vmem:[%s15892_s1 + $0x160c] sm:$0xf]  ;;  %v9633_v63 = vor.u32 %v10631_v3, %v9630_v46  ;;  %v10658_v45 = vld [vmem:[%s15894_s3] sm:$0xff]  ;;  %v6193_v59 = vmax.f32 %v13087_v19, 0.0 }
 0x319   :  { %6182 = vmatpush.bf16.msra.mxu3 %v9697_v49  ;;  %v9358_v54 = vld [vmem:[%s15892_s1 + $0x1618] sm:$0xf0]  ;;  %v10595_v9 = vld [vmem:[%s15892_s1 + $0x170c] sm:$0xf]  ;;  %v10666_v62 = vld [vmem:[%s15894_s3 + $0x40] sm:$0xff]  ;;  %v6194_v17 = vmax.f32 %v14291_v23, 0.0  ;;  %v6199_v19 = vpack.c.bf16 %v6195_v48, %v6195_v48 }
 0x31a   :  { %v5918_v49 = vpop.f32.mrf.mxu2  ;;  %v9486_v10 = vld [vmem:[%s15892_s1 + $0x1718] sm:$0xf0]  ;;  %v10663_v24 = vld [vmem:[%s15894_s3 + $0x28] sm:$0xff]  ;;  %v6197_v14 = vpack.c.bf16 %v6193_v59, %v6193_v59 }
 0x31b   :  { %6144 = vmatpush.bf16.msra.mxu0 %v9297_v61  ;;  %v10627_v61 = vld [vmem:[%s15892_s1 + $0x180c] sm:$0xf]  ;;  %v9614_v29 = vld [vmem:[%s15892_s1 + $0x1818] sm:$0xf0]  ;;  %v9489_v26 = vor.u32 %v10595_v9, %v9486_v10  ;;  %v6198_v3 = vpack.c.bf16 %v6194_v17, %v6194_v17 }
 0x31c   :  { %6157 = vmatpush.bf16.msra.mxu1 %v9425_v25  ;;  %6170 = vmatpush.bf16.msra.mxu2 %v9553_v51  ;;  %v9233_v25 = vor.u32 %v10531_v13, %v9230_v47  ;;  %v9361_v51 = vor.u32 %v10563_v4, %v9358_v54  ;;  %v9617_v30 = vor.u32 %v10627_v61, %v9614_v29  ;;  %v10665_v34 = vld [vmem:[%s15894_s3 + $0x38] sm:$0xff]  ;;  %v10671_v32 = vld [vmem:[%s15894_s3 + $0x68] sm:$0xff] }
 0x31d   :  { %6183 = vmatpush.bf16.msra.mxu3 %v9681_v28  ;;  %v5931_v20 = vpop.f32.mrf.mxu3  ;;  %v10673_v0 = vld [vmem:[%s15894_s3 + $0x78] sm:$0xff]  ;;  %v10664_v28 = vld [vmem:[%s15894_s3 + $0x30] sm:$0xff]  ;;  %v10667_v56 = vld [vmem:[%s15894_s3 + $0x48] sm:$0xff] }
 0x31e   :  { %v10681_v27 = vld [vmem:[%s15894_s3 + $0xb8] sm:$0xff] }
 0x31f   :  { %6145 = vmatpush.bf16.msra.mxu0 %v9281_v35  ;;  %v10661_v40 = vld [vmem:[%s15894_s3 + $0x18] sm:$0xff] }
 0x320   :  { %6158 = vmatpush.bf16.msra.mxu1 %v9409_v37  ;;  %6171 = vmatpush.bf16.msra.mxu2 %v9537_v38  ;;  %v10670_v37 = vld [vmem:[%s15894_s3 + $0x60] sm:$0xff]  ;;  %v10669_v22 = vld [vmem:[%s15894_s3 + $0x58] sm:$0xff] }
 0x321   :  { %6184 = vmatpush.bf16.msra.mxu3 %v9665_v42  ;;  %v10678_v38 = vld [vmem:[%s15894_s3 + $0xa0] sm:$0xff]  ;;  %v10677_v36 = vld [vmem:[%s15894_s3 + $0x98] sm:$0xff] }
 0x323   :  { %6146 = vmatpush.bf16.msra.mxu0 %v9265_v41  ;;  %v10676_v41 = vld [vmem:[%s15894_s3 + $0x90] sm:$0xff] }
 0x324   :  { %6159 = vmatpush.bf16.msra.mxu1 %v9393_v57  ;;  %6172 = vmatpush.bf16.msra.mxu2 %v9521_v16  ;;  %v10675_v57 = vld [vmem:[%s15894_s3 + $0x88] sm:$0xff] }
 0x325   :  { %6185 = vmatpush.bf16.msra.mxu3 %v9649_v15  ;;  %v10674_v15 = vld [vmem:[%s15894_s3 + $0x80] sm:$0xff] }
 0x327   :  { %6147 = vmatpush.bf16.msra.mxu0 %v9249_v8 }
 0x328   :  { %6160 = vmatpush.bf16.msra.mxu1 %v9377_v11  ;;  %6173 = vmatpush.bf16.msra.mxu2 %v9505_v18 }
 0x329   :  { %6186 = vmatpush.bf16.msra.mxu3 %v9633_v63 }
 0x32b   :  { %6148 = vmatpush.bf16.msra.mxu0 %v9233_v25  ;;  %v10689_v25 = vld [vmem:[%s15894_s3 + $0xf8] sm:$0xff] }
 0x32c   :  { %6161 = vmatpush.bf16.msra.mxu1 %v9361_v51  ;;  %6174 = vmatpush.bf16.msra.mxu2 %v9489_v26  ;;  %v10688_v26 = vld [vmem:[%s15894_s3 + $0xf0] sm:$0xff] }
 0x32d   :  { %6187 = vmatpush.bf16.msra.mxu3 %v9617_v30  ;;  %v10687_v30 = vld [vmem:[%s15894_s3 + $0xe8] sm:$0xff] }
 0x32e   :  { %6149 = vmatmul.bf16.vlgmr.msra.gmra.mxu0 %v11995_v6  ;;  %v10679_v6 = vld [vmem:[%s15894_s3 + $0xa8] sm:$0xff]  ;;  %v5955_v35 = vpop.f32.mrf.mxu1 }
 0x32f   :  { %6461 = vmatpush.bf16.msrb.mxu0 %v10665_v34  ;;  %6162 = vmatmul.bf16.vlgmr.msra.gmra.mxu1 %v11993_v5  ;;  %v5942_v5 = vpop.f32.mrf.mxu0 }
 0x330   :  { %6474 = vmatpush.bf16.msrb.mxu1 %v10673_v0  ;;  %6487 = vmatpush.bf16.msrb.mxu2 %v10681_v27  ;;  %v10686_v27 = vld [vmem:[%s15894_s3 + $0xe0] sm:$0xff] }
 0x331   :  { %6175 = vmatmul.bf16.vlgmr.msra.gmra.mxu2 %v11997_v7  ;;  %6188 = vmatmul.bf16.vlgmr.msra.gmra.mxu3 %v10697_v52  ;;  %v5943_v7 = vadd.f32 %v5942_v5, %v15732_v55  ;;  %v10659_v55 = vld [vmem:[%s15894_s3 + $0x8] sm:$0xff]  ;;  %v10684_v52 = vld [vmem:[%s15894_s3 + $0xd0] sm:$0xff] }
 0x332   :  { %v5968_v42 = vpop.f32.mrf.mxu2  ;;  %6500 = vmatpush.bf16.msrb.mxu3 %v10689_v25 }
 0x333   :  { %6462 = vmatpush.bf16.msrb.mxu0 %v10664_v28  ;;  %v5956_v39 = vadd.f32 %v5955_v35, %v5943_v7  ;;  %v10685_v28 = vld [vmem:[%s15894_s3 + $0xd8] sm:$0xff]  ;;  %v10682_v35 = vld [vmem:[%s15894_s3 + $0xc0] sm:$0xff] }
 0x334   :  { %6475 = vmatpush.bf16.msrb.mxu1 %v10672_v31  ;;  %6488 = vmatpush.bf16.msrb.mxu2 %v10680_v21 }
 0x335   :  { %v5969_v2 = vadd.f32 %v5968_v42, %v5956_v39  ;;  %v5981_v44 = vpop.f32.mrf.mxu3 }
 0x336   :  { %v5957_v60 = vpop.f32.mrf.mxu1  ;;  %6501 = vmatpush.bf16.msrb.mxu3 %v10688_v26 }
 0x337   :  { %6463 = vmatpush.bf16.msrb.mxu0 %v10663_v24  ;;  %v5944_v50 = vpop.f32.mrf.mxu0  ;;  %v5982_v1 = vadd.f32 %v5981_v44, %v5969_v2  ;;  %v10683_v24 = vld [vmem:[%s15894_s3 + $0xc8] sm:$0xff] }
 0x338   :  { %6476 = vmatpush.bf16.msrb.mxu1 %v10671_v32  ;;  %6489 = vmatpush.bf16.msrb.mxu2 %v10679_v6 }
 0x33a   :  { %v5970_v16 = vpop.f32.mrf.mxu2  ;;  %6502 = vmatpush.bf16.msrb.mxu3 %v10687_v30 }
 0x33b   :  { %6464 = vmatpush.bf16.msrb.mxu0 %v10662_v33 }
 0x33c   :  { %6477 = vmatpush.bf16.msrb.mxu1 %v10670_v37  ;;  %6490 = vmatpush.bf16.msrb.mxu2 %v10678_v38 }
 0x33d   :  { %v5983_v58 = vpop.f32.mrf.mxu3 }
 0x33e   :  { %6503 = vmatpush.bf16.msrb.mxu3 %v10686_v27 }
 0x33f   :  { %6465 = vmatpush.bf16.msrb.mxu0 %v10661_v40 }
 0x340   :  { %6478 = vmatpush.bf16.msrb.mxu1 %v10669_v22  ;;  %6491 = vmatpush.bf16.msrb.mxu2 %v10677_v36 }
 0x342   :  { %6504 = vmatpush.bf16.msrb.mxu3 %v10685_v28 }
 0x343   :  { %6466 = vmatpush.bf16.msrb.mxu0 %v10660_v43 }
 0x344   :  { %6479 = vmatpush.bf16.msrb.mxu1 %v10668_v12  ;;  %6492 = vmatpush.bf16.msrb.mxu2 %v10676_v41 }
 0x346   :  { %6505 = vmatpush.bf16.msrb.mxu3 %v10684_v52 }
 0x347   :  { %6467 = vmatpush.bf16.msrb.mxu0 %v10659_v55 }
 0x348   :  { %6480 = vmatpush.bf16.msrb.mxu1 %v10667_v56  ;;  %6493 = vmatpush.bf16.msrb.mxu2 %v10675_v57 }
 0x34a   :  { %6506 = vmatpush.bf16.msrb.mxu3 %v10683_v24 }
 0x34b   :  { %6468 = vmatpush.bf16.msrb.mxu0 %v10658_v45  ;;  %v5994_v46 = vpop.f32.mrf.mxu0 }
 0x34c   :  { %6481 = vmatpush.bf16.msrb.mxu1 %v10666_v62  ;;  %6494 = vmatpush.bf16.msrb.mxu2 %v10674_v15  ;;  %v5995_v8 = vadd.f32 %v5994_v46, %v5982_v1  ;;  %v10691_v15 = vld [vmem:[%s15895_s4] ss:$0 sm:$0xff] }
 0x34e   :  { %6469 = vmatmul.bf16.vlgmr.msrb.gmra.mxu0 %v6197_v14  ;;  %v6007_v11 = vpop.f32.mrf.mxu1  ;;  %6507 = vmatpush.bf16.msrb.mxu3 %v10682_v35 }
 0x34f   :  { %6482 = vmatmul.bf16.vlgmr.msrb.gmra.mxu1 %v6198_v3  ;;  %6495 = vmatmul.bf16.vlgmr.msrb.gmra.mxu2 %v6199_v19  ;;  %v6008_v18 = vadd.f32 %v6007_v11, %v5995_v8 }
 0x352   :  { %v6020_v13 = vpop.f32.mrf.mxu2 }
 0x353   :  { %v6021_v47 = vadd.f32 %v6020_v13, %v6008_v18  ;;  %v5996_v49 = vpop.f32.mrf.mxu0 }
 0x355   :  { %v6033_v4 = vpop.f32.mrf.mxu3 }
 0x356   :  { %v6009_v23 = vpop.f32.mrf.mxu1  ;;  %v6034_v63 = vadd.f32 %v6033_v4, %v6021_v47 }
 0x35a   :  { %v6022_v53 = vpop.f32.mrf.mxu2 }
 0x35d   :  { %v6035_v54 = vpop.f32.mrf.mxu3 }
 0x36b   :  { %v6046_v9 = vpop.f32.mrf.mxu0 }
 0x36c   :  { %v6047_v6 = vadd.f32 %v6046_v9, %v6034_v63 }
 0x36e   :  { %v6059_v10 = vpop.f32.mrf.mxu1 }
 0x36f   :  { %v6060_v37 = vadd.f32 %v6059_v10, %v6047_v6 }
 0x372   :  { %v6072_v20 = vpop.f32.mrf.mxu2 }
 0x373   :  { %v6048_v29 = vpop.f32.mrf.mxu0  ;;  %v6073_v38 = vadd.f32 %v6072_v20, %v6060_v37 }
 0x375   :  { %v6085_v61 = vpop.f32.mrf.mxu3 }
 0x376   :  { %v6061_v51 = vpop.f32.mrf.mxu1  ;;  %v6086_v22 = vadd.f32 %v6085_v61, %v6073_v38 }
 0x37a   :  { %v6074_v34 = vpop.f32.mrf.mxu2 }
 0x37d   :  { %v6087_v0 = vpop.f32.mrf.mxu3 }
 0x38b   :  { %v6098_v31 = vpop.f32.mrf.mxu0 }
 0x38c   :  { %v6099_v36 = vadd.f32 %v6098_v31, %v6086_v22 }
 0x38e   :  { %v6111_v21 = vpop.f32.mrf.mxu1 }
 0x38f   :  { %v6112_v42 = vadd.f32 %v6111_v21, %v6099_v36 }
 0x392   :  { %v6124_v32 = vpop.f32.mrf.mxu2 }
 0x393   :  { %v6100_v7 = vpop.f32.mrf.mxu0  ;;  %v6125_v2 = vadd.f32 %v6124_v32, %v6112_v42 }
 0x395   :  { %v6137_v5 = vpop.f32.mrf.mxu3 }
 0x396   :  { %v6113_v33 = vpop.f32.mrf.mxu1  ;;  %v6138_v44 = vadd.f32 %v6137_v5, %v6125_v2 }
 0x39a   :  { %v6126_v39 = vpop.f32.mrf.mxu2 }
 0x39d   :  { %v6139_v40 = vpop.f32.mrf.mxu3 }
 0x3ab   :  { %v6150_v50 = vpop.f32.mrf.mxu0 }
 0x3ac   :  { %v6163_v43 = vpop.f32.mrf.mxu1  ;;  %v6151_v60 = vadd.f32 %v6150_v50, %v6138_v44 }
 0x3ae   :  { %v6164_v1 = vadd.f32 %v6163_v43, %v6151_v60 }
 0x3b3   :  { %v6152_v56 = vpop.f32.mrf.mxu0 }
 0x3b4   :  { %v6176_v12 = vpop.f32.mrf.mxu2  ;;  %v6189_v41 = vpop.f32.mrf.mxu3 }
 0x3b5   :  { %v6177_v55 = vadd.f32 %v6176_v12, %v6164_v1  ;;  %v6165_v57 = vpop.f32.mrf.mxu1 }
 0x3b7   :  { %v6190_v16 = vadd.f32 %v6189_v41, %v6177_v55 }
 0x3b9   :  { %v6196_v58 = vmax.f32 %v6190_v16, 0.0 }
 0x3bb   :  { %v6200_v45 = vpack.c.bf16 %v6196_v58, %v6196_v58 }
 0x3bc   :  { %v6178_v59 = vpop.f32.mrf.mxu2  ;;  %v6191_v62 = vpop.f32.mrf.mxu3 }
 0x3bd   :  { %6508 = vmatmul.bf16.vlgmr.msrb.gmra.mxu3 %v6200_v45 }
 0x3cb   :  { %v6470_v17 = vpop.f32.mrf.mxu0 }
 0x3cc   :  { %v6471_v48 = vadd.f32 %v10691_v15, %v6470_v17  ;;  %v6483_v14 = vpop.f32.mrf.mxu1 }
 0x3ce   :  { %v6484_v3 = vadd.f32 %v6483_v14, %v6471_v48 }
 0x3d2   :  { %v6496_v19 = vpop.f32.mrf.mxu2 }
 0x3d3   :  { %v6497_v46 = vadd.f32 %v6496_v19, %v6484_v3  ;;  %v6472_v8 = vpop.f32.mrf.mxu0 }
 0x3d4   :  { %v6485_v11 = vpop.f32.mrf.mxu1 }
 0x3da   :  { %v6498_v18 = vpop.f32.mrf.mxu2 }
 0x440   :  { %v6509_v13 = vpop.f32.mrf.mxu3 }
 0x441   :  { %v6510_v47 = vadd.f32 %v6509_v13, %v6497_v46 }
 0x443   :  { %6513 = vst [vmem:[#allocation2] sm:$0x3] %v6510_v47 }
 0x444   :  { %6524 = dma.vmem_to_hbm [thread:$0]  %s6520_s20, 32, %s6522_s23, [#allocation3]  }
 0x448   :  { %v6511_v4 = vpop.f32.mrf.mxu3 }
 0x449   :  { %10722 = dma.done.wait [#allocation3], 32  }
 0x44a   :  { %10723 = vsyncadd [#allocation3], 4294967264 }
 0x44b   :  { %6529 = vsyncpa [#allocation3], 1 }

</bundles_post_ra>
